<compile_context>
chip_gen: v7x
topology: tpu7x:2x2x1
jax: 0.10.0
libtpu: 0.0.40
codegen_flags: <defaults>
</compile_context>

<pallas_src>
import functools

import jax
import jax.numpy as jnp
from jax import lax
from jax.experimental import pallas as pl
from jax.experimental.pallas import tpu as pltpu

LANE = 128


# ------------------------------ small helpers -------------------------------

def _round_up(x, m):
    return (x + m - 1) // m * m


def _vmem_budget():
    """Generation-aware usable-VMEM estimate in bytes (cap minus headroom)."""
    cap = None
    try:
        info = pltpu.get_tpu_info()
        cap = getattr(info, "vmem_capacity_bytes", None)
    except Exception:
        cap = None
    if not cap:
        cap = 64 * 1024 * 1024          # conservative: v7x per-core VMEM
    cap = int(cap)
    return max(cap - max(cap // 8, 8 * 1024 * 1024), 16 * 1024 * 1024)


def _pad_axis(x, target, axis):
    pad = target - x.shape[axis]
    if pad <= 0:
        return x
    widths = [(0, 0)] * x.ndim
    widths[axis] = (0, pad)
    return jnp.pad(x, widths)


def _pad2(w, rows, cols):
    return _pad_axis(_pad_axis(w, rows, 0), cols, 1)


def _pad1(b, cols):
    return _pad_axis(b, cols, 0).reshape(1, cols)


def _silu(y, approx):
    denom = 1.0 + jnp.exp(-y)
    if approx:
        return y * pl.reciprocal(denom, approx=True)
    return y / denom


def _pick_tm(m, row_bytes, budget):
    """M tile for the pointwise kernels: large, VMEM-safe, low padding waste."""
    tm = 2048
    while tm > 8 and 2 * tm * row_bytes > budget:
        tm //= 2
    tm = min(tm, _round_up(m, 8))
    while tm > 64 and (_round_up(m, tm) - m) * 16 > m:   # >~6% padded rows
        tm //= 2
    return max(tm, 8)


def _pick_tr(H, W, cip, cop, dsize, budget, max_rows, has_res):
    """Rows-per-tile for the 3x3 kernel: largest divisor of H fitting VMEM."""
    cands = [d for d in range(H, 0, -1) if H % d == 0]
    if max_rows is not None:
        filt = [d for d in cands if d <= max_rows]
        cands = filt if filt else [1]
    fixed = 2 * 9 * cip * cop * dsize + 8 * cop * 4       # weights + bias
    for tr in cands:
        rows = tr * W
        ext = (tr + 4) * W
        ws = fixed
        ws += 2 * rows * cip * dsize                       # x body (dbl-buf)
        ws += 8 * W * cip * dsize                          # halo rows
        ws += 2 * rows * cop * dsize                       # output
        if has_res:
            ws += 2 * rows * cop * dsize                   # residual
        ws += rows * cop * 4                               # f32 accumulator
        ws += 4 * ext * cip * dsize                        # ext scratch + temps
        ws += 2 * rows * cop * 4                           # matmul temps
        if ws <= budget:
            return tr
    # TODO(synk): add channel tiling if even one image row per tile overflows.
    return cands[-1]


# ------------------------------ Pallas kernels ------------------------------

def _pw_dual_out_kernel(x_ref, w1_ref, b1_ref, w2_ref, b2_ref, o1_ref, o2_ref,
                        *, approx):
    """conv1 & conv2 (1x1 conv + folded BN + SiLU) fused: x is read once."""
    x = x_ref[...]
    y1 = jnp.dot(x, w1_ref[...], preferred_element_type=jnp.float32) + b1_ref[...]
    o1_ref[...] = _silu(y1, approx).astype(o1_ref.dtype)
    y2 = jnp.dot(x, w2_ref[...], preferred_element_type=jnp.float32) + b2_ref[...]
    o2_ref[...] = _silu(y2, approx).astype(o2_ref.dtype)


def _pw_dual_in_kernel(a_ref, b_ref, wa_ref, wb_ref, bias_ref, o_ref, *, approx):
    """conv3 on concat([a, b], C): concat fused as two accumulated matmuls."""
    acc = jnp.dot(a_ref[...], wa_ref[...], preferred_element_type=jnp.float32)
    acc = acc + jnp.dot(b_ref[...], wb_ref[...], preferred_element_type=jnp.float32)
    o_ref[...] = _silu(acc + bias_ref[...], approx).astype(o_ref.dtype)


def _conv3x3_kernel(x_ref, top_ref, bot_ref, w_ref, b_ref, *rest,
                    TR, W, n_row_tiles, has_residual, approx):
    """3x3 conv (stride 1, pad 1) + folded-BN bias + SiLU (+ optional residual).

    Row-tiled with a one-image-row halo.  The tile plus halo rows are written
    into a flattened ((TR+4)*W, C) VMEM slab (a zero image row then the halo
    row on each side), so every tap is a contiguous (TR*W, C) window of the
    slab -> no vertical masks.  Two pre-masked slab copies (input column W-1 /
    column 0 zeroed) serve all kw==0 / kw==2 taps -> only 2 selects per step.
    """
    if has_residual:
        res_ref, o_ref, ext_ref, acc_ref = rest
    else:
        o_ref, ext_ref, acc_ref = rest
        res_ref = None

    i = pl.program_id(1)
    rows = TR * W
    cin = x_ref.shape[-1]

    body = x_ref[0].reshape(rows, cin)
    top = top_ref[0, 0] * (i > 0).astype(body.dtype)
    bot = bot_ref[0, 0] * (i < n_row_tiles - 1).astype(body.dtype)
    zrow = jnp.zeros_like(top)

    # Slab layout: [zero row | top halo | body | bottom halo | zero row].
    ext_ref[1, pl.ds(0, W)] = zrow
    ext_ref[1, pl.ds(W, W)] = top
    ext_ref[1, pl.ds(2 * W, rows)] = body
    ext_ref[1, pl.ds(2 * W + rows, W)] = bot
    ext_ref[1, pl.ds(3 * W + rows, W)] = zrow

    ext = ext_ref[1]
    col = lax.broadcasted_iota(jnp.int32, (ext.shape[0], 1), 0) % W
    zeros = jnp.zeros_like(ext)
    ext_ref[0] = jnp.where(col == W - 1, zeros, ext)   # operand for kw == 0 taps
    ext_ref[2] = jnp.where(col == 0, zeros, ext)       # operand for kw == 2 taps

    # 9 MXU matmuls with K = full padded input channels, accumulated directly
    # into the f32 VMEM accumulator (no 9-term register-blown temporary).
    # TODO(synk): on v6e/v7x the three kw taps of each kh row could be fused
    #             into a single K=3*C matmul for higher MXU utilization.
    first = True
    for kh in range(3):
        for kw in range(3):
            start = (kh + 1) * W + (kw - 1)
            xv = ext_ref[kw, pl.ds(start, rows), :]
            contrib = jnp.dot(xv, w_ref[kh * 3 + kw],
                              preferred_element_type=jnp.float32)
            if first:
                acc_ref[...] = contrib
                first = False
            else:
                acc_ref[...] += contrib

    y = _silu(acc_ref[...] + b_ref[...], approx)
    if has_residual:
        y = y + res_ref[0].reshape(rows, -1).astype(jnp.float32)
    o_ref[0] = y.reshape(TR, W, -1).astype(o_ref.dtype)


# ------------------------------- wrappers ------------------------------------

def _pw_dual_out(x_flat, w1, b1, w2, b2, *, out_dtype, approx, vmem_limit):
    m, cip = x_flat.shape
    cnp = w1.shape[1]
    dsz = jnp.dtype(x_flat.dtype).itemsize
    tm = _pick_tm(m, (cip + 2 * cnp) * dsz, vmem_limit // 4)
    m_pad = _round_up(m, tm)
    if m_pad != m:
        x_flat = jnp.pad(x_flat, ((0, m_pad - m), (0, 0)))
    kernel = functools.partial(_pw_dual_out_kernel, approx=approx)
    o1, o2 = pl.pallas_call(
        kernel,
        out_shape=(jax.ShapeDtypeStruct((m_pad, cnp), out_dtype),
                   jax.ShapeDtypeStruct((m_pad, cnp), out_dtype)),
        grid=(m_pad // tm,),
        in_specs=[
            pl.BlockSpec((tm, cip), lambda i: (i, 0)),
            pl.BlockSpec((cip, cnp), lambda i: (0, 0)),
            pl.BlockSpec((1, cnp), lambda i: (0, 0)),
            pl.BlockSpec((cip, cnp), lambda i: (0, 0)),
            pl.BlockSpec((1, cnp), lambda i: (0, 0)),
        ],
        out_specs=(pl.BlockSpec((tm, cnp), lambda i: (i, 0)),
                   pl.BlockSpec((tm, cnp), lambda i: (i, 0))),
        compiler_params=pltpu.CompilerParams(
            dimension_semantics=("parallel",),
            vmem_limit_bytes=vmem_limit),
    )(x_flat, w1, b1, w2, b2)
    return o1[:m], o2[:m]


def _pw_dual_in(a_flat, b_flat, wa, wb, bias, *, out_dtype, approx, vmem_limit):
    m, cnp = a_flat.shape
    cop = wa.shape[1]
    dsz = jnp.dtype(a_flat.dtype).itemsize
    tm = _pick_tm(m, 2 * cnp * dsz + cop * 4, vmem_limit // 4)
    m_pad = _round_up(m, tm)
    if m_pad != m:
        a_flat = jnp.pad(a_flat, ((0, m_pad - m), (0, 0)))
        b_flat = jnp.pad(b_flat, ((0, m_pad - m), (0, 0)))
    kernel = functools.partial(_pw_dual_in_kernel, approx=approx)
    out = pl.pallas_call(
        kernel,
        out_shape=jax.ShapeDtypeStruct((m_pad, cop), out_dtype),
        grid=(m_pad // tm,),
        in_specs=[
            pl.BlockSpec((tm, cnp), lambda i: (i, 0)),
            pl.BlockSpec((tm, cnp), lambda i: (i, 0)),
            pl.BlockSpec((cnp, cop), lambda i: (0, 0)),
            pl.BlockSpec((cnp, cop), lambda i: (0, 0)),
            pl.BlockSpec((1, cop), lambda i: (0, 0)),
        ],
        out_specs=pl.BlockSpec((tm, cop), lambda i: (i, 0)),
        compiler_params=pltpu.CompilerParams(
            dimension_semantics=("parallel",),
            vmem_limit_bytes=vmem_limit),
    )(a_flat, b_flat, wa, wb, bias)
    return out[:m]


def _conv3x3_bn_silu(x_img, w9, bias, *, residual=None, out_dtype, approx,
                     vmem_limit, max_row_tile=None):
    """x_img: (N, H, W, Cin_p); w9: (9, Cin_p, Cout_p); bias: (1, Cout_p)."""
    n, H, W, cip = x_img.shape
    cop = w9.shape[2]
    dsz = jnp.dtype(x_img.dtype).itemsize
    has_res = residual is not None
    TR = _pick_tr(H, W, cip, cop, dsz, (vmem_limit * 3) // 4, max_row_tile,
                  has_res)
    nrt = H // TR
    rows = TR * W
    ext_rows = (TR + 4) * W

    def body_map(b, i):
        return (b, i, 0, 0)

    def top_map(b, i):                       # halo row above the tile (clamped)
        return (b, jnp.maximum(i * TR - 1, 0), 0, 0)

    def bot_map(b, i):                       # halo row below the tile (clamped)
        return (b, jnp.minimum(i * TR + TR, H - 1), 0, 0)

    in_specs = [
        pl.BlockSpec((1, TR, W, cip), body_map),
        pl.BlockSpec((1, 1, W, cip), top_map),
        pl.BlockSpec((1, 1, W, cip), bot_map),
        # Constant block index -> weights/bias DMA'd once, resident all grid.
        pl.BlockSpec((9, cip, cop), lambda b, i: (0, 0, 0)),
        pl.BlockSpec((1, cop), lambda b, i: (0, 0)),
    ]
    args = [x_img, x_img, x_img, w9, bias]
    if has_res:
        in_specs.append(pl.BlockSpec((1, TR, W, cop), body_map))
        args.append(residual)

    kernel = functools.partial(_conv3x3_kernel, TR=TR, W=W, n_row_tiles=nrt,
                               has_residual=has_res, approx=approx)
    return pl.pallas_call(
        kernel,
        out_shape=jax.ShapeDtypeStruct((n, H, W, cop), out_dtype),
        grid=(n, nrt),
        in_specs=in_specs,
        out_specs=pl.BlockSpec((1, TR, W, cop), body_map),
        scratch_shapes=[pltpu.VMEM((3, ext_rows, cip), x_img.dtype),
                        pltpu.VMEM((rows, cop), jnp.float32)],
        compiler_params=pltpu.CompilerParams(
            dimension_semantics=("parallel", "parallel"),
            vmem_limit_bytes=vmem_limit),
    )(*args)


# ------------------------- parameter folding / prep --------------------------

def _fold_bn_params(bn, eps=1e-3):
    gamma, beta, mean, var = bn
    scale = gamma / jnp.sqrt(var + eps)
    return scale, beta - mean * scale


def _fold_pw(w, bn, ci_p, co_p):
    """(Co, Ci, 1, 1) conv + BN -> padded (Ci_p, Co_p) matmul weight + bias."""
    s, b = _fold_bn_params(bn)
    wm = (w[:, :, 0, 0] * s[:, None]).T
    return _pad2(wm, ci_p, co_p), _pad1(b, co_p)


def _w9_layout(w, ci_p, co_p):
    """(Co, Ci, 3, 3) -> padded (9, Ci_p, Co_p), tap index t = kh*3 + kw."""
    co, ci = w.shape[0], w.shape[1]
    w9 = jnp.transpose(w, (2, 3, 1, 0)).reshape(9, ci, co)
    return _pad_axis(_pad_axis(w9, ci_p, 1), co_p, 2)


def _fold_3x3(w, bn, ci_p, co_p):
    s, b = _fold_bn_params(bn)
    return _w9_layout(w * s[:, None, None, None], ci_p, co_p), _pad1(b, co_p)


def _fold_repconv(w3, bn3, w1, bn1, ci_p, co_p):
    """RepConv re-parameterization: (conv3x3+BN) + (conv1x1+BN) -> one 3x3."""
    s3, b3 = _fold_bn_params(bn3)
    s1, b1 = _fold_bn_params(bn1)
    weq = w3 * s3[:, None, None, None]
    weq = weq.at[:, :, 1, 1].add(w1[:, :, 0, 0] * s1[:, None])
    return _w9_layout(weq, ci_p, co_p), _pad1(b3 + b1, co_p)


def prepare_params(raw, compute_dtype=jnp.float32):
    """Fold BN / RepConv, pad channels to lane multiples, pre-cast weights."""
    cin = raw["conv1_w"].shape[1]
    cn = raw["conv1_w"].shape[0]
    cout = raw["conv3_w"].shape[0]
    cin_p = _round_up(cin, LANE)
    cn_p = _round_up(cn, LANE)
    cout_p = _round_up(cout, LANE)
    cd = compute_dtype

    w1, b1 = _fold_pw(raw["conv1_w"], raw["conv1_bn"], cin_p, cn_p)
    w2, b2 = _fold_pw(raw["conv2_w"], raw["conv2_bn"], cin_p, cn_p)

    # conv3 acts on concat([x1, x2]); split its weight so the concat is fused
    # into the kernel as two accumulated matmuls.
    s3, bias3 = _fold_bn_params(raw["conv3_bn"])
    w3 = raw["conv3_w"][:, :, 0, 0] * s3[:, None]             # (Cout, 2*Cn)
    w3a = _pad2(w3[:, :cn].T, cn_p, cout_p)
    w3b = _pad2(w3[:, cn:].T, cn_p, cout_p)
    b3 = _pad1(bias3, cout_p)

    blocks = []
    for blk in raw["bottlenecks"]:
        rep_w, rep_b = _fold_repconv(blk["rep3_w"], blk["rep3_bn"],
                                     blk["rep1_w"], blk["rep1_bn"], cn_p, cn_p)
        cw, cb = _fold_3x3(blk["conv_w"], blk["conv_bn"], cn_p, cn_p)
        blocks.append(dict(rep_w=rep_w.astype(cd), rep_b=rep_b,
                           conv_w=cw.astype(cd), conv_b=cb))

    return dict(w1=w1.astype(cd), b1=b1, w2=w2.astype(cd), b2=b2,
                w3a=w3a.astype(cd), w3b=w3b.astype(cd), b3=b3,
                bottlenecks=blocks)


# ------------------------------- full forward --------------------------------

def repncsp_forward(x_nchw, p, *, out_channels, max_row_tile=None):
    """RepNCSP forward. x_nchw: (N, Cin, H, W). Returns (N, Cout, H, W) f32."""
    N, Cin, H, W = x_nchw.shape
    M = N * H * W
    cin_p = p["w1"].shape[0]
    cn_p = p["w1"].shape[1]
    cd = p["w1"].dtype
    approx = jnp.dtype(cd) != jnp.dtype(jnp.float32)
    vmem_limit = _vmem_budget()

    # NCHW -> NHWC rows (channels on the lane axis, zero-padded to 128).
    x_flat = jnp.transpose(x_nchw, (0, 2, 3, 1)).reshape(M, Cin)
    x_flat = _pad_axis(x_flat, cin_p, 1).astype(cd)

    # conv1 & conv2 (1x1 + BN + SiLU) fused into one kernel.
    x1, x2 = _pw_dual_out(x_flat, p["w1"], p["b1"], p["w2"], p["b2"],
                          out_dtype=cd, approx=approx, vmem_limit=vmem_limit)

    # Bottleneck chain: RepConv (folded single 3x3) -> 3x3 + SiLU -> residual.
    # TODO(synk): fuse each bottleneck's two 3x3 convs into one pallas_call
    #             (2-row halo, rep tile kept in VMEM) to halve activation HBM
    #             traffic per bottleneck.
    cur = x1.reshape(N, H, W, cn_p)
    for blk in p["bottlenecks"]:
        rep = _conv3x3_bn_silu(cur, blk["rep_w"], blk["rep_b"],
                               out_dtype=cd, approx=approx,
                               vmem_limit=vmem_limit, max_row_tile=max_row_tile)
        cur = _conv3x3_bn_silu(rep, blk["conv_w"], blk["conv_b"],
                               residual=cur, out_dtype=cd, approx=approx,
                               vmem_limit=vmem_limit, max_row_tile=max_row_tile)

    # conv3 on concat([bottleneck(x1), x2]) with the concat fused in-kernel.
    out_flat = _pw_dual_in(cur.reshape(M, cn_p), x2,
                           p["w3a"], p["w3b"], p["b3"],
                           out_dtype=jnp.float32, approx=approx,
                           vmem_limit=vmem_limit)

    out = out_flat[:, :out_channels].reshape(N, H, W, out_channels)
    return jnp.transpose(out, (0, 3, 1, 2))


# -------------------------------- reference ----------------------------------

def _ref_conv_bn(x, w, bn, pad):
    y = lax.conv_general_dilated(
        x, w, window_strides=(1, 1), padding=((pad, pad), (pad, pad)),
        dimension_numbers=("NCHW", "OIHW", "NCHW"))
    s, b = _fold_bn_params(bn)
    return y * s[None, :, None, None] + b[None, :, None, None]


def _ref_silu(y):
    return y * jax.nn.sigmoid(y)


def repncsp_reference(x, raw):
    x1 = _ref_silu(_ref_conv_bn(x, raw["conv1_w"], raw["conv1_bn"], 0))
    x2 = _ref_silu(_ref_conv_bn(x, raw["conv2_w"], raw["conv2_bn"], 0))
    t = x1
    for blk in raw["bottlenecks"]:
        a = _ref_conv_bn(t, blk["rep3_w"], blk["rep3_bn"], 1)
        b = _ref_conv_bn(t, blk["rep1_w"], blk["rep1_bn"], 0)
        u = _ref_silu(a + b)                               # RepConv
        v = _ref_silu(_ref_conv_bn(u, blk["conv_w"], blk["conv_bn"], 1))
        t = t + v                                          # residual
    cat = jnp.concatenate([t, x2], axis=1)
    return _ref_silu(_ref_conv_bn(cat, raw["conv3_w"], raw["conv3_bn"], 0))


# ---------------------------------- main --------------------------------------

def _rand_bn(key, c):
    kg, kb, km, kv = jax.random.split(key, 4)
    gamma = 1.0 + 0.1 * jax.random.normal(kg, (c,), jnp.float32)
    beta = 0.1 * jax.random.normal(kb, (c,), jnp.float32)
    mean = 0.1 * jax.random.normal(km, (c,), jnp.float32)
    var = jax.random.uniform(kv, (c,), minval=0.5, maxval=1.5, dtype=jnp.float32)
    return (gamma, beta, mean, var)


def _rand_conv(key, co, ci, k):
    return 0.1 * jax.random.normal(key, (co, ci, k, k), jnp.float32)


if __name__ == "__main__":
    N, Cin, H, W = 2, 4, 16, 16
    Cout = 8
    csp_expand = 0.5
    repeat_num = 1
    Cn = int(Cout * csp_expand)

    keys = iter(jax.random.split(jax.random.PRNGKey(0), 32))

    def nk():
        return next(keys)

    x = jax.random.normal(nk(), (N, Cin, H, W), dtype=jnp.float32)

    raw = dict(
        conv1_w=_rand_conv(nk(), Cn, Cin, 1), conv1_bn=_rand_bn(nk(), Cn),
        conv2_w=_rand_conv(nk(), Cn, Cin, 1), conv2_bn=_rand_bn(nk(), Cn),
        conv3_w=_rand_conv(nk(), Cout, 2 * Cn, 1), conv3_bn=_rand_bn(nk(), Cout),
        bottlenecks=[dict(
            rep3_w=_rand_conv(nk(), Cn, Cn, 3), rep3_bn=_rand_bn(nk(), Cn),
            rep1_w=_rand_conv(nk(), Cn, Cn, 1), rep1_bn=_rand_bn(nk(), Cn),
            conv_w=_rand_conv(nk(), Cn, Cn, 3), conv_bn=_rand_bn(nk(), Cn),
        ) for _ in range(repeat_num)],
    )

    ref = repncsp_reference(x, raw)
    fwd = jax.jit(repncsp_forward,
                  static_argnames=("out_channels", "max_row_tile"))

    # 1) f32, auto row tile (whole image at this size) -- tight check.
    params_f32 = prepare_params(raw, jnp.float32)
    out = jax.block_until_ready(fwd(x, params_f32, out_channels=Cout))
    assert out.shape == (N, Cout, H, W), out.shape
    err = float(jnp.max(jnp.abs(out - ref)))
    assert jnp.allclose(out, ref, atol=1e-4, rtol=1e-4), err

    # 2) f32 with forced 4-row tiles -- exercises the halo path.
    out_t = jax.block_until_ready(
        fwd(x, params_f32, out_channels=Cout, max_row_tile=4))
    err_t = float(jnp.max(jnp.abs(out_t - ref)))
    assert jnp.allclose(out_t, ref, atol=1e-4, rtol=1e-4), err_t

    # 3) bf16 compute path (v6e/v7x production setting), relaxed tolerance.
    params_bf16 = prepare_params(raw, jnp.bfloat16)
    out_bf = jax.block_until_ready(fwd(x, params_bf16, out_channels=Cout))
    err_bf = float(jnp.max(jnp.abs(out_bf - ref)))
    assert jnp.allclose(out_bf, ref, atol=1e-1, rtol=5e-2), err_bf

    print("KERNEL_OK")
</pallas_src>

<mosaic_0001>
module attributes {stable_mosaic.version = 11 : i64} {
  func.func @_pw_dual_out_kernel(%arg0: i32, %arg1: memref<512x128xf32, #tpu.memory_space<vmem>>, %arg2: memref<128x128xf32, #tpu.memory_space<vmem>>, %arg3: memref<1x128xf32, #tpu.memory_space<vmem>>, %arg4: memref<128x128xf32, #tpu.memory_space<vmem>>, %arg5: memref<1x128xf32, #tpu.memory_space<vmem>>, %arg6: memref<512x128xf32, #tpu.memory_space<vmem>>, %arg7: memref<512x128xf32, #tpu.memory_space<vmem>>) attributes {dimension_semantics = [#tpu.dimension_semantics<parallel>], iteration_bounds = array<i64: 1>, scalar_prefetch = 0 : i64, scratch_operands = 0 : i64, tpu.core_type = #tpu.core_type<tc>, window_params = [{transform_indices = @transform_0, window_bounds = array<i64: 512, 128>}, {pipeline_mode = #tpu.pipeline_mode<synchronous>, transform_indices = @transform_1, window_bounds = array<i64: 128, 128>}, {pipeline_mode = #tpu.pipeline_mode<synchronous>, transform_indices = @transform_2, window_bounds = array<i64: 1, 128>}, {pipeline_mode = #tpu.pipeline_mode<synchronous>, transform_indices = @transform_3, window_bounds = array<i64: 128, 128>}, {pipeline_mode = #tpu.pipeline_mode<synchronous>, transform_indices = @transform_4, window_bounds = array<i64: 1, 128>}, {transform_indices = @transform_5, window_bounds = array<i64: 512, 128>}, {transform_indices = @transform_6, window_bounds = array<i64: 512, 128>}]} {
    %c0 = arith.constant 0 : index
    %c0_0 = arith.constant 0 : index
    %0 = vector.load %arg1[%c0, %c0_0] : memref<512x128xf32, #tpu.memory_space<vmem>>, vector<512x128xf32>
    %c0_1 = arith.constant 0 : index
    %c0_2 = arith.constant 0 : index
    %1 = vector.load %arg2[%c0_1, %c0_2] : memref<128x128xf32, #tpu.memory_space<vmem>>, vector<128x128xf32>
    %cst = arith.constant dense<0.000000e+00> : vector<512x128xf32>
    %2 = tpu.matmul %0, %1, %cst {dimension_numbers = #tpu.dot_dimension_numbers<[1], [0], [0], [1], [0, 0, 1, 1], [], []>} : vector<512x128xf32>, vector<128x128xf32>, vector<512x128xf32> -> vector<512x128xf32>
    %c0_3 = arith.constant 0 : index
    %c0_4 = arith.constant 0 : index
    %3 = vector.load %arg3[%c0_3, %c0_4] : memref<1x128xf32, #tpu.memory_space<vmem>>, vector<1x128xf32>
    %4 = vector.broadcast %3 : vector<1x128xf32> to vector<512x128xf32>
    %5 = arith.addf %2, %4 : vector<512x128xf32>
    %cst_5 = arith.constant 0.000000e+00 : f32
    %6 = vector.broadcast %cst_5 : f32 to vector<512x128xf32>
    %7 = arith.subf %6, %5 : vector<512x128xf32>
    %8 = math.exp %7 : vector<512x128xf32>
    %cst_6 = arith.constant 1.000000e+00 : f32
    %9 = vector.broadcast %cst_6 : f32 to vector<512x128xf32>
    %10 = arith.addf %9, %8 : vector<512x128xf32>
    %11 = arith.divf %5, %10 : vector<512x128xf32>
    %c0_7 = arith.constant 0 : index
    %c0_8 = arith.constant 0 : index
    %12 = vector.load %arg6[%c0_7, %c0_8] : memref<512x128xf32, #tpu.memory_space<vmem>>, vector<512x128xf32>
    tpu.vector_store %arg6[%c0_7, %c0_8], %11 {strides = array<i32>} : memref<512x128xf32, #tpu.memory_space<vmem>>, vector<512x128xf32>,
    %c0_9 = arith.constant 0 : index
    %c0_10 = arith.constant 0 : index
    %13 = vector.load %arg4[%c0_9, %c0_10] : memref<128x128xf32, #tpu.memory_space<vmem>>, vector<128x128xf32>
    %cst_11 = arith.constant dense<0.000000e+00> : vector<512x128xf32>
    %14 = tpu.matmul %0, %13, %cst_11 {dimension_numbers = #tpu.dot_dimension_numbers<[1], [0], [0], [1], [0, 0, 1, 1], [], []>} : vector<512x128xf32>, vector<128x128xf32>, vector<512x128xf32> -> vector<512x128xf32>
    %c0_12 = arith.constant 0 : index
    %c0_13 = arith.constant 0 : index
    %15 = vector.load %arg5[%c0_12, %c0_13] : memref<1x128xf32, #tpu.memory_space<vmem>>, vector<1x128xf32>
    %16 = vector.broadcast %15 : vector<1x128xf32> to vector<512x128xf32>
    %17 = arith.addf %14, %16 : vector<512x128xf32>
    %cst_14 = arith.constant 0.000000e+00 : f32
    %18 = vector.broadcast %cst_14 : f32 to vector<512x128xf32>
    %19 = arith.subf %18, %17 : vector<512x128xf32>
    %20 = math.exp %19 : vector<512x128xf32>
    %cst_15 = arith.constant 1.000000e+00 : f32
    %21 = vector.broadcast %cst_15 : f32 to vector<512x128xf32>
    %22 = arith.addf %21, %20 : vector<512x128xf32>
    %23 = arith.divf %17, %22 : vector<512x128xf32>
    %c0_16 = arith.constant 0 : index
    %c0_17 = arith.constant 0 : index
    %24 = vector.load %arg7[%c0_16, %c0_17] : memref<512x128xf32, #tpu.memory_space<vmem>>, vector<512x128xf32>
    tpu.vector_store %arg7[%c0_16, %c0_17], %23 {strides = array<i32>} : memref<512x128xf32, #tpu.memory_space<vmem>>, vector<512x128xf32>,
    return
  }
  func.func @transform_0(%arg0: i32) -> (i32, i32) {
    %c0_i32 = arith.constant 0 : i32
    %c0_i32_0 = arith.constant 0 : i32
    return %arg0, %c0_i32 : i32, i32
  }
  func.func @transform_1(%arg0: i32) -> (i32, i32) {
    %c0_i32 = arith.constant 0 : i32
    %c0_i32_0 = arith.constant 0 : i32
    %c0_i32_1 = arith.constant 0 : i32
    return %c0_i32, %c0_i32_0 : i32, i32
  }
  func.func @transform_2(%arg0: i32) -> (i32, i32) {
    %c0_i32 = arith.constant 0 : i32
    %c0_i32_0 = arith.constant 0 : i32
    %c0_i32_1 = arith.constant 0 : i32
    return %c0_i32, %c0_i32_0 : i32, i32
  }
  func.func @transform_3(%arg0: i32) -> (i32, i32) {
    %c0_i32 = arith.constant 0 : i32
    %c0_i32_0 = arith.constant 0 : i32
    %c0_i32_1 = arith.constant 0 : i32
    return %c0_i32, %c0_i32_0 : i32, i32
  }
  func.func @transform_4(%arg0: i32) -> (i32, i32) {
    %c0_i32 = arith.constant 0 : i32
    %c0_i32_0 = arith.constant 0 : i32
    %c0_i32_1 = arith.constant 0 : i32
    return %c0_i32, %c0_i32_0 : i32, i32
  }
  func.func @transform_5(%arg0: i32) -> (i32, i32) {
    %c0_i32 = arith.constant 0 : i32
    %c0_i32_0 = arith.constant 0 : i32
    return %arg0, %c0_i32 : i32, i32
  }
  func.func @transform_6(%arg0: i32) -> (i32, i32) {
    %c0_i32 = arith.constant 0 : i32
    %c0_i32_0 = arith.constant 0 : i32
    return %arg0, %c0_i32 : i32, i32
  }
}

module attributes {stable_mosaic.version = 11 : i64} {
  func.func @_conv3x3_kernel(%arg0: i32, %arg1: i32, %arg2: memref<1x16x16x128xf32, #tpu.memory_space<vmem>>, %arg3: memref<1x1x16x128xf32, #tpu.memory_space<vmem>>, %arg4: memref<1x1x16x128xf32, #tpu.memory_space<vmem>>, %arg5: memref<9x128x128xf32, #tpu.memory_space<vmem>>, %arg6: memref<1x128xf32, #tpu.memory_space<vmem>>, %arg7: memref<1x16x16x128xf32, #tpu.memory_space<vmem>>, %arg8: memref<3x320x128xf32, #tpu.memory_space<vmem>>, %arg9: memref<256x128xf32, #tpu.memory_space<vmem>>) attributes {dimension_semantics = [#tpu.dimension_semantics<parallel>, #tpu.dimension_semantics<parallel>], iteration_bounds = array<i64: 2, 1>, scalar_prefetch = 0 : i64, scratch_operands = 2 : i64, tpu.core_type = #tpu.core_type<tc>, window_params = [{transform_indices = @transform_0, window_bounds = array<i64: 1, 16, 16, 128>}, {transform_indices = @transform_1, window_bounds = array<i64: 1, 1, 16, 128>}, {transform_indices = @transform_2, window_bounds = array<i64: 1, 1, 16, 128>}, {pipeline_mode = #tpu.pipeline_mode<synchronous>, transform_indices = @transform_3, window_bounds = array<i64: 9, 128, 128>}, {pipeline_mode = #tpu.pipeline_mode<synchronous>, transform_indices = @transform_4, window_bounds = array<i64: 1, 128>}, {transform_indices = @transform_5, window_bounds = array<i64: 1, 16, 16, 128>}]} {
    %c0 = arith.constant 0 : index
    %c0_0 = arith.constant 0 : index
    %c0_1 = arith.constant 0 : index
    %c0_2 = arith.constant 0 : index
    %0 = vector.load %arg2[%c0, %c0_0, %c0_1, %c0_2] : memref<1x16x16x128xf32, #tpu.memory_space<vmem>>, vector<1x16x16x128xf32>
    %1 = vector.shape_cast %0 : vector<1x16x16x128xf32> to vector<16x16x128xf32>
    %2 = vector.shape_cast %1 : vector<16x16x128xf32> to vector<256x128xf32>
    %c0_3 = arith.constant 0 : index
    %c0_4 = arith.constant 0 : index
    %c0_5 = arith.constant 0 : index
    %c0_6 = arith.constant 0 : index
    %3 = vector.load %arg3[%c0_3, %c0_4, %c0_5, %c0_6] : memref<1x1x16x128xf32, #tpu.memory_space<vmem>>, vector<1x1x16x128xf32>
    %4 = vector.shape_cast %3 : vector<1x1x16x128xf32> to vector<16x128xf32>
    %c0_i32 = arith.constant 0 : i32
    %5 = arith.cmpi sgt, %arg1, %c0_i32 : i32
    %6 = arith.extui %5 : i1 to i32
    %7 = arith.sitofp %6 : i32 to f32
    %8 = vector.broadcast %7 : f32 to vector<16x128xf32>
    %9 = arith.mulf %4, %8 : vector<16x128xf32>
    %c0_7 = arith.constant 0 : index
    %c0_8 = arith.constant 0 : index
    %c0_9 = arith.constant 0 : index
    %c0_10 = arith.constant 0 : index
    %10 = vector.load %arg4[%c0_7, %c0_8, %c0_9, %c0_10] : memref<1x1x16x128xf32, #tpu.memory_space<vmem>>, vector<1x1x16x128xf32>
    %11 = vector.shape_cast %10 : vector<1x1x16x128xf32> to vector<16x128xf32>
    %c0_i32_11 = arith.constant 0 : i32
    %12 = arith.cmpi slt, %arg1, %c0_i32_11 : i32
    %13 = arith.extui %12 : i1 to i32
    %14 = arith.sitofp %13 : i32 to f32
    %15 = vector.broadcast %14 : f32 to vector<16x128xf32>
    %16 = arith.mulf %11, %15 : vector<16x128xf32>
    %cst = arith.constant 0.000000e+00 : f32
    %17 = vector.broadcast %cst : f32 to vector<16x128xf32>
    %c1 = arith.constant 1 : index
    %c0_12 = arith.constant 0 : index
    %c0_13 = arith.constant 0 : index
    %18 = vector.load %arg8[%c1, %c0_12, %c0_13] : memref<3x320x128xf32, #tpu.memory_space<vmem>>, vector<1x16x128xf32>
    %19 = vector.shape_cast %18 : vector<1x16x128xf32> to vector<16x128xf32>
    %20 = vector.shape_cast %17 : vector<16x128xf32> to vector<1x16x128xf32>
    tpu.vector_store %arg8[%c1, %c0_12, %c0_13], %20 {strides = array<i32>} : memref<3x320x128xf32, #tpu.memory_space<vmem>>, vector<1x16x128xf32>,
    %c1_14 = arith.constant 1 : index
    %c16 = arith.constant 16 : index
    %c0_15 = arith.constant 0 : index
    %21 = vector.load %arg8[%c1_14, %c16, %c0_15] : memref<3x320x128xf32, #tpu.memory_space<vmem>>, vector<1x16x128xf32>
    %22 = vector.shape_cast %21 : vector<1x16x128xf32> to vector<16x128xf32>
    %23 = vector.shape_cast %9 : vector<16x128xf32> to vector<1x16x128xf32>
    tpu.vector_store %arg8[%c1_14, %c16, %c0_15], %23 {strides = array<i32>} : memref<3x320x128xf32, #tpu.memory_space<vmem>>, vector<1x16x128xf32>,
    %c1_16 = arith.constant 1 : index
    %c32 = arith.constant 32 : index
    %c0_17 = arith.constant 0 : index
    %24 = vector.load %arg8[%c1_16, %c32, %c0_17] : memref<3x320x128xf32, #tpu.memory_space<vmem>>, vector<1x256x128xf32>
    %25 = vector.shape_cast %24 : vector<1x256x128xf32> to vector<256x128xf32>
    %26 = vector.shape_cast %2 : vector<256x128xf32> to vector<1x256x128xf32>
    tpu.vector_store %arg8[%c1_16, %c32, %c0_17], %26 {strides = array<i32>} : memref<3x320x128xf32, #tpu.memory_space<vmem>>, vector<1x256x128xf32>,
    %c1_18 = arith.constant 1 : index
    %c288 = arith.constant 288 : index
    %c0_19 = arith.constant 0 : index
    %27 = vector.load %arg8[%c1_18, %c288, %c0_19] : memref<3x320x128xf32, #tpu.memory_space<vmem>>, vector<1x16x128xf32>
    %28 = vector.shape_cast %27 : vector<1x16x128xf32> to vector<16x128xf32>
    %29 = vector.shape_cast %16 : vector<16x128xf32> to vector<1x16x128xf32>
    tpu.vector_store %arg8[%c1_18, %c288, %c0_19], %29 {strides = array<i32>} : memref<3x320x128xf32, #tpu.memory_space<vmem>>, vector<1x16x128xf32>,
    %c1_20 = arith.constant 1 : index
    %c304 = arith.constant 304 : index
    %c0_21 = arith.constant 0 : index
    %30 = vector.load %arg8[%c1_20, %c304, %c0_21] : memref<3x320x128xf32, #tpu.memory_space<vmem>>, vector<1x16x128xf32>
    %31 = vector.shape_cast %30 : vector<1x16x128xf32> to vector<16x128xf32>
    %32 = vector.shape_cast %17 : vector<16x128xf32> to vector<1x16x128xf32>
    tpu.vector_store %arg8[%c1_20, %c304, %c0_21], %32 {strides = array<i32>} : memref<3x320x128xf32, #tpu.memory_space<vmem>>, vector<1x16x128xf32>,
    %c1_22 = arith.constant 1 : index
    %c0_23 = arith.constant 0 : index
    %c0_24 = arith.constant 0 : index
    %33 = vector.load %arg8[%c1_22, %c0_23, %c0_24] : memref<3x320x128xf32, #tpu.memory_space<vmem>>, vector<1x320x128xf32>
    %34 = vector.shape_cast %33 : vector<1x320x128xf32> to vector<320x128xf32>
    %35 = tpu.iota {dimensions = array<i32: 0>} : vector<320x1xi32>
    %c16_i32 = arith.constant 16 : i32
    %c0_i32_25 = arith.constant 0 : i32
    %36 = arith.cmpi eq, %c16_i32, %c0_i32_25 : i32
    %c1_i32 = arith.constant 1 : i32
    %37 = arith.select %36, %c1_i32, %c16_i32 : i32
    %38 = vector.broadcast %37 : i32 to vector<320x1xi32>
    %39 = arith.remsi %35, %38 : vector<320x1xi32>
    %c0_i32_26 = arith.constant 0 : i32
    %40 = vector.broadcast %c0_i32_26 : i32 to vector<320x1xi32>
    %41 = arith.cmpi ne, %39, %40 : vector<320x1xi32>
    %c0_i32_27 = arith.constant 0 : i32
    %42 = vector.broadcast %c0_i32_27 : i32 to vector<320x1xi32>
    %43 = arith.cmpi slt, %39, %42 : vector<320x1xi32>
    %c0_i32_28 = arith.constant 0 : i32
    %44 = arith.cmpi slt, %37, %c0_i32_28 : i32
    %45 = vector.broadcast %44 : i1 to vector<320x1xi1>
    %46 = vector.broadcast %45 : vector<320x1xi1> to vector<320x1xi1>
    %47 = arith.xori %43, %46 : vector<320x1xi1>
    %48 = arith.andi %47, %41 : vector<320x1xi1>
    %49 = vector.broadcast %37 : i32 to vector<320x1xi32>
    %50 = arith.addi %39, %49 : vector<320x1xi32>
    %51 = arith.select %48, %50, %39 : vector<320x1xi1>, vector<320x1xi32>
    %cst_29 = arith.constant 0.000000e+00 : f32
    %52 = vector.broadcast %cst_29 : f32 to vector<320x128xf32>
    %c15_i32 = arith.constant 15 : i32
    %53 = vector.broadcast %c15_i32 : i32 to vector<320x1xi32>
    %54 = arith.cmpi eq, %51, %53 : vector<320x1xi32>
    %55 = vector.shape_cast %54 : vector<320x1xi1> to vector<320x1xi1>
    %56 = vector.broadcast %55 : vector<320x1xi1> to vector<320x128xi1>
    %57 = arith.select %56, %52, %34 : vector<320x128xi1>, vector<320x128xf32>
    %c0_30 = arith.constant 0 : index
    %c0_31 = arith.constant 0 : index
    %c0_32 = arith.constant 0 : index
    %58 = vector.load %arg8[%c0_30, %c0_31, %c0_32] : memref<3x320x128xf32, #tpu.memory_space<vmem>>, vector<1x320x128xf32>
    %59 = vector.shape_cast %58 : vector<1x320x128xf32> to vector<320x128xf32>
    %60 = vector.shape_cast %57 : vector<320x128xf32> to vector<1x320x128xf32>
    tpu.vector_store %arg8[%c0_30, %c0_31, %c0_32], %60 {strides = array<i32>} : memref<3x320x128xf32, #tpu.memory_space<vmem>>, vector<1x320x128xf32>,
    %c0_i32_33 = arith.constant 0 : i32
    %61 = vector.broadcast %c0_i32_33 : i32 to vector<320x1xi32>
    %62 = arith.cmpi eq, %51, %61 : vector<320x1xi32>
    %63 = vector.shape_cast %62 : vector<320x1xi1> to vector<320x1xi1>
    %64 = vector.broadcast %63 : vector<320x1xi1> to vector<320x128xi1>
    %65 = arith.select %64, %52, %34 : vector<320x128xi1>, vector<320x128xf32>
    %c2 = arith.constant 2 : index
    %c0_34 = arith.constant 0 : index
    %c0_35 = arith.constant 0 : index
    %66 = vector.load %arg8[%c2, %c0_34, %c0_35] : memref<3x320x128xf32, #tpu.memory_space<vmem>>, vector<1x320x128xf32>
    %67 = vector.shape_cast %66 : vector<1x320x128xf32> to vector<320x128xf32>
    %68 = vector.shape_cast %65 : vector<320x128xf32> to vector<1x320x128xf32>
    tpu.vector_store %arg8[%c2, %c0_34, %c0_35], %68 {strides = array<i32>} : memref<3x320x128xf32, #tpu.memory_space<vmem>>, vector<1x320x128xf32>,
    %c0_36 = arith.constant 0 : index
    %c15 = arith.constant 15 : index
    %c0_37 = arith.constant 0 : index
    %69 = vector.load %arg8[%c0_36, %c15, %c0_37] : memref<3x320x128xf32, #tpu.memory_space<vmem>>, vector<1x256x128xf32>
    %70 = vector.shape_cast %69 : vector<1x256x128xf32> to vector<256x128xf32>
    %c0_38 = arith.constant 0 : index
    %c0_39 = arith.constant 0 : index
    %c0_40 = arith.constant 0 : index
    %71 = vector.load %arg5[%c0_38, %c0_39, %c0_40] : memref<9x128x128xf32, #tpu.memory_space<vmem>>, vector<1x128x128xf32>
    %72 = vector.shape_cast %71 : vector<1x128x128xf32> to vector<128x128xf32>
    %cst_41 = arith.constant dense<0.000000e+00> : vector<256x128xf32>
    %73 = tpu.matmul %70, %72, %cst_41 {dimension_numbers = #tpu.dot_dimension_numbers<[1], [0], [0], [1], [0, 0, 1, 1], [], []>} : vector<256x128xf32>, vector<128x128xf32>, vector<256x128xf32> -> vector<256x128xf32>
    %c0_42 = arith.constant 0 : index
    %c0_43 = arith.constant 0 : index
    %74 = vector.load %arg9[%c0_42, %c0_43] : memref<256x128xf32, #tpu.memory_space<vmem>>, vector<256x128xf32>
    tpu.vector_store %arg9[%c0_42, %c0_43], %73 {strides = array<i32>} : memref<256x128xf32, #tpu.memory_space<vmem>>, vector<256x128xf32>,
    %c1_44 = arith.constant 1 : index
    %c16_45 = arith.constant 16 : index
    %c0_46 = arith.constant 0 : index
    %75 = vector.load %arg8[%c1_44, %c16_45, %c0_46] : memref<3x320x128xf32, #tpu.memory_space<vmem>>, vector<1x256x128xf32>
    %76 = vector.shape_cast %75 : vector<1x256x128xf32> to vector<256x128xf32>
    %c1_47 = arith.constant 1 : index
    %c0_48 = arith.constant 0 : index
    %c0_49 = arith.constant 0 : index
    %77 = vector.load %arg5[%c1_47, %c0_48, %c0_49] : memref<9x128x128xf32, #tpu.memory_space<vmem>>, vector<1x128x128xf32>
    %78 = vector.shape_cast %77 : vector<1x128x128xf32> to vector<128x128xf32>
    %cst_50 = arith.constant dense<0.000000e+00> : vector<256x128xf32>
    %79 = tpu.matmul %76, %78, %cst_50 {dimension_numbers = #tpu.dot_dimension_numbers<[1], [0], [0], [1], [0, 0, 1, 1], [], []>} : vector<256x128xf32>, vector<128x128xf32>, vector<256x128xf32> -> vector<256x128xf32>
    %c0_51 = arith.constant 0 : index
    %c0_52 = arith.constant 0 : index
    %80 = vector.load %arg9[%c0_51, %c0_52] : memref<256x128xf32, #tpu.memory_space<vmem>>, vector<256x128xf32>
    %81 = arith.addf %80, %79 : vector<256x128xf32>
    %c0_53 = arith.constant 0 : index
    %c0_54 = arith.constant 0 : index
    %82 = vector.load %arg9[%c0_53, %c0_54] : memref<256x128xf32, #tpu.memory_space<vmem>>, vector<256x128xf32>
    tpu.vector_store %arg9[%c0_53, %c0_54], %81 {strides = array<i32>} : memref<256x128xf32, #tpu.memory_space<vmem>>, vector<256x128xf32>,
    %c2_55 = arith.constant 2 : index
    %c17 = arith.constant 17 : index
    %c0_56 = arith.constant 0 : index
    %83 = vector.load %arg8[%c2_55, %c17, %c0_56] : memref<3x320x128xf32, #tpu.memory_space<vmem>>, vector<1x256x128xf32>
    %84 = vector.shape_cast %83 : vector<1x256x128xf32> to vector<256x128xf32>
    %c2_57 = arith.constant 2 : index
    %c0_58 = arith.constant 0 : index
    %c0_59 = arith.constant 0 : index
    %85 = vector.load %arg5[%c2_57, %c0_58, %c0_59] : memref<9x128x128xf32, #tpu.memory_space<vmem>>, vector<1x128x128xf32>
    %86 = vector.shape_cast %85 : vector<1x128x128xf32> to vector<128x128xf32>
    %cst_60 = arith.constant dense<0.000000e+00> : vector<256x128xf32>
    %87 = tpu.matmul %84, %86, %cst_60 {dimension_numbers = #tpu.dot_dimension_numbers<[1], [0], [0], [1], [0, 0, 1, 1], [], []>} : vector<256x128xf32>, vector<128x128xf32>, vector<256x128xf32> -> vector<256x128xf32>
    %c0_61 = arith.constant 0 : index
    %c0_62 = arith.constant 0 : index
    %88 = vector.load %arg9[%c0_61, %c0_62] : memref<256x128xf32, #tpu.memory_space<vmem>>, vector<256x128xf32>
    %89 = arith.addf %88, %87 : vector<256x128xf32>
    %c0_63 = arith.constant 0 : index
    %c0_64 = arith.constant 0 : index
    %90 = vector.load %arg9[%c0_63, %c0_64] : memref<256x128xf32, #tpu.memory_space<vmem>>, vector<256x128xf32>
    tpu.vector_store %arg9[%c0_63, %c0_64], %89 {strides = array<i32>} : memref<256x128xf32, #tpu.memory_space<vmem>>, vector<256x128xf32>,
    %c0_65 = arith.constant 0 : index
    %c31 = arith.constant 31 : index
    %c0_66 = arith.constant 0 : index
    %91 = vector.load %arg8[%c0_65, %c31, %c0_66] : memref<3x320x128xf32, #tpu.memory_space<vmem>>, vector<1x256x128xf32>
    %92 = vector.shape_cast %91 : vector<1x256x128xf32> to vector<256x128xf32>
    %c3 = arith.constant 3 : index
    %c0_67 = arith.constant 0 : index
    %c0_68 = arith.constant 0 : index
    %93 = vector.load %arg5[%c3, %c0_67, %c0_68] : memref<9x128x128xf32, #tpu.memory_space<vmem>>, vector<1x128x128xf32>
    %94 = vector.shape_cast %93 : vector<1x128x128xf32> to vector<128x128xf32>
    %cst_69 = arith.constant dense<0.000000e+00> : vector<256x128xf32>
    %95 = tpu.matmul %92, %94, %cst_69 {dimension_numbers = #tpu.dot_dimension_numbers<[1], [0], [0], [1], [0, 0, 1, 1], [], []>} : vector<256x128xf32>, vector<128x128xf32>, vector<256x128xf32> -> vector<256x128xf32>
    %c0_70 = arith.constant 0 : index
    %c0_71 = arith.constant 0 : index
    %96 = vector.load %arg9[%c0_70, %c0_71] : memref<256x128xf32, #tpu.memory_space<vmem>>, vector<256x128xf32>
    %97 = arith.addf %96, %95 : vector<256x128xf32>
    %c0_72 = arith.constant 0 : index
    %c0_73 = arith.constant 0 : index
    %98 = vector.load %arg9[%c0_72, %c0_73] : memref<256x128xf32, #tpu.memory_space<vmem>>, vector<256x128xf32>
    tpu.vector_store %arg9[%c0_72, %c0_73], %97 {strides = array<i32>} : memref<256x128xf32, #tpu.memory_space<vmem>>, vector<256x128xf32>,
    %c1_74 = arith.constant 1 : index
    %c32_75 = arith.constant 32 : index
    %c0_76 = arith.constant 0 : index
    %99 = vector.load %arg8[%c1_74, %c32_75, %c0_76] : memref<3x320x128xf32, #tpu.memory_space<vmem>>, vector<1x256x128xf32>
    %100 = vector.shape_cast %99 : vector<1x256x128xf32> to vector<256x128xf32>
    %c4 = arith.constant 4 : index
    %c0_77 = arith.constant 0 : index
    %c0_78 = arith.constant 0 : index
    %101 = vector.load %arg5[%c4, %c0_77, %c0_78] : memref<9x128x128xf32, #tpu.memory_space<vmem>>, vector<1x128x128xf32>
    %102 = vector.shape_cast %101 : vector<1x128x128xf32> to vector<128x128xf32>
    %cst_79 = arith.constant dense<0.000000e+00> : vector<256x128xf32>
    %103 = tpu.matmul %100, %102, %cst_79 {dimension_numbers = #tpu.dot_dimension_numbers<[1], [0], [0], [1], [0, 0, 1, 1], [], []>} : vector<256x128xf32>, vector<128x128xf32>, vector<256x128xf32> -> vector<256x128xf32>
    %c0_80 = arith.constant 0 : index
    %c0_81 = arith.constant 0 : index
    %104 = vector.load %arg9[%c0_80, %c0_81] : memref<256x128xf32, #tpu.memory_space<vmem>>, vector<256x128xf32>
    %105 = arith.addf %104, %103 : vector<256x128xf32>
    %c0_82 = arith.constant 0 : index
    %c0_83 = arith.constant 0 : index
    %106 = vector.load %arg9[%c0_82, %c0_83] : memref<256x128xf32, #tpu.memory_space<vmem>>, vector<256x128xf32>
    tpu.vector_store %arg9[%c0_82, %c0_83], %105 {strides = array<i32>} : memref<256x128xf32, #tpu.memory_space<vmem>>, vector<256x128xf32>,
    %c2_84 = arith.constant 2 : index
    %c33 = arith.constant 33 : index
    %c0_85 = arith.constant 0 : index
    %107 = vector.load %arg8[%c2_84, %c33, %c0_85] : memref<3x320x128xf32, #tpu.memory_space<vmem>>, vector<1x256x128xf32>
    %108 = vector.shape_cast %107 : vector<1x256x128xf32> to vector<256x128xf32>
    %c5 = arith.constant 5 : index
    %c0_86 = arith.constant 0 : index
    %c0_87 = arith.constant 0 : index
    %109 = vector.load %arg5[%c5, %c0_86, %c0_87] : memref<9x128x128xf32, #tpu.memory_space<vmem>>, vector<1x128x128xf32>
    %110 = vector.shape_cast %109 : vector<1x128x128xf32> to vector<128x128xf32>
    %cst_88 = arith.constant dense<0.000000e+00> : vector<256x128xf32>
    %111 = tpu.matmul %108, %110, %cst_88 {dimension_numbers = #tpu.dot_dimension_numbers<[1], [0], [0], [1], [0, 0, 1, 1], [], []>} : vector<256x128xf32>, vector<128x128xf32>, vector<256x128xf32> -> vector<256x128xf32>
    %c0_89 = arith.constant 0 : index
    %c0_90 = arith.constant 0 : index
    %112 = vector.load %arg9[%c0_89, %c0_90] : memref<256x128xf32, #tpu.memory_space<vmem>>, vector<256x128xf32>
    %113 = arith.addf %112, %111 : vector<256x128xf32>
    %c0_91 = arith.constant 0 : index
    %c0_92 = arith.constant 0 : index
    %114 = vector.load %arg9[%c0_91, %c0_92] : memref<256x128xf32, #tpu.memory_space<vmem>>, vector<256x128xf32>
    tpu.vector_store %arg9[%c0_91, %c0_92], %113 {strides = array<i32>} : memref<256x128xf32, #tpu.memory_space<vmem>>, vector<256x128xf32>,
    %c0_93 = arith.constant 0 : index
    %c47 = arith.constant 47 : index
    %c0_94 = arith.constant 0 : index
    %115 = vector.load %arg8[%c0_93, %c47, %c0_94] : memref<3x320x128xf32, #tpu.memory_space<vmem>>, vector<1x256x128xf32>
    %116 = vector.shape_cast %115 : vector<1x256x128xf32> to vector<256x128xf32>
    %c6 = arith.constant 6 : index
    %c0_95 = arith.constant 0 : index
    %c0_96 = arith.constant 0 : index
    %117 = vector.load %arg5[%c6, %c0_95, %c0_96] : memref<9x128x128xf32, #tpu.memory_space<vmem>>, vector<1x128x128xf32>
    %118 = vector.shape_cast %117 : vector<1x128x128xf32> to vector<128x128xf32>
    %cst_97 = arith.constant dense<0.000000e+00> : vector<256x128xf32>
    %119 = tpu.matmul %116, %118, %cst_97 {dimension_numbers = #tpu.dot_dimension_numbers<[1], [0], [0], [1], [0, 0, 1, 1], [], []>} : vector<256x128xf32>, vector<128x128xf32>, vector<256x128xf32> -> vector<256x128xf32>
    %c0_98 = arith.constant 0 : index
    %c0_99 = arith.constant 0 : index
    %120 = vector.load %arg9[%c0_98, %c0_99] : memref<256x128xf32, #tpu.memory_space<vmem>>, vector<256x128xf32>
    %121 = arith.addf %120, %119 : vector<256x128xf32>
    %c0_100 = arith.constant 0 : index
    %c0_101 = arith.constant 0 : index
    %122 = vector.load %arg9[%c0_100, %c0_101] : memref<256x128xf32, #tpu.memory_space<vmem>>, vector<256x128xf32>
    tpu.vector_store %arg9[%c0_100, %c0_101], %121 {strides = array<i32>} : memref<256x128xf32, #tpu.memory_space<vmem>>, vector<256x128xf32>,
    %c1_102 = arith.constant 1 : index
    %c48 = arith.constant 48 : index
    %c0_103 = arith.constant 0 : index
    %123 = vector.load %arg8[%c1_102, %c48, %c0_103] : memref<3x320x128xf32, #tpu.memory_space<vmem>>, vector<1x256x128xf32>
    %124 = vector.shape_cast %123 : vector<1x256x128xf32> to vector<256x128xf32>
    %c7 = arith.constant 7 : index
    %c0_104 = arith.constant 0 : index
    %c0_105 = arith.constant 0 : index
    %125 = vector.load %arg5[%c7, %c0_104, %c0_105] : memref<9x128x128xf32, #tpu.memory_space<vmem>>, vector<1x128x128xf32>
    %126 = vector.shape_cast %125 : vector<1x128x128xf32> to vector<128x128xf32>
    %cst_106 = arith.constant dense<0.000000e+00> : vector<256x128xf32>
    %127 = tpu.matmul %124, %126, %cst_106 {dimension_numbers = #tpu.dot_dimension_numbers<[1], [0], [0], [1], [0, 0, 1, 1], [], []>} : vector<256x128xf32>, vector<128x128xf32>, vector<256x128xf32> -> vector<256x128xf32>
    %c0_107 = arith.constant 0 : index
    %c0_108 = arith.constant 0 : index
    %128 = vector.load %arg9[%c0_107, %c0_108] : memref<256x128xf32, #tpu.memory_space<vmem>>, vector<256x128xf32>
    %129 = arith.addf %128, %127 : vector<256x128xf32>
    %c0_109 = arith.constant 0 : index
    %c0_110 = arith.constant 0 : index
    %130 = vector.load %arg9[%c0_109, %c0_110] : memref<256x128xf32, #tpu.memory_space<vmem>>, vector<256x128xf32>
    tpu.vector_store %arg9[%c0_109, %c0_110], %129 {strides = array<i32>} : memref<256x128xf32, #tpu.memory_space<vmem>>, vector<256x128xf32>,
    %c2_111 = arith.constant 2 : index
    %c49 = arith.constant 49 : index
    %c0_112 = arith.constant 0 : index
    %131 = vector.load %arg8[%c2_111, %c49, %c0_112] : memref<3x320x128xf32, #tpu.memory_space<vmem>>, vector<1x256x128xf32>
    %132 = vector.shape_cast %131 : vector<1x256x128xf32> to vector<256x128xf32>
    %c8 = arith.constant 8 : index
    %c0_113 = arith.constant 0 : index
    %c0_114 = arith.constant 0 : index
    %133 = vector.load %arg5[%c8, %c0_113, %c0_114] : memref<9x128x128xf32, #tpu.memory_space<vmem>>, vector<1x128x128xf32>
    %134 = vector.shape_cast %133 : vector<1x128x128xf32> to vector<128x128xf32>
    %cst_115 = arith.constant dense<0.000000e+00> : vector<256x128xf32>
    %135 = tpu.matmul %132, %134, %cst_115 {dimension_numbers = #tpu.dot_dimension_numbers<[1], [0], [0], [1], [0, 0, 1, 1], [], []>} : vector<256x128xf32>, vector<128x128xf32>, vector<256x128xf32> -> vector<256x128xf32>
    %c0_116 = arith.constant 0 : index
    %c0_117 = arith.constant 0 : index
    %136 = vector.load %arg9[%c0_116, %c0_117] : memref<256x128xf32, #tpu.memory_space<vmem>>, vector<256x128xf32>
    %137 = arith.addf %136, %135 : vector<256x128xf32>
    %c0_118 = arith.constant 0 : index
    %c0_119 = arith.constant 0 : index
    %138 = vector.load %arg9[%c0_118, %c0_119] : memref<256x128xf32, #tpu.memory_space<vmem>>, vector<256x128xf32>
    tpu.vector_store %arg9[%c0_118, %c0_119], %137 {strides = array<i32>} : memref<256x128xf32, #tpu.memory_space<vmem>>, vector<256x128xf32>,
    %c0_120 = arith.constant 0 : index
    %c0_121 = arith.constant 0 : index
    %139 = vector.load %arg9[%c0_120, %c0_121] : memref<256x128xf32, #tpu.memory_space<vmem>>, vector<256x128xf32>
    %c0_122 = arith.constant 0 : index
    %c0_123 = arith.constant 0 : index
    %140 = vector.load %arg6[%c0_122, %c0_123] : memref<1x128xf32, #tpu.memory_space<vmem>>, vector<1x128xf32>
    %141 = vector.broadcast %140 : vector<1x128xf32> to vector<256x128xf32>
    %142 = arith.addf %139, %141 : vector<256x128xf32>
    %cst_124 = arith.constant 0.000000e+00 : f32
    %143 = vector.broadcast %cst_124 : f32 to vector<256x128xf32>
    %144 = arith.subf %143, %142 : vector<256x128xf32>
    %145 = math.exp %144 : vector<256x128xf32>
    %cst_125 = arith.constant 1.000000e+00 : f32
    %146 = vector.broadcast %cst_125 : f32 to vector<256x128xf32>
    %147 = arith.addf %146, %145 : vector<256x128xf32>
    %148 = arith.divf %142, %147 : vector<256x128xf32>
    %149 = vector.shape_cast %148 : vector<256x128xf32> to vector<16x16x128xf32>
    %c0_126 = arith.constant 0 : index
    %c0_127 = arith.constant 0 : index
    %c0_128 = arith.constant 0 : index
    %c0_129 = arith.constant 0 : index
    %150 = vector.load %arg7[%c0_126, %c0_127, %c0_128, %c0_129] : memref<1x16x16x128xf32, #tpu.memory_space<vmem>>, vector<1x16x16x128xf32>
    %151 = vector.shape_cast %150 : vector<1x16x16x128xf32> to vector<16x16x128xf32>
    %152 = vector.shape_cast %149 : vector<16x16x128xf32> to vector<1x16x16x128xf32>
    tpu.vector_store %arg7[%c0_126, %c0_127, %c0_128, %c0_129], %152 {strides = array<i32>} : memref<1x16x16x128xf32, #tpu.memory_space<vmem>>, vector<1x16x16x128xf32>,
    return
  }
  func.func @transform_0(%arg0: i32, %arg1: i32) -> (i32, i32, i32, i32) {
    %c0_i32 = arith.constant 0 : i32
    %c0_i32_0 = arith.constant 0 : i32
    %c0_i32_1 = arith.constant 0 : i32
    return %arg0, %arg1, %c0_i32, %c0_i32_0 : i32, i32, i32, i32
  }
  func.func @transform_1(%arg0: i32, %arg1: i32) -> (i32, i32, i32, i32) {
    %c16_i32 = arith.constant 16 : i32
    %0 = arith.muli %arg1, %c16_i32 : i32
    %c1_i32 = arith.constant 1 : i32
    %1 = arith.subi %0, %c1_i32 : i32
    %c0_i32 = arith.constant 0 : i32
    %2 = arith.maxsi %1, %c0_i32 : i32
    %c0_i32_0 = arith.constant 0 : i32
    %c0_i32_1 = arith.constant 0 : i32
    %c0_i32_2 = arith.constant 0 : i32
    return %arg0, %2, %c0_i32_0, %c0_i32_1 : i32, i32, i32, i32
  }
  func.func @transform_2(%arg0: i32, %arg1: i32) -> (i32, i32, i32, i32) {
    %c16_i32 = arith.constant 16 : i32
    %0 = arith.muli %arg1, %c16_i32 : i32
    %c16_i32_0 = arith.constant 16 : i32
    %1 = arith.addi %0, %c16_i32_0 : i32
    %c15_i32 = arith.constant 15 : i32
    %2 = arith.minsi %1, %c15_i32 : i32
    %c0_i32 = arith.constant 0 : i32
    %c0_i32_1 = arith.constant 0 : i32
    %c0_i32_2 = arith.constant 0 : i32
    return %arg0, %2, %c0_i32, %c0_i32_1 : i32, i32, i32, i32
  }
  func.func @transform_3(%arg0: i32, %arg1: i32) -> (i32, i32, i32) {
    %c0_i32 = arith.constant 0 : i32
    %c0_i32_0 = arith.constant 0 : i32
    %c0_i32_1 = arith.constant 0 : i32
    %c0_i32_2 = arith.constant 0 : i32
    return %c0_i32, %c0_i32_0, %c0_i32_1 : i32, i32, i32
  }
  func.func @transform_4(%arg0: i32, %arg1: i32) -> (i32, i32) {
    %c0_i32 = arith.constant 0 : i32
    %c0_i32_0 = arith.constant 0 : i32
    %c0_i32_1 = arith.constant 0 : i32
    return %c0_i32, %c0_i32_0 : i32, i32
  }
  func.func @transform_5(%arg0: i32, %arg1: i32) -> (i32, i32, i32, i32) {
    %c0_i32 = arith.constant 0 : i32
    %c0_i32_0 = arith.constant 0 : i32
    %c0_i32_1 = arith.constant 0 : i32
    return %arg0, %arg1, %c0_i32, %c0_i32_0 : i32, i32, i32, i32
  }
}

module attributes {stable_mosaic.version = 11 : i64} {
  func.func @_pw_dual_in_kernel(%arg0: i32, %arg1: memref<512x128xf32, #tpu.memory_space<vmem>>, %arg2: memref<512x128xf32, #tpu.memory_space<vmem>>, %arg3: memref<128x128xf32, #tpu.memory_space<vmem>>, %arg4: memref<128x128xf32, #tpu.memory_space<vmem>>, %arg5: memref<1x128xf32, #tpu.memory_space<vmem>>, %arg6: memref<512x128xf32, #tpu.memory_space<vmem>>) attributes {dimension_semantics = [#tpu.dimension_semantics<parallel>], iteration_bounds = array<i64: 1>, scalar_prefetch = 0 : i64, scratch_operands = 0 : i64, tpu.core_type = #tpu.core_type<tc>, window_params = [{transform_indices = @transform_0, window_bounds = array<i64: 512, 128>}, {transform_indices = @transform_1, window_bounds = array<i64: 512, 128>}, {pipeline_mode = #tpu.pipeline_mode<synchronous>, transform_indices = @transform_2, window_bounds = array<i64: 128, 128>}, {pipeline_mode = #tpu.pipeline_mode<synchronous>, transform_indices = @transform_3, window_bounds = array<i64: 128, 128>}, {pipeline_mode = #tpu.pipeline_mode<synchronous>, transform_indices = @transform_4, window_bounds = array<i64: 1, 128>}, {transform_indices = @transform_5, window_bounds = array<i64: 512, 128>}]} {
    %c0 = arith.constant 0 : index
    %c0_0 = arith.constant 0 : index
    %0 = vector.load %arg1[%c0, %c0_0] : memref<512x128xf32, #tpu.memory_space<vmem>>, vector<512x128xf32>
    %c0_1 = arith.constant 0 : index
    %c0_2 = arith.constant 0 : index
    %1 = vector.load %arg3[%c0_1, %c0_2] : memref<128x128xf32, #tpu.memory_space<vmem>>, vector<128x128xf32>
    %cst = arith.constant dense<0.000000e+00> : vector<512x128xf32>
    %2 = tpu.matmul %0, %1, %cst {dimension_numbers = #tpu.dot_dimension_numbers<[1], [0], [0], [1], [0, 0, 1, 1], [], []>} : vector<512x128xf32>, vector<128x128xf32>, vector<512x128xf32> -> vector<512x128xf32>
    %c0_3 = arith.constant 0 : index
    %c0_4 = arith.constant 0 : index
    %3 = vector.load %arg2[%c0_3, %c0_4] : memref<512x128xf32, #tpu.memory_space<vmem>>, vector<512x128xf32>
    %c0_5 = arith.constant 0 : index
    %c0_6 = arith.constant 0 : index
    %4 = vector.load %arg4[%c0_5, %c0_6] : memref<128x128xf32, #tpu.memory_space<vmem>>, vector<128x128xf32>
    %cst_7 = arith.constant dense<0.000000e+00> : vector<512x128xf32>
    %5 = tpu.matmul %3, %4, %cst_7 {dimension_numbers = #tpu.dot_dimension_numbers<[1], [0], [0], [1], [0, 0, 1, 1], [], []>} : vector<512x128xf32>, vector<128x128xf32>, vector<512x128xf32> -> vector<512x128xf32>
    %6 = arith.addf %2, %5 : vector<512x128xf32>
    %c0_8 = arith.constant 0 : index
    %c0_9 = arith.constant 0 : index
    %7 = vector.load %arg5[%c0_8, %c0_9] : memref<1x128xf32, #tpu.memory_space<vmem>>, vector<1x128xf32>
    %8 = vector.broadcast %7 : vector<1x128xf32> to vector<512x128xf32>
    %9 = arith.addf %6, %8 : vector<512x128xf32>
    %cst_10 = arith.constant 0.000000e+00 : f32
    %10 = vector.broadcast %cst_10 : f32 to vector<512x128xf32>
    %11 = arith.subf %10, %9 : vector<512x128xf32>
    %12 = math.exp %11 : vector<512x128xf32>
    %cst_11 = arith.constant 1.000000e+00 : f32
    %13 = vector.broadcast %cst_11 : f32 to vector<512x128xf32>
    %14 = arith.addf %13, %12 : vector<512x128xf32>
    %15 = arith.divf %9, %14 : vector<512x128xf32>
    %c0_12 = arith.constant 0 : index
    %c0_13 = arith.constant 0 : index
    %16 = vector.load %arg6[%c0_12, %c0_13] : memref<512x128xf32, #tpu.memory_space<vmem>>, vector<512x128xf32>
    tpu.vector_store %arg6[%c0_12, %c0_13], %15 {strides = array<i32>} : memref<512x128xf32, #tpu.memory_space<vmem>>, vector<512x128xf32>,
    return
  }
  func.func @transform_0(%arg0: i32) -> (i32, i32) {
    %c0_i32 = arith.constant 0 : i32
    %c0_i32_0 = arith.constant 0 : i32
    return %arg0, %c0_i32 : i32, i32
  }
  func.func @transform_1(%arg0: i32) -> (i32, i32) {
    %c0_i32 = arith.constant 0 : i32
    %c0_i32_0 = arith.constant 0 : i32
    return %arg0, %c0_i32 : i32, i32
  }
  func.func @transform_2(%arg0: i32) -> (i32, i32) {
    %c0_i32 = arith.constant 0 : i32
    %c0_i32_0 = arith.constant 0 : i32
    %c0_i32_1 = arith.constant 0 : i32
    return %c0_i32, %c0_i32_0 : i32, i32
  }
  func.func @transform_3(%arg0: i32) -> (i32, i32) {
    %c0_i32 = arith.constant 0 : i32
    %c0_i32_0 = arith.constant 0 : i32
    %c0_i32_1 = arith.constant 0 : i32
    return %c0_i32, %c0_i32_0 : i32, i32
  }
  func.func @transform_4(%arg0: i32) -> (i32, i32) {
    %c0_i32 = arith.constant 0 : i32
    %c0_i32_0 = arith.constant 0 : i32
    %c0_i32_1 = arith.constant 0 : i32
    return %c0_i32, %c0_i32_0 : i32, i32
  }
  func.func @transform_5(%arg0: i32) -> (i32, i32) {
    %c0_i32 = arith.constant 0 : i32
    %c0_i32_0 = arith.constant 0 : i32
    return %arg0, %c0_i32 : i32, i32
  }
}

module attributes {stable_mosaic.version = 11 : i64} {
  func.func @_conv3x3_kernel(%arg0: i32, %arg1: i32, %arg2: memref<1x16x16x128xf32, #tpu.memory_space<vmem>>, %arg3: memref<1x1x16x128xf32, #tpu.memory_space<vmem>>, %arg4: memref<1x1x16x128xf32, #tpu.memory_space<vmem>>, %arg5: memref<9x128x128xf32, #tpu.memory_space<vmem>>, %arg6: memref<1x128xf32, #tpu.memory_space<vmem>>, %arg7: memref<1x16x16x128xf32, #tpu.memory_space<vmem>>, %arg8: memref<1x16x16x128xf32, #tpu.memory_space<vmem>>, %arg9: memref<3x320x128xf32, #tpu.memory_space<vmem>>, %arg10: memref<256x128xf32, #tpu.memory_space<vmem>>) attributes {dimension_semantics = [#tpu.dimension_semantics<parallel>, #tpu.dimension_semantics<parallel>], iteration_bounds = array<i64: 2, 1>, scalar_prefetch = 0 : i64, scratch_operands = 2 : i64, tpu.core_type = #tpu.core_type<tc>, window_params = [{transform_indices = @transform_0, window_bounds = array<i64: 1, 16, 16, 128>}, {transform_indices = @transform_1, window_bounds = array<i64: 1, 1, 16, 128>}, {transform_indices = @transform_2, window_bounds = array<i64: 1, 1, 16, 128>}, {pipeline_mode = #tpu.pipeline_mode<synchronous>, transform_indices = @transform_3, window_bounds = array<i64: 9, 128, 128>}, {pipeline_mode = #tpu.pipeline_mode<synchronous>, transform_indices = @transform_4, window_bounds = array<i64: 1, 128>}, {transform_indices = @transform_5, window_bounds = array<i64: 1, 16, 16, 128>}, {transform_indices = @transform_6, window_bounds = array<i64: 1, 16, 16, 128>}]} {
    %c0 = arith.constant 0 : index
    %c0_0 = arith.constant 0 : index
    %c0_1 = arith.constant 0 : index
    %c0_2 = arith.constant 0 : index
    %0 = vector.load %arg2[%c0, %c0_0, %c0_1, %c0_2] : memref<1x16x16x128xf32, #tpu.memory_space<vmem>>, vector<1x16x16x128xf32>
    %1 = vector.shape_cast %0 : vector<1x16x16x128xf32> to vector<16x16x128xf32>
    %2 = vector.shape_cast %1 : vector<16x16x128xf32> to vector<256x128xf32>
    %c0_3 = arith.constant 0 : index
    %c0_4 = arith.constant 0 : index
    %c0_5 = arith.constant 0 : index
    %c0_6 = arith.constant 0 : index
    %3 = vector.load %arg3[%c0_3, %c0_4, %c0_5, %c0_6] : memref<1x1x16x128xf32, #tpu.memory_space<vmem>>, vector<1x1x16x128xf32>
    %4 = vector.shape_cast %3 : vector<1x1x16x128xf32> to vector<16x128xf32>
    %c0_i32 = arith.constant 0 : i32
    %5 = arith.cmpi sgt, %arg1, %c0_i32 : i32
    %6 = arith.extui %5 : i1 to i32
    %7 = arith.sitofp %6 : i32 to f32
    %8 = vector.broadcast %7 : f32 to vector<16x128xf32>
    %9 = arith.mulf %4, %8 : vector<16x128xf32>
    %c0_7 = arith.constant 0 : index
    %c0_8 = arith.constant 0 : index
    %c0_9 = arith.constant 0 : index
    %c0_10 = arith.constant 0 : index
    %10 = vector.load %arg4[%c0_7, %c0_8, %c0_9, %c0_10] : memref<1x1x16x128xf32, #tpu.memory_space<vmem>>, vector<1x1x16x128xf32>
    %11 = vector.shape_cast %10 : vector<1x1x16x128xf32> to vector<16x128xf32>
    %c0_i32_11 = arith.constant 0 : i32
    %12 = arith.cmpi slt, %arg1, %c0_i32_11 : i32
    %13 = arith.extui %12 : i1 to i32
    %14 = arith.sitofp %13 : i32 to f32
    %15 = vector.broadcast %14 : f32 to vector<16x128xf32>
    %16 = arith.mulf %11, %15 : vector<16x128xf32>
    %cst = arith.constant 0.000000e+00 : f32
    %17 = vector.broadcast %cst : f32 to vector<16x128xf32>
    %c1 = arith.constant 1 : index
    %c0_12 = arith.constant 0 : index
    %c0_13 = arith.constant 0 : index
    %18 = vector.load %arg9[%c1, %c0_12, %c0_13] : memref<3x320x128xf32, #tpu.memory_space<vmem>>, vector<1x16x128xf32>
    %19 = vector.shape_cast %18 : vector<1x16x128xf32> to vector<16x128xf32>
    %20 = vector.shape_cast %17 : vector<16x128xf32> to vector<1x16x128xf32>
    tpu.vector_store %arg9[%c1, %c0_12, %c0_13], %20 {strides = array<i32>} : memref<3x320x128xf32, #tpu.memory_space<vmem>>, vector<1x16x128xf32>,
    %c1_14 = arith.constant 1 : index
    %c16 = arith.constant 16 : index
    %c0_15 = arith.constant 0 : index
    %21 = vector.load %arg9[%c1_14, %c16, %c0_15] : memref<3x320x128xf32, #tpu.memory_space<vmem>>, vector<1x16x128xf32>
    %22 = vector.shape_cast %21 : vector<1x16x128xf32> to vector<16x128xf32>
    %23 = vector.shape_cast %9 : vector<16x128xf32> to vector<1x16x128xf32>
    tpu.vector_store %arg9[%c1_14, %c16, %c0_15], %23 {strides = array<i32>} : memref<3x320x128xf32, #tpu.memory_space<vmem>>, vector<1x16x128xf32>,
    %c1_16 = arith.constant 1 : index
    %c32 = arith.constant 32 : index
    %c0_17 = arith.constant 0 : index
    %24 = vector.load %arg9[%c1_16, %c32, %c0_17] : memref<3x320x128xf32, #tpu.memory_space<vmem>>, vector<1x256x128xf32>
    %25 = vector.shape_cast %24 : vector<1x256x128xf32> to vector<256x128xf32>
    %26 = vector.shape_cast %2 : vector<256x128xf32> to vector<1x256x128xf32>
    tpu.vector_store %arg9[%c1_16, %c32, %c0_17], %26 {strides = array<i32>} : memref<3x320x128xf32, #tpu.memory_space<vmem>>, vector<1x256x128xf32>,
    %c1_18 = arith.constant 1 : index
    %c288 = arith.constant 288 : index
    %c0_19 = arith.constant 0 : index
    %27 = vector.load %arg9[%c1_18, %c288, %c0_19] : memref<3x320x128xf32, #tpu.memory_space<vmem>>, vector<1x16x128xf32>
    %28 = vector.shape_cast %27 : vector<1x16x128xf32> to vector<16x128xf32>
    %29 = vector.shape_cast %16 : vector<16x128xf32> to vector<1x16x128xf32>
    tpu.vector_store %arg9[%c1_18, %c288, %c0_19], %29 {strides = array<i32>} : memref<3x320x128xf32, #tpu.memory_space<vmem>>, vector<1x16x128xf32>,
    %c1_20 = arith.constant 1 : index
    %c304 = arith.constant 304 : index
    %c0_21 = arith.constant 0 : index
    %30 = vector.load %arg9[%c1_20, %c304, %c0_21] : memref<3x320x128xf32, #tpu.memory_space<vmem>>, vector<1x16x128xf32>
    %31 = vector.shape_cast %30 : vector<1x16x128xf32> to vector<16x128xf32>
    %32 = vector.shape_cast %17 : vector<16x128xf32> to vector<1x16x128xf32>
    tpu.vector_store %arg9[%c1_20, %c304, %c0_21], %32 {strides = array<i32>} : memref<3x320x128xf32, #tpu.memory_space<vmem>>, vector<1x16x128xf32>,
    %c1_22 = arith.constant 1 : index
    %c0_23 = arith.constant 0 : index
    %c0_24 = arith.constant 0 : index
    %33 = vector.load %arg9[%c1_22, %c0_23, %c0_24] : memref<3x320x128xf32, #tpu.memory_space<vmem>>, vector<1x320x128xf32>
    %34 = vector.shape_cast %33 : vector<1x320x128xf32> to vector<320x128xf32>
    %35 = tpu.iota {dimensions = array<i32: 0>} : vector<320x1xi32>
    %c16_i32 = arith.constant 16 : i32
    %c0_i32_25 = arith.constant 0 : i32
    %36 = arith.cmpi eq, %c16_i32, %c0_i32_25 : i32
    %c1_i32 = arith.constant 1 : i32
    %37 = arith.select %36, %c1_i32, %c16_i32 : i32
    %38 = vector.broadcast %37 : i32 to vector<320x1xi32>
    %39 = arith.remsi %35, %38 : vector<320x1xi32>
    %c0_i32_26 = arith.constant 0 : i32
    %40 = vector.broadcast %c0_i32_26 : i32 to vector<320x1xi32>
    %41 = arith.cmpi ne, %39, %40 : vector<320x1xi32>
    %c0_i32_27 = arith.constant 0 : i32
    %42 = vector.broadcast %c0_i32_27 : i32 to vector<320x1xi32>
    %43 = arith.cmpi slt, %39, %42 : vector<320x1xi32>
    %c0_i32_28 = arith.constant 0 : i32
    %44 = arith.cmpi slt, %37, %c0_i32_28 : i32
    %45 = vector.broadcast %44 : i1 to vector<320x1xi1>
    %46 = vector.broadcast %45 : vector<320x1xi1> to vector<320x1xi1>
    %47 = arith.xori %43, %46 : vector<320x1xi1>
    %48 = arith.andi %47, %41 : vector<320x1xi1>
    %49 = vector.broadcast %37 : i32 to vector<320x1xi32>
    %50 = arith.addi %39, %49 : vector<320x1xi32>
    %51 = arith.select %48, %50, %39 : vector<320x1xi1>, vector<320x1xi32>
    %cst_29 = arith.constant 0.000000e+00 : f32
    %52 = vector.broadcast %cst_29 : f32 to vector<320x128xf32>
    %c15_i32 = arith.constant 15 : i32
    %53 = vector.broadcast %c15_i32 : i32 to vector<320x1xi32>
    %54 = arith.cmpi eq, %51, %53 : vector<320x1xi32>
    %55 = vector.shape_cast %54 : vector<320x1xi1> to vector<320x1xi1>
    %56 = vector.broadcast %55 : vector<320x1xi1> to vector<320x128xi1>
    %57 = arith.select %56, %52, %34 : vector<320x128xi1>, vector<320x128xf32>
    %c0_30 = arith.constant 0 : index
    %c0_31 = arith.constant 0 : index
    %c0_32 = arith.constant 0 : index
    %58 = vector.load %arg9[%c0_30, %c0_31, %c0_32] : memref<3x320x128xf32, #tpu.memory_space<vmem>>, vector<1x320x128xf32>
    %59 = vector.shape_cast %58 : vector<1x320x128xf32> to vector<320x128xf32>
    %60 = vector.shape_cast %57 : vector<320x128xf32> to vector<1x320x128xf32>
    tpu.vector_store %arg9[%c0_30, %c0_31, %c0_32], %60 {strides = array<i32>} : memref<3x320x128xf32, #tpu.memory_space<vmem>>, vector<1x320x128xf32>,
    %c0_i32_33 = arith.constant 0 : i32
    %61 = vector.broadcast %c0_i32_33 : i32 to vector<320x1xi32>
    %62 = arith.cmpi eq, %51, %61 : vector<320x1xi32>
    %63 = vector.shape_cast %62 : vector<320x1xi1> to vector<320x1xi1>
    %64 = vector.broadcast %63 : vector<320x1xi1> to vector<320x128xi1>
    %65 = arith.select %64, %52, %34 : vector<320x128xi1>, vector<320x128xf32>
    %c2 = arith.constant 2 : index
    %c0_34 = arith.constant 0 : index
    %c0_35 = arith.constant 0 : index
    %66 = vector.load %arg9[%c2, %c0_34, %c0_35] : memref<3x320x128xf32, #tpu.memory_space<vmem>>, vector<1x320x128xf32>
    %67 = vector.shape_cast %66 : vector<1x320x128xf32> to vector<320x128xf32>
    %68 = vector.shape_cast %65 : vector<320x128xf32> to vector<1x320x128xf32>
    tpu.vector_store %arg9[%c2, %c0_34, %c0_35], %68 {strides = array<i32>} : memref<3x320x128xf32, #tpu.memory_space<vmem>>, vector<1x320x128xf32>,
    %c0_36 = arith.constant 0 : index
    %c15 = arith.constant 15 : index
    %c0_37 = arith.constant 0 : index
    %69 = vector.load %arg9[%c0_36, %c15, %c0_37] : memref<3x320x128xf32, #tpu.memory_space<vmem>>, vector<1x256x128xf32>
    %70 = vector.shape_cast %69 : vector<1x256x128xf32> to vector<256x128xf32>
    %c0_38 = arith.constant 0 : index
    %c0_39 = arith.constant 0 : index
    %c0_40 = arith.constant 0 : index
    %71 = vector.load %arg5[%c0_38, %c0_39, %c0_40] : memref<9x128x128xf32, #tpu.memory_space<vmem>>, vector<1x128x128xf32>
    %72 = vector.shape_cast %71 : vector<1x128x128xf32> to vector<128x128xf32>
    %cst_41 = arith.constant dense<0.000000e+00> : vector<256x128xf32>
    %73 = tpu.matmul %70, %72, %cst_41 {dimension_numbers = #tpu.dot_dimension_numbers<[1], [0], [0], [1], [0, 0, 1, 1], [], []>} : vector<256x128xf32>, vector<128x128xf32>, vector<256x128xf32> -> vector<256x128xf32>
    %c0_42 = arith.constant 0 : index
    %c0_43 = arith.constant 0 : index
    %74 = vector.load %arg10[%c0_42, %c0_43] : memref<256x128xf32, #tpu.memory_space<vmem>>, vector<256x128xf32>
    tpu.vector_store %arg10[%c0_42, %c0_43], %73 {strides = array<i32>} : memref<256x128xf32, #tpu.memory_space<vmem>>, vector<256x128xf32>,
    %c1_44 = arith.constant 1 : index
    %c16_45 = arith.constant 16 : index
    %c0_46 = arith.constant 0 : index
    %75 = vector.load %arg9[%c1_44, %c16_45, %c0_46] : memref<3x320x128xf32, #tpu.memory_space<vmem>>, vector<1x256x128xf32>
    %76 = vector.shape_cast %75 : vector<1x256x128xf32> to vector<256x128xf32>
    %c1_47 = arith.constant 1 : index
    %c0_48 = arith.constant 0 : index
    %c0_49 = arith.constant 0 : index
    %77 = vector.load %arg5[%c1_47, %c0_48, %c0_49] : memref<9x128x128xf32, #tpu.memory_space<vmem>>, vector<1x128x128xf32>
    %78 = vector.shape_cast %77 : vector<1x128x128xf32> to vector<128x128xf32>
    %cst_50 = arith.constant dense<0.000000e+00> : vector<256x128xf32>
    %79 = tpu.matmul %76, %78, %cst_50 {dimension_numbers = #tpu.dot_dimension_numbers<[1], [0], [0], [1], [0, 0, 1, 1], [], []>} : vector<256x128xf32>, vector<128x128xf32>, vector<256x128xf32> -> vector<256x128xf32>
    %c0_51 = arith.constant 0 : index
    %c0_52 = arith.constant 0 : index
    %80 = vector.load %arg10[%c0_51, %c0_52] : memref<256x128xf32, #tpu.memory_space<vmem>>, vector<256x128xf32>
    %81 = arith.addf %80, %79 : vector<256x128xf32>
    %c0_53 = arith.constant 0 : index
    %c0_54 = arith.constant 0 : index
    %82 = vector.load %arg10[%c0_53, %c0_54] : memref<256x128xf32, #tpu.memory_space<vmem>>, vector<256x128xf32>
    tpu.vector_store %arg10[%c0_53, %c0_54], %81 {strides = array<i32>} : memref<256x128xf32, #tpu.memory_space<vmem>>, vector<256x128xf32>,
    %c2_55 = arith.constant 2 : index
    %c17 = arith.constant 17 : index
    %c0_56 = arith.constant 0 : index
    %83 = vector.load %arg9[%c2_55, %c17, %c0_56] : memref<3x320x128xf32, #tpu.memory_space<vmem>>, vector<1x256x128xf32>
    %84 = vector.shape_cast %83 : vector<1x256x128xf32> to vector<256x128xf32>
    %c2_57 = arith.constant 2 : index
    %c0_58 = arith.constant 0 : index
    %c0_59 = arith.constant 0 : index
    %85 = vector.load %arg5[%c2_57, %c0_58, %c0_59] : memref<9x128x128xf32, #tpu.memory_space<vmem>>, vector<1x128x128xf32>
    %86 = vector.shape_cast %85 : vector<1x128x128xf32> to vector<128x128xf32>
    %cst_60 = arith.constant dense<0.000000e+00> : vector<256x128xf32>
    %87 = tpu.matmul %84, %86, %cst_60 {dimension_numbers = #tpu.dot_dimension_numbers<[1], [0], [0], [1], [0, 0, 1, 1], [], []>} : vector<256x128xf32>, vector<128x128xf32>, vector<256x128xf32> -> vector<256x128xf32>
    %c0_61 = arith.constant 0 : index
    %c0_62 = arith.constant 0 : index
    %88 = vector.load %arg10[%c0_61, %c0_62] : memref<256x128xf32, #tpu.memory_space<vmem>>, vector<256x128xf32>
    %89 = arith.addf %88, %87 : vector<256x128xf32>
    %c0_63 = arith.constant 0 : index
    %c0_64 = arith.constant 0 : index
    %90 = vector.load %arg10[%c0_63, %c0_64] : memref<256x128xf32, #tpu.memory_space<vmem>>, vector<256x128xf32>
    tpu.vector_store %arg10[%c0_63, %c0_64], %89 {strides = array<i32>} : memref<256x128xf32, #tpu.memory_space<vmem>>, vector<256x128xf32>,
    %c0_65 = arith.constant 0 : index
    %c31 = arith.constant 31 : index
    %c0_66 = arith.constant 0 : index
    %91 = vector.load %arg9[%c0_65, %c31, %c0_66] : memref<3x320x128xf32, #tpu.memory_space<vmem>>, vector<1x256x128xf32>
    %92 = vector.shape_cast %91 : vector<1x256x128xf32> to vector<256x128xf32>
    %c3 = arith.constant 3 : index
    %c0_67 = arith.constant 0 : index
    %c0_68 = arith.constant 0 : index
    %93 = vector.load %arg5[%c3, %c0_67, %c0_68] : memref<9x128x128xf32, #tpu.memory_space<vmem>>, vector<1x128x128xf32>
    %94 = vector.shape_cast %93 : vector<1x128x128xf32> to vector<128x128xf32>
    %cst_69 = arith.constant dense<0.000000e+00> : vector<256x128xf32>
    %95 = tpu.matmul %92, %94, %cst_69 {dimension_numbers = #tpu.dot_dimension_numbers<[1], [0], [0], [1], [0, 0, 1, 1], [], []>} : vector<256x128xf32>, vector<128x128xf32>, vector<256x128xf32> -> vector<256x128xf32>
    %c0_70 = arith.constant 0 : index
    %c0_71 = arith.constant 0 : index
    %96 = vector.load %arg10[%c0_70, %c0_71] : memref<256x128xf32, #tpu.memory_space<vmem>>, vector<256x128xf32>
    %97 = arith.addf %96, %95 : vector<256x128xf32>
    %c0_72 = arith.constant 0 : index
    %c0_73 = arith.constant 0 : index
    %98 = vector.load %arg10[%c0_72, %c0_73] : memref<256x128xf32, #tpu.memory_space<vmem>>, vector<256x128xf32>
    tpu.vector_store %arg10[%c0_72, %c0_73], %97 {strides = array<i32>} : memref<256x128xf32, #tpu.memory_space<vmem>>, vector<256x128xf32>,
    %c1_74 = arith.constant 1 : index
    %c32_75 = arith.constant 32 : index
    %c0_76 = arith.constant 0 : index
    %99 = vector.load %arg9[%c1_74, %c32_75, %c0_76] : memref<3x320x128xf32, #tpu.memory_space<vmem>>, vector<1x256x128xf32>
    %100 = vector.shape_cast %99 : vector<1x256x128xf32> to vector<256x128xf32>
    %c4 = arith.constant 4 : index
    %c0_77 = arith.constant 0 : index
    %c0_78 = arith.constant 0 : index
    %101 = vector.load %arg5[%c4, %c0_77, %c0_78] : memref<9x128x128xf32, #tpu.memory_space<vmem>>, vector<1x128x128xf32>
    %102 = vector.shape_cast %101 : vector<1x128x128xf32> to vector<128x128xf32>
    %cst_79 = arith.constant dense<0.000000e+00> : vector<256x128xf32>
    %103 = tpu.matmul %100, %102, %cst_79 {dimension_numbers = #tpu.dot_dimension_numbers<[1], [0], [0], [1], [0, 0, 1, 1], [], []>} : vector<256x128xf32>, vector<128x128xf32>, vector<256x128xf32> -> vector<256x128xf32>
    %c0_80 = arith.constant 0 : index
    %c0_81 = arith.constant 0 : index
    %104 = vector.load %arg10[%c0_80, %c0_81] : memref<256x128xf32, #tpu.memory_space<vmem>>, vector<256x128xf32>
    %105 = arith.addf %104, %103 : vector<256x128xf32>
    %c0_82 = arith.constant 0 : index
    %c0_83 = arith.constant 0 : index
    %106 = vector.load %arg10[%c0_82, %c0_83] : memref<256x128xf32, #tpu.memory_space<vmem>>, vector<256x128xf32>
    tpu.vector_store %arg10[%c0_82, %c0_83], %105 {strides = array<i32>} : memref<256x128xf32, #tpu.memory_space<vmem>>, vector<256x128xf32>,
    %c2_84 = arith.constant 2 : index
    %c33 = arith.constant 33 : index
    %c0_85 = arith.constant 0 : index
    %107 = vector.load %arg9[%c2_84, %c33, %c0_85] : memref<3x320x128xf32, #tpu.memory_space<vmem>>, vector<1x256x128xf32>
    %108 = vector.shape_cast %107 : vector<1x256x128xf32> to vector<256x128xf32>
    %c5 = arith.constant 5 : index
    %c0_86 = arith.constant 0 : index
    %c0_87 = arith.constant 0 : index
    %109 = vector.load %arg5[%c5, %c0_86, %c0_87] : memref<9x128x128xf32, #tpu.memory_space<vmem>>, vector<1x128x128xf32>
    %110 = vector.shape_cast %109 : vector<1x128x128xf32> to vector<128x128xf32>
    %cst_88 = arith.constant dense<0.000000e+00> : vector<256x128xf32>
    %111 = tpu.matmul %108, %110, %cst_88 {dimension_numbers = #tpu.dot_dimension_numbers<[1], [0], [0], [1], [0, 0, 1, 1], [], []>} : vector<256x128xf32>, vector<128x128xf32>, vector<256x128xf32> -> vector<256x128xf32>
    %c0_89 = arith.constant 0 : index
    %c0_90 = arith.constant 0 : index
    %112 = vector.load %arg10[%c0_89, %c0_90] : memref<256x128xf32, #tpu.memory_space<vmem>>, vector<256x128xf32>
    %113 = arith.addf %112, %111 : vector<256x128xf32>
    %c0_91 = arith.constant 0 : index
    %c0_92 = arith.constant 0 : index
    %114 = vector.load %arg10[%c0_91, %c0_92] : memref<256x128xf32, #tpu.memory_space<vmem>>, vector<256x128xf32>
    tpu.vector_store %arg10[%c0_91, %c0_92], %113 {strides = array<i32>} : memref<256x128xf32, #tpu.memory_space<vmem>>, vector<256x128xf32>,
    %c0_93 = arith.constant 0 : index
    %c47 = arith.constant 47 : index
    %c0_94 = arith.constant 0 : index
    %115 = vector.load %arg9[%c0_93, %c47, %c0_94] : memref<3x320x128xf32, #tpu.memory_space<vmem>>, vector<1x256x128xf32>
    %116 = vector.shape_cast %115 : vector<1x256x128xf32> to vector<256x128xf32>
    %c6 = arith.constant 6 : index
    %c0_95 = arith.constant 0 : index
    %c0_96 = arith.constant 0 : index
    %117 = vector.load %arg5[%c6, %c0_95, %c0_96] : memref<9x128x128xf32, #tpu.memory_space<vmem>>, vector<1x128x128xf32>
    %118 = vector.shape_cast %117 : vector<1x128x128xf32> to vector<128x128xf32>
    %cst_97 = arith.constant dense<0.000000e+00> : vector<256x128xf32>
    %119 = tpu.matmul %116, %118, %cst_97 {dimension_numbers = #tpu.dot_dimension_numbers<[1], [0], [0], [1], [0, 0, 1, 1], [], []>} : vector<256x128xf32>, vector<128x128xf32>, vector<256x128xf32> -> vector<256x128xf32>
    %c0_98 = arith.constant 0 : index
    %c0_99 = arith.constant 0 : index
    %120 = vector.load %arg10[%c0_98, %c0_99] : memref<256x128xf32, #tpu.memory_space<vmem>>, vector<256x128xf32>
    %121 = arith.addf %120, %119 : vector<256x128xf32>
    %c0_100 = arith.constant 0 : index
    %c0_101 = arith.constant 0 : index
    %122 = vector.load %arg10[%c0_100, %c0_101] : memref<256x128xf32, #tpu.memory_space<vmem>>, vector<256x128xf32>
    tpu.vector_store %arg10[%c0_100, %c0_101], %121 {strides = array<i32>} : memref<256x128xf32, #tpu.memory_space<vmem>>, vector<256x128xf32>,
    %c1_102 = arith.constant 1 : index
    %c48 = arith.constant 48 : index
    %c0_103 = arith.constant 0 : index
    %123 = vector.load %arg9[%c1_102, %c48, %c0_103] : memref<3x320x128xf32, #tpu.memory_space<vmem>>, vector<1x256x128xf32>
    %124 = vector.shape_cast %123 : vector<1x256x128xf32> to vector<256x128xf32>
    %c7 = arith.constant 7 : index
    %c0_104 = arith.constant 0 : index
    %c0_105 = arith.constant 0 : index
    %125 = vector.load %arg5[%c7, %c0_104, %c0_105] : memref<9x128x128xf32, #tpu.memory_space<vmem>>, vector<1x128x128xf32>
    %126 = vector.shape_cast %125 : vector<1x128x128xf32> to vector<128x128xf32>
    %cst_106 = arith.constant dense<0.000000e+00> : vector<256x128xf32>
    %127 = tpu.matmul %124, %126, %cst_106 {dimension_numbers = #tpu.dot_dimension_numbers<[1], [0], [0], [1], [0, 0, 1, 1], [], []>} : vector<256x128xf32>, vector<128x128xf32>, vector<256x128xf32> -> vector<256x128xf32>
    %c0_107 = arith.constant 0 : index
    %c0_108 = arith.constant 0 : index
    %128 = vector.load %arg10[%c0_107, %c0_108] : memref<256x128xf32, #tpu.memory_space<vmem>>, vector<256x128xf32>
    %129 = arith.addf %128, %127 : vector<256x128xf32>
    %c0_109 = arith.constant 0 : index
    %c0_110 = arith.constant 0 : index
    %130 = vector.load %arg10[%c0_109, %c0_110] : memref<256x128xf32, #tpu.memory_space<vmem>>, vector<256x128xf32>
    tpu.vector_store %arg10[%c0_109, %c0_110], %129 {strides = array<i32>} : memref<256x128xf32, #tpu.memory_space<vmem>>, vector<256x128xf32>,
    %c2_111 = arith.constant 2 : index
    %c49 = arith.constant 49 : index
    %c0_112 = arith.constant 0 : index
    %131 = vector.load %arg9[%c2_111, %c49, %c0_112] : memref<3x320x128xf32, #tpu.memory_space<vmem>>, vector<1x256x128xf32>
    %132 = vector.shape_cast %131 : vector<1x256x128xf32> to vector<256x128xf32>
    %c8 = arith.constant 8 : index
    %c0_113 = arith.constant 0 : index
    %c0_114 = arith.constant 0 : index
    %133 = vector.load %arg5[%c8, %c0_113, %c0_114] : memref<9x128x128xf32, #tpu.memory_space<vmem>>, vector<1x128x128xf32>
    %134 = vector.shape_cast %133 : vector<1x128x128xf32> to vector<128x128xf32>
    %cst_115 = arith.constant dense<0.000000e+00> : vector<256x128xf32>
    %135 = tpu.matmul %132, %134, %cst_115 {dimension_numbers = #tpu.dot_dimension_numbers<[1], [0], [0], [1], [0, 0, 1, 1], [], []>} : vector<256x128xf32>, vector<128x128xf32>, vector<256x128xf32> -> vector<256x128xf32>
    %c0_116 = arith.constant 0 : index
    %c0_117 = arith.constant 0 : index
    %136 = vector.load %arg10[%c0_116, %c0_117] : memref<256x128xf32, #tpu.memory_space<vmem>>, vector<256x128xf32>
    %137 = arith.addf %136, %135 : vector<256x128xf32>
    %c0_118 = arith.constant 0 : index
    %c0_119 = arith.constant 0 : index
    %138 = vector.load %arg10[%c0_118, %c0_119] : memref<256x128xf32, #tpu.memory_space<vmem>>, vector<256x128xf32>
    tpu.vector_store %arg10[%c0_118, %c0_119], %137 {strides = array<i32>} : memref<256x128xf32, #tpu.memory_space<vmem>>, vector<256x128xf32>,
    %c0_120 = arith.constant 0 : index
    %c0_121 = arith.constant 0 : index
    %139 = vector.load %arg10[%c0_120, %c0_121] : memref<256x128xf32, #tpu.memory_space<vmem>>, vector<256x128xf32>
    %c0_122 = arith.constant 0 : index
    %c0_123 = arith.constant 0 : index
    %140 = vector.load %arg6[%c0_122, %c0_123] : memref<1x128xf32, #tpu.memory_space<vmem>>, vector<1x128xf32>
    %141 = vector.broadcast %140 : vector<1x128xf32> to vector<256x128xf32>
    %142 = arith.addf %139, %141 : vector<256x128xf32>
    %cst_124 = arith.constant 0.000000e+00 : f32
    %143 = vector.broadcast %cst_124 : f32 to vector<256x128xf32>
    %144 = arith.subf %143, %142 : vector<256x128xf32>
    %145 = math.exp %144 : vector<256x128xf32>
    %cst_125 = arith.constant 1.000000e+00 : f32
    %146 = vector.broadcast %cst_125 : f32 to vector<256x128xf32>
    %147 = arith.addf %146, %145 : vector<256x128xf32>
    %148 = arith.divf %142, %147 : vector<256x128xf32>
    %c0_126 = arith.constant 0 : index
    %c0_127 = arith.constant 0 : index
    %c0_128 = arith.constant 0 : index
    %c0_129 = arith.constant 0 : index
    %149 = vector.load %arg7[%c0_126, %c0_127, %c0_128, %c0_129] : memref<1x16x16x128xf32, #tpu.memory_space<vmem>>, vector<1x16x16x128xf32>
    %150 = vector.shape_cast %149 : vector<1x16x16x128xf32> to vector<16x16x128xf32>
    %151 = vector.shape_cast %150 : vector<16x16x128xf32> to vector<256x128xf32>
    %152 = arith.addf %148, %151 : vector<256x128xf32>
    %153 = vector.shape_cast %152 : vector<256x128xf32> to vector<16x16x128xf32>
    %c0_130 = arith.constant 0 : index
    %c0_131 = arith.constant 0 : index
    %c0_132 = arith.constant 0 : index
    %c0_133 = arith.constant 0 : index
    %154 = vector.load %arg8[%c0_130, %c0_131, %c0_132, %c0_133] : memref<1x16x16x128xf32, #tpu.memory_space<vmem>>, vector<1x16x16x128xf32>
    %155 = vector.shape_cast %154 : vector<1x16x16x128xf32> to vector<16x16x128xf32>
    %156 = vector.shape_cast %153 : vector<16x16x128xf32> to vector<1x16x16x128xf32>
    tpu.vector_store %arg8[%c0_130, %c0_131, %c0_132, %c0_133], %156 {strides = array<i32>} : memref<1x16x16x128xf32, #tpu.memory_space<vmem>>, vector<1x16x16x128xf32>,
    return
  }
  func.func @transform_0(%arg0: i32, %arg1: i32) -> (i32, i32, i32, i32) {
    %c0_i32 = arith.constant 0 : i32
    %c0_i32_0 = arith.constant 0 : i32
    %c0_i32_1 = arith.constant 0 : i32
    return %arg0, %arg1, %c0_i32, %c0_i32_0 : i32, i32, i32, i32
  }
  func.func @transform_1(%arg0: i32, %arg1: i32) -> (i32, i32, i32, i32) {
    %c16_i32 = arith.constant 16 : i32
    %0 = arith.muli %arg1, %c16_i32 : i32
    %c1_i32 = arith.constant 1 : i32
    %1 = arith.subi %0, %c1_i32 : i32
    %c0_i32 = arith.constant 0 : i32
    %2 = arith.maxsi %1, %c0_i32 : i32
    %c0_i32_0 = arith.constant 0 : i32
    %c0_i32_1 = arith.constant 0 : i32
    %c0_i32_2 = arith.constant 0 : i32
    return %arg0, %2, %c0_i32_0, %c0_i32_1 : i32, i32, i32, i32
  }
  func.func @transform_2(%arg0: i32, %arg1: i32) -> (i32, i32, i32, i32) {
    %c16_i32 = arith.constant 16 : i32
    %0 = arith.muli %arg1, %c16_i32 : i32
    %c16_i32_0 = arith.constant 16 : i32
    %1 = arith.addi %0, %c16_i32_0 : i32
    %c15_i32 = arith.constant 15 : i32
    %2 = arith.minsi %1, %c15_i32 : i32
    %c0_i32 = arith.constant 0 : i32
    %c0_i32_1 = arith.constant 0 : i32
    %c0_i32_2 = arith.constant 0 : i32
    return %arg0, %2, %c0_i32, %c0_i32_1 : i32, i32, i32, i32
  }
  func.func @transform_3(%arg0: i32, %arg1: i32) -> (i32, i32, i32) {
    %c0_i32 = arith.constant 0 : i32
    %c0_i32_0 = arith.constant 0 : i32
    %c0_i32_1 = arith.constant 0 : i32
    %c0_i32_2 = arith.constant 0 : i32
    return %c0_i32, %c0_i32_0, %c0_i32_1 : i32, i32, i32
  }
  func.func @transform_4(%arg0: i32, %arg1: i32) -> (i32, i32) {
    %c0_i32 = arith.constant 0 : i32
    %c0_i32_0 = arith.constant 0 : i32
    %c0_i32_1 = arith.constant 0 : i32
    return %c0_i32, %c0_i32_0 : i32, i32
  }
  func.func @transform_5(%arg0: i32, %arg1: i32) -> (i32, i32, i32, i32) {
    %c0_i32 = arith.constant 0 : i32
    %c0_i32_0 = arith.constant 0 : i32
    %c0_i32_1 = arith.constant 0 : i32
    return %arg0, %arg1, %c0_i32, %c0_i32_0 : i32, i32, i32, i32
  }
  func.func @transform_6(%arg0: i32, %arg1: i32) -> (i32, i32, i32, i32) {
    %c0_i32 = arith.constant 0 : i32
    %c0_i32_0 = arith.constant 0 : i32
    %c0_i32_1 = arith.constant 0 : i32
    return %arg0, %arg1, %c0_i32, %c0_i32_0 : i32, i32, i32, i32
  }
}

</mosaic_0001>

<bundles_post_ra>
// kernel: repncsp_forward.4
= control target key start
LH: loop header
LB: loop body
LE: loop exit
PB: predicated region body
PF: predicated region fallthrough
CT: control target
= control target key end

     0   :  { %s4487_s1 = inlined_call_operand.vmem [shape: f32[128,128], index: 1, kind: input, shape index: {}]   ;;  %s4488_s3 = inlined_call_operand.vmem [shape: f32[128,128], index: 3, kind: input, shape index: {}]   ;;  %s4489_s0 = inlined_call_operand.vmem [shape: f32[512,128], index: 0, kind: input, shape index: {}]   ;;  %s4490_s2 = inlined_call_operand.vmem [shape: f32[1,128], index: 2, kind: input, shape index: {}]   ;;  %s4491_s4 = inlined_call_operand.vmem [shape: f32[1,128], index: 4, kind: input, shape index: {}]   ;;  %s4492_s5 = inlined_call_operand.vmem [shape: f32[512,128], index: 5, kind: output, shape index: {0}]   ;;  %s4493_s6 = inlined_call_operand.vmem [shape: f32[512,128], index: 6, kind: output, shape index: {1}]  }
   0x1   :  { %v86_v0 = vld [vmem:[%s4487_s1] sm:$0xff]  ;;  %v87_v1 = vld [vmem:[%s4487_s1 + $0x8] sm:$0xff]  ;;  %v88_v5 = vld [vmem:[%s4487_s1 + $0x10] sm:$0xff] }
   0x2   :  { %v942_v2 = vld [vmem:[%s4488_s3] sm:$0xff]  ;;  %v2224_v3 = vpack.c.bf16 %v87_v1, %v86_v0  ;;  %v943_v4 = vld [vmem:[%s4488_s3 + $0x8] sm:$0xff]  ;;  %v89_v6 = vld [vmem:[%s4487_s1 + $0x18] sm:$0xff] }
   0x3   :  { %v2256_v7 = vpack.c.bf16 %v943_v4, %v942_v2  ;;  %v2228_v8 = vpack.c.bf16 %v89_v6, %v88_v5  ;;  %v944_v9 = vld [vmem:[%s4488_s3 + $0x10] sm:$0xff]  ;;  %v945_v10 = vld [vmem:[%s4488_s3 + $0x18] sm:$0xff]  ;;  %v90_v11 = vld [vmem:[%s4487_s1 + $0x20] sm:$0xff] }
   0x4   :  { %2225 = vmatprep.subr.bf16.mxu0 %v2224_v3  ;;  %v2260_v12 = vpack.c.bf16 %v945_v10, %v944_v9  ;;  %v91_v13 = vld [vmem:[%s4487_s1 + $0x28] sm:$0xff]  ;;  %v946_v14 = vld [vmem:[%s4488_s3 + $0x20] sm:$0xff]  ;;  %v92_v18 = vld [vmem:[%s4487_s1 + $0x30] sm:$0xff] }
   0x5   :  { %v947_v15 = vld [vmem:[%s4488_s3 + $0x28] sm:$0xff]  ;;  %2257 = vmatprep.subr.bf16.mxu1 %v2256_v7  ;;  %2227 = vmatpush3.bf16.msra.mxu0 %v2224_v3  ;;  %v2232_v16 = vpack.c.bf16 %v91_v13, %v90_v11  ;;  %v93_v19 = vld [vmem:[%s4487_s1 + $0x38] sm:$0xff]  ;;  %v948_v20 = vld [vmem:[%s4488_s3 + $0x30] sm:$0xff] }
   0x6   :  { %2259 = vmatpush3.bf16.msra.mxu1 %v2256_v7  ;;  %2229 = vmatprep.subr.bf16.mxu0 %v2228_v8  ;;  %v2264_v17 = vpack.c.bf16 %v947_v15, %v946_v14  ;;  %v949_v21 = vld [vmem:[%s4488_s3 + $0x38] sm:$0xff]  ;;  %v2236_v22 = vpack.c.bf16 %v93_v19, %v92_v18  ;;  %v94_v24 = vld [vmem:[%s4487_s1 + $0x40] sm:$0xff]  ;;  %v95_v25 = vld [vmem:[%s4487_s1 + $0x48] sm:$0xff] }
   0x7   :  { %2261 = vmatprep.subr.bf16.mxu1 %v2260_v12  ;;  %v2268_v23 = vpack.c.bf16 %v949_v21, %v948_v20  ;;  %v22_v26 = vld [vmem:[%s4489_s0] sm:$0xff]  ;;  %v951_v28 = vld [vmem:[%s4488_s3 + $0x48] sm:$0xff]  ;;  %v2240_v29 = vpack.c.bf16 %v95_v25, %v94_v24  ;;  %v96_v31 = vld [vmem:[%s4487_s1 + $0x50] sm:$0xff] }
   0x8   :  { %v950_v27 = vld [vmem:[%s4488_s3 + $0x40] sm:$0xff]  ;;  %2000 = vmatprep.mubr.f32.mxu0 %v22_v26  ;;  %2128 = vmatprep.mubr.f32.mxu1 %v22_v26  ;;  %v97_v32 = vld [vmem:[%s4487_s1 + $0x58] sm:$0xff]  ;;  %v952_v33 = vld [vmem:[%s4488_s3 + $0x50] sm:$0xff] }
   0x9   :  { %2231 = vmatpush3.bf16.msra.mxu0 %v2228_v8  ;;  %v2272_v30 = vpack.c.bf16 %v951_v28, %v950_v27  ;;  %v953_v34 = vld [vmem:[%s4488_s3 + $0x58] sm:$0xff]  ;;  %v2244_v35 = vpack.c.bf16 %v97_v32, %v96_v31  ;;  %v98_v37 = vld [vmem:[%s4487_s1 + $0x60] sm:$0xff]  ;;  %v99_v38 = vld [vmem:[%s4487_s1 + $0x68] sm:$0xff] }
   0xa   :  { %2263 = vmatpush3.bf16.msra.mxu1 %v2260_v12  ;;  %2233 = vmatprep.subr.bf16.mxu0 %v2232_v16  ;;  %v2276_v36 = vpack.c.bf16 %v953_v34, %v952_v33  ;;  %v954_v39 = vld [vmem:[%s4488_s3 + $0x60] sm:$0xff]  ;;  %v955_v40 = vld [vmem:[%s4488_s3 + $0x68] sm:$0xff]  ;;  %v2248_v41 = vpack.c.bf16 %v99_v38, %v98_v37  ;;  %v100_v43 = vld [vmem:[%s4487_s1 + $0x70] sm:$0xff] }
   0xb   :  { %2265 = vmatprep.subr.bf16.mxu1 %v2264_v17  ;;  %v2280_v42 = vpack.c.bf16 %v955_v40, %v954_v39  ;;  %v101_v44 = vld [vmem:[%s4487_s1 + $0x78] sm:$0xff]  ;;  %v956_v45 = vld [vmem:[%s4488_s3 + $0x70] sm:$0xff]  ;;  %v23_v49 = vld [vmem:[%s4489_s0 + $0x8] sm:$0xff] }
   0xc   :  { %v957_v46 = vld [vmem:[%s4488_s3 + $0x78] sm:$0xff]  ;;  %v2252_v47 = vpack.c.bf16 %v101_v44, %v100_v43  ;;  %v24_v50 = vld [vmem:[%s4489_s0 + $0x10] sm:$0xff]  ;;  %v26_v52 = vld [vmem:[%s4489_s0 + $0x20] sm:$0xff] }
   0xd   :  { %2235 = vmatpush3.bf16.msra.mxu0 %v2232_v16  ;;  %v2284_v48 = vpack.c.bf16 %v957_v46, %v956_v45  ;;  %v25_v51 = vld [vmem:[%s4489_s0 + $0x18] sm:$0xff]  ;;  %v27_v53 = vld [vmem:[%s4489_s0 + $0x28] sm:$0xff]  ;;  %v28_v54 = vld [vmem:[%s4489_s0 + $0x30] sm:$0xff] }
   0xe   :  { %2267 = vmatpush3.bf16.msra.mxu1 %v2264_v17  ;;  %2237 = vmatprep.subr.bf16.mxu0 %v2236_v22  ;;  %v29_v55 = vld [vmem:[%s4489_s0 + $0x38] sm:$0xff]  ;;  %v30_v56 = vld [vmem:[%s4489_s0 + $0x40] sm:$0xff]  ;;  %v31_v57 = vld [vmem:[%s4489_s0 + $0x48] sm:$0xff] }
   0xf   :  { %2269 = vmatprep.subr.bf16.mxu1 %v2268_v23  ;;  %v32_v58 = vld [vmem:[%s4489_s0 + $0x50] sm:$0xff]  ;;  %v33_v59 = vld [vmem:[%s4489_s0 + $0x58] sm:$0xff]  ;;  %v34_v60 = vld [vmem:[%s4489_s0 + $0x60] sm:$0xff] }
  0x10   :  { %v35_v61 = vld [vmem:[%s4489_s0 + $0x68] sm:$0xff]  ;;  %v36_v62 = vld [vmem:[%s4489_s0 + $0x70] sm:$0xff]  ;;  %v37_v63 = vld [vmem:[%s4489_s0 + $0x78] sm:$0xff] }
  0x11   :  { %2239 = vmatpush3.bf16.msra.mxu0 %v2236_v22  ;;  %v38_v0 = vld [vmem:[%s4489_s0 + $0x80] sm:$0xff]  ;;  %v39_v1 = vld [vmem:[%s4489_s0 + $0x88] sm:$0xff]  ;;  %v40_v2 = vld [vmem:[%s4489_s0 + $0x90] sm:$0xff] }
  0x12   :  { %2271 = vmatpush3.bf16.msra.mxu1 %v2268_v23  ;;  %2241 = vmatprep.subr.bf16.mxu0 %v2240_v29  ;;  %v41_v3 = vld [vmem:[%s4489_s0 + $0x98] sm:$0xff]  ;;  %v42_v4 = vld [vmem:[%s4489_s0 + $0xa0] sm:$0xff]  ;;  %v43_v5 = vld [vmem:[%s4489_s0 + $0xa8] sm:$0xff] }
  0x13   :  { %2273 = vmatprep.subr.bf16.mxu1 %v2272_v30  ;;  %v44_v6 = vld [vmem:[%s4489_s0 + $0xb0] sm:$0xff]  ;;  %v45_v7 = vld [vmem:[%s4489_s0 + $0xb8] sm:$0xff]  ;;  %v46_v8 = vld [vmem:[%s4489_s0 + $0xc0] sm:$0xff] }
  0x14   :  { %v47_v9 = vld [vmem:[%s4489_s0 + $0xc8] sm:$0xff]  ;;  %v48_v10 = vld [vmem:[%s4489_s0 + $0xd0] sm:$0xff]  ;;  %v49_v11 = vld [vmem:[%s4489_s0 + $0xd8] sm:$0xff] }
  0x15   :  { %2243 = vmatpush3.bf16.msra.mxu0 %v2240_v29  ;;  %v50_v12 = vld [vmem:[%s4489_s0 + $0xe0] sm:$0xff]  ;;  %v51_v13 = vld [vmem:[%s4489_s0 + $0xe8] sm:$0xff]  ;;  %v52_v14 = vld [vmem:[%s4489_s0 + $0xf0] sm:$0xff] }
  0x16   :  { %2275 = vmatpush3.bf16.msra.mxu1 %v2272_v30  ;;  %2245 = vmatprep.subr.bf16.mxu0 %v2244_v35  ;;  %v53_v15 = vld [vmem:[%s4489_s0 + $0xf8] sm:$0xff]  ;;  %v54_v16 = vld [vmem:[%s4489_s0 + $0x100] sm:$0xff]  ;;  %v55_v17 = vld [vmem:[%s4489_s0 + $0x108] sm:$0xff] }
  0x17   :  { %2277 = vmatprep.subr.bf16.mxu1 %v2276_v36  ;;  %v56_v18 = vld [vmem:[%s4489_s0 + $0x110] sm:$0xff]  ;;  %v57_v19 = vld [vmem:[%s4489_s0 + $0x118] sm:$0xff]  ;;  %v58_v20 = vld [vmem:[%s4489_s0 + $0x120] sm:$0xff] }
  0x18   :  { %v59_v21 = vld [vmem:[%s4489_s0 + $0x128] sm:$0xff]  ;;  %v60_v22 = vld [vmem:[%s4489_s0 + $0x130] sm:$0xff]  ;;  %v61_v23 = vld [vmem:[%s4489_s0 + $0x138] sm:$0xff] }
  0x19   :  { %2247 = vmatpush3.bf16.msra.mxu0 %v2244_v35  ;;  %v62_v24 = vld [vmem:[%s4489_s0 + $0x140] sm:$0xff]  ;;  %v63_v25 = vld [vmem:[%s4489_s0 + $0x148] sm:$0xff]  ;;  %v64_v26 = vld [vmem:[%s4489_s0 + $0x150] sm:$0xff] }
  0x1a   :  { %2279 = vmatpush3.bf16.msra.mxu1 %v2276_v36  ;;  %2249 = vmatprep.subr.bf16.mxu0 %v2248_v41  ;;  %v65_v27 = vld [vmem:[%s4489_s0 + $0x158] sm:$0xff]  ;;  %v66_v28 = vld [vmem:[%s4489_s0 + $0x160] sm:$0xff]  ;;  %v67_v29 = vld [vmem:[%s4489_s0 + $0x168] sm:$0xff] }
  0x1b   :  { %2281 = vmatprep.subr.bf16.mxu1 %v2280_v42  ;;  %v68_v30 = vld [vmem:[%s4489_s0 + $0x170] sm:$0xff]  ;;  %v69_v31 = vld [vmem:[%s4489_s0 + $0x178] sm:$0xff]  ;;  %v70_v32 = vld [vmem:[%s4489_s0 + $0x180] sm:$0xff] }
  0x1c   :  { %v71_v33 = vld [vmem:[%s4489_s0 + $0x188] sm:$0xff]  ;;  %v72_v34 = vld [vmem:[%s4489_s0 + $0x190] sm:$0xff]  ;;  %v73_v35 = vld [vmem:[%s4489_s0 + $0x198] sm:$0xff] }
  0x1d   :  { %2251 = vmatpush3.bf16.msra.mxu0 %v2248_v41  ;;  %v74_v36 = vld [vmem:[%s4489_s0 + $0x1a0] sm:$0xff]  ;;  %v75_v37 = vld [vmem:[%s4489_s0 + $0x1a8] sm:$0xff]  ;;  %v76_v38 = vld [vmem:[%s4489_s0 + $0x1b0] sm:$0xff] }
  0x1e   :  { %2283 = vmatpush3.bf16.msra.mxu1 %v2280_v42  ;;  %2253 = vmatprep.subr.bf16.mxu0 %v2252_v47  ;;  %v77_v39 = vld [vmem:[%s4489_s0 + $0x1b8] sm:$0xff]  ;;  %v78_v40 = vld [vmem:[%s4489_s0 + $0x1c0] sm:$0xff]  ;;  %v79_v41 = vld [vmem:[%s4489_s0 + $0x1c8] sm:$0xff] }
  0x1f   :  { %2285 = vmatprep.subr.bf16.mxu1 %v2284_v48  ;;  %v80_v42 = vld [vmem:[%s4489_s0 + $0x1d0] sm:$0xff]  ;;  %v81_v43 = vld [vmem:[%s4489_s0 + $0x1d8] sm:$0xff]  ;;  %v82_v44 = vld [vmem:[%s4489_s0 + $0x1e0] sm:$0xff] }
  0x20   :  { %v83_v45 = vld [vmem:[%s4489_s0 + $0x1e8] sm:$0xff]  ;;  %v84_v46 = vld [vmem:[%s4489_s0 + $0x1f0] sm:$0xff] }
  0x21   :  { %2255 = vmatpush3.bf16.msra.mxu0 %v2252_v47  ;;  %v85_v47 = vld [vmem:[%s4489_s0 + $0x1f8] sm:$0xff] }
  0x22   :  { %2287 = vmatpush3.bf16.msra.mxu1 %v2284_v48  ;;  %v3130_v48 = vld [vmem:[%s4490_s2] ss:$0 sm:$0xff] }
  0x24   :  { %2001 = vmatmul.mubr.f32.vlgmr.msra.gmra.mrb[0].mxu0 %v23_v49 }
  0x25   :  { %2129 = vmatmul.mubr.f32.vlgmr.msra.gmra.mrb[0].mxu1 %v23_v49  ;;  %2003 = vmatprep.mubr.f32.mxu0 %v24_v50  ;;  %v3135_v49 = vld [vmem:[%s4491_s4] ss:$0 sm:$0xff] }
  0x26   :  { %2131 = vmatprep.mubr.f32.mxu1 %v24_v50 }
  0x28   :  { %2004 = vmatmul.mubr.f32.gmra.mrb[2].mxu0 %v25_v51 }
  0x29   :  { %2132 = vmatmul.mubr.f32.gmra.mrb[2].mxu1 %v25_v51  ;;  %2006 = vmatprep.mubr.f32.mxu0 %v26_v52 }
  0x2a   :  { %2134 = vmatprep.mubr.f32.mxu1 %v26_v52 }
  0x2c   :  { %2007 = vmatmul.mubr.f32.gmra.mrb[4].mxu0 %v27_v53 }
  0x2d   :  { %2135 = vmatmul.mubr.f32.gmra.mrb[4].mxu1 %v27_v53  ;;  %2009 = vmatprep.mubr.f32.mxu0 %v28_v54 }
  0x2e   :  { %2137 = vmatprep.mubr.f32.mxu1 %v28_v54 }
  0x30   :  { %2010 = vmatmul.mubr.f32.gmra.mrb[6].mxu0 %v29_v55 }
  0x31   :  { %2138 = vmatmul.mubr.f32.gmra.mrb[6].mxu1 %v29_v55  ;;  %2012 = vmatprep.mubr.f32.mxu0 %v30_v56 }
  0x32   :  { %2140 = vmatprep.mubr.f32.mxu1 %v30_v56 }
  0x34   :  { %2013 = vmatmul.mubr.f32.gmra.mrb[8].mxu0 %v31_v57 }
  0x35   :  { %2141 = vmatmul.mubr.f32.gmra.mrb[8].mxu1 %v31_v57  ;;  %2015 = vmatprep.mubr.f32.mxu0 %v32_v58 }
  0x36   :  { %2143 = vmatprep.mubr.f32.mxu1 %v32_v58 }
  0x38   :  { %2016 = vmatmul.mubr.f32.gmra.mrb[10].mxu0 %v33_v59 }
  0x39   :  { %2144 = vmatmul.mubr.f32.gmra.mrb[10].mxu1 %v33_v59  ;;  %2018 = vmatprep.mubr.f32.mxu0 %v34_v60 }
  0x3a   :  { %2146 = vmatprep.mubr.f32.mxu1 %v34_v60 }
  0x3c   :  { %2019 = vmatmul.mubr.f32.gmra.mrb[12].mxu0 %v35_v61 }
  0x3d   :  { %2147 = vmatmul.mubr.f32.gmra.mrb[12].mxu1 %v35_v61  ;;  %2021 = vmatprep.mubr.f32.mxu0 %v36_v62 }
  0x3e   :  { %2149 = vmatprep.mubr.f32.mxu1 %v36_v62 }
  0x40   :  { %2022 = vmatmul.mubr.f32.gmra.mrb[14].mxu0 %v37_v63 }
  0x41   :  { %2150 = vmatmul.mubr.f32.gmra.mrb[14].mxu1 %v37_v63  ;;  %2024 = vmatprep.mubr.f32.mxu0 %v38_v0 }
  0x42   :  { %2152 = vmatprep.mubr.f32.mxu1 %v38_v0 }
  0x44   :  { %2025 = vmatmul.mubr.f32.gmra.mrb[16].mxu0 %v39_v1 }
  0x45   :  { %2153 = vmatmul.mubr.f32.gmra.mrb[16].mxu1 %v39_v1  ;;  %2027 = vmatprep.mubr.f32.mxu0 %v40_v2 }
  0x46   :  { %2155 = vmatprep.mubr.f32.mxu1 %v40_v2 }
  0x48   :  { %2028 = vmatmul.mubr.f32.gmra.mrb[18].mxu0 %v41_v3 }
  0x49   :  { %2156 = vmatmul.mubr.f32.gmra.mrb[18].mxu1 %v41_v3  ;;  %2030 = vmatprep.mubr.f32.mxu0 %v42_v4 }
  0x4a   :  { %2158 = vmatprep.mubr.f32.mxu1 %v42_v4 }
  0x4c   :  { %2031 = vmatmul.mubr.f32.gmra.mrb[20].mxu0 %v43_v5 }
  0x4d   :  { %2159 = vmatmul.mubr.f32.gmra.mrb[20].mxu1 %v43_v5  ;;  %2033 = vmatprep.mubr.f32.mxu0 %v44_v6 }
  0x4e   :  { %2161 = vmatprep.mubr.f32.mxu1 %v44_v6 }
  0x50   :  { %2034 = vmatmul.mubr.f32.gmra.mrb[22].mxu0 %v45_v7 }
  0x51   :  { %2162 = vmatmul.mubr.f32.gmra.mrb[22].mxu1 %v45_v7  ;;  %2036 = vmatprep.mubr.f32.mxu0 %v46_v8 }
  0x52   :  { %2164 = vmatprep.mubr.f32.mxu1 %v46_v8 }
  0x54   :  { %2037 = vmatmul.mubr.f32.gmra.mrb[24].mxu0 %v47_v9 }
  0x55   :  { %2165 = vmatmul.mubr.f32.gmra.mrb[24].mxu1 %v47_v9  ;;  %2039 = vmatprep.mubr.f32.mxu0 %v48_v10 }
  0x56   :  { %2167 = vmatprep.mubr.f32.mxu1 %v48_v10 }
  0x58   :  { %2040 = vmatmul.mubr.f32.gmra.mrb[26].mxu0 %v49_v11 }
  0x59   :  { %2168 = vmatmul.mubr.f32.gmra.mrb[26].mxu1 %v49_v11  ;;  %2042 = vmatprep.mubr.f32.mxu0 %v50_v12 }
  0x5a   :  { %2170 = vmatprep.mubr.f32.mxu1 %v50_v12 }
  0x5c   :  { %2043 = vmatmul.mubr.f32.gmra.mrb[28].mxu0 %v51_v13 }
  0x5d   :  { %2171 = vmatmul.mubr.f32.gmra.mrb[28].mxu1 %v51_v13  ;;  %2045 = vmatprep.mubr.f32.mxu0 %v52_v14 }
  0x5e   :  { %2173 = vmatprep.mubr.f32.mxu1 %v52_v14 }
  0x60   :  { %2046 = vmatmul.mubr.f32.gmra.mrb[30].mxu0 %v53_v15 }
  0x61   :  { %2174 = vmatmul.mubr.f32.gmra.mrb[30].mxu1 %v53_v15  ;;  %2048 = vmatprep.mubr.f32.mxu0 %v54_v16 }
  0x62   :  { %2176 = vmatprep.mubr.f32.mxu1 %v54_v16 }
  0x64   :  { %2049 = vmatmul.mubr.f32.gmra.mrb[32].mxu0 %v55_v17 }
  0x65   :  { %2177 = vmatmul.mubr.f32.gmra.mrb[32].mxu1 %v55_v17  ;;  %2051 = vmatprep.mubr.f32.mxu0 %v56_v18 }
  0x66   :  { %2179 = vmatprep.mubr.f32.mxu1 %v56_v18 }
  0x68   :  { %2052 = vmatmul.mubr.f32.gmra.mrb[34].mxu0 %v57_v19 }
  0x69   :  { %2180 = vmatmul.mubr.f32.gmra.mrb[34].mxu1 %v57_v19  ;;  %2054 = vmatprep.mubr.f32.mxu0 %v58_v20 }
  0x6a   :  { %2182 = vmatprep.mubr.f32.mxu1 %v58_v20 }
  0x6c   :  { %2055 = vmatmul.mubr.f32.gmra.mrb[36].mxu0 %v59_v21 }
  0x6d   :  { %2183 = vmatmul.mubr.f32.gmra.mrb[36].mxu1 %v59_v21  ;;  %2057 = vmatprep.mubr.f32.mxu0 %v60_v22 }
  0x6e   :  { %2185 = vmatprep.mubr.f32.mxu1 %v60_v22 }
  0x70   :  { %2058 = vmatmul.mubr.f32.gmra.mrb[38].mxu0 %v61_v23 }
  0x71   :  { %2186 = vmatmul.mubr.f32.gmra.mrb[38].mxu1 %v61_v23  ;;  %2060 = vmatprep.mubr.f32.mxu0 %v62_v24 }
  0x72   :  { %2188 = vmatprep.mubr.f32.mxu1 %v62_v24 }
  0x74   :  { %2061 = vmatmul.mubr.f32.gmra.mrb[40].mxu0 %v63_v25 }
  0x75   :  { %2189 = vmatmul.mubr.f32.gmra.mrb[40].mxu1 %v63_v25  ;;  %2063 = vmatprep.mubr.f32.mxu0 %v64_v26 }
  0x76   :  { %2191 = vmatprep.mubr.f32.mxu1 %v64_v26 }
  0x78   :  { %2064 = vmatmul.mubr.f32.gmra.mrb[42].mxu0 %v65_v27 }
  0x79   :  { %2192 = vmatmul.mubr.f32.gmra.mrb[42].mxu1 %v65_v27  ;;  %2066 = vmatprep.mubr.f32.mxu0 %v66_v28 }
  0x7a   :  { %2194 = vmatprep.mubr.f32.mxu1 %v66_v28 }
  0x7c   :  { %2067 = vmatmul.mubr.f32.gmra.mrb[44].mxu0 %v67_v29 }
  0x7d   :  { %2195 = vmatmul.mubr.f32.gmra.mrb[44].mxu1 %v67_v29  ;;  %2069 = vmatprep.mubr.f32.mxu0 %v68_v30 }
  0x7e   :  { %2197 = vmatprep.mubr.f32.mxu1 %v68_v30 }
  0x80   :  { %2070 = vmatmul.mubr.f32.gmra.mrb[46].mxu0 %v69_v31 }
  0x81   :  { %2198 = vmatmul.mubr.f32.gmra.mrb[46].mxu1 %v69_v31  ;;  %2072 = vmatprep.mubr.f32.mxu0 %v70_v32 }
  0x82   :  { %2200 = vmatprep.mubr.f32.mxu1 %v70_v32 }
  0x84   :  { %2073 = vmatmul.mubr.f32.gmra.mrb[48].mxu0 %v71_v33 }
  0x85   :  { %2201 = vmatmul.mubr.f32.gmra.mrb[48].mxu1 %v71_v33  ;;  %2075 = vmatprep.mubr.f32.mxu0 %v72_v34 }
  0x86   :  { %2203 = vmatprep.mubr.f32.mxu1 %v72_v34 }
  0x88   :  { %2076 = vmatmul.mubr.f32.gmra.mrb[50].mxu0 %v73_v35 }
  0x89   :  { %2204 = vmatmul.mubr.f32.gmra.mrb[50].mxu1 %v73_v35  ;;  %2078 = vmatprep.mubr.f32.mxu0 %v74_v36 }
  0x8a   :  { %2206 = vmatprep.mubr.f32.mxu1 %v74_v36 }
  0x8c   :  { %2079 = vmatmul.mubr.f32.gmra.mrb[52].mxu0 %v75_v37 }
  0x8d   :  { %2207 = vmatmul.mubr.f32.gmra.mrb[52].mxu1 %v75_v37  ;;  %2081 = vmatprep.mubr.f32.mxu0 %v76_v38 }
  0x8e   :  { %2209 = vmatprep.mubr.f32.mxu1 %v76_v38 }
  0x90   :  { %2082 = vmatmul.mubr.f32.gmra.mrb[54].mxu0 %v77_v39 }
  0x91   :  { %2210 = vmatmul.mubr.f32.gmra.mrb[54].mxu1 %v77_v39  ;;  %2084 = vmatprep.mubr.f32.mxu0 %v78_v40 }
  0x92   :  { %2212 = vmatprep.mubr.f32.mxu1 %v78_v40 }
  0x94   :  { %2085 = vmatmul.mubr.f32.gmra.mrb[56].mxu0 %v79_v41 }
  0x95   :  { %2213 = vmatmul.mubr.f32.gmra.mrb[56].mxu1 %v79_v41  ;;  %2087 = vmatprep.mubr.f32.mxu0 %v80_v42 }
  0x96   :  { %2215 = vmatprep.mubr.f32.mxu1 %v80_v42 }
  0x98   :  { %2088 = vmatmul.mubr.f32.gmra.mrb[58].mxu0 %v81_v43 }
  0x99   :  { %2216 = vmatmul.mubr.f32.gmra.mrb[58].mxu1 %v81_v43  ;;  %2090 = vmatprep.mubr.f32.mxu0 %v82_v44 }
  0x9a   :  { %2218 = vmatprep.mubr.f32.mxu1 %v82_v44 }
  0x9c   :  { %2091 = vmatmul.mubr.f32.gmra.mrb[60].mxu0 %v83_v45 }
  0x9d   :  { %2219 = vmatmul.mubr.f32.gmra.mrb[60].mxu1 %v83_v45  ;;  %2093 = vmatprep.mubr.f32.mxu0 %v84_v46 }
  0x9e   :  { %2221 = vmatprep.mubr.f32.mxu1 %v84_v46 }
  0xa0   :  { %2094 = vmatmul.mubr.f32.gmra.mrb[62].mxu0 %v85_v47 }
  0xa1   :  { %2222 = vmatmul.mubr.f32.gmra.mrb[62].mxu1 %v85_v47 }
  0xf7   :  { %v2002_v50 = vpop.f32.mrb[0].mxu0 }
  0xf8   :  { %v3138_v51 = vadd.f32 %v2002_v50, %v3130_v48  ;;  %v2130_v52 = vpop.f32.mrb[0].mxu1  ;;  %v175_v53 = vpop.f32.mrb[1].mxu0 }
  0xf9   :  { %v3141_v54 = vadd.f32 %v2130_v52, %v3135_v49  ;;  %v3144_v55 = vadd.f32 %v3130_v48, %v175_v53  ;;  %v1031_v56 = vpop.f32.mrb[1].mxu1 }
  0xfa   :  { %v495_v57 = vsub.f32 0.0, %v3138_v51  ;;  %v3148_v58 = vadd.f32 %v3135_v49, %v1031_v56 }
  0xfb   :  { %v1351_v59 = vsub.f32 0.0, %v3141_v54  ;;  %v494_v60 = vsub.f32 0.0, %v3144_v55  ;;  %v2005_v61 = vpop.f32.mrb[2].mxu0 }
  0xfc   :  { %v560_v62 = vmul.f32 1.442695, %v495_v57  ;;  %v1350_v63 = vsub.f32 0.0, %v3148_v58  ;;  %v3154_v0 = vadd.f32 %v2005_v61, %v3130_v48  ;;  %v2133_v1 = vpop.f32.mrb[2].mxu1  ;;  %v185_v2 = vpop.f32.mrb[3].mxu0 }
  0xfd   :  { %v1416_v3 = vmul.f32 1.442695, %v1351_v59  ;;  %v558_v4 = vmul.f32 1.442695, %v494_v60  ;;  %v3157_v5 = vadd.f32 %v2133_v1, %v3135_v49  ;;  %v3160_v6 = vadd.f32 %v3130_v48, %v185_v2  ;;  %v1041_v7 = vpop.f32.mrb[3].mxu1 }
  0xfe   :  { %2288 = vpow2.f32 %v560_v62  ;;  %v1414_v8 = vmul.f32 1.442695, %v1350_v63  ;;  %v497_v9 = vsub.f32 0.0, %v3154_v0  ;;  %v3164_v10 = vadd.f32 %v3135_v49, %v1041_v7 }
  0xff   :  { %2290 = vpow2.f32 %v1416_v3  ;;  %v1353_v11 = vsub.f32 0.0, %v3157_v5  ;;  %v496_v12 = vsub.f32 0.0, %v3160_v6  ;;  %v2008_v13 = vpop.f32.mrb[4].mxu0 }
 0x100   :  { %2292 = vpow2.f32 %v558_v4  ;;  %v564_v14 = vmul.f32 1.442695, %v497_v9  ;;  %v1352_v15 = vsub.f32 0.0, %v3164_v10  ;;  %v3170_v16 = vadd.f32 %v2008_v13, %v3130_v48  ;;  %v2136_v17 = vpop.f32.mrb[4].mxu1  ;;  %v195_v18 = vpop.f32.mrb[5].mxu0 }
 0x101   :  { %2294 = vpow2.f32 %v1414_v8  ;;  %v1420_v19 = vmul.f32 1.442695, %v1353_v11  ;;  %v562_v20 = vmul.f32 1.442695, %v496_v12  ;;  %v3173_v21 = vadd.f32 %v2136_v17, %v3135_v49  ;;  %v1051_v22 = vpop.f32.mrb[5].mxu1 }
 0x102   :  { %2296 = vpow2.f32 %v564_v14  ;;  %v1418_v23 = vmul.f32 1.442695, %v1352_v15  ;;  %v499_v24 = vsub.f32 0.0, %v3170_v16  ;;  %v3177_v25 = vadd.f32 %v3130_v48, %v195_v18 }
 0x103   :  { %2298 = vpow2.f32 %v1420_v19  ;;  %v1355_v26 = vsub.f32 0.0, %v3173_v21  ;;  %v3181_v27 = vadd.f32 %v3135_v49, %v1051_v22  ;;  %v2011_v28 = vpop.f32.mrb[6].mxu0 }
 0x104   :  { %2300 = vpow2.f32 %v562_v20  ;;  %v568_v29 = vmul.f32 1.442695, %v499_v24  ;;  %v498_v30 = vsub.f32 0.0, %v3177_v25  ;;  %v3185_v31 = vadd.f32 %v2011_v28, %v3130_v48  ;;  %v2139_v32 = vpop.f32.mrb[6].mxu1  ;;  %v205_v33 = vpop.f32.mrb[7].mxu0 }
 0x105   :  { %2302 = vpow2.f32 %v1418_v23  ;;  %v1424_v34 = vmul.f32 1.442695, %v1355_v26  ;;  %v1354_v35 = vsub.f32 0.0, %v3181_v27  ;;  %v1061_v36 = vpop.f32.mrb[7].mxu1  ;;  %v3190_v43 = vadd.f32 %v2139_v32, %v3135_v49 }
 0x106   :  { %2304 = vpow2.f32 %v568_v29  ;;  %v566_v37 = vmul.f32 1.442695, %v498_v30  ;;  %v501_v38 = vsub.f32 0.0, %v3185_v31  ;;  %v3193_v50 = vadd.f32 %v3130_v48, %v205_v33 }
 0x107   :  { %2306 = vpow2.f32 %v1424_v34  ;;  %v1422_v39 = vmul.f32 1.442695, %v1354_v35  ;;  %v2014_v40 = vpop.f32.mrb[8].mxu0  ;;  %v3196_v57 = vadd.f32 %v3135_v49, %v1061_v36  ;;  %v1357_v2 = vsub.f32 0.0, %v3190_v43 }
 0x108   :  { %v2289_v41 = vpop.eup %2288  ;;  %2308 = vpow2.f32 %v566_v37  ;;  %v572_v42 = vmul.f32 1.442695, %v501_v38  ;;  %v2142_v44 = vpop.f32.mrb[8].mxu1  ;;  %v3199_v61 = vadd.f32 %v2014_v40, %v3130_v48  ;;  %v500_v9 = vsub.f32 0.0, %v3193_v50 }
 0x109   :  { %v215_v45 = vpop.f32.mrb[9].mxu0  ;;  %v2291_v46 = vpop.eup %2290  ;;  %v687_v47 = vadd.f32 1.0, %v2289_v41  ;;  %2310 = vpow2.f32 %v1422_v39  ;;  %v3204_v11 = vadd.f32 %v2142_v44, %v3135_v49  ;;  %v1356_v15 = vsub.f32 0.0, %v3196_v57 }
 0x10a   :  { %v1071_v52 = vpop.f32.mrb[9].mxu1  ;;  %v2293_v53 = vpop.eup %2292  ;;  %v1543_v56 = vadd.f32 1.0, %v2291_v46  ;;  %2312 = vpow2.f32 %v572_v42  ;;  %v503_v19 = vsub.f32 0.0, %v3199_v61  ;;  %v1428_v24 = vmul.f32 1.442695, %v1357_v2 }
 0x10b   :  { %v2295_v59 = vpop.eup %2294  ;;  %2314 = vrcp.f32 %v687_v47  ;;  %v686_v60 = vadd.f32 1.0, %v2293_v53  ;;  %v2017_v62 = vpop.f32.mrb[10].mxu0  ;;  %v3209_v26 = vadd.f32 %v3130_v48, %v215_v45  ;;  %v570_v33 = vmul.f32 1.442695, %v500_v9 }
 0x10c   :  { %v2297_v63 = vpop.eup %2296  ;;  %2316 = vrcp.f32 %v1543_v56  ;;  %v1542_v1 = vadd.f32 1.0, %v2295_v59  ;;  %v2145_v3 = vpop.f32.mrb[10].mxu1  ;;  %v1359_v34 = vsub.f32 0.0, %v3204_v11  ;;  %v1426_v38 = vmul.f32 1.442695, %v1356_v15 }
 0x10d   :  { %v225_v4 = vpop.f32.mrb[11].mxu0  ;;  %v2299_v7 = vpop.eup %2298  ;;  %2318 = vrcp.f32 %v686_v60  ;;  %v689_v8 = vadd.f32 1.0, %v2297_v63  ;;  %v3217_v39 = vadd.f32 %v3135_v49, %v1071_v52  ;;  %v576_v42 = vmul.f32 1.442695, %v503_v19 }
 0x10e   :  { %v1081_v12 = vpop.f32.mrb[11].mxu1  ;;  %v2301_v13 = vpop.eup %2300  ;;  %2320 = vrcp.f32 %v1542_v1  ;;  %v1545_v14 = vadd.f32 1.0, %v2299_v7  ;;  %v3220_v44 = vadd.f32 %v2017_v62, %v3130_v48  ;;  %v502_v53 = vsub.f32 0.0, %v3209_v26 }
 0x10f   :  { %v2303_v17 = vpop.eup %2302  ;;  %2322 = vrcp.f32 %v689_v8  ;;  %v688_v18 = vadd.f32 1.0, %v2301_v13  ;;  %v2020_v20 = vpop.f32.mrb[12].mxu0  ;;  %v3226_v56 = vadd.f32 %v2145_v3, %v3135_v49  ;;  %v1432_v1 = vmul.f32 1.442695, %v1359_v34 }
 0x110   :  { %v2305_v22 = vpop.eup %2304  ;;  %2324 = vrcp.f32 %v1545_v14  ;;  %v1544_v23 = vadd.f32 1.0, %v2303_v17  ;;  %v2148_v28 = vpop.f32.mrb[12].mxu1  ;;  %v3233_v62 = vadd.f32 %v3130_v48, %v225_v4  ;;  %v1358_v3 = vsub.f32 0.0, %v3217_v39 }
 0x111   :  { %v3211_v29 = vpop.f32.mrb[13].mxu0  ;;  %v2307_v30 = vpop.eup %2306  ;;  %2326 = vrcp.f32 %v688_v18  ;;  %v691_v32 = vadd.f32 1.0, %v2305_v22  ;;  %v3240_v9 = vadd.f32 %v3135_v49, %v1081_v12  ;;  %v505_v15 = vsub.f32 0.0, %v3220_v44 }
 0x112   :  { %v3214_v35 = vpop.f32.mrb[13].mxu1  ;;  %v2309_v36 = vpop.eup %2308  ;;  %2328 = vrcp.f32 %v1544_v23  ;;  %v1547_v37 = vadd.f32 1.0, %v2307_v30  ;;  %v3245_v4 = vadd.f32 %v2020_v20, %v3130_v48  ;;  %v1361_v12 = vsub.f32 0.0, %v3226_v56 }
 0x113   :  { %v2311_v40 = vpop.eup %2310  ;;  %2330 = vrcp.f32 %v691_v32  ;;  %v690_v41 = vadd.f32 1.0, %v2309_v36  ;;  %v3222_v45 = vpop.f32.mrb[14].mxu0  ;;  %v574_v30 = vmul.f32 1.442695, %v502_v53  ;;  %v1430_v34 = vmul.f32 1.442695, %v1358_v3 }
 0x114   :  { %v2313_v46 = vpop.eup %2312  ;;  %2332 = vrcp.f32 %v1547_v37  ;;  %v1546_v47 = vadd.f32 1.0, %v2311_v40  ;;  %v3228_v59 = vpop.f32.mrb[14].mxu1  ;;  %v1360_v36 = vsub.f32 0.0, %v3240_v9  ;;  %v507_v40 = vsub.f32 0.0, %v3245_v4 }
 0x115   :  { %v3230_v52 = vpop.f32.mrb[15].mxu0  ;;  %v2315_v60 = vpop.eup %2314  ;;  %2334 = vrcp.f32 %v690_v41  ;;  %v693_v63 = vadd.f32 1.0, %v2313_v46 }
 0x116   :  { %v3235_v2 = vpop.f32.mrb[15].mxu1  ;;  %v2317_v7 = vpop.eup %2316  ;;  %v753_v8 = vmul.f32 %v2315_v60, %v3138_v51  ;;  %2336 = vrcp.f32 %v1546_v47 }
 0x117   :  { %v2319_v13 = vpop.eup %2318  ;;  %v1609_v14 = vmul.f32 %v2317_v7, %v3141_v54  ;;  %2338 = vrcp.f32 %v693_v63  ;;  %v3247_v17 = vpop.f32.mrb[16].mxu0  ;;  %v3255_v54 = vadd.f32 %v2148_v28, %v3135_v49 }
 0x118   :  { %v2321_v18 = vpop.eup %2320  ;;  %879 = vst [vmem:[%s4492_s5 + $0x8] sm:$0xff] %v753_v8  ;;  %v751_v51 = vmul.f32 %v2319_v13, %v3144_v55  ;;  %2340 = vpow2.f32 %v1428_v24  ;;  %v3257_v19 = vpop.f32.mrb[16].mxu1  ;;  %v504_v55 = vsub.f32 0.0, %v3233_v62  ;;  %v1434_v8 = vmul.f32 1.442695, %v1360_v36 }
 0x119   :  { %v3259_v22 = vpop.f32.mrb[17].mxu0  ;;  %v2323_v20 = vpop.eup %2322  ;;  %1735 = vst [vmem:[%s4493_s6 + $0x8] sm:$0xff] %v1609_v14  ;;  %v1607_v23 = vmul.f32 %v2321_v18, %v3148_v58  ;;  %2342 = vpow2.f32 %v570_v33  ;;  %v580_v33 = vmul.f32 1.442695, %v505_v15  ;;  %v1363_v47 = vsub.f32 0.0, %v3255_v54 }
 0x11a   :  { %v3266_v24 = vpop.f32.mrb[17].mxu1  ;;  %v2325_v32 = vpop.eup %2324  ;;  %878 = vst [vmem:[%s4492_s5] sm:$0xff] %v751_v51  ;;  %v757_v28 = vmul.f32 %v2323_v20, %v3154_v0  ;;  %2344 = vpow2.f32 %v1426_v38  ;;  %v1436_v38 = vmul.f32 1.442695, %v1361_v12  ;;  %v578_v63 = vmul.f32 1.442695, %v504_v55 }
 0x11b   :  { %v2327_v37 = vpop.eup %2326  ;;  %1734 = vst [vmem:[%s4493_s6] sm:$0xff] %v1607_v23  ;;  %v1613_v58 = vmul.f32 %v2325_v32, %v3157_v5  ;;  %2346 = vpow2.f32 %v576_v42  ;;  %v3278_v41 = vpop.f32.mrb[18].mxu0  ;;  %v584_v13 = vmul.f32 1.442695, %v507_v40  ;;  %v1440_v18 = vmul.f32 1.442695, %v1363_v47 }
 0x11c   :  { %v2329_v46 = vpop.eup %2328  ;;  %881 = vst [vmem:[%s4492_s5 + $0x18] sm:$0xff] %v757_v28  ;;  %v755_v0 = vmul.f32 %v2327_v37, %v3160_v6  ;;  %2348 = vpow2.f32 %v1432_v1  ;;  %v3285_v53 = vpop.f32.mrb[18].mxu1  ;;  %v3325_v55 = vadd.f32 %v3130_v48, %v3211_v29  ;;  %v3332_v28 = vadd.f32 %v3135_v49, %v3214_v35 }
 0x11d   :  { %v3287_v5 = vpop.f32.mrb[19].mxu0  ;;  %v2331_v42 = vpop.eup %2330  ;;  %1737 = vst [vmem:[%s4493_s6 + $0x18] sm:$0xff] %v1613_v58  ;;  %v1611_v60 = vmul.f32 %v2329_v46, %v3164_v10  ;;  %2350 = vpow2.f32 %v574_v30  ;;  %v3341_v29 = vadd.f32 %v3222_v45, %v3130_v48  ;;  %v3349_v40 = vadd.f32 %v3228_v59, %v3135_v49 }
 0x11e   :  { %v3293_v7 = vpop.f32.mrb[19].mxu1  ;;  %v2333_v6 = vpop.eup %2332  ;;  %880 = vst [vmem:[%s4492_s5 + $0x10] sm:$0xff] %v755_v0  ;;  %v761_v1 = vmul.f32 %v2331_v42, %v3170_v16  ;;  %2352 = vpow2.f32 %v1430_v34  ;;  %v506_v47 = vsub.f32 0.0, %v3325_v55 }
 0x11f   :  { %v2335_v3 = vpop.eup %2334  ;;  %1736 = vst [vmem:[%s4493_s6 + $0x10] sm:$0xff] %v1611_v60  ;;  %v1617_v10 = vmul.f32 %v2333_v6, %v3173_v21  ;;  %2354 = vpow2.f32 %v580_v33  ;;  %v3303_v14 = vpop.f32.mrb[20].mxu0  ;;  %v1362_v60 = vsub.f32 0.0, %v3332_v28 }
 0x120   :  { %v2337_v15 = vpop.eup %2336  ;;  %883 = vst [vmem:[%s4492_s5 + $0x28] sm:$0xff] %v761_v1  ;;  %v759_v16 = vmul.f32 %v2335_v3, %v3177_v25  ;;  %2356 = vpow2.f32 %v1436_v38  ;;  %v3309_v51 = vpop.f32.mrb[20].mxu1 }
 0x121   :  { %v3311_v12 = vpop.f32.mrb[21].mxu0  ;;  %v2339_v20 = vpop.eup %2338  ;;  %1739 = vst [vmem:[%s4493_s6 + $0x28] sm:$0xff] %v1617_v10  ;;  %v1615_v21 = vmul.f32 %v2337_v15, %v3181_v27  ;;  %2358 = vpow2.f32 %v578_v63  ;;  %v3357_v63 = vadd.f32 %v3130_v48, %v3230_v52 }
 0x122   :  { %v3317_v23 = vpop.f32.mrb[21].mxu1  ;;  %v2341_v30 = vpop.eup %2340  ;;  %882 = vst [vmem:[%s4492_s5 + $0x20] sm:$0xff] %v759_v16  ;;  %v765_v25 = vmul.f32 %v2339_v20, %v3185_v31  ;;  %2360 = vpow2.f32 %v1434_v8  ;;  %v509_v8 = vsub.f32 0.0, %v3341_v29  ;;  %v1365_v16 = vsub.f32 0.0, %v3349_v40 }
 0x123   :  { %v2343_v32 = vpop.eup %2342  ;;  %1738 = vst [vmem:[%s4493_s6 + $0x20] sm:$0xff] %v1615_v21  ;;  %v1549_v27 = vadd.f32 1.0, %v2341_v30  ;;  %2362 = vpow2.f32 %v584_v13  ;;  %v3334_v34 = vpop.f32.mrb[22].mxu0  ;;  %v582_v21 = vmul.f32 1.442695, %v506_v47  ;;  %v3371_v30 = vadd.f32 %v3135_v49, %v3235_v2 }
 0x124   :  { %v2345_v36 = vpop.eup %2344  ;;  %885 = vst [vmem:[%s4492_s5 + $0x38] sm:$0xff] %v765_v25  ;;  %v692_v31 = vadd.f32 1.0, %v2343_v32  ;;  %2364 = vpow2.f32 %v1440_v18  ;;  %v3343_v37 = vpop.f32.mrb[22].mxu1 }
 0x125   :  { %v3345_v58 = vpop.f32.mrb[23].mxu0  ;;  %v2347_v33 = vpop.eup %2346  ;;  %2366 = vrcp.f32 %v1549_v27  ;;  %v1548_v35 = vadd.f32 1.0, %v2345_v36  ;;  %v1438_v27 = vmul.f32 1.442695, %v1362_v60  ;;  %v508_v36 = vsub.f32 0.0, %v3357_v63 }
 0x126   :  { %v3351_v46 = vpop.f32.mrb[23].mxu1  ;;  %v2349_v0 = vpop.eup %2348  ;;  %2368 = vrcp.f32 %v692_v31  ;;  %v695_v38 = vadd.f32 1.0, %v2347_v33  ;;  %v1444_v60 = vmul.f32 1.442695, %v1365_v16  ;;  %v3397_v16 = vadd.f32 %v3135_v49, %v3266_v24 }
 0x127   :  { %v2351_v45 = vpop.eup %2350  ;;  %2370 = vrcp.f32 %v1548_v35  ;;  %v1551_v42 = vadd.f32 1.0, %v2349_v0  ;;  %v3359_v6 = vpop.f32.mrb[24].mxu0  ;;  %v588_v0 = vmul.f32 1.442695, %v509_v8 }
 0x128   :  { %v2353_v59 = vpop.eup %2352  ;;  %2372 = vrcp.f32 %v695_v38  ;;  %v694_v1 = vadd.f32 1.0, %v2351_v45  ;;  %v3362_v3 = vpop.f32.mrb[24].mxu1  ;;  %v3378_v38 = vadd.f32 %v3247_v17, %v3130_v48  ;;  %v1364_v17 = vsub.f32 0.0, %v3371_v30 }
 0x129   :  { %v3364_v10 = vpop.f32.mrb[25].mxu0  ;;  %v2355_v13 = vpop.eup %2354  ;;  %2374 = vrcp.f32 %v1551_v42  ;;  %v1550_v15 = vadd.f32 1.0, %v2353_v59  ;;  %v3386_v59 = vadd.f32 %v3257_v19, %v3135_v49 }
 0x12a   :  { %v3367_v18 = vpop.f32.mrb[25].mxu1  ;;  %v2357_v52 = vpop.eup %2356  ;;  %2376 = vrcp.f32 %v694_v1  ;;  %v697_v20 = vadd.f32 1.0, %v2355_v13 }
 0x12b   :  { %v2359_v25 = vpop.eup %2358  ;;  %2378 = vrcp.f32 %v1550_v15  ;;  %v1553_v32 = vadd.f32 1.0, %v2357_v52  ;;  %v3374_v31 = vpop.f32.mrb[26].mxu0  ;;  %v3393_v15 = vadd.f32 %v3130_v48, %v3259_v22  ;;  %v3405_v22 = vadd.f32 %v3278_v41, %v3130_v48 }
 0x12c   :  { %v2361_v33 = vpop.eup %2360  ;;  %2380 = vrcp.f32 %v697_v20  ;;  %v696_v35 = vadd.f32 1.0, %v2359_v25  ;;  %v3380_v47 = vpop.f32.mrb[26].mxu1  ;;  %v586_v25 = vmul.f32 1.442695, %v508_v36 }
 0x12d   :  { %v3382_v2 = vpop.f32.mrb[27].mxu0  ;;  %v2363_v45 = vpop.eup %2362  ;;  %2382 = vrcp.f32 %v1553_v32  ;;  %v1552_v42 = vadd.f32 1.0, %v2361_v33 }
 0x12e   :  { %v3388_v1 = vpop.f32.mrb[27].mxu1  ;;  %v2365_v13 = vpop.eup %2364  ;;  %2384 = vrcp.f32 %v696_v35  ;;  %v699_v8 = vadd.f32 1.0, %v2363_v45  ;;  %v511_v35 = vsub.f32 0.0, %v3378_v38 }
 0x12f   :  { %v2367_v52 = vpop.eup %2366  ;;  %2386 = vrcp.f32 %v1552_v42  ;;  %v1555_v20 = vadd.f32 1.0, %v2365_v13  ;;  %v3399_v19 = vpop.f32.mrb[28].mxu0  ;;  %v1367_v13 = vsub.f32 0.0, %v3386_v59 }
 0x130   :  { %v2369_v32 = vpop.eup %2368  ;;  %v1621_v33 = vmul.f32 %v2367_v52, %v3190_v43  ;;  %2388 = vrcp.f32 %v699_v8  ;;  %v3407_v45 = vpop.f32.mrb[28].mxu1  ;;  %v3415_v43 = vadd.f32 %v3285_v53, %v3135_v49 }
 0x131   :  { %v3409_v42 = vpop.f32.mrb[29].mxu0  ;;  %v2371_v36 = vpop.eup %2370  ;;  %v763_v24 = vmul.f32 %v2369_v32, %v3193_v50  ;;  %2390 = vrcp.f32 %v1555_v20  ;;  %v3426_v50 = vadd.f32 %v3130_v48, %v3287_v5  ;;  %v1442_v32 = vmul.f32 1.442695, %v1364_v17 }
 0x132   :  { %4494 = vst [vmem:[#allocation2_spill] sm:$0xff] %v3409_v42  ;;  %v3417_v8 = vpop.f32.mrb[29].mxu1  ;;  %v2373_v52 = vpop.eup %2372  ;;  %1741 = vst [vmem:[%s4493_s6 + $0x38] sm:$0xff] %v1621_v33  ;;  %v1619_v41 = vmul.f32 %v2371_v36, %v3196_v57  ;;  %2392 = vpow2.f32 %v582_v21  ;;  %v510_v42 = vsub.f32 0.0, %v3393_v15  ;;  %v1366_v33 = vsub.f32 0.0, %v3397_v16 }
 0x133   :  { %4495 = vst [vmem:[#allocation3_spill] sm:$0xff] %v3417_v8  ;;  %v2375_v20 = vpop.eup %2374  ;;  %884 = vst [vmem:[%s4492_s5 + $0x30] sm:$0xff] %v763_v24  ;;  %v769_v53 = vmul.f32 %v2373_v52, %v3199_v61  ;;  %2394 = vpow2.f32 %v1438_v27  ;;  %v3433_v8 = vpop.f32.mrb[30].mxu0  ;;  %v592_v21 = vmul.f32 1.442695, %v511_v35  ;;  %v513_v36 = vsub.f32 0.0, %v3405_v22 }
 0x134   :  { %v2377_v57 = vpop.eup %2376  ;;  %1740 = vst [vmem:[%s4493_s6 + $0x30] sm:$0xff] %v1619_v41  ;;  %v1625_v5 = vmul.f32 %v2375_v20, %v3204_v11  ;;  %2396 = vpow2.f32 %v588_v0  ;;  %v3440_v24 = vpop.f32.mrb[30].mxu1  ;;  %v1448_v52 = vmul.f32 1.442695, %v1367_v13  ;;  %v1369_v41 = vsub.f32 0.0, %v3415_v43 }
 0x135   :  { %v3442_v61 = vpop.f32.mrb[31].mxu0  ;;  %v2379_v27 = vpop.eup %2378  ;;  %887 = vst [vmem:[%s4492_s5 + $0x48] sm:$0xff] %v769_v53  ;;  %v767_v17 = vmul.f32 %v2377_v57, %v3209_v26  ;;  %2398 = vpow2.f32 %v1444_v60  ;;  %v590_v20 = vmul.f32 1.442695, %v510_v42  ;;  %v1446_v60 = vmul.f32 1.442695, %v1366_v33 }
 0x136   :  { %4496 = vst [vmem:[#allocation4_spill] sm:$0xff] %v3442_v61  ;;  %v3449_v11 = vpop.f32.mrb[31].mxu1  ;;  %v2381_v0 = vpop.eup %2380  ;;  %1743 = vst [vmem:[%s4493_s6 + $0x48] sm:$0xff] %v1625_v5  ;;  %v1623_v35 = vmul.f32 %v2379_v27, %v3217_v39  ;;  %2400 = vpow2.f32 %v586_v25  ;;  %v512_v61 = vsub.f32 0.0, %v3426_v50  ;;  %v596_v25 = vmul.f32 1.442695, %v513_v36 }
 0x137   :  { %v2383_v53 = vpop.eup %2382  ;;  %886 = vst [vmem:[%s4492_s5 + $0x40] sm:$0xff] %v767_v17  ;;  %v773_v26 = vmul.f32 %v2381_v0, %v3220_v44  ;;  %2402 = vpow2.f32 %v1442_v32  ;;  %v3460_v13 = vpop.f32.mrb[32].mxu0  ;;  %v1452_v32 = vmul.f32 1.442695, %v1369_v41 }
 0x138   :  { %v2385_v57 = vpop.eup %2384  ;;  %1742 = vst [vmem:[%s4493_s6 + $0x40] sm:$0xff] %v1623_v35  ;;  %v1629_v39 = vmul.f32 %v2383_v53, %v3226_v56  ;;  %2404 = vpow2.f32 %v592_v21  ;;  %v3466_v42 = vpop.f32.mrb[32].mxu1  ;;  %v594_v21 = vmul.f32 1.442695, %v512_v61  ;;  %v3503_v53 = vadd.f32 %v3303_v14, %v3130_v48 }
 0x139   :  { %v3468_v5 = vpop.f32.mrb[33].mxu0  ;;  %v2387_v27 = vpop.eup %2386  ;;  %889 = vst [vmem:[%s4492_s5 + $0x58] sm:$0xff] %v773_v26  ;;  %v771_v44 = vmul.f32 %v2385_v57, %v3233_v62  ;;  %2406 = vpow2.f32 %v1448_v52  ;;  %v3516_v14 = vadd.f32 %v3130_v48, %v3311_v12  ;;  %v3528_v12 = vadd.f32 %v3135_v49, %v3317_v23 }
 0x13a   :  { %v3474_v33 = vpop.f32.mrb[33].mxu1  ;;  %v2389_v17 = vpop.eup %2388  ;;  %1745 = vst [vmem:[%s4493_s6 + $0x58] sm:$0xff] %v1629_v39  ;;  %v1627_v56 = vmul.f32 %v2387_v27, %v3240_v9  ;;  %2408 = vpow2.f32 %v590_v20  ;;  %v3492_v9 = vadd.f32 %v3135_v49, %v3293_v7  ;;  %v3538_v23 = vadd.f32 %v3334_v34, %v3130_v48 }
 0x13b   :  { %v2391_v36 = vpop.eup %2390  ;;  %888 = vst [vmem:[%s4492_s5 + $0x50] sm:$0xff] %v771_v44  ;;  %v777_v62 = vmul.f32 %v2389_v17, %v3245_v4  ;;  %2410 = vpow2.f32 %v1446_v60  ;;  %v3484_v52 = vpop.f32.mrb[34].mxu0  ;;  %v3512_v60 = vadd.f32 %v3309_v51, %v3135_v49  ;;  %v3549_v34 = vadd.f32 %v3343_v37, %v3135_v49 }
 0x13c   :  { %v2393_v41 = vpop.eup %2392  ;;  %1744 = vst [vmem:[%s4493_s6 + $0x50] sm:$0xff] %v1627_v56  ;;  %v1633_v0 = vmul.f32 %v2391_v36, %v3255_v54  ;;  %2412 = vpow2.f32 %v596_v25  ;;  %v3494_v61 = vpop.f32.mrb[34].mxu1  ;;  %v515_v36 = vsub.f32 0.0, %v3503_v53 }
 0x13d   :  { %v3496_v35 = vpop.f32.mrb[35].mxu0  ;;  %v2395_v4 = vpop.eup %2394  ;;  %891 = vst [vmem:[%s4492_s5 + $0x68] sm:$0xff] %v777_v62  ;;  %v698_v20 = vadd.f32 1.0, %v2393_v41  ;;  %2414 = vpow2.f32 %v1452_v32  ;;  %v1368_v32 = vsub.f32 0.0, %v3492_v9 }
 0x13e   :  { %v3505_v54 = vpop.f32.mrb[35].mxu1  ;;  %v2397_v26 = vpop.eup %2396  ;;  %1747 = vst [vmem:[%s4493_s6 + $0x68] sm:$0xff] %v1633_v0  ;;  %v1554_v7 = vadd.f32 1.0, %v2395_v4  ;;  %2416 = vpow2.f32 %v594_v21  ;;  %v1371_v4 = vsub.f32 0.0, %v3512_v60 }
 0x13f   :  { %v2399_v57 = vpop.eup %2398  ;;  %2418 = vrcp.f32 %v698_v20  ;;  %v701_v39 = vadd.f32 1.0, %v2397_v26  ;;  %v3518_v25 = vpop.f32.mrb[36].mxu0 }
 0x140   :  { %4497 = vst [vmem:[#allocation5_spill] sm:$0xff] %v3518_v25  ;;  %v2401_v27 = vpop.eup %2400  ;;  %2420 = vrcp.f32 %v1554_v7  ;;  %v1557_v44 = vadd.f32 1.0, %v2399_v57  ;;  %v3521_v17 = vpop.f32.mrb[36].mxu1  ;;  %v514_v7 = vsub.f32 0.0, %v3516_v14 }
 0x141   :  { %4498 = vst [vmem:[#allocation6_spill] sm:$0xff] %v3521_v17  ;;  %v3523_v56 = vpop.f32.mrb[37].mxu0  ;;  %v2403_v51 = vpop.eup %2402  ;;  %2422 = vrcp.f32 %v701_v39  ;;  %v700_v21 = vadd.f32 1.0, %v2401_v27  ;;  %v1370_v17 = vsub.f32 0.0, %v3528_v12 }
 0x142   :  { %4499 = vst [vmem:[#allocation7_spill] sm:$0xff] %v3523_v56  ;;  %v3530_v62 = vpop.f32.mrb[37].mxu1  ;;  %v2405_v41 = vpop.eup %2404  ;;  %2424 = vrcp.f32 %v1557_v44  ;;  %v1556_v0 = vadd.f32 1.0, %v2403_v51  ;;  %v1450_v56 = vmul.f32 1.442695, %v1368_v32 }
 0x143   :  { %4500 = vst [vmem:[#allocation8_spill] sm:$0xff] %v3530_v62  ;;  %v2407_v20 = vpop.eup %2406  ;;  %2426 = vrcp.f32 %v700_v21  ;;  %v703_v26 = vadd.f32 1.0, %v2405_v41  ;;  %v3534_v57 = vpop.f32.mrb[38].mxu0  ;;  %v600_v41 = vmul.f32 1.442695, %v515_v36 }
 0x144   :  { %4501 = vst [vmem:[#allocation9_spill] sm:$0xff] %v3534_v57  ;;  %v2409_v39 = vpop.eup %2408  ;;  %2428 = vrcp.f32 %v1556_v0  ;;  %v1559_v27 = vadd.f32 1.0, %v2407_v20  ;;  %v3540_v62 = vpop.f32.mrb[38].mxu1  ;;  %v1456_v32 = vmul.f32 1.442695, %v1371_v4  ;;  %v3560_v4 = vadd.f32 %v3135_v49, %v3351_v46 }
 0x145   :  { %4502 = vst [vmem:[#allocation10_spill] sm:$0xff] %v3540_v62  ;;  %v3542_v44 = vpop.f32.mrb[39].mxu0  ;;  %v2411_v51 = vpop.eup %2410  ;;  %2430 = vrcp.f32 %v703_v26  ;;  %v702_v21 = vadd.f32 1.0, %v2409_v39  ;;  %v3553_v26 = vadd.f32 %v3130_v48, %v3345_v58  ;;  %v1454_v58 = vmul.f32 1.442695, %v1370_v17 }
 0x146   :  { %4503 = vst [vmem:[#allocation11_spill] sm:$0xff] %v3542_v44  ;;  %v3545_v25 = vpop.f32.mrb[39].mxu1  ;;  %v2413_v57 = vpop.eup %2412  ;;  %2432 = vrcp.f32 %v1559_v27  ;;  %v1558_v0 = vadd.f32 1.0, %v2411_v51  ;;  %v598_v44 = vmul.f32 1.442695, %v514_v7  ;;  %v517_v27 = vsub.f32 0.0, %v3538_v23 }
 0x147   :  { %4504 = vst [vmem:[#allocation12_spill] sm:$0xff] %v3545_v25  ;;  %v2415_v20 = vpop.eup %2414  ;;  %2434 = vrcp.f32 %v702_v21  ;;  %v705_v62 = vadd.f32 1.0, %v2413_v57  ;;  %v3555_v36 = vpop.f32.mrb[40].mxu0  ;;  %v3568_v21 = vadd.f32 %v3359_v6, %v3130_v48  ;;  %v1373_v46 = vsub.f32 0.0, %v3549_v34 }
 0x148   :  { %4505 = vst [vmem:[#allocation13_spill] sm:$0xff] %v3555_v36  ;;  %v2417_v39 = vpop.eup %2416  ;;  %2436 = vrcp.f32 %v1558_v0  ;;  %v1561_v25 = vadd.f32 1.0, %v2415_v20  ;;  %v3562_v37 = vpop.f32.mrb[40].mxu1  ;;  %v516_v17 = vsub.f32 0.0, %v3553_v26  ;;  %v3582_v6 = vadd.f32 %v3130_v48, %v3364_v10 }
 0x149   :  { %4506 = vst [vmem:[#allocation14_spill] sm:$0xff] %v3562_v37  ;;  %v3564_v51 = vpop.f32.mrb[41].mxu0  ;;  %v2419_v7 = vpop.eup %2418  ;;  %2438 = vrcp.f32 %v705_v62  ;;  %v704_v57 = vadd.f32 1.0, %v2417_v39  ;;  %v3576_v37 = vadd.f32 %v3362_v3, %v3135_v49 }
 0x14a   :  { %4507 = vst [vmem:[#allocation15_spill] sm:$0xff] %v3564_v51  ;;  %v3570_v0 = vpop.f32.mrb[41].mxu1  ;;  %v2421_v20 = vpop.eup %2420  ;;  %v775_v36 = vmul.f32 %v2419_v7, %v3325_v55  ;;  %2440 = vrcp.f32 %v1561_v25  ;;  %v1372_v25 = vsub.f32 0.0, %v3560_v4 }
 0x14b   :  { %v2423_v51 = vpop.eup %2422  ;;  %v1631_v62 = vmul.f32 %v2421_v20, %v3332_v28  ;;  %2442 = vrcp.f32 %v704_v57  ;;  %v3584_v39 = vpop.f32.mrb[42].mxu0  ;;  %v3593_v28 = vadd.f32 %v3135_v49, %v3367_v18  ;;  %v1460_v18 = vmul.f32 1.442695, %v1373_v46 }
 0x14c   :  { %v2425_v55 = vpop.eup %2424  ;;  %890 = vst [vmem:[%s4492_s5 + $0x60] sm:$0xff] %v775_v36  ;;  %v781_v3 = vmul.f32 %v2423_v51, %v3341_v29  ;;  %2444 = vpow2.f32 %v1450_v56  ;;  %v3595_v7 = vpop.f32.mrb[42].mxu1  ;;  %v604_v29 = vmul.f32 1.442695, %v517_v27  ;;  %v519_v56 = vsub.f32 0.0, %v3568_v21 }
 0x14d   :  { %v3597_v48 = vpop.f32.mrb[43].mxu0  ;;  %v2427_v10 = vpop.eup %2426  ;;  %1746 = vst [vmem:[%s4493_s6 + $0x60] sm:$0xff] %v1631_v62  ;;  %v1637_v36 = vmul.f32 %v2425_v55, %v3349_v40  ;;  %2446 = vpow2.f32 %v600_v41  ;;  %v1375_v20 = vsub.f32 0.0, %v3576_v37  ;;  %v602_v41 = vmul.f32 1.442695, %v516_v17 }
 0x14e   :  { %v3604_v51 = vpop.f32.mrb[43].mxu1  ;;  %v2429_v57 = vpop.eup %2428  ;;  %893 = vst [vmem:[%s4492_s5 + $0x78] sm:$0xff] %v781_v3  ;;  %v779_v49 = vmul.f32 %v2427_v10, %v3357_v63  ;;  %2448 = vpow2.f32 %v1456_v32  ;;  %v518_v27 = vsub.f32 0.0, %v3582_v6  ;;  %v1458_v32 = vmul.f32 1.442695, %v1372_v25 }
 0x14f   :  { %v2431_v62 = vpop.eup %2430  ;;  %1749 = vst [vmem:[%s4493_s6 + $0x78] sm:$0xff] %v1637_v36  ;;  %v1635_v40 = vmul.f32 %v2429_v57, %v3371_v30  ;;  %2450 = vpow2.f32 %v598_v44  ;;  %v3616_v55 = vpop.f32.mrb[44].mxu0  ;;  %v1374_v46 = vsub.f32 0.0, %v3593_v28  ;;  %v608_v36 = vmul.f32 1.442695, %v519_v56 }
 0x150   :  { %v2433_v3 = vpop.eup %2432  ;;  %892 = vst [vmem:[%s4492_s5 + $0x70] sm:$0xff] %v779_v49  ;;  %v785_v63 = vmul.f32 %v2431_v62, %v3378_v38  ;;  %2452 = vpow2.f32 %v1454_v58  ;;  %v3623_v10 = vpop.f32.mrb[44].mxu1  ;;  %v1464_v25 = vmul.f32 1.442695, %v1375_v20 }
 0x151   :  { %v3625_v30 = vpop.f32.mrb[45].mxu0  ;;  %v2435_v44 = vpop.eup %2434  ;;  %1748 = vst [vmem:[%s4493_s6 + $0x70] sm:$0xff] %v1635_v40  ;;  %v1641_v17 = vmul.f32 %v2433_v3, %v3386_v59  ;;  %2454 = vpow2.f32 %v604_v29  ;;  %v606_v29 = vmul.f32 1.442695, %v518_v27 }
 0x152   :  { %v3631_v57 = vpop.f32.mrb[45].mxu1  ;;  %v2437_v38 = vpop.eup %2436  ;;  %895 = vst [vmem:[%s4492_s5 + $0x88] sm:$0xff] %v785_v63  ;;  %v783_v58 = vmul.f32 %v2435_v44, %v3393_v15  ;;  %2456 = vpow2.f32 %v1460_v18  ;;  %v1462_v18 = vmul.f32 1.442695, %v1374_v46  ;;  %v3664_v63 = vld [vmem:[%s4490_s2] ss:$0 sm:$0xff] }
 0x153   :  { %v2439_v49 = vpop.eup %2438  ;;  %1751 = vst [vmem:[%s4493_s6 + $0x88] sm:$0xff] %v1641_v17  ;;  %v1639_v59 = vmul.f32 %v2437_v38, %v3397_v16  ;;  %2458 = vpow2.f32 %v602_v41  ;;  %v3641_v56 = vpop.f32.mrb[46].mxu0  ;;  %v3689_v38 = vadd.f32 %v3664_v63, %v3382_v2  ;;  %v3704_v2 = vadd.f32 %v3664_v63, %v3399_v19 }
 0x154   :  { %v2441_v62 = vpop.eup %2440  ;;  %894 = vst [vmem:[%s4492_s5 + $0x80] sm:$0xff] %v783_v58  ;;  %v789_v15 = vmul.f32 %v2439_v49, %v3405_v22  ;;  %2460 = vpow2.f32 %v1458_v32  ;;  %v3647_v20 = vpop.f32.mrb[46].mxu1  ;;  %v3668_v32 = vadd.f32 %v3664_v63, %v3374_v31 }
 0x155   :  { %v3649_v40 = vpop.f32.mrb[47].mxu0  ;;  %v2443_v3 = vpop.eup %2442  ;;  %1750 = vst [vmem:[%s4493_s6 + $0x80] sm:$0xff] %v1639_v59  ;;  %v1645_v16 = vmul.f32 %v2441_v62, %v3415_v43  ;;  %2462 = vpow2.f32 %v608_v36 }
 0x156   :  { %4508 = vst [vmem:[#allocation16_spill] sm:$0xff] %v3649_v40  ;;  %v3655_v41 = vpop.f32.mrb[47].mxu1  ;;  %v2445_v27 = vpop.eup %2444  ;;  %897 = vst [vmem:[%s4492_s5 + $0x98] sm:$0xff] %v789_v15  ;;  %v787_v22 = vmul.f32 %v2443_v3, %v3426_v50  ;;  %2464 = vpow2.f32 %v1464_v25  ;;  %v3676_v50 = vld [vmem:[%s4491_s4] ss:$0 sm:$0xff] }
 0x157   :  { %4509 = vst [vmem:[#allocation17_spill] sm:$0xff] %v3655_v41  ;;  %v2447_v43 = vpop.eup %2446  ;;  %1753 = vst [vmem:[%s4493_s6 + $0x98] sm:$0xff] %v1645_v16  ;;  %v1560_v46 = vadd.f32 1.0, %v2445_v27  ;;  %2466 = vpow2.f32 %v606_v29  ;;  %v3680_v44 = vadd.f32 %v3676_v50, %v3380_v47  ;;  %v3682_v17 = vpop.f32.mrb[48].mxu0  ;;  %v3697_v59 = vadd.f32 %v3676_v50, %v3388_v1  ;;  %v4519_v41 = vld [vmem:[#allocation2_spill] sm:$0xff] }
 0x158   :  { %4510 = vst [vmem:[#allocation18_spill] sm:$0xff] %v3682_v17  ;;  %v2449_v31 = vpop.eup %2448  ;;  %896 = vst [vmem:[%s4492_s5 + $0x90] sm:$0xff] %v787_v22  ;;  %v707_v36 = vadd.f32 1.0, %v2447_v43  ;;  %2468 = vpow2.f32 %v1462_v18  ;;  %v3691_v58 = vpop.f32.mrb[48].mxu1  ;;  %v521_v18 = vsub.f32 0.0, %v3668_v32 }
 0x159   :  { %4511 = vst [vmem:[#allocation19_spill] sm:$0xff] %v3691_v58  ;;  %v3693_v25 = vpop.f32.mrb[49].mxu0  ;;  %v2451_v49 = vpop.eup %2450  ;;  %2470 = vrcp.f32 %v1560_v46  ;;  %v1563_v47 = vadd.f32 1.0, %v2449_v31  ;;  %v1377_v27 = vsub.f32 0.0, %v3680_v44  ;;  %v520_v46 = vsub.f32 0.0, %v3689_v38 }
 0x15a   :  { %4512 = vst [vmem:[#allocation20_spill] sm:$0xff] %v3693_v25  ;;  %v3699_v29 = vpop.f32.mrb[49].mxu1  ;;  %v2453_v62 = vpop.eup %2452  ;;  %2472 = vrcp.f32 %v707_v36  ;;  %v706_v15 = vadd.f32 1.0, %v2451_v49 }
 0x15b   :  { %4513 = vst [vmem:[#allocation21_spill] sm:$0xff] %v3699_v29  ;;  %v2455_v3 = vpop.eup %2454  ;;  %2474 = vrcp.f32 %v1563_v47  ;;  %v1562_v16 = vadd.f32 1.0, %v2453_v62  ;;  %v3707_v22 = vpop.f32.mrb[50].mxu0  ;;  %v1376_v29 = vsub.f32 0.0, %v3697_v59  ;;  %v1468_v17 = vmul.f32 1.442695, %v1377_v27 }
 0x15c   :  { %4514 = vst [vmem:[#allocation22_spill] sm:$0xff] %v3707_v22  ;;  %v2457_v1 = vpop.eup %2456  ;;  %2476 = vrcp.f32 %v706_v15  ;;  %v709_v43 = vadd.f32 1.0, %v2455_v3  ;;  %v3710_v31 = vpop.f32.mrb[50].mxu1  ;;  %v612_v22 = vmul.f32 1.442695, %v521_v18  ;;  %v523_v15 = vsub.f32 0.0, %v3704_v2 }
 0x15d   :  { %4515 = vst [vmem:[#allocation23_spill] sm:$0xff] %v3710_v31  ;;  %v3712_v36 = vpop.f32.mrb[51].mxu0  ;;  %v2459_v49 = vpop.eup %2458  ;;  %2478 = vrcp.f32 %v1562_v16  ;;  %v1565_v19 = vadd.f32 1.0, %v2457_v1 }
 0x15e   :  { %4516 = vst [vmem:[#allocation24_spill] sm:$0xff] %v3712_v36  ;;  %v3715_v47 = vpop.f32.mrb[51].mxu1  ;;  %v2461_v62 = vpop.eup %2460  ;;  %2480 = vrcp.f32 %v709_v43  ;;  %v708_v25 = vadd.f32 1.0, %v2459_v49  ;;  %v3720_v36 = vadd.f32 %v3676_v50, %v3407_v45  ;;  %v3726_v43 = vadd.f32 %v3664_v63, %v4519_v41  ;;  %v4522_v45 = vld [vmem:[#allocation3_spill] sm:$0xff] }
 0x15f   :  { %4517 = vst [vmem:[#allocation25_spill] sm:$0xff] %v3715_v47  ;;  %v2463_v3 = vpop.eup %2462  ;;  %2482 = vrcp.f32 %v1565_v19  ;;  %v1564_v58 = vadd.f32 1.0, %v2461_v62  ;;  %v3722_v16 = vpop.f32.mrb[52].mxu0  ;;  %v610_v47 = vmul.f32 1.442695, %v520_v46  ;;  %v3734_v40 = vadd.f32 %v3676_v50, %v4522_v45 }
 0x160   :  { %4518 = vst [vmem:[#allocation26_spill] sm:$0xff] %v3722_v16  ;;  %v2465_v1 = vpop.eup %2464  ;;  %2484 = vrcp.f32 %v708_v25  ;;  %v711_v31 = vadd.f32 1.0, %v2463_v3  ;;  %v3728_v18 = vpop.f32.mrb[52].mxu1  ;;  %v1466_v62 = vmul.f32 1.442695, %v1376_v29  ;;  %v3740_v41 = vadd.f32 %v3664_v63, %v3433_v8 }
 0x161   :  { %4520 = vst [vmem:[#allocation2_spill] sm:$0xff] %v3728_v18  ;;  %v3730_v49 = vpop.f32.mrb[53].mxu0  ;;  %v2467_v19 = vpop.eup %2466  ;;  %2486 = vrcp.f32 %v1564_v58  ;;  %v1567_v27 = vadd.f32 1.0, %v2465_v1  ;;  %v616_v3 = vmul.f32 1.442695, %v523_v15  ;;  %v1379_v58 = vsub.f32 0.0, %v3720_v36 }
 0x162   :  { %4521 = vst [vmem:[#allocation27_spill] sm:$0xff] %v3730_v49  ;;  %v3736_v16 = vpop.f32.mrb[53].mxu1  ;;  %v2469_v25 = vpop.eup %2468  ;;  %2488 = vrcp.f32 %v711_v31  ;;  %v710_v46 = vadd.f32 1.0, %v2467_v19  ;;  %v3745_v29 = vadd.f32 %v3676_v50, %v3440_v24  ;;  %v522_v15 = vsub.f32 0.0, %v3726_v43  ;;  %v4525_v19 = vld [vmem:[#allocation4_spill] sm:$0xff] }
 0x163   :  { %4523 = vst [vmem:[#allocation3_spill] sm:$0xff] %v3736_v16  ;;  %v2471_v18 = vpop.eup %2470  ;;  %2490 = vrcp.f32 %v1567_v27  ;;  %v1566_v49 = vadd.f32 1.0, %v2469_v25  ;;  %v3747_v1 = vpop.f32.mrb[54].mxu0  ;;  %v3753_v8 = vadd.f32 %v3664_v63, %v4525_v19 }
 0x164   :  { %4524 = vst [vmem:[#allocation28_spill] sm:$0xff] %v3747_v1  ;;  %v2473_v45 = vpop.eup %2472  ;;  %v1643_v31 = vmul.f32 %v2471_v18, %v3492_v9  ;;  %2492 = vrcp.f32 %v710_v46  ;;  %v3755_v27 = vpop.f32.mrb[54].mxu1  ;;  %v1378_v1 = vsub.f32 0.0, %v3734_v40  ;;  %v3763_v9 = vadd.f32 %v3676_v50, %v3449_v11 }
 0x165   :  { %v3757_v25 = vpop.f32.mrb[55].mxu0  ;;  %v2475_v16 = vpop.eup %2474  ;;  %v793_v24 = vmul.f32 %v2473_v45, %v3503_v53  ;;  %2494 = vrcp.f32 %v1566_v49  ;;  %v3774_v53 = vadd.f32 %v3664_v63, %v3460_v13  ;;  %v1472_v45 = vmul.f32 1.442695, %v1379_v58 }
 0x166   :  { %4526 = vst [vmem:[#allocation4_spill] sm:$0xff] %v3757_v25  ;;  %v3765_v18 = vpop.f32.mrb[55].mxu1  ;;  %v2477_v46 = vpop.eup %2476  ;;  %1752 = vst [vmem:[%s4493_s6 + $0x90] sm:$0xff] %v1643_v31  ;;  %v1649_v19 = vmul.f32 %v2475_v16, %v3512_v60  ;;  %2496 = vpow2.f32 %v612_v22  ;;  %v525_v25 = vsub.f32 0.0, %v3740_v41  ;;  %v1381_v31 = vsub.f32 0.0, %v3745_v29 }
 0x167   :  { %4527 = vst [vmem:[#allocation29_spill] sm:$0xff] %v3765_v18  ;;  %v2479_v49 = vpop.eup %2478  ;;  %899 = vst [vmem:[%s4492_s5 + $0xa8] sm:$0xff] %v793_v24  ;;  %v791_v11 = vmul.f32 %v2477_v46, %v3516_v14  ;;  %2498 = vpow2.f32 %v1468_v17  ;;  %v3781_v18 = vpop.f32.mrb[56].mxu0  ;;  %v614_v22 = vmul.f32 1.442695, %v522_v15  ;;  %v524_v16 = vsub.f32 0.0, %v3753_v8 }
 0x168   :  { %v2481_v60 = vpop.eup %2480  ;;  %1755 = vst [vmem:[%s4493_s6 + $0xa8] sm:$0xff] %v1649_v19  ;;  %v1647_v13 = vmul.f32 %v2479_v49, %v3528_v12  ;;  %2500 = vpow2.f32 %v610_v47  ;;  %v3788_v24 = vpop.f32.mrb[56].mxu1  ;;  %v1470_v46 = vmul.f32 1.442695, %v1378_v1  ;;  %v1380_v19 = vsub.f32 0.0, %v3763_v9 }
 0x169   :  { %v3790_v14 = vpop.f32.mrb[57].mxu0  ;;  %v2483_v17 = vpop.eup %2482  ;;  %898 = vst [vmem:[%s4492_s5 + $0xa0] sm:$0xff] %v791_v11  ;;  %v797_v58 = vmul.f32 %v2481_v60, %v3538_v23  ;;  %2502 = vpow2.f32 %v1466_v62  ;;  %v620_v49 = vmul.f32 1.442695, %v525_v25  ;;  %v1476_v62 = vmul.f32 1.442695, %v1381_v31 }
 0x16a   :  { %4528 = vst [vmem:[#allocation30_spill] sm:$0xff] %v3790_v14  ;;  %v3797_v12 = vpop.f32.mrb[57].mxu1  ;;  %v2485_v47 = vpop.eup %2484  ;;  %1754 = vst [vmem:[%s4493_s6 + $0xa0] sm:$0xff] %v1647_v13  ;;  %v1653_v15 = vmul.f32 %v2483_v17, %v3549_v34  ;;  %2504 = vpow2.f32 %v616_v3  ;;  %v527_v14 = vsub.f32 0.0, %v3774_v53  ;;  %v618_v3 = vmul.f32 1.442695, %v524_v16 }
 0x16b   :  { %v2487_v11 = vpop.eup %2486  ;;  %901 = vst [vmem:[%s4492_s5 + $0xb8] sm:$0xff] %v797_v58  ;;  %v795_v23 = vmul.f32 %v2485_v47, %v3553_v26  ;;  %2506 = vpow2.f32 %v1472_v45  ;;  %v3808_v1 = vpop.f32.mrb[58].mxu0  ;;  %v1474_v45 = vmul.f32 1.442695, %v1380_v19 }
 0x16c   :  { %v2489_v60 = vpop.eup %2488  ;;  %1757 = vst [vmem:[%s4493_s6 + $0xb8] sm:$0xff] %v1653_v15  ;;  %v1651_v34 = vmul.f32 %v2487_v11, %v3560_v4  ;;  %2508 = vpow2.f32 %v614_v22  ;;  %v3814_v25 = vpop.f32.mrb[58].mxu1  ;;  %v624_v22 = vmul.f32 1.442695, %v527_v14  ;;  %v3851_v11 = vadd.f32 %v3664_v63, %v3468_v5 }
 0x16d   :  { %v3816_v13 = vpop.f32.mrb[59].mxu0  ;;  %v2491_v17 = vpop.eup %2490  ;;  %900 = vst [vmem:[%s4492_s5 + $0xb0] sm:$0xff] %v795_v23  ;;  %v801_v26 = vmul.f32 %v2489_v60, %v3568_v21  ;;  %2510 = vpow2.f32 %v1470_v46  ;;  %v3864_v5 = vadd.f32 %v3664_v63, %v3484_v52  ;;  %v3876_v52 = vadd.f32 %v3676_v50, %v3494_v61 }
 0x16e   :  { %v3822_v31 = vpop.f32.mrb[59].mxu1  ;;  %v2493_v58 = vpop.eup %2492  ;;  %1756 = vst [vmem:[%s4493_s6 + $0xb0] sm:$0xff] %v1651_v34  ;;  %v1657_v4 = vmul.f32 %v2491_v17, %v3576_v37  ;;  %2512 = vpow2.f32 %v620_v49  ;;  %v3840_v37 = vadd.f32 %v3676_v50, %v3466_v42  ;;  %v3884_v61 = vadd.f32 %v3664_v63, %v3496_v35  ;;  %v4537_v35 = vld [vmem:[#allocation5_spill] sm:$0xff] }
 0x16f   :  { %v2495_v16 = vpop.eup %2494  ;;  %903 = vst [vmem:[%s4492_s5 + $0xc8] sm:$0xff] %v801_v26  ;;  %v799_v21 = vmul.f32 %v2493_v58, %v3582_v6  ;;  %2514 = vpow2.f32 %v1476_v62  ;;  %v3832_v46 = vpop.f32.mrb[60].mxu0  ;;  %v3860_v62 = vadd.f32 %v3676_v50, %v3474_v33 }
 0x170   :  { %4529 = vst [vmem:[#allocation31_spill] sm:$0xff] %v3832_v46  ;;  %v2497_v19 = vpop.eup %2496  ;;  %1759 = vst [vmem:[%s4493_s6 + $0xc8] sm:$0xff] %v1657_v4  ;;  %v1655_v47 = vmul.f32 %v2495_v16, %v3593_v28  ;;  %2516 = vpow2.f32 %v618_v3  ;;  %v3842_v14 = vpop.f32.mrb[60].mxu1  ;;  %v526_v16 = vsub.f32 0.0, %v3851_v11 }
 0x171   :  { %4530 = vst [vmem:[#allocation32_spill] sm:$0xff] %v3842_v14  ;;  %v3844_v15 = vpop.f32.mrb[61].mxu0  ;;  %v2499_v6 = vpop.eup %2498  ;;  %902 = vst [vmem:[%s4492_s5 + $0xc0] sm:$0xff] %v799_v21  ;;  %v713_v49 = vadd.f32 1.0, %v2497_v19  ;;  %2518 = vpow2.f32 %v1474_v45  ;;  %v1383_v45 = vsub.f32 0.0, %v3840_v37 }
 0x172   :  { %4531 = vst [vmem:[#allocation33_spill] sm:$0xff] %v3844_v15  ;;  %v3853_v28 = vpop.f32.mrb[61].mxu1  ;;  %v2501_v23 = vpop.eup %2500  ;;  %1758 = vst [vmem:[%s4493_s6 + $0xc0] sm:$0xff] %v1655_v47  ;;  %v1569_v42 = vadd.f32 1.0, %v2499_v6  ;;  %2520 = vpow2.f32 %v624_v22  ;;  %v1382_v6 = vsub.f32 0.0, %v3860_v62 }
 0x173   :  { %4532 = vst [vmem:[#allocation34_spill] sm:$0xff] %v3853_v28  ;;  %v2503_v60 = vpop.eup %2502  ;;  %2522 = vrcp.f32 %v713_v49  ;;  %v712_v34 = vadd.f32 1.0, %v2501_v23  ;;  %v3866_v3 = vpop.f32.mrb[62].mxu0  ;;  %v3893_v28 = vadd.f32 %v3664_v63, %v4537_v35 }
 0x174   :  { %4533 = vst [vmem:[#allocation35_spill] sm:$0xff] %v3866_v3  ;;  %v2505_v17 = vpop.eup %2504  ;;  %2524 = vrcp.f32 %v1569_v42  ;;  %v1568_v26 = vadd.f32 1.0, %v2503_v60  ;;  %v3869_v58 = vpop.f32.mrb[62].mxu1  ;;  %v529_v42 = vsub.f32 0.0, %v3864_v5  ;;  %v3889_v3 = vadd.f32 %v3676_v50, %v3505_v54 }
 0x175   :  { %4534 = vst [vmem:[#allocation36_spill] sm:$0xff] %v3869_v58  ;;  %v3871_v4 = vpop.f32.mrb[63].mxu0  ;;  %v2507_v33 = vpop.eup %2506  ;;  %2526 = vrcp.f32 %v712_v34  ;;  %v715_v22 = vadd.f32 1.0, %v2505_v17  ;;  %v1480_v17 = vmul.f32 1.442695, %v1383_v45 }
 0x176   :  { %4535 = vst [vmem:[#allocation37_spill] sm:$0xff] %v3871_v4  ;;  %v3878_v21 = vpop.f32.mrb[63].mxu1  ;;  %v2509_v19 = vpop.eup %2508  ;;  %2528 = vrcp.f32 %v1568_v26  ;;  %v1571_v47 = vadd.f32 1.0, %v2507_v33  ;;  %v622_v26 = vmul.f32 1.442695, %v526_v16  ;;  %v1385_v33 = vsub.f32 0.0, %v3876_v52 }
 0x177   :  { %4536 = vst [vmem:[#allocation38_spill] sm:$0xff] %v3878_v21  ;;  %v2511_v49 = vpop.eup %2510  ;;  %2530 = vrcp.f32 %v715_v22  ;;  %v714_v23 = vadd.f32 1.0, %v2509_v19  ;;  %v1478_v19 = vmul.f32 1.442695, %v1382_v6 }
 0x178   :  { %v2513_v60 = vpop.eup %2512  ;;  %2532 = vrcp.f32 %v1571_v47  ;;  %v1570_v34 = vadd.f32 1.0, %v2511_v49  ;;  %v628_v49 = vmul.f32 1.442695, %v529_v42  ;;  %v1484_v15 = vmul.f32 1.442695, %v1385_v33 }
 0x179   :  { %v2515_v4 = vpop.eup %2514  ;;  %2534 = vrcp.f32 %v714_v23  ;;  %v717_v21 = vadd.f32 1.0, %v2513_v60  ;;  %v528_v60 = vsub.f32 0.0, %v3884_v61  ;;  %v531_v33 = vsub.f32 0.0, %v3893_v28 }
 0x17a   :  { %v2517_v58 = vpop.eup %2516  ;;  %2536 = vrcp.f32 %v1570_v34  ;;  %v1573_v22 = vadd.f32 1.0, %v2515_v4  ;;  %v4538_v34 = vld [vmem:[#allocation6_spill] sm:$0xff] }
 0x17b   :  { %v2519_v47 = vpop.eup %2518  ;;  %2538 = vrcp.f32 %v717_v21  ;;  %v716_v45 = vadd.f32 1.0, %v2517_v58  ;;  %v3898_v4 = vadd.f32 %v3676_v50, %v4538_v34  ;;  %v4539_v21 = vld [vmem:[#allocation7_spill] sm:$0xff] }
 0x17c   :  { %v2521_v23 = vpop.eup %2520  ;;  %2540 = vrcp.f32 %v1573_v22  ;;  %v1572_v16 = vadd.f32 1.0, %v2519_v47  ;;  %v3902_v58 = vadd.f32 %v3664_v63, %v4539_v21  ;;  %v1384_v22 = vsub.f32 0.0, %v3889_v3  ;;  %v4540_v47 = vld [vmem:[#allocation8_spill] sm:$0xff] }
 0x17d   :  { %v2523_v6 = vpop.eup %2522  ;;  %2542 = vrcp.f32 %v716_v45  ;;  %v719_v54 = vadd.f32 1.0, %v2521_v23  ;;  %v3908_v14 = vadd.f32 %v3676_v50, %v4540_v47  ;;  %v4541_v45 = vld [vmem:[#allocation9_spill] sm:$0xff]  ;;  %v626_v47 = vmul.f32 1.442695, %v528_v60 }
 0x17e   :  { %v2525_v42 = vpop.eup %2524  ;;  %v805_v35 = vmul.f32 %v2523_v6, %v3668_v32  ;;  %2544 = vrcp.f32 %v1572_v16  ;;  %v3914_v23 = vadd.f32 %v3664_v63, %v4541_v45  ;;  %v1387_v16 = vsub.f32 0.0, %v3898_v4  ;;  %v4542_v6 = vld [vmem:[#allocation10_spill] sm:$0xff] }
 0x17f   :  { %v2527_v34 = vpop.eup %2526  ;;  %v1661_v46 = vmul.f32 %v2525_v42, %v3680_v44  ;;  %2546 = vrcp.f32 %v719_v54  ;;  %v3923_v44 = vadd.f32 %v3676_v50, %v4542_v6 }
 0x180   :  { %v2529_v21 = vpop.eup %2528  ;;  %905 = vst [vmem:[%s4492_s5 + $0xd8] sm:$0xff] %v805_v35  ;;  %v803_v32 = vmul.f32 %v2527_v34, %v3689_v38  ;;  %2548 = vpow2.f32 %v1480_v17  ;;  %v530_v35 = vsub.f32 0.0, %v3902_v58  ;;  %v1482_v17 = vmul.f32 1.442695, %v1384_v22 }
 0x181   :  { %v2531_v54 = vpop.eup %2530  ;;  %1761 = vst [vmem:[%s4493_s6 + $0xd8] sm:$0xff] %v1661_v46  ;;  %v1659_v42 = vmul.f32 %v2529_v21, %v3697_v59  ;;  %2550 = vpow2.f32 %v622_v26  ;;  %v1386_v34 = vsub.f32 0.0, %v3908_v14  ;;  %v632_v46 = vmul.f32 1.442695, %v531_v33 }
 0x182   :  { %v2533_v45 = vpop.eup %2532  ;;  %904 = vst [vmem:[%s4492_s5 + $0xd0] sm:$0xff] %v803_v32  ;;  %v809_v38 = vmul.f32 %v2531_v54, %v3704_v2  ;;  %2552 = vpow2.f32 %v1478_v19  ;;  %v533_v26 = vsub.f32 0.0, %v3914_v23  ;;  %v1488_v19 = vmul.f32 1.442695, %v1387_v16 }
 0x183   :  { %v2535_v6 = vpop.eup %2534  ;;  %1760 = vst [vmem:[%s4493_s6 + $0xd0] sm:$0xff] %v1659_v42  ;;  %v1665_v59 = vmul.f32 %v2533_v45, %v3720_v36  ;;  %2554 = vpow2.f32 %v628_v49  ;;  %v1389_v22 = vsub.f32 0.0, %v3923_v44  ;;  %v630_v49 = vmul.f32 1.442695, %v530_v35 }
 0x184   :  { %v2537_v60 = vpop.eup %2536  ;;  %907 = vst [vmem:[%s4492_s5 + $0xe8] sm:$0xff] %v809_v38  ;;  %v807_v2 = vmul.f32 %v2535_v6, %v3726_v43  ;;  %2556 = vpow2.f32 %v1484_v15  ;;  %v1486_v15 = vmul.f32 1.442695, %v1386_v34  ;;  %v4543_v38 = vld [vmem:[#allocation11_spill] sm:$0xff] }
 0x185   :  { %v2539_v21 = vpop.eup %2538  ;;  %1763 = vst [vmem:[%s4493_s6 + $0xe8] sm:$0xff] %v1665_v59  ;;  %v1663_v36 = vmul.f32 %v2537_v60, %v3734_v40  ;;  %2558 = vpow2.f32 %v626_v47  ;;  %v636_v40 = vmul.f32 1.442695, %v533_v26 }
 0x186   :  { %v2541_v33 = vpop.eup %2540  ;;  %906 = vst [vmem:[%s4492_s5 + $0xe0] sm:$0xff] %v807_v2  ;;  %v813_v43 = vmul.f32 %v2539_v21, %v3740_v41  ;;  %2560 = vpow2.f32 %v1482_v17  ;;  %v1492_v41 = vmul.f32 1.442695, %v1389_v22 }
 0x187   :  { %v2543_v32 = vpop.eup %2542  ;;  %1762 = vst [vmem:[%s4493_s6 + $0xe0] sm:$0xff] %v1663_v36  ;;  %v1669_v16 = vmul.f32 %v2541_v33, %v3745_v29  ;;  %2562 = vpow2.f32 %v632_v46  ;;  %v4545_v46 = vld [vmem:[#allocation13_spill] sm:$0xff] }
 0x188   :  { %v2545_v54 = vpop.eup %2544  ;;  %909 = vst [vmem:[%s4492_s5 + $0xf8] sm:$0xff] %v813_v43  ;;  %v811_v42 = vmul.f32 %v2543_v32, %v3753_v8  ;;  %2564 = vpow2.f32 %v1488_v19  ;;  %v3971_v8 = vadd.f32 %v3664_v63, %v4543_v38  ;;  %v3985_v26 = vadd.f32 %v3664_v63, %v4545_v46  ;;  %v4546_v19 = vld [vmem:[#allocation14_spill] sm:$0xff]  ;;  %v4547_v32 = vld [vmem:[#allocation15_spill] sm:$0xff] }
 0x189   :  { %v2547_v47 = vpop.eup %2546  ;;  %1765 = vst [vmem:[%s4493_s6 + $0xf8] sm:$0xff] %v1669_v16  ;;  %v1667_v35 = vmul.f32 %v2545_v54, %v3763_v9  ;;  %2566 = vpow2.f32 %v630_v49  ;;  %v4544_v9 = vld [vmem:[#allocation12_spill] sm:$0xff]  ;;  %v3989_v22 = vadd.f32 %v3676_v50, %v4546_v19  ;;  %v3995_v16 = vadd.f32 %v3664_v63, %v4547_v32 }
 0x18a   :  { %v2549_v29 = vpop.eup %2548  ;;  %908 = vst [vmem:[%s4492_s5 + $0xf0] sm:$0xff] %v811_v42  ;;  %v817_v45 = vmul.f32 %v2547_v47, %v3774_v53  ;;  %2568 = vpow2.f32 %v1486_v15  ;;  %v3978_v6 = vadd.f32 %v3676_v50, %v4544_v9  ;;  %v532_v49 = vsub.f32 0.0, %v3971_v8 }
 0x18b   :  { %v2551_v17 = vpop.eup %2550  ;;  %1764 = vst [vmem:[%s4493_s6 + $0xf0] sm:$0xff] %v1667_v35  ;;  %v1575_v34 = vadd.f32 1.0, %v2549_v29  ;;  %2570 = vpow2.f32 %v636_v40  ;;  %v535_v42 = vsub.f32 0.0, %v3985_v26  ;;  %v1391_v35 = vsub.f32 0.0, %v3989_v22 }
 0x18c   :  { %v2553_v59 = vpop.eup %2552  ;;  %911 = vst [vmem:[%s4492_s5 + $0x108] sm:$0xff] %v817_v45  ;;  %v718_v53 = vadd.f32 1.0, %v2551_v17  ;;  %2572 = vpow2.f32 %v1492_v41  ;;  %v1388_v15 = vsub.f32 0.0, %v3978_v6  ;;  %v634_v38 = vmul.f32 1.442695, %v532_v49 }
 0x18d   :  { %v2555_v60 = vpop.eup %2554  ;;  %2574 = vrcp.f32 %v1575_v34  ;;  %v1574_v2 = vadd.f32 1.0, %v2553_v59  ;;  %v4001_v17 = vadd.f32 %v3676_v50, %v3570_v0  ;;  %v4006_v19 = vadd.f32 %v3664_v63, %v3584_v39 }
 0x18e   :  { %v2557_v21 = vpop.eup %2556  ;;  %2576 = vrcp.f32 %v718_v53  ;;  %v721_v36 = vadd.f32 1.0, %v2555_v60  ;;  %v1490_v59 = vmul.f32 1.442695, %v1388_v15  ;;  %v534_v53 = vsub.f32 0.0, %v3995_v16 }
 0x18f   :  { %v2559_v33 = vpop.eup %2558  ;;  %2578 = vrcp.f32 %v1574_v2  ;;  %v1577_v43 = vadd.f32 1.0, %v2557_v21  ;;  %v640_v2 = vmul.f32 1.442695, %v535_v42  ;;  %v1496_v49 = vmul.f32 1.442695, %v1391_v35 }
 0x190   :  { %v2561_v40 = vpop.eup %2560  ;;  %2580 = vrcp.f32 %v721_v36  ;;  %v720_v54 = vadd.f32 1.0, %v2559_v33  ;;  %v4010_v0 = vadd.f32 %v3676_v50, %v3595_v7  ;;  %v1390_v15 = vsub.f32 0.0, %v4001_v17 }
 0x191   :  { %v2563_v41 = vpop.eup %2562  ;;  %2582 = vrcp.f32 %v1577_v43  ;;  %v1576_v47 = vadd.f32 1.0, %v2561_v40  ;;  %v4015_v32 = vadd.f32 %v3664_v63, %v3597_v48  ;;  %v4019_v42 = vadd.f32 %v3676_v50, %v3604_v51 }
 0x192   :  { %v2565_v29 = vpop.eup %2564  ;;  %2584 = vrcp.f32 %v720_v54  ;;  %v723_v45 = vadd.f32 1.0, %v2563_v41  ;;  %v638_v54 = vmul.f32 1.442695, %v534_v53  ;;  %v4025_v35 = vadd.f32 %v3664_v63, %v3616_v55 }
 0x193   :  { %v2567_v34 = vpop.eup %2566  ;;  %2586 = vrcp.f32 %v1576_v47  ;;  %v1579_v9 = vadd.f32 1.0, %v2565_v29  ;;  %v537_v47 = vsub.f32 0.0, %v4006_v19  ;;  %v4031_v51 = vadd.f32 %v3676_v50, %v3623_v10 }
 0x194   :  { %v2569_v46 = vpop.eup %2568  ;;  %2588 = vrcp.f32 %v723_v45  ;;  %v722_v60 = vadd.f32 1.0, %v2567_v34  ;;  %v1393_v45 = vsub.f32 0.0, %v4010_v0  ;;  %v536_v55 = vsub.f32 0.0, %v4015_v32 }
 0x195   :  { %v2571_v21 = vpop.eup %2570  ;;  %2590 = vrcp.f32 %v1579_v9  ;;  %v1578_v36 = vadd.f32 1.0, %v2569_v46  ;;  %v1494_v53 = vmul.f32 1.442695, %v1390_v15  ;;  %v1392_v46 = vsub.f32 0.0, %v4019_v42 }
 0x196   :  { %v2573_v33 = vpop.eup %2572  ;;  %2592 = vrcp.f32 %v722_v60  ;;  %v725_v43 = vadd.f32 1.0, %v2571_v21 }
 0x197   :  { %v2575_v40 = vpop.eup %2574  ;;  %2594 = vrcp.f32 %v1578_v36  ;;  %v1581_v39 = vadd.f32 1.0, %v2573_v33  ;;  %v1395_v36 = vsub.f32 0.0, %v4031_v51 }
 0x198   :  { %v2577_v41 = vpop.eup %2576  ;;  %v1673_v7 = vmul.f32 %v2575_v40, %v3840_v37  ;;  %2596 = vrcp.f32 %v725_v43 }
 0x199   :  { %v2579_v48 = vpop.eup %2578  ;;  %v815_v29 = vmul.f32 %v2577_v41, %v3851_v11  ;;  %2598 = vrcp.f32 %v1581_v39  ;;  %v4040_v11 = vadd.f32 %v3664_v63, %v3625_v30  ;;  %v644_v30 = vmul.f32 1.442695, %v537_v47 }
 0x19a   :  { %v2581_v34 = vpop.eup %2580  ;;  %1767 = vst [vmem:[%s4493_s6 + $0x108] sm:$0xff] %v1673_v7  ;;  %v1671_v37 = vmul.f32 %v2579_v48, %v3860_v62  ;;  %2600 = vpow2.f32 %v634_v38  ;;  %v539_v38 = vsub.f32 0.0, %v4025_v35 }
 0x19b   :  { %v2583_v9 = vpop.eup %2582  ;;  %910 = vst [vmem:[%s4492_s5 + $0x100] sm:$0xff] %v815_v29  ;;  %v821_v10 = vmul.f32 %v2581_v34, %v3864_v5  ;;  %2602 = vpow2.f32 %v1490_v59  ;;  %v1500_v59 = vmul.f32 1.442695, %v1393_v45  ;;  %v538_v43 = vsub.f32 0.0, %v4040_v11 }
 0x19c   :  { %v2585_v60 = vpop.eup %2584  ;;  %1766 = vst [vmem:[%s4493_s6 + $0x100] sm:$0xff] %v1671_v37  ;;  %v1677_v62 = vmul.f32 %v2583_v9, %v3876_v52  ;;  %2604 = vpow2.f32 %v640_v2  ;;  %v642_v2 = vmul.f32 1.442695, %v536_v55  ;;  %v648_v39 = vmul.f32 1.442695, %v539_v38 }
 0x19d   :  { %v2587_v21 = vpop.eup %2586  ;;  %913 = vst [vmem:[%s4492_s5 + $0x118] sm:$0xff] %v821_v10  ;;  %v819_v5 = vmul.f32 %v2585_v60, %v3884_v61  ;;  %2606 = vpow2.f32 %v1496_v49  ;;  %v1498_v49 = vmul.f32 1.442695, %v1392_v46 }
 0x19e   :  { %v2589_v33 = vpop.eup %2588  ;;  %1769 = vst [vmem:[%s4493_s6 + $0x118] sm:$0xff] %v1677_v62  ;;  %v1675_v52 = vmul.f32 %v2587_v21, %v3889_v3  ;;  %2608 = vpow2.f32 %v638_v54 }
 0x19f   :  { %v2591_v15 = vpop.eup %2590  ;;  %912 = vst [vmem:[%s4492_s5 + $0x110] sm:$0xff] %v819_v5  ;;  %v825_v61 = vmul.f32 %v2589_v33, %v3893_v28  ;;  %2610 = vpow2.f32 %v1494_v53  ;;  %v1504_v28 = vmul.f32 1.442695, %v1395_v36  ;;  %v4548_v53 = vld [vmem:[#allocation16_spill] sm:$0xff]  ;;  %v4549_v5 = vld [vmem:[#allocation17_spill] sm:$0xff] }
 0x1a0   :  { %v2593_v40 = vpop.eup %2592  ;;  %1768 = vst [vmem:[%s4493_s6 + $0x110] sm:$0xff] %v1675_v52  ;;  %v1681_v3 = vmul.f32 %v2591_v15, %v3898_v4  ;;  %2612 = vpow2.f32 %v644_v30  ;;  %v646_v4 = vmul.f32 1.442695, %v538_v43  ;;  %v4106_v46 = vadd.f32 %v3664_v63, %v4548_v53  ;;  %v4553_v53 = vld [vmem:[#allocation21_spill] sm:$0xff] }
 0x1a1   :  { %v2595_v54 = vpop.eup %2594  ;;  %915 = vst [vmem:[%s4492_s5 + $0x128] sm:$0xff] %v825_v61  ;;  %v823_v41 = vmul.f32 %v2593_v40, %v3902_v58  ;;  %2614 = vpow2.f32 %v1500_v59  ;;  %v4550_v40 = vld [vmem:[#allocation18_spill] sm:$0xff] }
 0x1a2   :  { %v2597_v7 = vpop.eup %2596  ;;  %1771 = vst [vmem:[%s4493_s6 + $0x128] sm:$0xff] %v1681_v3  ;;  %v1679_v47 = vmul.f32 %v2595_v54, %v3908_v14  ;;  %2616 = vpow2.f32 %v642_v2  ;;  %v4088_v14 = vadd.f32 %v3676_v50, %v3631_v57  ;;  %v4102_v57 = vadd.f32 %v3676_v50, %v3647_v20 }
 0x1a3   :  { %v2599_v48 = vpop.eup %2598  ;;  %914 = vst [vmem:[%s4492_s5 + $0x120] sm:$0xff] %v823_v41  ;;  %v829_v29 = vmul.f32 %v2597_v7, %v3914_v23  ;;  %2618 = vpow2.f32 %v1498_v49  ;;  %v4095_v23 = vadd.f32 %v3664_v63, %v3641_v56  ;;  %v4112_v20 = vadd.f32 %v3676_v50, %v4549_v5 }
 0x1a4   :  { %v2601_v58 = vpop.eup %2600  ;;  %1770 = vst [vmem:[%s4493_s6 + $0x120] sm:$0xff] %v1679_v47  ;;  %v1685_v45 = vmul.f32 %v2599_v48, %v3923_v44  ;;  %2620 = vpow2.f32 %v648_v39  ;;  %v1394_v62 = vsub.f32 0.0, %v4088_v14  ;;  %v1397_v33 = vsub.f32 0.0, %v4102_v57  ;;  %v4551_v48 = vld [vmem:[#allocation19_spill] sm:$0xff] }
 0x1a5   :  { %v2603_v34 = vpop.eup %2602  ;;  %917 = vst [vmem:[%s4492_s5 + $0x138] sm:$0xff] %v829_v29  ;;  %v724_v37 = vadd.f32 1.0, %v2601_v58  ;;  %2622 = vpow2.f32 %v1504_v28  ;;  %v541_v21 = vsub.f32 0.0, %v4095_v23  ;;  %v540_v43 = vsub.f32 0.0, %v4106_v46 }
 0x1a6   :  { %v2605_v55 = vpop.eup %2604  ;;  %1773 = vst [vmem:[%s4493_s6 + $0x138] sm:$0xff] %v1685_v45  ;;  %v1580_v44 = vadd.f32 1.0, %v2603_v34  ;;  %2624 = vpow2.f32 %v646_v4  ;;  %v1502_v49 = vmul.f32 1.442695, %v1394_v62  ;;  %v4118_v3 = vadd.f32 %v3664_v63, %v4550_v40 }
 0x1a7   :  { %v2607_v9 = vpop.eup %2606  ;;  %2626 = vrcp.f32 %v724_v37  ;;  %v727_v10 = vadd.f32 1.0, %v2605_v55  ;;  %v652_v41 = vmul.f32 1.442695, %v541_v21  ;;  %v1396_v28 = vsub.f32 0.0, %v4112_v20  ;;  %v4552_v37 = vld [vmem:[#allocation20_spill] sm:$0xff] }
 0x1a8   :  { %v2609_v56 = vpop.eup %2608  ;;  %2628 = vrcp.f32 %v1580_v44  ;;  %v1583_v60 = vadd.f32 1.0, %v2607_v9  ;;  %v1508_v4 = vmul.f32 1.442695, %v1397_v33  ;;  %v4123_v29 = vadd.f32 %v3676_v50, %v4551_v48  ;;  %v4555_v33 = vld [vmem:[#allocation23_spill] sm:$0xff] }
 0x1a9   :  { %v2611_v30 = vpop.eup %2610  ;;  %2630 = vrcp.f32 %v727_v10  ;;  %v726_v38 = vadd.f32 1.0, %v2609_v56  ;;  %v650_v34 = vmul.f32 1.442695, %v540_v43  ;;  %v4127_v55 = vadd.f32 %v3664_v63, %v4552_v37 }
 0x1aa   :  { %v2613_v59 = vpop.eup %2612  ;;  %2632 = vrcp.f32 %v1583_v60  ;;  %v1582_v36 = vadd.f32 1.0, %v2611_v30  ;;  %v543_v10 = vsub.f32 0.0, %v4118_v3  ;;  %v4132_v56 = vadd.f32 %v3676_v50, %v4553_v53 }
 0x1ab   :  { %v2615_v52 = vpop.eup %2614  ;;  %2634 = vrcp.f32 %v726_v38  ;;  %v729_v2 = vadd.f32 1.0, %v2613_v59  ;;  %v1506_v30 = vmul.f32 1.442695, %v1396_v28  ;;  %v4554_v38 = vld [vmem:[#allocation22_spill] sm:$0xff]  ;;  %v4557_v28 = vld [vmem:[#allocation25_spill] sm:$0xff] }
 0x1ac   :  { %v2617_v15 = vpop.eup %2616  ;;  %2636 = vrcp.f32 %v1582_v36  ;;  %v1585_v61 = vadd.f32 1.0, %v2615_v52  ;;  %v4136_v21 = vadd.f32 %v3664_v63, %v4554_v38  ;;  %v1399_v36 = vsub.f32 0.0, %v4123_v29 }
 0x1ad   :  { %v2619_v39 = vpop.eup %2618  ;;  %2638 = vrcp.f32 %v729_v2  ;;  %v728_v54 = vadd.f32 1.0, %v2617_v15  ;;  %v4142_v52 = vadd.f32 %v3676_v50, %v4555_v33  ;;  %v542_v15 = vsub.f32 0.0, %v4127_v55 }
 0x1ae   :  { %v2621_v7 = vpop.eup %2620  ;;  %2640 = vrcp.f32 %v1585_v61  ;;  %v1584_v47 = vadd.f32 1.0, %v2619_v39  ;;  %v4556_v61 = vld [vmem:[#allocation24_spill] sm:$0xff]  ;;  %v545_v48 = vsub.f32 0.0, %v4136_v21 }
 0x1af   :  { %v2623_v58 = vpop.eup %2622  ;;  %2642 = vrcp.f32 %v728_v54  ;;  %v731_v45 = vadd.f32 1.0, %v2621_v7  ;;  %v4148_v40 = vadd.f32 %v3664_v63, %v4556_v61  ;;  %v1398_v54 = vsub.f32 0.0, %v4132_v56  ;;  %v4559_v61 = vld [vmem:[#allocation2_spill] sm:$0xff] }
 0x1b0   :  { %v2625_v44 = vpop.eup %2624  ;;  %2644 = vrcp.f32 %v1584_v47  ;;  %v1587_v9 = vadd.f32 1.0, %v2623_v58  ;;  %v656_v47 = vmul.f32 1.442695, %v543_v10 }
 0x1b1   :  { %v2627_v60 = vpop.eup %2626  ;;  %2646 = vrcp.f32 %v731_v45  ;;  %v730_v62 = vadd.f32 1.0, %v2625_v44  ;;  %v544_v37 = vsub.f32 0.0, %v4148_v40 }
 0x1b2   :  { %v2629_v5 = vpop.eup %2628  ;;  %v827_v59 = vmul.f32 %v2627_v60, %v3971_v8  ;;  %2648 = vrcp.f32 %v1587_v9 }
 0x1b3   :  { %v2631_v2 = vpop.eup %2630  ;;  %v1683_v43 = vmul.f32 %v2629_v5, %v3978_v6  ;;  %2650 = vrcp.f32 %v730_v62  ;;  %v4157_v6 = vadd.f32 %v3676_v50, %v4557_v28  ;;  %v1512_v50 = vmul.f32 1.442695, %v1399_v36  ;;  %v4560_v28 = vld [vmem:[#allocation27_spill] sm:$0xff] }
 0x1b4   :  { %v2633_v39 = vpop.eup %2632  ;;  %916 = vst [vmem:[%s4492_s5 + $0x130] sm:$0xff] %v827_v59  ;;  %v833_v8 = vmul.f32 %v2631_v2, %v3985_v26  ;;  %2652 = vpow2.f32 %v1502_v49  ;;  %v1401_v49 = vsub.f32 0.0, %v4142_v52  ;;  %v4558_v2 = vld [vmem:[#allocation26_spill] sm:$0xff] }
 0x1b5   :  { %v2635_v7 = vpop.eup %2634  ;;  %1772 = vst [vmem:[%s4493_s6 + $0x130] sm:$0xff] %v1683_v43  ;;  %v1689_v63 = vmul.f32 %v2633_v39, %v3989_v22  ;;  %2654 = vpow2.f32 %v652_v41  ;;  %v654_v41 = vmul.f32 1.442695, %v542_v15  ;;  %v1400_v9 = vsub.f32 0.0, %v4157_v6 }
 0x1b6   :  { %v2637_v58 = vpop.eup %2636  ;;  %919 = vst [vmem:[%s4492_s5 + $0x148] sm:$0xff] %v833_v8  ;;  %v831_v26 = vmul.f32 %v2635_v7, %v3995_v16  ;;  %2656 = vpow2.f32 %v1508_v4  ;;  %v1510_v4 = vmul.f32 1.442695, %v1398_v54  ;;  %v1516_v60 = vmul.f32 1.442695, %v1401_v49 }
 0x1b7   :  { %v2639_v45 = vpop.eup %2638  ;;  %1775 = vst [vmem:[%s4493_s6 + $0x148] sm:$0xff] %v1689_v63  ;;  %v1687_v22 = vmul.f32 %v2637_v58, %v4001_v17  ;;  %2658 = vpow2.f32 %v650_v34  ;;  %v660_v34 = vmul.f32 1.442695, %v545_v48  ;;  %v4561_v48 = vld [vmem:[#allocation3_spill] sm:$0xff] }
 0x1b8   :  { %v2641_v44 = vpop.eup %2640  ;;  %918 = vst [vmem:[%s4492_s5 + $0x140] sm:$0xff] %v831_v26  ;;  %v837_v16 = vmul.f32 %v2639_v45, %v4006_v19  ;;  %2660 = vpow2.f32 %v1506_v30  ;;  %v4562_v45 = vld [vmem:[#allocation28_spill] sm:$0xff] }
 0x1b9   :  { %v2643_v10 = vpop.eup %2642  ;;  %1774 = vst [vmem:[%s4493_s6 + $0x140] sm:$0xff] %v1687_v22  ;;  %v1693_v17 = vmul.f32 %v2641_v44, %v4010_v0  ;;  %2662 = vpow2.f32 %v656_v47  ;;  %v658_v0 = vmul.f32 1.442695, %v544_v37 }
 0x1ba   :  { %v2645_v53 = vpop.eup %2644  ;;  %921 = vst [vmem:[%s4492_s5 + $0x158] sm:$0xff] %v837_v16  ;;  %v835_v19 = vmul.f32 %v2643_v10, %v4015_v32  ;;  %2664 = vpow2.f32 %v1512_v50  ;;  %v1514_v32 = vmul.f32 1.442695, %v1400_v9 }
 0x1bb   :  { %v2647_v62 = vpop.eup %2646  ;;  %1777 = vst [vmem:[%s4493_s6 + $0x158] sm:$0xff] %v1693_v17  ;;  %v1691_v30 = vmul.f32 %v2645_v53, %v4019_v42  ;;  %2666 = vpow2.f32 %v654_v41 }
 0x1bc   :  { %v2649_v38 = vpop.eup %2648  ;;  %920 = vst [vmem:[%s4492_s5 + $0x150] sm:$0xff] %v835_v19  ;;  %v841_v5 = vmul.f32 %v2647_v62, %v4025_v35  ;;  %2668 = vpow2.f32 %v1510_v4  ;;  %v4206_v35 = vld [vmem:[%s4490_s2] ss:$0 sm:$0xff] }
 0x1bd   :  { %v2651_v59 = vpop.eup %2650  ;;  %1776 = vst [vmem:[%s4493_s6 + $0x150] sm:$0xff] %v1691_v30  ;;  %v1697_v36 = vmul.f32 %v2649_v38, %v4031_v51  ;;  %2670 = vpow2.f32 %v660_v34  ;;  %v4210_v43 = vadd.f32 %v4206_v35, %v4558_v2  ;;  %v4229_v7 = vadd.f32 %v4206_v35, %v4560_v28 }
 0x1be   :  { %v2653_v42 = vpop.eup %2652  ;;  %923 = vst [vmem:[%s4492_s5 + $0x168] sm:$0xff] %v841_v5  ;;  %v839_v33 = vmul.f32 %v2651_v59, %v4040_v11  ;;  %2672 = vpow2.f32 %v1516_v60  ;;  %v4218_v11 = vld [vmem:[%s4491_s4] ss:$0 sm:$0xff]  ;;  %v4238_v22 = vadd.f32 %v4206_v35, %v4562_v45 }
 0x1bf   :  { %v2655_v15 = vpop.eup %2654  ;;  %1779 = vst [vmem:[%s4493_s6 + $0x168] sm:$0xff] %v1697_v36  ;;  %v1586_v51 = vadd.f32 1.0, %v2653_v42  ;;  %2674 = vpow2.f32 %v658_v0  ;;  %v4222_v39 = vadd.f32 %v4218_v11, %v4559_v61  ;;  %v4233_v58 = vadd.f32 %v4218_v11, %v4561_v48  ;;  %v4563_v42 = vld [vmem:[#allocation4_spill] sm:$0xff]  ;;  %v4564_v61 = vld [vmem:[#allocation29_spill] sm:$0xff] }
 0x1c0   :  { %v2657_v8 = vpop.eup %2656  ;;  %922 = vst [vmem:[%s4492_s5 + $0x160] sm:$0xff] %v839_v33  ;;  %v733_v54 = vadd.f32 1.0, %v2655_v15  ;;  %2676 = vpow2.f32 %v1514_v32  ;;  %v547_v49 = vsub.f32 0.0, %v4210_v43  ;;  %v546_v9 = vsub.f32 0.0, %v4229_v7 }
 0x1c1   :  { %v2659_v63 = vpop.eup %2658  ;;  %2678 = vrcp.f32 %v1586_v51  ;;  %v1589_v47 = vadd.f32 1.0, %v2657_v8  ;;  %v1403_v44 = vsub.f32 0.0, %v4222_v39  ;;  %v1402_v34 = vsub.f32 0.0, %v4233_v58 }
 0x1c2   :  { %v2661_v26 = vpop.eup %2660  ;;  %2680 = vrcp.f32 %v733_v54  ;;  %v732_v50 = vadd.f32 1.0, %v2659_v63  ;;  %v664_v60 = vmul.f32 1.442695, %v547_v49  ;;  %v549_v62 = vsub.f32 0.0, %v4238_v22 }
 0x1c3   :  { %v2663_v41 = vpop.eup %2662  ;;  %2682 = vrcp.f32 %v1589_v47  ;;  %v1588_v37 = vadd.f32 1.0, %v2661_v26  ;;  %v1520_v38 = vmul.f32 1.442695, %v1403_v44  ;;  %v4246_v5 = vadd.f32 %v4218_v11, %v3755_v27 }
 0x1c4   :  { %v2665_v16 = vpop.eup %2664  ;;  %2684 = vrcp.f32 %v732_v50  ;;  %v735_v4 = vadd.f32 1.0, %v2663_v41  ;;  %v662_v36 = vmul.f32 1.442695, %v546_v9  ;;  %v4250_v33 = vadd.f32 %v4206_v35, %v4563_v42 }
 0x1c5   :  { %v2667_v10 = vpop.eup %2666  ;;  %2686 = vrcp.f32 %v1588_v37  ;;  %v1591_v17 = vadd.f32 1.0, %v2665_v16  ;;  %v1518_v51 = vmul.f32 1.442695, %v1402_v34  ;;  %v4254_v8 = vadd.f32 %v4218_v11, %v4564_v61  ;;  %v4565_v37 = vld [vmem:[#allocation30_spill] sm:$0xff] }
 0x1c6   :  { %v2669_v53 = vpop.eup %2668  ;;  %2688 = vrcp.f32 %v735_v4  ;;  %v734_v19 = vadd.f32 1.0, %v2667_v10  ;;  %v668_v28 = vmul.f32 1.442695, %v549_v62  ;;  %v4258_v63 = vadd.f32 %v4206_v35, %v3781_v18 }
 0x1c7   :  { %v2671_v30 = vpop.eup %2670  ;;  %2690 = vrcp.f32 %v1591_v17  ;;  %v1590_v0 = vadd.f32 1.0, %v2669_v53  ;;  %v1405_v26 = vsub.f32 0.0, %v4246_v5  ;;  %v4263_v50 = vadd.f32 %v4218_v11, %v3788_v24 }
 0x1c8   :  { %v2673_v32 = vpop.eup %2672  ;;  %2692 = vrcp.f32 %v734_v19  ;;  %v737_v59 = vadd.f32 1.0, %v2671_v30  ;;  %v548_v41 = vsub.f32 0.0, %v4250_v33  ;;  %v4269_v44 = vadd.f32 %v4206_v35, %v4565_v37 }
 0x1c9   :  { %v2675_v2 = vpop.eup %2674  ;;  %2694 = vrcp.f32 %v1590_v0  ;;  %v1593_v15 = vadd.f32 1.0, %v2673_v32  ;;  %v1404_v4 = vsub.f32 0.0, %v4254_v8  ;;  %v4275_v24 = vadd.f32 %v4218_v11, %v3797_v12 }
 0x1ca   :  { %v2677_v54 = vpop.eup %2676  ;;  %2696 = vrcp.f32 %v737_v59  ;;  %v736_v27 = vadd.f32 1.0, %v2675_v2  ;;  %v551_v10 = vsub.f32 0.0, %v4258_v63  ;;  %v1524_v34 = vmul.f32 1.442695, %v1405_v26 }
 0x1cb   :  { %v2679_v47 = vpop.eup %2678  ;;  %2698 = vrcp.f32 %v1593_v15  ;;  %v1592_v48 = vadd.f32 1.0, %v2677_v54  ;;  %v1407_v53 = vsub.f32 0.0, %v4263_v50  ;;  %v1522_v30 = vmul.f32 1.442695, %v1404_v4 }
 0x1cc   :  { %v2681_v49 = vpop.eup %2680  ;;  %v1695_v45 = vmul.f32 %v2679_v47, %v4088_v14  ;;  %2700 = vrcp.f32 %v736_v27  ;;  %v1406_v0 = vsub.f32 0.0, %v4275_v24  ;;  %v672_v32 = vmul.f32 1.442695, %v551_v10 }
 0x1cd   :  { %v2683_v18 = vpop.eup %2682  ;;  %v845_v16 = vmul.f32 %v2681_v49, %v4095_v23  ;;  %2702 = vrcp.f32 %v1592_v48  ;;  %v4284_v23 = vadd.f32 %v4206_v35, %v3808_v1  ;;  %v666_v1 = vmul.f32 1.442695, %v548_v41 }
 0x1ce   :  { %v2685_v9 = vpop.eup %2684  ;;  %1778 = vst [vmem:[%s4493_s6 + $0x160] sm:$0xff] %v1695_v45  ;;  %v1701_v14 = vmul.f32 %v2683_v18, %v4102_v57  ;;  %2704 = vpow2.f32 %v664_v60  ;;  %v550_v60 = vsub.f32 0.0, %v4269_v44  ;;  %v1528_v42 = vmul.f32 1.442695, %v1407_v53 }
 0x1cf   :  { %v2687_v17 = vpop.eup %2686  ;;  %925 = vst [vmem:[%s4492_s5 + $0x178] sm:$0xff] %v845_v16  ;;  %v843_v12 = vmul.f32 %v2685_v9, %v4106_v46  ;;  %2706 = vpow2.f32 %v1520_v38  ;;  %v553_v59 = vsub.f32 0.0, %v4284_v23  ;;  %v4346_v37 = vadd.f32 %v4218_v11, %v3822_v31 }
 0x1d0   :  { %v2689_v19 = vpop.eup %2688  ;;  %1781 = vst [vmem:[%s4493_s6 + $0x178] sm:$0xff] %v1701_v14  ;;  %v1699_v57 = vmul.f32 %v2687_v17, %v4112_v20  ;;  %2708 = vpow2.f32 %v662_v36  ;;  %v670_v15 = vmul.f32 1.442695, %v550_v60 }
 0x1d1   :  { %v2691_v62 = vpop.eup %2690  ;;  %924 = vst [vmem:[%s4492_s5 + $0x170] sm:$0xff] %v843_v12  ;;  %v849_v46 = vmul.f32 %v2689_v19, %v4118_v3  ;;  %2710 = vpow2.f32 %v1518_v51  ;;  %v4566_v12 = vld [vmem:[#allocation31_spill] sm:$0xff]  ;;  %v1408_v19 = vsub.f32 0.0, %v4346_v37 }
 0x1d2   :  { %v2693_v38 = vpop.eup %2692  ;;  %1780 = vst [vmem:[%s4493_s6 + $0x170] sm:$0xff] %v1699_v57  ;;  %v1705_v20 = vmul.f32 %v2691_v62, %v4123_v29  ;;  %2712 = vpow2.f32 %v668_v28  ;;  %v4567_v62 = vld [vmem:[#allocation32_spill] sm:$0xff] }
 0x1d3   :  { %v2695_v36 = vpop.eup %2694  ;;  %927 = vst [vmem:[%s4492_s5 + $0x188] sm:$0xff] %v849_v46  ;;  %v847_v3 = vmul.f32 %v2693_v38, %v4127_v55  ;;  %2714 = vpow2.f32 %v1524_v34  ;;  %v1526_v55 = vmul.f32 1.442695, %v1406_v0  ;;  %v4352_v34 = vadd.f32 %v4206_v35, %v4566_v12 }
 0x1d4   :  { %v2697_v2 = vpop.eup %2696  ;;  %1783 = vst [vmem:[%s4493_s6 + $0x188] sm:$0xff] %v1705_v20  ;;  %v1703_v29 = vmul.f32 %v2695_v36, %v4132_v56  ;;  %2716 = vpow2.f32 %v666_v1  ;;  %v676_v56 = vmul.f32 1.442695, %v553_v59  ;;  %v4357_v46 = vadd.f32 %v4218_v11, %v4567_v62  ;;  %v4568_v20 = vld [vmem:[#allocation33_spill] sm:$0xff] }
 0x1d5   :  { %v2699_v51 = vpop.eup %2698  ;;  %926 = vst [vmem:[%s4492_s5 + $0x180] sm:$0xff] %v847_v3  ;;  %v853_v61 = vmul.f32 %v2697_v2, %v4136_v21  ;;  %2718 = vpow2.f32 %v1522_v30  ;;  %v555_v3 = vsub.f32 0.0, %v4352_v34 }
 0x1d6   :  { %v2701_v54 = vpop.eup %2700  ;;  %1782 = vst [vmem:[%s4493_s6 + $0x180] sm:$0xff] %v1703_v29  ;;  %v1709_v27 = vmul.f32 %v2699_v51, %v4142_v52  ;;  %2720 = vpow2.f32 %v672_v32  ;;  %v4332_v52 = vadd.f32 %v4218_v11, %v3814_v25  ;;  %v4361_v32 = vadd.f32 %v4206_v35, %v4568_v20 }
 0x1d7   :  { %v2703_v28 = vpop.eup %2702  ;;  %929 = vst [vmem:[%s4492_s5 + $0x198] sm:$0xff] %v853_v61  ;;  %v851_v47 = vmul.f32 %v2701_v54, %v4148_v40  ;;  %2722 = vpow2.f32 %v1528_v42  ;;  %v4339_v40 = vadd.f32 %v4206_v35, %v3816_v13  ;;  %v4569_v42 = vld [vmem:[#allocation34_spill] sm:$0xff]  ;;  %v1530_v51 = vmul.f32 1.442695, %v1408_v19  ;;  %v4570_v61 = vld [vmem:[#allocation35_spill] sm:$0xff] }
 0x1d8   :  { %v2705_v21 = vpop.eup %2704  ;;  %1785 = vst [vmem:[%s4493_s6 + $0x198] sm:$0xff] %v1709_v27  ;;  %v1707_v48 = vmul.f32 %v2703_v28, %v4157_v6  ;;  %2724 = vpow2.f32 %v670_v15  ;;  %v1409_v13 = vsub.f32 0.0, %v4332_v52  ;;  %v4366_v2 = vadd.f32 %v4218_v11, %v4569_v42  ;;  %v4571_v28 = vld [vmem:[#allocation36_spill] sm:$0xff] }
 0x1d9   :  { %v2707_v26 = vpop.eup %2706  ;;  %928 = vst [vmem:[%s4492_s5 + $0x190] sm:$0xff] %v851_v47  ;;  %v739_v49 = vadd.f32 1.0, %v2705_v21  ;;  %2726 = vpow2.f32 %v1526_v55  ;;  %v552_v14 = vsub.f32 0.0, %v4339_v40  ;;  %v4370_v55 = vadd.f32 %v4206_v35, %v4570_v61 }
 0x1da   :  { %v2709_v45 = vpop.eup %2708  ;;  %1784 = vst [vmem:[%s4493_s6 + $0x190] sm:$0xff] %v1707_v48  ;;  %v1595_v6 = vadd.f32 1.0, %v2707_v26  ;;  %2728 = vpow2.f32 %v676_v56  ;;  %v1532_v60 = vmul.f32 1.442695, %v1409_v13  ;;  %v1411_v56 = vsub.f32 0.0, %v4357_v46 }
 0x1db   :  { %v2711_v25 = vpop.eup %2710  ;;  %2730 = vrcp.f32 %v739_v49  ;;  %v738_v41 = vadd.f32 1.0, %v2709_v45  ;;  %v674_v38 = vmul.f32 1.442695, %v552_v14  ;;  %v4375_v47 = vadd.f32 %v4218_v11, %v4571_v28  ;;  %v4572_v49 = vld [vmem:[#allocation37_spill] sm:$0xff] }
 0x1dc   :  { %v2713_v18 = vpop.eup %2712  ;;  %2732 = vrcp.f32 %v1595_v6  ;;  %v1594_v16 = vadd.f32 1.0, %v2711_v25  ;;  %v554_v26 = vsub.f32 0.0, %v4361_v32  ;;  %v4380_v45 = vadd.f32 %v4206_v35, %v4572_v49 }
 0x1dd   :  { %v2715_v4 = vpop.eup %2714  ;;  %2734 = vrcp.f32 %v738_v41  ;;  %v741_v9 = vadd.f32 1.0, %v2713_v18  ;;  %v1410_v41 = vsub.f32 0.0, %v4366_v2  ;;  %v4573_v18 = vld [vmem:[#allocation38_spill] sm:$0xff]  ;;  %v557_v14 = vsub.f32 0.0, %v4370_v55 }
 0x1de   :  { %v2717_v10 = vpop.eup %2716  ;;  %2736 = vrcp.f32 %v1594_v16  ;;  %v1597_v17 = vadd.f32 1.0, %v2715_v4  ;;  %v4386_v16 = vadd.f32 %v4218_v11, %v4573_v18  ;;  %v678_v12 = vmul.f32 1.442695, %v554_v26 }
 0x1df   :  { %v2719_v53 = vpop.eup %2718  ;;  %2738 = vrcp.f32 %v741_v9  ;;  %v740_v31 = vadd.f32 1.0, %v2717_v10  ;;  %v680_v9 = vmul.f32 1.442695, %v555_v3  ;;  %v1534_v19 = vmul.f32 1.442695, %v1410_v41 }
 0x1e0   :  { %v2721_v57 = vpop.eup %2720  ;;  %2740 = vrcp.f32 %v1597_v17  ;;  %v1596_v1 = vadd.f32 1.0, %v2719_v53  ;;  %v1413_v17 = vsub.f32 0.0, %v4375_v47  ;;  %v556_v53 = vsub.f32 0.0, %v4380_v45 }
 0x1e1   :  { %v2723_v30 = vpop.eup %2722  ;;  %2742 = vrcp.f32 %v740_v31  ;;  %v743_v0 = vadd.f32 1.0, %v2721_v57  ;;  %v1412_v57 = vsub.f32 0.0, %v4386_v16 }
 0x1e2   :  { %v2725_v59 = vpop.eup %2724  ;;  %2744 = vrcp.f32 %v1596_v1  ;;  %v1599_v36 = vadd.f32 1.0, %v2723_v30  ;;  %v1540_v30 = vmul.f32 1.442695, %v1413_v17 }
 0x1e3   :  { %v2727_v29 = vpop.eup %2726  ;;  %2746 = vrcp.f32 %v743_v0  ;;  %v742_v15 = vadd.f32 1.0, %v2725_v59 }
 0x1e4   :  { %v2729_v54 = vpop.eup %2728  ;;  %2748 = vrcp.f32 %v1599_v36  ;;  %v1598_v27 = vadd.f32 1.0, %v2727_v29 }
 0x1e5   :  { %v2731_v21 = vpop.eup %2730  ;;  %2750 = vrcp.f32 %v742_v15  ;;  %v745_v48 = vadd.f32 1.0, %v2729_v54 }
 0x1e6   :  { %v2733_v6 = vpop.eup %2732  ;;  %v857_v25 = vmul.f32 %v2731_v21, %v4210_v43  ;;  %2752 = vrcp.f32 %v1598_v27  ;;  %v1536_v43 = vmul.f32 1.442695, %v1411_v56 }
 0x1e7   :  { %v2735_v13 = vpop.eup %2734  ;;  %v1713_v4 = vmul.f32 %v2733_v6, %v4222_v39  ;;  %2754 = vrcp.f32 %v745_v48 }
 0x1e8   :  { %v2737_v10 = vpop.eup %2736  ;;  %931 = vst [vmem:[%s4492_s5 + $0x1a8] sm:$0xff] %v857_v25  ;;  %v855_v35 = vmul.f32 %v2735_v13, %v4229_v7  ;;  %2756 = vpow2.f32 %v1532_v60  ;;  %v684_v60 = vmul.f32 1.442695, %v557_v14 }
 0x1e9   :  { %v2739_v11 = vpop.eup %2738  ;;  %1787 = vst [vmem:[%s4493_s6 + $0x1a8] sm:$0xff] %v1713_v4  ;;  %v1711_v39 = vmul.f32 %v2737_v10, %v4233_v58  ;;  %2758 = vpow2.f32 %v674_v38 }
 0x1ea   :  { %v2741_v31 = vpop.eup %2740  ;;  %930 = vst [vmem:[%s4492_s5 + $0x1a0] sm:$0xff] %v855_v35  ;;  %v861_v7 = vmul.f32 %v2739_v11, %v4238_v22  ;;  %2760 = vpow2.f32 %v1530_v51 }
 0x1eb   :  { %v2743_v1 = vpop.eup %2742  ;;  %1786 = vst [vmem:[%s4493_s6 + $0x1a0] sm:$0xff] %v1711_v39  ;;  %v1717_v58 = vmul.f32 %v2741_v31, %v4246_v5  ;;  %2762 = vpow2.f32 %v680_v9  ;;  %v682_v5 = vmul.f32 1.442695, %v556_v53 }
 0x1ec   :  { %v2745_v62 = vpop.eup %2744  ;;  %933 = vst [vmem:[%s4492_s5 + $0x1b8] sm:$0xff] %v861_v7  ;;  %v859_v22 = vmul.f32 %v2743_v1, %v4250_v33  ;;  %2764 = vpow2.f32 %v1536_v43  ;;  %v1538_v33 = vmul.f32 1.442695, %v1412_v57 }
 0x1ed   :  { %v2747_v0 = vpop.eup %2746  ;;  %1789 = vst [vmem:[%s4493_s6 + $0x1b8] sm:$0xff] %v1717_v58  ;;  %v1715_v38 = vmul.f32 %v2745_v62, %v4254_v8  ;;  %2766 = vpow2.f32 %v678_v12 }
 0x1ee   :  { %v2749_v20 = vpop.eup %2748  ;;  %932 = vst [vmem:[%s4492_s5 + $0x1b0] sm:$0xff] %v859_v22  ;;  %v865_v59 = vmul.f32 %v2747_v0, %v4258_v63  ;;  %2768 = vpow2.f32 %v1534_v19 }
 0x1ef   :  { %v2751_v36 = vpop.eup %2750  ;;  %1788 = vst [vmem:[%s4493_s6 + $0x1b0] sm:$0xff] %v1715_v38  ;;  %v1721_v3 = vmul.f32 %v2749_v20, %v4263_v50  ;;  %2770 = vpow2.f32 %v684_v60 }
 0x1f0   :  { %v2753_v8 = vpop.eup %2752  ;;  %935 = vst [vmem:[%s4492_s5 + $0x1c8] sm:$0xff] %v865_v59  ;;  %v863_v42 = vmul.f32 %v2751_v36, %v4269_v44  ;;  %2772 = vpow2.f32 %v1540_v30 }
 0x1f1   :  { %v2755_v29 = vpop.eup %2754  ;;  %1791 = vst [vmem:[%s4493_s6 + $0x1c8] sm:$0xff] %v1721_v3  ;;  %v1719_v63 = vmul.f32 %v2753_v8, %v4275_v24  ;;  %2774 = vpow2.f32 %v682_v5 }
 0x1f2   :  { %v2757_v15 = vpop.eup %2756  ;;  %934 = vst [vmem:[%s4492_s5 + $0x1c0] sm:$0xff] %v863_v42  ;;  %v869_v50 = vmul.f32 %v2755_v29, %v4284_v23  ;;  %2776 = vpow2.f32 %v1538_v33 }
 0x1f3   :  { %v2759_v51 = vpop.eup %2758  ;;  %1790 = vst [vmem:[%s4493_s6 + $0x1c0] sm:$0xff] %v1719_v63  ;;  %v1601_v44 = vadd.f32 1.0, %v2757_v15 }
 0x1f4   :  { %v2761_v61 = vpop.eup %2760  ;;  %937 = vst [vmem:[%s4492_s5 + $0x1d8] sm:$0xff] %v869_v50  ;;  %v744_v24 = vadd.f32 1.0, %v2759_v51 }
 0x1f5   :  { %v2763_v54 = vpop.eup %2762  ;;  %2778 = vrcp.f32 %v1601_v44  ;;  %v1600_v27 = vadd.f32 1.0, %v2761_v61 }
 0x1f6   :  { %v2765_v56 = vpop.eup %2764  ;;  %2780 = vrcp.f32 %v744_v24  ;;  %v747_v28 = vadd.f32 1.0, %v2763_v54 }
 0x1f7   :  { %v2767_v23 = vpop.eup %2766  ;;  %2782 = vrcp.f32 %v1600_v27  ;;  %v1603_v21 = vadd.f32 1.0, %v2765_v56 }
 0x1f8   :  { %v2769_v48 = vpop.eup %2768  ;;  %2784 = vrcp.f32 %v747_v28  ;;  %v746_v26 = vadd.f32 1.0, %v2767_v23 }
 0x1f9   :  { %v2771_v49 = vpop.eup %2770  ;;  %2786 = vrcp.f32 %v1603_v21  ;;  %v1602_v6 = vadd.f32 1.0, %v2769_v48 }
 0x1fa   :  { %v2773_v25 = vpop.eup %2772  ;;  %2788 = vrcp.f32 %v746_v26  ;;  %v749_v41 = vadd.f32 1.0, %v2771_v49 }
 0x1fb   :  { %v2775_v18 = vpop.eup %2774  ;;  %2790 = vrcp.f32 %v1602_v6  ;;  %v1605_v13 = vadd.f32 1.0, %v2773_v25 }
 0x1fc   :  { %v2777_v4 = vpop.eup %2776  ;;  %2792 = vrcp.f32 %v749_v41  ;;  %v748_v9 = vadd.f32 1.0, %v2775_v18 }
 0x1fd   :  { %2794 = vrcp.f32 %v1605_v13  ;;  %v1604_v14 = vadd.f32 1.0, %v2777_v4 }
 0x1fe   :  { %2796 = vrcp.f32 %v748_v9 }
 0x1ff   :  { %v2779_v10 = vpop.eup %2778  ;;  %2798 = vrcp.f32 %v1604_v14 }
 0x200   :  { %v2781_v35 = vpop.eup %2780  ;;  %v1725_v43 = vmul.f32 %v2779_v10, %v4332_v52 }
 0x201   :  { %v2783_v17 = vpop.eup %2782  ;;  %v867_v11 = vmul.f32 %v2781_v35, %v4339_v40 }
 0x202   :  { %v2785_v39 = vpop.eup %2784  ;;  %1793 = vst [vmem:[%s4493_s6 + $0x1d8] sm:$0xff] %v1725_v43  ;;  %v1723_v12 = vmul.f32 %v2783_v17, %v4346_v37 }
 0x203   :  { %v2787_v53 = vpop.eup %2786  ;;  %936 = vst [vmem:[%s4492_s5 + $0x1d0] sm:$0xff] %v867_v11  ;;  %v873_v31 = vmul.f32 %v2785_v39, %v4352_v34 }
 0x204   :  { %v2789_v7 = vpop.eup %2788  ;;  %1792 = vst [vmem:[%s4493_s6 + $0x1d0] sm:$0xff] %v1723_v12  ;;  %v1729_v52 = vmul.f32 %v2787_v53, %v4357_v46 }
 0x205   :  { %v2791_v40 = vpop.eup %2790  ;;  %939 = vst [vmem:[%s4492_s5 + $0x1e8] sm:$0xff] %v873_v31  ;;  %v871_v37 = vmul.f32 %v2789_v7, %v4361_v32 }
 0x206   :  { %v2793_v19 = vpop.eup %2792  ;;  %1795 = vst [vmem:[%s4493_s6 + $0x1e8] sm:$0xff] %v1729_v52  ;;  %v1727_v34 = vmul.f32 %v2791_v40, %v4366_v2 }
 0x207   :  { %v2795_v57 = vpop.eup %2794  ;;  %938 = vst [vmem:[%s4492_s5 + $0x1e0] sm:$0xff] %v871_v37  ;;  %v877_v46 = vmul.f32 %v2793_v19, %v4370_v55 }
 0x208   :  { %v2797_v1 = vpop.eup %2796  ;;  %1794 = vst [vmem:[%s4493_s6 + $0x1e0] sm:$0xff] %v1727_v34  ;;  %v1733_v32 = vmul.f32 %v2795_v57, %v4375_v47 }
 0x209   :  { %v2799_v58 = vpop.eup %2798  ;;  %941 = vst [vmem:[%s4492_s5 + $0x1f8] sm:$0xff] %v877_v46  ;;  %v875_v2 = vmul.f32 %v2797_v1, %v4380_v45 }
 0x20a   :  { %1797 = vst [vmem:[%s4493_s6 + $0x1f8] sm:$0xff] %v1733_v32  ;;  %v1731_v55 = vmul.f32 %v2799_v58, %v4386_v16 }
 0x20b   :  { %940 = vst [vmem:[%s4492_s5 + $0x1f0] sm:$0xff] %v875_v2 }
 0x20c   :  { %1796 = vst [vmem:[%s4493_s6 + $0x1f0] sm:$0xff] %v1731_v55 }

// kernel: repncsp_forward.7
= control target key start
LH: loop header
LB: loop body
LE: loop exit
PB: predicated region body
PF: predicated region fallthrough
CT: control target
= control target key end

     0   :  { %s3307_s3 = inlined_call_operand.vmem [shape: f32[128,128], index: 3, kind: input, shape index: {}]   ;;  %s3308_s2 = inlined_call_operand.vmem [shape: f32[128,128], index: 2, kind: input, shape index: {}]   ;;  %s3309_s1 = inlined_call_operand.vmem [shape: f32[512,128], index: 1, kind: input, shape index: {}]   ;;  %s3310_s0 = inlined_call_operand.vmem [shape: f32[512,128], index: 0, kind: input, shape index: {}]   ;;  %s3311_s4 = inlined_call_operand.vmem [shape: f32[1,128], index: 4, kind: input, shape index: {}]   ;;  %s3312_s5 = inlined_call_operand.vmem [shape: f32[512,128], index: 5, kind: output, shape index: {}]  }
   0x1   :  { %v164_v0 = vld [vmem:[%s3307_s3] sm:$0xff]  ;;  %v165_v1 = vld [vmem:[%s3307_s3 + $0x8] sm:$0xff]  ;;  %v166_v5 = vld [vmem:[%s3307_s3 + $0x10] sm:$0xff] }
   0x2   :  { %v84_v2 = vld [vmem:[%s3308_s2] sm:$0xff]  ;;  %v1890_v3 = vpack.c.bf16 %v165_v1, %v164_v0  ;;  %v85_v4 = vld [vmem:[%s3308_s2 + $0x8] sm:$0xff]  ;;  %v167_v6 = vld [vmem:[%s3307_s3 + $0x18] sm:$0xff] }
   0x3   :  { %v1922_v7 = vpack.c.bf16 %v85_v4, %v84_v2  ;;  %v1894_v8 = vpack.c.bf16 %v167_v6, %v166_v5  ;;  %v86_v9 = vld [vmem:[%s3308_s2 + $0x10] sm:$0xff]  ;;  %v87_v10 = vld [vmem:[%s3308_s2 + $0x18] sm:$0xff]  ;;  %v168_v11 = vld [vmem:[%s3307_s3 + $0x20] sm:$0xff] }
   0x4   :  { %1891 = vmatprep.subr.bf16.mxu1 %v1890_v3  ;;  %v1926_v12 = vpack.c.bf16 %v87_v10, %v86_v9  ;;  %v169_v13 = vld [vmem:[%s3307_s3 + $0x28] sm:$0xff]  ;;  %v88_v14 = vld [vmem:[%s3308_s2 + $0x20] sm:$0xff]  ;;  %v170_v18 = vld [vmem:[%s3307_s3 + $0x30] sm:$0xff] }
   0x5   :  { %v89_v15 = vld [vmem:[%s3308_s2 + $0x28] sm:$0xff]  ;;  %1923 = vmatprep.subr.bf16.mxu0 %v1922_v7  ;;  %1893 = vmatpush3.bf16.msra.mxu1 %v1890_v3  ;;  %v1898_v16 = vpack.c.bf16 %v169_v13, %v168_v11  ;;  %v171_v19 = vld [vmem:[%s3307_s3 + $0x38] sm:$0xff]  ;;  %v90_v20 = vld [vmem:[%s3308_s2 + $0x30] sm:$0xff] }
   0x6   :  { %1925 = vmatpush3.bf16.msra.mxu0 %v1922_v7  ;;  %1895 = vmatprep.subr.bf16.mxu1 %v1894_v8  ;;  %v1930_v17 = vpack.c.bf16 %v89_v15, %v88_v14  ;;  %v91_v21 = vld [vmem:[%s3308_s2 + $0x38] sm:$0xff]  ;;  %v1902_v22 = vpack.c.bf16 %v171_v19, %v170_v18  ;;  %v172_v24 = vld [vmem:[%s3307_s3 + $0x40] sm:$0xff]  ;;  %v173_v25 = vld [vmem:[%s3307_s3 + $0x48] sm:$0xff] }
   0x7   :  { %1927 = vmatprep.subr.bf16.mxu0 %v1926_v12  ;;  %v1934_v23 = vpack.c.bf16 %v91_v21, %v90_v20  ;;  %v100_v26 = vld [vmem:[%s3309_s1] sm:$0xff]  ;;  %v93_v28 = vld [vmem:[%s3308_s2 + $0x48] sm:$0xff]  ;;  %v1906_v30 = vpack.c.bf16 %v173_v25, %v172_v24  ;;  %v174_v32 = vld [vmem:[%s3307_s3 + $0x50] sm:$0xff] }
   0x8   :  { %v92_v27 = vld [vmem:[%s3308_s2 + $0x40] sm:$0xff]  ;;  %1666 = vmatprep.mubr.f32.mxu1 %v100_v26  ;;  %v175_v33 = vld [vmem:[%s3307_s3 + $0x58] sm:$0xff]  ;;  %v94_v34 = vld [vmem:[%s3308_s2 + $0x50] sm:$0xff] }
   0x9   :  { %1897 = vmatpush3.bf16.msra.mxu1 %v1894_v8  ;;  %v20_v29 = vld [vmem:[%s3310_s0] sm:$0xff]  ;;  %v1938_v31 = vpack.c.bf16 %v93_v28, %v92_v27  ;;  %v95_v35 = vld [vmem:[%s3308_s2 + $0x58] sm:$0xff]  ;;  %v1910_v36 = vpack.c.bf16 %v175_v33, %v174_v32  ;;  %v177_v39 = vld [vmem:[%s3307_s3 + $0x68] sm:$0xff] }
   0xa   :  { %1929 = vmatpush3.bf16.msra.mxu0 %v1926_v12  ;;  %1899 = vmatprep.subr.bf16.mxu1 %v1898_v16  ;;  %v1942_v37 = vpack.c.bf16 %v95_v35, %v94_v34  ;;  %v176_v38 = vld [vmem:[%s3307_s3 + $0x60] sm:$0xff]  ;;  %v97_v41 = vld [vmem:[%s3308_s2 + $0x68] sm:$0xff]  ;;  %v178_v44 = vld [vmem:[%s3307_s3 + $0x70] sm:$0xff] }
   0xb   :  { %1931 = vmatprep.subr.bf16.mxu0 %v1930_v17  ;;  %1794 = vmatprep.mubr.f32.mxu0 %v20_v29  ;;  %v96_v40 = vld [vmem:[%s3308_s2 + $0x60] sm:$0xff]  ;;  %v1914_v42 = vpack.c.bf16 %v177_v39, %v176_v38  ;;  %v179_v45 = vld [vmem:[%s3307_s3 + $0x78] sm:$0xff]  ;;  %v98_v46 = vld [vmem:[%s3308_s2 + $0x70] sm:$0xff] }
   0xc   :  { %v1946_v43 = vpack.c.bf16 %v97_v41, %v96_v40  ;;  %v99_v47 = vld [vmem:[%s3308_s2 + $0x78] sm:$0xff]  ;;  %v1918_v48 = vpack.c.bf16 %v179_v45, %v178_v44  ;;  %v101_v50 = vld [vmem:[%s3309_s1 + $0x8] sm:$0xff]  ;;  %v102_v52 = vld [vmem:[%s3309_s1 + $0x10] sm:$0xff] }
   0xd   :  { %1901 = vmatpush3.bf16.msra.mxu1 %v1898_v16  ;;  %v1950_v49 = vpack.c.bf16 %v99_v47, %v98_v46  ;;  %v21_v51 = vld [vmem:[%s3310_s0 + $0x8] sm:$0xff]  ;;  %v22_v53 = vld [vmem:[%s3310_s0 + $0x10] sm:$0xff]  ;;  %v103_v54 = vld [vmem:[%s3309_s1 + $0x18] sm:$0xff] }
   0xe   :  { %1933 = vmatpush3.bf16.msra.mxu0 %v1930_v17  ;;  %1903 = vmatprep.subr.bf16.mxu1 %v1902_v22  ;;  %v23_v55 = vld [vmem:[%s3310_s0 + $0x18] sm:$0xff]  ;;  %v104_v56 = vld [vmem:[%s3309_s1 + $0x20] sm:$0xff]  ;;  %v105_v58 = vld [vmem:[%s3309_s1 + $0x28] sm:$0xff] }
   0xf   :  { %1935 = vmatprep.subr.bf16.mxu0 %v1934_v23  ;;  %v24_v57 = vld [vmem:[%s3310_s0 + $0x20] sm:$0xff]  ;;  %v25_v59 = vld [vmem:[%s3310_s0 + $0x28] sm:$0xff]  ;;  %v106_v60 = vld [vmem:[%s3309_s1 + $0x30] sm:$0xff] }
  0x10   :  { %v26_v61 = vld [vmem:[%s3310_s0 + $0x30] sm:$0xff]  ;;  %v107_v62 = vld [vmem:[%s3309_s1 + $0x38] sm:$0xff]  ;;  %v108_v0 = vld [vmem:[%s3309_s1 + $0x40] sm:$0xff] }
  0x11   :  { %1905 = vmatpush3.bf16.msra.mxu1 %v1902_v22  ;;  %v27_v63 = vld [vmem:[%s3310_s0 + $0x38] sm:$0xff]  ;;  %v28_v1 = vld [vmem:[%s3310_s0 + $0x40] sm:$0xff]  ;;  %v109_v2 = vld [vmem:[%s3309_s1 + $0x48] sm:$0xff] }
  0x12   :  { %1937 = vmatpush3.bf16.msra.mxu0 %v1934_v23  ;;  %1907 = vmatprep.subr.bf16.mxu1 %v1906_v30  ;;  %v29_v3 = vld [vmem:[%s3310_s0 + $0x48] sm:$0xff]  ;;  %v110_v4 = vld [vmem:[%s3309_s1 + $0x50] sm:$0xff]  ;;  %v111_v6 = vld [vmem:[%s3309_s1 + $0x58] sm:$0xff] }
  0x13   :  { %1939 = vmatprep.subr.bf16.mxu0 %v1938_v31  ;;  %v30_v5 = vld [vmem:[%s3310_s0 + $0x50] sm:$0xff]  ;;  %v31_v7 = vld [vmem:[%s3310_s0 + $0x58] sm:$0xff]  ;;  %v112_v8 = vld [vmem:[%s3309_s1 + $0x60] sm:$0xff] }
  0x14   :  { %v32_v9 = vld [vmem:[%s3310_s0 + $0x60] sm:$0xff]  ;;  %v113_v10 = vld [vmem:[%s3309_s1 + $0x68] sm:$0xff]  ;;  %v114_v12 = vld [vmem:[%s3309_s1 + $0x70] sm:$0xff] }
  0x15   :  { %1909 = vmatpush3.bf16.msra.mxu1 %v1906_v30  ;;  %v33_v11 = vld [vmem:[%s3310_s0 + $0x68] sm:$0xff]  ;;  %v34_v13 = vld [vmem:[%s3310_s0 + $0x70] sm:$0xff]  ;;  %v115_v14 = vld [vmem:[%s3309_s1 + $0x78] sm:$0xff] }
  0x16   :  { %1941 = vmatpush3.bf16.msra.mxu0 %v1938_v31  ;;  %1911 = vmatprep.subr.bf16.mxu1 %v1910_v36  ;;  %v35_v15 = vld [vmem:[%s3310_s0 + $0x78] sm:$0xff]  ;;  %v116_v16 = vld [vmem:[%s3309_s1 + $0x80] sm:$0xff]  ;;  %v117_v18 = vld [vmem:[%s3309_s1 + $0x88] sm:$0xff] }
  0x17   :  { %1943 = vmatprep.subr.bf16.mxu0 %v1942_v37  ;;  %v36_v17 = vld [vmem:[%s3310_s0 + $0x80] sm:$0xff]  ;;  %v37_v19 = vld [vmem:[%s3310_s0 + $0x88] sm:$0xff]  ;;  %v118_v20 = vld [vmem:[%s3309_s1 + $0x90] sm:$0xff] }
  0x18   :  { %v38_v21 = vld [vmem:[%s3310_s0 + $0x90] sm:$0xff]  ;;  %v119_v22 = vld [vmem:[%s3309_s1 + $0x98] sm:$0xff]  ;;  %v120_v24 = vld [vmem:[%s3309_s1 + $0xa0] sm:$0xff] }
  0x19   :  { %1913 = vmatpush3.bf16.msra.mxu1 %v1910_v36  ;;  %v39_v23 = vld [vmem:[%s3310_s0 + $0x98] sm:$0xff]  ;;  %v40_v25 = vld [vmem:[%s3310_s0 + $0xa0] sm:$0xff]  ;;  %v121_v26 = vld [vmem:[%s3309_s1 + $0xa8] sm:$0xff] }
  0x1a   :  { %1945 = vmatpush3.bf16.msra.mxu0 %v1942_v37  ;;  %1915 = vmatprep.subr.bf16.mxu1 %v1914_v42  ;;  %v41_v27 = vld [vmem:[%s3310_s0 + $0xa8] sm:$0xff]  ;;  %v122_v28 = vld [vmem:[%s3309_s1 + $0xb0] sm:$0xff]  ;;  %v123_v30 = vld [vmem:[%s3309_s1 + $0xb8] sm:$0xff] }
  0x1b   :  { %1947 = vmatprep.subr.bf16.mxu0 %v1946_v43  ;;  %v42_v29 = vld [vmem:[%s3310_s0 + $0xb0] sm:$0xff]  ;;  %v43_v31 = vld [vmem:[%s3310_s0 + $0xb8] sm:$0xff]  ;;  %v124_v32 = vld [vmem:[%s3309_s1 + $0xc0] sm:$0xff] }
  0x1c   :  { %v44_v33 = vld [vmem:[%s3310_s0 + $0xc0] sm:$0xff]  ;;  %v125_v34 = vld [vmem:[%s3309_s1 + $0xc8] sm:$0xff]  ;;  %v126_v36 = vld [vmem:[%s3309_s1 + $0xd0] sm:$0xff] }
  0x1d   :  { %1917 = vmatpush3.bf16.msra.mxu1 %v1914_v42  ;;  %v45_v35 = vld [vmem:[%s3310_s0 + $0xc8] sm:$0xff]  ;;  %v46_v37 = vld [vmem:[%s3310_s0 + $0xd0] sm:$0xff]  ;;  %v127_v38 = vld [vmem:[%s3309_s1 + $0xd8] sm:$0xff] }
  0x1e   :  { %1949 = vmatpush3.bf16.msra.mxu0 %v1946_v43  ;;  %1919 = vmatprep.subr.bf16.mxu1 %v1918_v48  ;;  %v47_v39 = vld [vmem:[%s3310_s0 + $0xd8] sm:$0xff]  ;;  %v128_v40 = vld [vmem:[%s3309_s1 + $0xe0] sm:$0xff]  ;;  %v129_v42 = vld [vmem:[%s3309_s1 + $0xe8] sm:$0xff] }
  0x1f   :  { %1951 = vmatprep.subr.bf16.mxu0 %v1950_v49  ;;  %v48_v41 = vld [vmem:[%s3310_s0 + $0xe0] sm:$0xff]  ;;  %v49_v43 = vld [vmem:[%s3310_s0 + $0xe8] sm:$0xff]  ;;  %v130_v44 = vld [vmem:[%s3309_s1 + $0xf0] sm:$0xff] }
  0x20   :  { %v50_v45 = vld [vmem:[%s3310_s0 + $0xf0] sm:$0xff]  ;;  %v131_v46 = vld [vmem:[%s3309_s1 + $0xf8] sm:$0xff] }
  0x21   :  { %1921 = vmatpush3.bf16.msra.mxu1 %v1918_v48  ;;  %v51_v47 = vld [vmem:[%s3310_s0 + $0xf8] sm:$0xff]  ;;  %v132_v48 = vld [vmem:[%s3309_s1 + $0x100] sm:$0xff] }
  0x22   :  { %1953 = vmatpush3.bf16.msra.mxu0 %v1950_v49  ;;  %v52_v49 = vld [vmem:[%s3310_s0 + $0x100] sm:$0xff] }
  0x24   :  { %1667 = vmatmul.mubr.f32.vlgmr.msra.gmra.mrb[0].mxu1 %v101_v50  ;;  %v133_v50 = vld [vmem:[%s3309_s1 + $0x108] sm:$0xff] }
  0x25   :  { %1795 = vmatmul.mubr.f32.vlgmr.msra.gmra.mrb[0].mxu0 %v21_v51  ;;  %1669 = vmatprep.mubr.f32.mxu1 %v102_v52  ;;  %v53_v51 = vld [vmem:[%s3310_s0 + $0x108] sm:$0xff]  ;;  %v134_v52 = vld [vmem:[%s3309_s1 + $0x110] sm:$0xff] }
  0x26   :  { %1797 = vmatprep.mubr.f32.mxu0 %v22_v53  ;;  %v54_v53 = vld [vmem:[%s3310_s0 + $0x110] sm:$0xff] }
  0x28   :  { %1670 = vmatmul.mubr.f32.gmra.mrb[2].mxu1 %v103_v54  ;;  %v135_v54 = vld [vmem:[%s3309_s1 + $0x118] sm:$0xff] }
  0x29   :  { %1798 = vmatmul.mubr.f32.gmra.mrb[2].mxu0 %v23_v55  ;;  %1672 = vmatprep.mubr.f32.mxu1 %v104_v56  ;;  %v55_v55 = vld [vmem:[%s3310_s0 + $0x118] sm:$0xff]  ;;  %v136_v56 = vld [vmem:[%s3309_s1 + $0x120] sm:$0xff] }
  0x2a   :  { %1800 = vmatprep.mubr.f32.mxu0 %v24_v57  ;;  %v56_v57 = vld [vmem:[%s3310_s0 + $0x120] sm:$0xff] }
  0x2c   :  { %1673 = vmatmul.mubr.f32.gmra.mrb[4].mxu1 %v105_v58  ;;  %v137_v58 = vld [vmem:[%s3309_s1 + $0x128] sm:$0xff] }
  0x2d   :  { %1801 = vmatmul.mubr.f32.gmra.mrb[4].mxu0 %v25_v59  ;;  %1675 = vmatprep.mubr.f32.mxu1 %v106_v60  ;;  %v57_v59 = vld [vmem:[%s3310_s0 + $0x128] sm:$0xff]  ;;  %v138_v60 = vld [vmem:[%s3309_s1 + $0x130] sm:$0xff] }
  0x2e   :  { %1803 = vmatprep.mubr.f32.mxu0 %v26_v61  ;;  %v58_v61 = vld [vmem:[%s3310_s0 + $0x130] sm:$0xff] }
  0x30   :  { %1676 = vmatmul.mubr.f32.gmra.mrb[6].mxu1 %v107_v62  ;;  %v139_v62 = vld [vmem:[%s3309_s1 + $0x138] sm:$0xff] }
  0x31   :  { %1804 = vmatmul.mubr.f32.gmra.mrb[6].mxu0 %v27_v63  ;;  %1678 = vmatprep.mubr.f32.mxu1 %v108_v0  ;;  %v59_v63 = vld [vmem:[%s3310_s0 + $0x138] sm:$0xff]  ;;  %v140_v0 = vld [vmem:[%s3309_s1 + $0x140] sm:$0xff] }
  0x32   :  { %1806 = vmatprep.mubr.f32.mxu0 %v28_v1  ;;  %v60_v1 = vld [vmem:[%s3310_s0 + $0x140] sm:$0xff] }
  0x34   :  { %1679 = vmatmul.mubr.f32.gmra.mrb[8].mxu1 %v109_v2  ;;  %v141_v2 = vld [vmem:[%s3309_s1 + $0x148] sm:$0xff] }
  0x35   :  { %1807 = vmatmul.mubr.f32.gmra.mrb[8].mxu0 %v29_v3  ;;  %1681 = vmatprep.mubr.f32.mxu1 %v110_v4  ;;  %v61_v3 = vld [vmem:[%s3310_s0 + $0x148] sm:$0xff]  ;;  %v142_v4 = vld [vmem:[%s3309_s1 + $0x150] sm:$0xff] }
  0x36   :  { %1809 = vmatprep.mubr.f32.mxu0 %v30_v5  ;;  %v62_v5 = vld [vmem:[%s3310_s0 + $0x150] sm:$0xff] }
  0x38   :  { %1682 = vmatmul.mubr.f32.gmra.mrb[10].mxu1 %v111_v6  ;;  %v143_v6 = vld [vmem:[%s3309_s1 + $0x158] sm:$0xff] }
  0x39   :  { %1810 = vmatmul.mubr.f32.gmra.mrb[10].mxu0 %v31_v7  ;;  %1684 = vmatprep.mubr.f32.mxu1 %v112_v8  ;;  %v63_v7 = vld [vmem:[%s3310_s0 + $0x158] sm:$0xff]  ;;  %v144_v8 = vld [vmem:[%s3309_s1 + $0x160] sm:$0xff] }
  0x3a   :  { %1812 = vmatprep.mubr.f32.mxu0 %v32_v9  ;;  %v64_v9 = vld [vmem:[%s3310_s0 + $0x160] sm:$0xff] }
  0x3c   :  { %1685 = vmatmul.mubr.f32.gmra.mrb[12].mxu1 %v113_v10  ;;  %v145_v10 = vld [vmem:[%s3309_s1 + $0x168] sm:$0xff] }
  0x3d   :  { %1813 = vmatmul.mubr.f32.gmra.mrb[12].mxu0 %v33_v11  ;;  %1687 = vmatprep.mubr.f32.mxu1 %v114_v12  ;;  %v65_v11 = vld [vmem:[%s3310_s0 + $0x168] sm:$0xff]  ;;  %v146_v12 = vld [vmem:[%s3309_s1 + $0x170] sm:$0xff] }
  0x3e   :  { %1815 = vmatprep.mubr.f32.mxu0 %v34_v13  ;;  %v66_v13 = vld [vmem:[%s3310_s0 + $0x170] sm:$0xff] }
  0x40   :  { %1688 = vmatmul.mubr.f32.gmra.mrb[14].mxu1 %v115_v14  ;;  %v147_v14 = vld [vmem:[%s3309_s1 + $0x178] sm:$0xff] }
  0x41   :  { %1816 = vmatmul.mubr.f32.gmra.mrb[14].mxu0 %v35_v15  ;;  %1690 = vmatprep.mubr.f32.mxu1 %v116_v16  ;;  %v67_v15 = vld [vmem:[%s3310_s0 + $0x178] sm:$0xff]  ;;  %v148_v16 = vld [vmem:[%s3309_s1 + $0x180] sm:$0xff] }
  0x42   :  { %1818 = vmatprep.mubr.f32.mxu0 %v36_v17  ;;  %v68_v17 = vld [vmem:[%s3310_s0 + $0x180] sm:$0xff] }
  0x44   :  { %1691 = vmatmul.mubr.f32.gmra.mrb[16].mxu1 %v117_v18  ;;  %v149_v18 = vld [vmem:[%s3309_s1 + $0x188] sm:$0xff] }
  0x45   :  { %1819 = vmatmul.mubr.f32.gmra.mrb[16].mxu0 %v37_v19  ;;  %1693 = vmatprep.mubr.f32.mxu1 %v118_v20  ;;  %v69_v19 = vld [vmem:[%s3310_s0 + $0x188] sm:$0xff]  ;;  %v150_v20 = vld [vmem:[%s3309_s1 + $0x190] sm:$0xff] }
  0x46   :  { %1821 = vmatprep.mubr.f32.mxu0 %v38_v21  ;;  %v70_v21 = vld [vmem:[%s3310_s0 + $0x190] sm:$0xff] }
  0x48   :  { %1694 = vmatmul.mubr.f32.gmra.mrb[18].mxu1 %v119_v22  ;;  %v151_v22 = vld [vmem:[%s3309_s1 + $0x198] sm:$0xff] }
  0x49   :  { %1822 = vmatmul.mubr.f32.gmra.mrb[18].mxu0 %v39_v23  ;;  %1696 = vmatprep.mubr.f32.mxu1 %v120_v24  ;;  %v71_v23 = vld [vmem:[%s3310_s0 + $0x198] sm:$0xff]  ;;  %v152_v24 = vld [vmem:[%s3309_s1 + $0x1a0] sm:$0xff] }
  0x4a   :  { %1824 = vmatprep.mubr.f32.mxu0 %v40_v25  ;;  %v72_v25 = vld [vmem:[%s3310_s0 + $0x1a0] sm:$0xff] }
  0x4c   :  { %1697 = vmatmul.mubr.f32.gmra.mrb[20].mxu1 %v121_v26  ;;  %v153_v26 = vld [vmem:[%s3309_s1 + $0x1a8] sm:$0xff] }
  0x4d   :  { %1825 = vmatmul.mubr.f32.gmra.mrb[20].mxu0 %v41_v27  ;;  %1699 = vmatprep.mubr.f32.mxu1 %v122_v28  ;;  %v73_v27 = vld [vmem:[%s3310_s0 + $0x1a8] sm:$0xff]  ;;  %v154_v28 = vld [vmem:[%s3309_s1 + $0x1b0] sm:$0xff] }
  0x4e   :  { %1827 = vmatprep.mubr.f32.mxu0 %v42_v29  ;;  %v74_v29 = vld [vmem:[%s3310_s0 + $0x1b0] sm:$0xff] }
  0x50   :  { %1700 = vmatmul.mubr.f32.gmra.mrb[22].mxu1 %v123_v30  ;;  %v155_v30 = vld [vmem:[%s3309_s1 + $0x1b8] sm:$0xff] }
  0x51   :  { %1828 = vmatmul.mubr.f32.gmra.mrb[22].mxu0 %v43_v31  ;;  %1702 = vmatprep.mubr.f32.mxu1 %v124_v32  ;;  %v75_v31 = vld [vmem:[%s3310_s0 + $0x1b8] sm:$0xff]  ;;  %v156_v32 = vld [vmem:[%s3309_s1 + $0x1c0] sm:$0xff] }
  0x52   :  { %1830 = vmatprep.mubr.f32.mxu0 %v44_v33  ;;  %v76_v33 = vld [vmem:[%s3310_s0 + $0x1c0] sm:$0xff] }
  0x54   :  { %1703 = vmatmul.mubr.f32.gmra.mrb[24].mxu1 %v125_v34  ;;  %v157_v34 = vld [vmem:[%s3309_s1 + $0x1c8] sm:$0xff] }
  0x55   :  { %1831 = vmatmul.mubr.f32.gmra.mrb[24].mxu0 %v45_v35  ;;  %1705 = vmatprep.mubr.f32.mxu1 %v126_v36  ;;  %v77_v35 = vld [vmem:[%s3310_s0 + $0x1c8] sm:$0xff]  ;;  %v158_v36 = vld [vmem:[%s3309_s1 + $0x1d0] sm:$0xff] }
  0x56   :  { %1833 = vmatprep.mubr.f32.mxu0 %v46_v37  ;;  %v78_v37 = vld [vmem:[%s3310_s0 + $0x1d0] sm:$0xff] }
  0x58   :  { %1706 = vmatmul.mubr.f32.gmra.mrb[26].mxu1 %v127_v38  ;;  %v159_v38 = vld [vmem:[%s3309_s1 + $0x1d8] sm:$0xff] }
  0x59   :  { %1834 = vmatmul.mubr.f32.gmra.mrb[26].mxu0 %v47_v39  ;;  %1708 = vmatprep.mubr.f32.mxu1 %v128_v40  ;;  %v79_v39 = vld [vmem:[%s3310_s0 + $0x1d8] sm:$0xff]  ;;  %v160_v40 = vld [vmem:[%s3309_s1 + $0x1e0] sm:$0xff] }
  0x5a   :  { %1836 = vmatprep.mubr.f32.mxu0 %v48_v41  ;;  %v80_v41 = vld [vmem:[%s3310_s0 + $0x1e0] sm:$0xff] }
  0x5c   :  { %1709 = vmatmul.mubr.f32.gmra.mrb[28].mxu1 %v129_v42  ;;  %v161_v42 = vld [vmem:[%s3309_s1 + $0x1e8] sm:$0xff] }
  0x5d   :  { %1837 = vmatmul.mubr.f32.gmra.mrb[28].mxu0 %v49_v43  ;;  %1711 = vmatprep.mubr.f32.mxu1 %v130_v44  ;;  %v81_v43 = vld [vmem:[%s3310_s0 + $0x1e8] sm:$0xff]  ;;  %v162_v44 = vld [vmem:[%s3309_s1 + $0x1f0] sm:$0xff] }
  0x5e   :  { %1839 = vmatprep.mubr.f32.mxu0 %v50_v45  ;;  %v82_v45 = vld [vmem:[%s3310_s0 + $0x1f0] sm:$0xff] }
  0x60   :  { %1712 = vmatmul.mubr.f32.gmra.mrb[30].mxu1 %v131_v46  ;;  %v163_v46 = vld [vmem:[%s3309_s1 + $0x1f8] sm:$0xff] }
  0x61   :  { %1840 = vmatmul.mubr.f32.gmra.mrb[30].mxu0 %v51_v47  ;;  %1714 = vmatprep.mubr.f32.mxu1 %v132_v48  ;;  %v83_v47 = vld [vmem:[%s3310_s0 + $0x1f8] sm:$0xff] }
  0x62   :  { %1842 = vmatprep.mubr.f32.mxu0 %v52_v49 }
  0x64   :  { %1715 = vmatmul.mubr.f32.gmra.mrb[32].mxu1 %v133_v50  ;;  %v2788_v50 = vld [vmem:[%s3311_s4] ss:$0 sm:$0xff] }
  0x65   :  { %1843 = vmatmul.mubr.f32.gmra.mrb[32].mxu0 %v53_v51  ;;  %1717 = vmatprep.mubr.f32.mxu1 %v134_v52 }
  0x66   :  { %1845 = vmatprep.mubr.f32.mxu0 %v54_v53 }
  0x68   :  { %1718 = vmatmul.mubr.f32.gmra.mrb[34].mxu1 %v135_v54 }
  0x69   :  { %1846 = vmatmul.mubr.f32.gmra.mrb[34].mxu0 %v55_v55  ;;  %1720 = vmatprep.mubr.f32.mxu1 %v136_v56 }
  0x6a   :  { %1848 = vmatprep.mubr.f32.mxu0 %v56_v57 }
  0x6c   :  { %1721 = vmatmul.mubr.f32.gmra.mrb[36].mxu1 %v137_v58 }
  0x6d   :  { %1849 = vmatmul.mubr.f32.gmra.mrb[36].mxu0 %v57_v59  ;;  %1723 = vmatprep.mubr.f32.mxu1 %v138_v60 }
  0x6e   :  { %1851 = vmatprep.mubr.f32.mxu0 %v58_v61 }
  0x70   :  { %1724 = vmatmul.mubr.f32.gmra.mrb[38].mxu1 %v139_v62 }
  0x71   :  { %1852 = vmatmul.mubr.f32.gmra.mrb[38].mxu0 %v59_v63  ;;  %1726 = vmatprep.mubr.f32.mxu1 %v140_v0 }
  0x72   :  { %1854 = vmatprep.mubr.f32.mxu0 %v60_v1 }
  0x74   :  { %1727 = vmatmul.mubr.f32.gmra.mrb[40].mxu1 %v141_v2 }
  0x75   :  { %1855 = vmatmul.mubr.f32.gmra.mrb[40].mxu0 %v61_v3  ;;  %1729 = vmatprep.mubr.f32.mxu1 %v142_v4 }
  0x76   :  { %1857 = vmatprep.mubr.f32.mxu0 %v62_v5 }
  0x78   :  { %1730 = vmatmul.mubr.f32.gmra.mrb[42].mxu1 %v143_v6 }
  0x79   :  { %1858 = vmatmul.mubr.f32.gmra.mrb[42].mxu0 %v63_v7  ;;  %1732 = vmatprep.mubr.f32.mxu1 %v144_v8 }
  0x7a   :  { %1860 = vmatprep.mubr.f32.mxu0 %v64_v9 }
  0x7c   :  { %1733 = vmatmul.mubr.f32.gmra.mrb[44].mxu1 %v145_v10 }
  0x7d   :  { %1861 = vmatmul.mubr.f32.gmra.mrb[44].mxu0 %v65_v11  ;;  %1735 = vmatprep.mubr.f32.mxu1 %v146_v12 }
  0x7e   :  { %1863 = vmatprep.mubr.f32.mxu0 %v66_v13 }
  0x80   :  { %1736 = vmatmul.mubr.f32.gmra.mrb[46].mxu1 %v147_v14 }
  0x81   :  { %1864 = vmatmul.mubr.f32.gmra.mrb[46].mxu0 %v67_v15  ;;  %1738 = vmatprep.mubr.f32.mxu1 %v148_v16 }
  0x82   :  { %1866 = vmatprep.mubr.f32.mxu0 %v68_v17 }
  0x84   :  { %1739 = vmatmul.mubr.f32.gmra.mrb[48].mxu1 %v149_v18 }
  0x85   :  { %1867 = vmatmul.mubr.f32.gmra.mrb[48].mxu0 %v69_v19  ;;  %1741 = vmatprep.mubr.f32.mxu1 %v150_v20 }
  0x86   :  { %1869 = vmatprep.mubr.f32.mxu0 %v70_v21 }
  0x88   :  { %1742 = vmatmul.mubr.f32.gmra.mrb[50].mxu1 %v151_v22 }
  0x89   :  { %1870 = vmatmul.mubr.f32.gmra.mrb[50].mxu0 %v71_v23  ;;  %1744 = vmatprep.mubr.f32.mxu1 %v152_v24 }
  0x8a   :  { %1872 = vmatprep.mubr.f32.mxu0 %v72_v25 }
  0x8c   :  { %1745 = vmatmul.mubr.f32.gmra.mrb[52].mxu1 %v153_v26 }
  0x8d   :  { %1873 = vmatmul.mubr.f32.gmra.mrb[52].mxu0 %v73_v27  ;;  %1747 = vmatprep.mubr.f32.mxu1 %v154_v28 }
  0x8e   :  { %1875 = vmatprep.mubr.f32.mxu0 %v74_v29 }
  0x90   :  { %1748 = vmatmul.mubr.f32.gmra.mrb[54].mxu1 %v155_v30 }
  0x91   :  { %1876 = vmatmul.mubr.f32.gmra.mrb[54].mxu0 %v75_v31  ;;  %1750 = vmatprep.mubr.f32.mxu1 %v156_v32 }
  0x92   :  { %1878 = vmatprep.mubr.f32.mxu0 %v76_v33 }
  0x94   :  { %1751 = vmatmul.mubr.f32.gmra.mrb[56].mxu1 %v157_v34 }
  0x95   :  { %1879 = vmatmul.mubr.f32.gmra.mrb[56].mxu0 %v77_v35  ;;  %1753 = vmatprep.mubr.f32.mxu1 %v158_v36 }
  0x96   :  { %1881 = vmatprep.mubr.f32.mxu0 %v78_v37 }
  0x98   :  { %1754 = vmatmul.mubr.f32.gmra.mrb[58].mxu1 %v159_v38 }
  0x99   :  { %1882 = vmatmul.mubr.f32.gmra.mrb[58].mxu0 %v79_v39  ;;  %1756 = vmatprep.mubr.f32.mxu1 %v160_v40 }
  0x9a   :  { %1884 = vmatprep.mubr.f32.mxu0 %v80_v41 }
  0x9c   :  { %1757 = vmatmul.mubr.f32.gmra.mrb[60].mxu1 %v161_v42 }
  0x9d   :  { %1885 = vmatmul.mubr.f32.gmra.mrb[60].mxu0 %v81_v43  ;;  %1759 = vmatprep.mubr.f32.mxu1 %v162_v44 }
  0x9e   :  { %1887 = vmatprep.mubr.f32.mxu0 %v82_v45 }
  0xa0   :  { %1760 = vmatmul.mubr.f32.gmra.mrb[62].mxu1 %v163_v46 }
  0xa1   :  { %1888 = vmatmul.mubr.f32.gmra.mrb[62].mxu0 %v83_v47 }
  0xf7   :  { %v1668_v48 = vpop.f32.mrb[0].mxu1 }
  0xf8   :  { %v1796_v49 = vpop.f32.mrb[0].mxu0  ;;  %v246_v51 = vpop.f32.mrb[1].mxu1 }
  0xf9   :  { %v637_v52 = vadd.f32 %v1796_v49, %v1668_v48  ;;  %v631_v53 = vpop.f32.mrb[1].mxu0 }
  0xfa   :  { %v632_v54 = vadd.f32 %v631_v53, %v246_v51 }
  0xfb   :  { %v2791_v55 = vadd.f32 %v2788_v50, %v637_v52  ;;  %v1671_v56 = vpop.f32.mrb[2].mxu1 }
  0xfc   :  { %v2794_v57 = vadd.f32 %v2788_v50, %v632_v54  ;;  %v1799_v58 = vpop.f32.mrb[2].mxu0  ;;  %v256_v59 = vpop.f32.mrb[3].mxu1 }
  0xfd   :  { %v1022_v60 = vsub.f32 0.0, %v2791_v55  ;;  %v647_v61 = vadd.f32 %v1799_v58, %v1671_v56  ;;  %v641_v62 = vpop.f32.mrb[3].mxu0 }
  0xfe   :  { %v1021_v63 = vsub.f32 0.0, %v2794_v57  ;;  %v642_v0 = vadd.f32 %v641_v62, %v256_v59 }
  0xff   :  { %v1087_v1 = vmul.f32 1.442695, %v1022_v60  ;;  %v2799_v2 = vadd.f32 %v2788_v50, %v647_v61  ;;  %v1674_v3 = vpop.f32.mrb[4].mxu1 }
 0x100   :  { %v1085_v4 = vmul.f32 1.442695, %v1021_v63  ;;  %v2802_v5 = vadd.f32 %v2788_v50, %v642_v0  ;;  %v1802_v6 = vpop.f32.mrb[4].mxu0  ;;  %v266_v7 = vpop.f32.mrb[5].mxu1 }
 0x101   :  { %2018 = vpow2.f32 %v1087_v1  ;;  %v1024_v8 = vsub.f32 0.0, %v2799_v2  ;;  %v657_v9 = vadd.f32 %v1802_v6, %v1674_v3  ;;  %v651_v10 = vpop.f32.mrb[5].mxu0 }
 0x102   :  { %2020 = vpow2.f32 %v1085_v4  ;;  %v1023_v11 = vsub.f32 0.0, %v2802_v5  ;;  %v652_v12 = vadd.f32 %v651_v10, %v266_v7 }
 0x103   :  { %v1091_v13 = vmul.f32 1.442695, %v1024_v8  ;;  %v2807_v14 = vadd.f32 %v2788_v50, %v657_v9  ;;  %v1677_v15 = vpop.f32.mrb[6].mxu1 }
 0x104   :  { %v1089_v16 = vmul.f32 1.442695, %v1023_v11  ;;  %v2810_v17 = vadd.f32 %v2788_v50, %v652_v12  ;;  %v1805_v18 = vpop.f32.mrb[6].mxu0  ;;  %v276_v19 = vpop.f32.mrb[7].mxu1 }
 0x105   :  { %2022 = vpow2.f32 %v1091_v13  ;;  %v1026_v20 = vsub.f32 0.0, %v2807_v14  ;;  %v667_v21 = vadd.f32 %v1805_v18, %v1677_v15  ;;  %v661_v22 = vpop.f32.mrb[7].mxu0 }
 0x106   :  { %2024 = vpow2.f32 %v1089_v16  ;;  %v1025_v23 = vsub.f32 0.0, %v2810_v17  ;;  %v662_v24 = vadd.f32 %v661_v22, %v276_v19 }
 0x107   :  { %v1095_v25 = vmul.f32 1.442695, %v1026_v20  ;;  %v2815_v26 = vadd.f32 %v2788_v50, %v667_v21  ;;  %v1680_v27 = vpop.f32.mrb[8].mxu1 }
 0x108   :  { %v1093_v28 = vmul.f32 1.442695, %v1025_v23  ;;  %v2818_v29 = vadd.f32 %v2788_v50, %v662_v24  ;;  %v1808_v30 = vpop.f32.mrb[8].mxu0  ;;  %v286_v31 = vpop.f32.mrb[9].mxu1 }
 0x109   :  { %2026 = vpow2.f32 %v1095_v25  ;;  %v1028_v32 = vsub.f32 0.0, %v2815_v26  ;;  %v677_v33 = vadd.f32 %v1808_v30, %v1680_v27  ;;  %v671_v34 = vpop.f32.mrb[9].mxu0 }
 0x10a   :  { %2028 = vpow2.f32 %v1093_v28  ;;  %v1027_v35 = vsub.f32 0.0, %v2818_v29  ;;  %v672_v36 = vadd.f32 %v671_v34, %v286_v31 }
 0x10b   :  { %v2019_v37 = vpop.eup %2018  ;;  %v1099_v38 = vmul.f32 1.442695, %v1028_v32  ;;  %v2823_v39 = vadd.f32 %v2788_v50, %v677_v33  ;;  %v1683_v40 = vpop.f32.mrb[10].mxu1 }
 0x10c   :  { %v2021_v41 = vpop.eup %2020  ;;  %v1214_v42 = vadd.f32 1.0, %v2019_v37  ;;  %v1097_v43 = vmul.f32 1.442695, %v1027_v35  ;;  %v2826_v44 = vadd.f32 %v2788_v50, %v672_v36  ;;  %v1811_v45 = vpop.f32.mrb[10].mxu0 }
 0x10d   :  { %v296_v46 = vpop.f32.mrb[11].mxu1  ;;  %v1213_v47 = vadd.f32 1.0, %v2021_v41  ;;  %2030 = vpow2.f32 %v1099_v38  ;;  %v1030_v48 = vsub.f32 0.0, %v2823_v39  ;;  %v687_v49 = vadd.f32 %v1811_v45, %v1683_v40  ;;  %v681_v51 = vpop.f32.mrb[11].mxu0 }
 0x10e   :  { %2032 = vrcp.f32 %v1214_v42  ;;  %v1029_v52 = vsub.f32 0.0, %v2826_v44  ;;  %v682_v53 = vadd.f32 %v681_v51, %v296_v46 }
 0x10f   :  { %v2023_v54 = vpop.eup %2022  ;;  %2034 = vrcp.f32 %v1213_v47  ;;  %v1103_v56 = vmul.f32 1.442695, %v1030_v48  ;;  %v2831_v58 = vadd.f32 %v2788_v50, %v687_v49  ;;  %v1686_v59 = vpop.f32.mrb[12].mxu1 }
 0x110   :  { %v2025_v60 = vpop.eup %2024  ;;  %v1216_v61 = vadd.f32 1.0, %v2023_v54  ;;  %2036 = vpow2.f32 %v1097_v43  ;;  %v1101_v62 = vmul.f32 1.442695, %v1029_v52  ;;  %v2834_v63 = vadd.f32 %v2788_v50, %v682_v53  ;;  %v1814_v0 = vpop.f32.mrb[12].mxu0 }
 0x111   :  { %v306_v1 = vpop.f32.mrb[13].mxu1  ;;  %v1215_v3 = vadd.f32 1.0, %v2025_v60  ;;  %2038 = vpow2.f32 %v1103_v56  ;;  %v1032_v4 = vsub.f32 0.0, %v2831_v58  ;;  %v697_v6 = vadd.f32 %v1814_v0, %v1686_v59  ;;  %v691_v7 = vpop.f32.mrb[13].mxu0 }
 0x112   :  { %2040 = vrcp.f32 %v1216_v61  ;;  %v1031_v8 = vsub.f32 0.0, %v2834_v63  ;;  %v692_v9 = vadd.f32 %v691_v7, %v306_v1 }
 0x113   :  { %v2027_v10 = vpop.eup %2026  ;;  %2042 = vrcp.f32 %v1215_v3  ;;  %v1107_v11 = vmul.f32 1.442695, %v1032_v4  ;;  %v2839_v12 = vadd.f32 %v2788_v50, %v697_v6  ;;  %v1689_v13 = vpop.f32.mrb[14].mxu1 }
 0x114   :  { %v2029_v15 = vpop.eup %2028  ;;  %v1218_v16 = vadd.f32 1.0, %v2027_v10  ;;  %2044 = vpow2.f32 %v1101_v62  ;;  %v1105_v18 = vmul.f32 1.442695, %v1031_v8  ;;  %v2842_v19 = vadd.f32 %v2788_v50, %v692_v9  ;;  %v1817_v20 = vpop.f32.mrb[14].mxu0 }
 0x115   :  { %v316_v21 = vpop.f32.mrb[15].mxu1  ;;  %v1217_v22 = vadd.f32 1.0, %v2029_v15  ;;  %2046 = vpow2.f32 %v1107_v11  ;;  %v1034_v23 = vsub.f32 0.0, %v2839_v12  ;;  %v707_v24 = vadd.f32 %v1817_v20, %v1689_v13  ;;  %v701_v25 = vpop.f32.mrb[15].mxu0 }
 0x116   :  { %2048 = vrcp.f32 %v1218_v16  ;;  %v1033_v27 = vsub.f32 0.0, %v2842_v19  ;;  %v702_v28 = vadd.f32 %v701_v25, %v316_v21 }
 0x117   :  { %v2031_v30 = vpop.eup %2030  ;;  %2050 = vrcp.f32 %v1217_v22  ;;  %v1111_v31 = vmul.f32 1.442695, %v1034_v23  ;;  %v2847_v32 = vadd.f32 %v2788_v50, %v707_v24  ;;  %v1692_v33 = vpop.f32.mrb[16].mxu1 }
 0x118   :  { %v2033_v34 = vpop.eup %2032  ;;  %v1220_v35 = vadd.f32 1.0, %v2031_v30  ;;  %2052 = vpow2.f32 %v1105_v18  ;;  %v1109_v36 = vmul.f32 1.442695, %v1033_v27  ;;  %v2850_v37 = vadd.f32 %v2788_v50, %v702_v28  ;;  %v1820_v38 = vpop.f32.mrb[16].mxu0 }
 0x119   :  { %v326_v40 = vpop.f32.mrb[17].mxu1  ;;  %v2035_v41 = vpop.eup %2034  ;;  %v1280_v42 = vmul.f32 %v2033_v34, %v2791_v55  ;;  %2054 = vpow2.f32 %v1111_v31  ;;  %v1036_v43 = vsub.f32 0.0, %v2847_v32  ;;  %v717_v45 = vadd.f32 %v1820_v38, %v1692_v33 }
 0x11a   :  { %v711_v46 = vpop.f32.mrb[17].mxu0  ;;  %v2037_v47 = vpop.eup %2036  ;;  %v1278_v48 = vmul.f32 %v2035_v41, %v2794_v57  ;;  %2056 = vrcp.f32 %v1220_v35  ;;  %v1035_v49 = vsub.f32 0.0, %v2850_v37 }
 0x11b   :  { %v712_v51 = vadd.f32 %v711_v46, %v326_v40  ;;  %v2039_v52 = vpop.eup %2038  ;;  %1406 = vst [vmem:[%s3312_s5 + $0x8] sm:$0xff] %v1280_v42  ;;  %v1219_v53 = vadd.f32 1.0, %v2037_v47  ;;  %2058 = vpow2.f32 %v1109_v36  ;;  %v1115_v55 = vmul.f32 1.442695, %v1036_v43  ;;  %v1695_v56 = vpop.f32.mrb[18].mxu1 }
 0x11c   :  { %v2860_v54 = vadd.f32 %v2788_v50, %v717_v45  ;;  %v2041_v59 = vpop.eup %2040  ;;  %1405 = vst [vmem:[%s3312_s5] sm:$0xff] %v1278_v48  ;;  %v1222_v57 = vadd.f32 1.0, %v2039_v52  ;;  %v1113_v60 = vmul.f32 1.442695, %v1035_v49  ;;  %v1823_v62 = vpop.f32.mrb[18].mxu0 }
 0x11d   :  { %v2866_v61 = vadd.f32 %v2788_v50, %v712_v51  ;;  %v336_v0 = vpop.f32.mrb[19].mxu1  ;;  %v2043_v1 = vpop.eup %2042  ;;  %v1284_v3 = vmul.f32 %v2041_v59, %v2799_v2  ;;  %2060 = vrcp.f32 %v1219_v53  ;;  %v727_v6 = vadd.f32 %v1823_v62, %v1695_v56 }
 0x11e   :  { %v1038_v4 = vsub.f32 0.0, %v2860_v54  ;;  %v721_v7 = vpop.f32.mrb[19].mxu0  ;;  %v2045_v8 = vpop.eup %2044  ;;  %v1282_v9 = vmul.f32 %v2043_v1, %v2802_v5  ;;  %2062 = vrcp.f32 %v1222_v57 }
 0x11f   :  { %v1037_v10 = vsub.f32 0.0, %v2866_v61  ;;  %v722_v11 = vadd.f32 %v721_v7, %v336_v0  ;;  %v2047_v13 = vpop.eup %2046  ;;  %1408 = vst [vmem:[%s3312_s5 + $0x18] sm:$0xff] %v1284_v3  ;;  %v1221_v15 = vadd.f32 1.0, %v2045_v8  ;;  %2064 = vpow2.f32 %v1115_v55  ;;  %v1698_v18 = vpop.f32.mrb[20].mxu1 }
 0x120   :  { %v1119_v2 = vmul.f32 1.442695, %v1038_v4  ;;  %v2876_v16 = vadd.f32 %v2788_v50, %v727_v6  ;;  %v2049_v20 = vpop.eup %2048  ;;  %1407 = vst [vmem:[%s3312_s5 + $0x10] sm:$0xff] %v1282_v9  ;;  %v1224_v5 = vadd.f32 1.0, %v2047_v13  ;;  %2066 = vpow2.f32 %v1113_v60  ;;  %v1826_v23 = vpop.f32.mrb[20].mxu0 }
 0x121   :  { %v1117_v21 = vmul.f32 1.442695, %v1037_v10  ;;  %v2882_v22 = vadd.f32 %v2788_v50, %v722_v11  ;;  %v346_v24 = vpop.f32.mrb[21].mxu1  ;;  %v2051_v25 = vpop.eup %2050  ;;  %v1288_v27 = vmul.f32 %v2049_v20, %v2807_v14  ;;  %2068 = vrcp.f32 %v1221_v15 }
 0x122   :  { %v1040_v28 = vsub.f32 0.0, %v2876_v16  ;;  %v737_v30 = vadd.f32 %v1826_v23, %v1698_v18  ;;  %v731_v31 = vpop.f32.mrb[21].mxu0  ;;  %v2053_v33 = vpop.eup %2052  ;;  %v1286_v34 = vmul.f32 %v2051_v25, %v2810_v17  ;;  %2070 = vrcp.f32 %v1224_v5 }
 0x123   :  { %v1039_v35 = vsub.f32 0.0, %v2882_v22  ;;  %v732_v36 = vadd.f32 %v731_v31, %v346_v24  ;;  %v2055_v38 = vpop.eup %2054  ;;  %1410 = vst [vmem:[%s3312_s5 + $0x28] sm:$0xff] %v1288_v27  ;;  %v1223_v40 = vadd.f32 1.0, %v2053_v33  ;;  %2072 = vpow2.f32 %v1119_v2  ;;  %v1701_v42 = vpop.f32.mrb[22].mxu1 }
 0x124   :  { %v1123_v14 = vmul.f32 1.442695, %v1040_v28  ;;  %v2892_v41 = vadd.f32 %v2788_v50, %v737_v30  ;;  %v2057_v43 = vpop.eup %2056  ;;  %1409 = vst [vmem:[%s3312_s5 + $0x20] sm:$0xff] %v1286_v34  ;;  %v1226_v17 = vadd.f32 1.0, %v2055_v38  ;;  %2074 = vpow2.f32 %v1117_v21  ;;  %v1829_v47 = vpop.f32.mrb[22].mxu0 }
 0x125   :  { %v1121_v45 = vmul.f32 1.442695, %v1039_v35  ;;  %v2898_v46 = vadd.f32 %v2788_v50, %v732_v36  ;;  %v356_v48 = vpop.f32.mrb[23].mxu1  ;;  %v2059_v49 = vpop.eup %2058  ;;  %v1292_v51 = vmul.f32 %v2057_v43, %v2815_v26  ;;  %2076 = vrcp.f32 %v1223_v40 }
 0x126   :  { %v1042_v52 = vsub.f32 0.0, %v2892_v41  ;;  %v747_v53 = vadd.f32 %v1829_v47, %v1701_v42  ;;  %v741_v55 = vpop.f32.mrb[23].mxu0  ;;  %2078 = vrcp.f32 %v1226_v17  ;;  %v1225_v56 = vadd.f32 1.0, %v2059_v49 }
 0x127   :  { %v1041_v59 = vsub.f32 0.0, %v2898_v46  ;;  %v742_v57 = vadd.f32 %v741_v55, %v356_v48  ;;  %v2061_v60 = vpop.eup %2060  ;;  %1412 = vst [vmem:[%s3312_s5 + $0x38] sm:$0xff] %v1292_v51  ;;  %2080 = vpow2.f32 %v1123_v14  ;;  %v1704_v26 = vpop.f32.mrb[24].mxu1 }
 0x128   :  { %v1127_v62 = vmul.f32 1.442695, %v1042_v52  ;;  %v2907_v0 = vadd.f32 %v2788_v50, %v747_v53  ;;  %v2063_v1 = vpop.eup %2062  ;;  %v1290_v3 = vmul.f32 %v2061_v60, %v2818_v29  ;;  %2082 = vrcp.f32 %v1225_v56  ;;  %v1832_v7 = vpop.f32.mrb[24].mxu0 }
 0x129   :  { %v1125_v4 = vmul.f32 1.442695, %v1041_v59  ;;  %v2911_v6 = vadd.f32 %v2788_v50, %v742_v57  ;;  %v366_v8 = vpop.f32.mrb[25].mxu1  ;;  %v2065_v9 = vpop.eup %2064  ;;  %v1296_v10 = vmul.f32 %v2063_v1, %v2823_v39  ;;  %2084 = vpow2.f32 %v1121_v45 }
 0x12a   :  { %v1044_v11 = vsub.f32 0.0, %v2907_v0  ;;  %v757_v13 = vadd.f32 %v1832_v7, %v1704_v26  ;;  %v751_v15 = vpop.f32.mrb[25].mxu0  ;;  %v2067_v2 = vpop.eup %2066  ;;  %1411 = vst [vmem:[%s3312_s5 + $0x30] sm:$0xff] %v1290_v3  ;;  %v1228_v29 = vadd.f32 1.0, %v2065_v9  ;;  %2086 = vpow2.f32 %v1127_v62 }
 0x12b   :  { %v1043_v18 = vsub.f32 0.0, %v2911_v6  ;;  %v752_v20 = vadd.f32 %v751_v15, %v366_v8  ;;  %v2069_v5 = vpop.eup %2068  ;;  %1414 = vst [vmem:[%s3312_s5 + $0x48] sm:$0xff] %v1296_v10  ;;  %v1227_v39 = vadd.f32 1.0, %v2067_v2  ;;  %2088 = vpow2.f32 %v1125_v4  ;;  %v1707_v24 = vpop.f32.mrb[26].mxu1 }
 0x12c   :  { %v1131_v21 = vmul.f32 1.442695, %v1044_v11  ;;  %v2923_v23 = vadd.f32 %v2788_v50, %v757_v13  ;;  %v2071_v25 = vpop.eup %2070  ;;  %v1294_v27 = vmul.f32 %v2069_v5, %v2826_v44  ;;  %2090 = vrcp.f32 %v1228_v29  ;;  %v1835_v31 = vpop.f32.mrb[26].mxu0 }
 0x12d   :  { %v1129_v28 = vmul.f32 1.442695, %v1043_v18  ;;  %v2927_v30 = vadd.f32 %v2788_v50, %v752_v20  ;;  %v376_v33 = vpop.f32.mrb[27].mxu1  ;;  %v2073_v34 = vpop.eup %2072  ;;  %v1300_v35 = vmul.f32 %v2071_v25, %v2831_v58  ;;  %2092 = vrcp.f32 %v1227_v39 }
 0x12e   :  { %v1046_v36 = vsub.f32 0.0, %v2923_v23  ;;  %v767_v38 = vadd.f32 %v1835_v31, %v1707_v24  ;;  %v761_v40 = vpop.f32.mrb[27].mxu0  ;;  %v2075_v14 = vpop.eup %2074  ;;  %1413 = vst [vmem:[%s3312_s5 + $0x40] sm:$0xff] %v1294_v27  ;;  %v1230_v44 = vadd.f32 1.0, %v2073_v34  ;;  %2094 = vpow2.f32 %v1131_v21 }
 0x12f   :  { %v1045_v42 = vsub.f32 0.0, %v2927_v30  ;;  %v762_v43 = vadd.f32 %v761_v40, %v376_v33  ;;  %v2077_v17 = vpop.eup %2076  ;;  %1416 = vst [vmem:[%s3312_s5 + $0x58] sm:$0xff] %v1300_v35  ;;  %v1229_v58 = vadd.f32 1.0, %v2075_v14  ;;  %2096 = vpow2.f32 %v1129_v28  ;;  %v1710_v48 = vpop.f32.mrb[28].mxu1 }
 0x130   :  { %v1135_v45 = vmul.f32 1.442695, %v1046_v36  ;;  %v2939_v47 = vadd.f32 %v2788_v50, %v767_v38  ;;  %v2079_v49 = vpop.eup %2078  ;;  %v1298_v51 = vmul.f32 %v2077_v17, %v2834_v63  ;;  %2098 = vrcp.f32 %v1230_v44  ;;  %v1838_v55 = vpop.f32.mrb[28].mxu0 }
 0x131   :  { %v1133_v52 = vmul.f32 1.442695, %v1045_v42  ;;  %v2943_v53 = vadd.f32 %v2788_v50, %v762_v43  ;;  %v386_v56 = vpop.f32.mrb[29].mxu1  ;;  %v2081_v59 = vpop.eup %2080  ;;  %v1304_v57 = vmul.f32 %v2079_v49, %v2839_v12  ;;  %2100 = vrcp.f32 %v1229_v58 }
 0x132   :  { %v1048_v60 = vsub.f32 0.0, %v2939_v47  ;;  %v777_v62 = vadd.f32 %v1838_v55, %v1710_v48  ;;  %v771_v26 = vpop.f32.mrb[29].mxu0  ;;  %v2083_v1 = vpop.eup %2082  ;;  %1415 = vst [vmem:[%s3312_s5 + $0x50] sm:$0xff] %v1298_v51  ;;  %v1232_v63 = vadd.f32 1.0, %v2081_v59  ;;  %2102 = vpow2.f32 %v1135_v45 }
 0x133   :  { %v1047_v3 = vsub.f32 0.0, %v2943_v53  ;;  %v772_v4 = vadd.f32 %v771_v26, %v386_v56  ;;  %v2085_v7 = vpop.eup %2084  ;;  %1418 = vst [vmem:[%s3312_s5 + $0x68] sm:$0xff] %v1304_v57  ;;  %v1302_v12 = vmul.f32 %v2083_v1, %v2842_v19  ;;  %2104 = vpow2.f32 %v1133_v52  ;;  %v1713_v10 = vpop.f32.mrb[30].mxu1 }
 0x134   :  { %v1139_v8 = vmul.f32 1.442695, %v1048_v60  ;;  %v2956_v9 = vadd.f32 %v2788_v50, %v777_v62  ;;  %v2087_v11 = vpop.eup %2086  ;;  %2106 = vrcp.f32 %v1232_v63  ;;  %v1231_v13 = vadd.f32 1.0, %v2085_v7  ;;  %v1841_v29 = vpop.f32.mrb[30].mxu0 }
 0x135   :  { %v1137_v15 = vmul.f32 1.442695, %v1047_v3  ;;  %v2959_v2 = vadd.f32 %v2788_v50, %v772_v4  ;;  %v396_v18 = vpop.f32.mrb[31].mxu1  ;;  %v2089_v20 = vpop.eup %2088  ;;  %1417 = vst [vmem:[%s3312_s5 + $0x60] sm:$0xff] %v1302_v12  ;;  %v1234_v19 = vadd.f32 1.0, %v2087_v11  ;;  %v787_v39 = vadd.f32 %v1841_v29, %v1713_v10 }
 0x136   :  { %2108 = vpow2.f32 %v1139_v8  ;;  %v1050_v5 = vsub.f32 0.0, %v2956_v9  ;;  %v781_v21 = vpop.f32.mrb[31].mxu0  ;;  %v2091_v24 = vpop.eup %2090  ;;  %v1233_v25 = vadd.f32 1.0, %v2089_v20 }
 0x137   :  { %2110 = vrcp.f32 %v1231_v13  ;;  %v1049_v27 = vsub.f32 0.0, %v2959_v2  ;;  %v782_v28 = vadd.f32 %v781_v21, %v396_v18  ;;  %v2093_v31 = vpop.eup %2092  ;;  %v1308_v33 = vmul.f32 %v2091_v24, %v2847_v32  ;;  %v1716_v36 = vpop.f32.mrb[32].mxu1 }
 0x138   :  { %2112 = vrcp.f32 %v1234_v19  ;;  %v1143_v34 = vmul.f32 1.442695, %v1050_v5  ;;  %v2968_v35 = vadd.f32 %v2788_v50, %v787_v39  ;;  %v2095_v38 = vpop.eup %2094  ;;  %v1306_v40 = vmul.f32 %v2093_v31, %v2850_v37  ;;  %v1844_v42 = vpop.f32.mrb[32].mxu0 }
 0x139   :  { %2114 = vrcp.f32 %v1233_v25  ;;  %v1141_v14 = vmul.f32 1.442695, %v1049_v27  ;;  %v2972_v44 = vadd.f32 %v2788_v50, %v782_v28  ;;  %v406_v43 = vpop.f32.mrb[33].mxu1  ;;  %v2097_v17 = vpop.eup %2096  ;;  %1420 = vst [vmem:[%s3312_s5 + $0x78] sm:$0xff] %v1308_v33  ;;  %v1236_v32 = vadd.f32 1.0, %v2095_v38 }
 0x13a   :  { %2116 = vpow2.f32 %v1137_v15  ;;  %v1052_v58 = vsub.f32 0.0, %v2968_v35  ;;  %v797_v45 = vadd.f32 %v1844_v42, %v1716_v36  ;;  %v791_v48 = vpop.f32.mrb[33].mxu0  ;;  %v2099_v49 = vpop.eup %2098  ;;  %1419 = vst [vmem:[%s3312_s5 + $0x70] sm:$0xff] %v1306_v40  ;;  %v1235_v37 = vadd.f32 1.0, %v2097_v17 }
 0x13b   :  { %2118 = vpow2.f32 %v1143_v34  ;;  %v1051_v51 = vsub.f32 0.0, %v2972_v44  ;;  %v792_v52 = vadd.f32 %v791_v48, %v406_v43  ;;  %v2101_v55 = vpop.eup %2100  ;;  %v1312_v56 = vmul.f32 %v2099_v49, %v2860_v54  ;;  %v1719_v60 = vpop.f32.mrb[34].mxu1 }
 0x13c   :  { %2120 = vrcp.f32 %v1236_v32  ;;  %v1147_v59 = vmul.f32 1.442695, %v1052_v58  ;;  %v2984_v57 = vadd.f32 %v2788_v50, %v797_v45  ;;  %v2103_v62 = vpop.eup %2102  ;;  %v1310_v26 = vmul.f32 %v2101_v55, %v2866_v61  ;;  %v1847_v3 = vpop.f32.mrb[34].mxu0 }
 0x13d   :  { %2122 = vrcp.f32 %v1235_v37  ;;  %v1145_v1 = vmul.f32 1.442695, %v1051_v51  ;;  %v2988_v63 = vadd.f32 %v2788_v50, %v792_v52  ;;  %v416_v4 = vpop.f32.mrb[35].mxu1  ;;  %v2105_v7 = vpop.eup %2104  ;;  %1422 = vst [vmem:[%s3312_s5 + $0x88] sm:$0xff] %v1312_v56  ;;  %v1238_v54 = vadd.f32 1.0, %v2103_v62 }
 0x13e   :  { %2124 = vpow2.f32 %v1141_v14  ;;  %v1054_v12 = vsub.f32 0.0, %v2984_v57  ;;  %v807_v8 = vadd.f32 %v1847_v3, %v1719_v60  ;;  %v801_v10 = vpop.f32.mrb[35].mxu0  ;;  %v2107_v11 = vpop.eup %2106  ;;  %1421 = vst [vmem:[%s3312_s5 + $0x80] sm:$0xff] %v1310_v26  ;;  %v1237_v61 = vadd.f32 1.0, %v2105_v7 }
 0x13f   :  { %2126 = vpow2.f32 %v1147_v59  ;;  %v1053_v13 = vsub.f32 0.0, %v2988_v63  ;;  %v802_v15 = vadd.f32 %v801_v10, %v416_v4  ;;  %v1316_v18 = vmul.f32 %v2107_v11, %v2876_v16  ;;  %v1722_v5 = vpop.f32.mrb[36].mxu1 }
 0x140   :  { %v2109_v29 = vpop.eup %2108  ;;  %2128 = vrcp.f32 %v1238_v54  ;;  %v1151_v20 = vmul.f32 1.442695, %v1054_v12  ;;  %v3000_v19 = vadd.f32 %v2788_v50, %v807_v8  ;;  %v1850_v27 = vpop.f32.mrb[36].mxu0 }
 0x141   :  { %v2111_v39 = vpop.eup %2110  ;;  %2130 = vrcp.f32 %v1237_v61  ;;  %v1240_v21 = vadd.f32 1.0, %v2109_v29  ;;  %v1149_v24 = vmul.f32 1.442695, %v1053_v13  ;;  %v3003_v25 = vadd.f32 %v2788_v50, %v802_v15  ;;  %v426_v28 = vpop.f32.mrb[37].mxu1  ;;  %1424 = vst [vmem:[%s3312_s5 + $0x98] sm:$0xff] %v1316_v18 }
 0x142   :  { %v2113_v31 = vpop.eup %2112  ;;  %v1314_v16 = vmul.f32 %v2111_v39, %v2882_v22  ;;  %2132 = vpow2.f32 %v1145_v1  ;;  %v1056_v33 = vsub.f32 0.0, %v3000_v19  ;;  %v817_v34 = vadd.f32 %v1850_v27, %v1722_v5  ;;  %v811_v36 = vpop.f32.mrb[37].mxu0 }
 0x143   :  { %v2115_v38 = vpop.eup %2114  ;;  %v1320_v40 = vmul.f32 %v2113_v31, %v2892_v41  ;;  %2134 = vrcp.f32 %v1240_v21  ;;  %v1055_v14 = vsub.f32 0.0, %v3003_v25  ;;  %v812_v42 = vadd.f32 %v811_v36, %v426_v28  ;;  %v1725_v58 = vpop.f32.mrb[38].mxu1 }
 0x144   :  { %v2117_v43 = vpop.eup %2116  ;;  %1423 = vst [vmem:[%s3312_s5 + $0x90] sm:$0xff] %v1314_v16  ;;  %v1318_v17 = vmul.f32 %v2115_v38, %v2898_v46  ;;  %2136 = vpow2.f32 %v1151_v20  ;;  %v1155_v22 = vmul.f32 1.442695, %v1056_v33  ;;  %v3017_v32 = vadd.f32 %v2788_v50, %v817_v34  ;;  %v1853_v37 = vpop.f32.mrb[38].mxu0 }
 0x145   :  { %v2119_v45 = vpop.eup %2118  ;;  %1426 = vst [vmem:[%s3312_s5 + $0xa8] sm:$0xff] %v1320_v40  ;;  %v1239_v41 = vadd.f32 1.0, %v2117_v43  ;;  %2138 = vpow2.f32 %v1149_v24  ;;  %v1153_v48 = vmul.f32 1.442695, %v1055_v14  ;;  %v3023_v49 = vadd.f32 %v2788_v50, %v812_v42  ;;  %v436_v51 = vpop.f32.mrb[39].mxu1 }
 0x146   :  { %v2121_v46 = vpop.eup %2120  ;;  %1425 = vst [vmem:[%s3312_s5 + $0xa0] sm:$0xff] %v1318_v17  ;;  %v1242_v52 = vadd.f32 1.0, %v2119_v45  ;;  %2140 = vpow2.f32 %v1155_v22  ;;  %v1058_v55 = vsub.f32 0.0, %v3017_v32  ;;  %v827_v56 = vadd.f32 %v1853_v37, %v1725_v58  ;;  %v821_v59 = vpop.f32.mrb[39].mxu0 }
 0x147   :  { %v2123_v60 = vpop.eup %2122  ;;  %v1324_v62 = vmul.f32 %v2121_v46, %v2907_v0  ;;  %2142 = vrcp.f32 %v1239_v41  ;;  %v1057_v26 = vsub.f32 0.0, %v3023_v49  ;;  %v822_v1 = vadd.f32 %v821_v59, %v436_v51  ;;  %v1728_v12 = vpop.f32.mrb[40].mxu1 }
 0x148   :  { %v2125_v3 = vpop.eup %2124  ;;  %v1322_v4 = vmul.f32 %v2123_v60, %v2911_v6  ;;  %2144 = vrcp.f32 %v1242_v52  ;;  %v1159_v7 = vmul.f32 1.442695, %v1058_v55  ;;  %v3033_v54 = vadd.f32 %v2788_v50, %v827_v56  ;;  %v1856_v61 = vpop.f32.mrb[40].mxu0 }
 0x149   :  { %v2127_v8 = vpop.eup %2126  ;;  %1428 = vst [vmem:[%s3312_s5 + $0xb8] sm:$0xff] %v1324_v62  ;;  %v1241_v10 = vadd.f32 1.0, %v2125_v3  ;;  %2146 = vpow2.f32 %v1153_v48  ;;  %v1157_v0 = vmul.f32 1.442695, %v1057_v26  ;;  %v3039_v11 = vadd.f32 %v2788_v50, %v822_v1  ;;  %v446_v13 = vpop.f32.mrb[41].mxu1 }
 0x14a   :  { %v2129_v6 = vpop.eup %2128  ;;  %1427 = vst [vmem:[%s3312_s5 + $0xb0] sm:$0xff] %v1322_v4  ;;  %v1244_v15 = vadd.f32 1.0, %v2127_v8  ;;  %2148 = vpow2.f32 %v1159_v7  ;;  %v1060_v29 = vsub.f32 0.0, %v3033_v54  ;;  %v837_v18 = vadd.f32 %v1856_v61, %v1728_v12  ;;  %v831_v20 = vpop.f32.mrb[41].mxu0 }
 0x14b   :  { %v2131_v5 = vpop.eup %2130  ;;  %v1328_v39 = vmul.f32 %v2129_v6, %v2923_v23  ;;  %2150 = vrcp.f32 %v1241_v10  ;;  %v1059_v21 = vsub.f32 0.0, %v3039_v11  ;;  %v832_v24 = vadd.f32 %v831_v20, %v446_v13  ;;  %v1731_v33 = vpop.f32.mrb[42].mxu1 }
 0x14c   :  { %v2133_v27 = vpop.eup %2132  ;;  %v1326_v28 = vmul.f32 %v2131_v5, %v2927_v30  ;;  %2152 = vrcp.f32 %v1244_v15  ;;  %v1163_v31 = vmul.f32 1.442695, %v1060_v29  ;;  %v3049_v16 = vadd.f32 %v2788_v50, %v837_v18  ;;  %v1859_v40 = vpop.f32.mrb[42].mxu0 }
 0x14d   :  { %v2135_v34 = vpop.eup %2134  ;;  %1430 = vst [vmem:[%s3312_s5 + $0xc8] sm:$0xff] %v1328_v39  ;;  %v1243_v36 = vadd.f32 1.0, %v2133_v27  ;;  %2154 = vpow2.f32 %v1157_v0  ;;  %v1161_v23 = vmul.f32 1.442695, %v1059_v21  ;;  %v3055_v38 = vadd.f32 %v2788_v50, %v832_v24  ;;  %v456_v14 = vpop.f32.mrb[43].mxu1 }
 0x14e   :  { %v2137_v30 = vpop.eup %2136  ;;  %1429 = vst [vmem:[%s3312_s5 + $0xc0] sm:$0xff] %v1326_v28  ;;  %v1332_v42 = vmul.f32 %v2135_v34, %v2939_v47  ;;  %2156 = vpow2.f32 %v1163_v31  ;;  %v1062_v43 = vsub.f32 0.0, %v3049_v16  ;;  %v847_v17 = vadd.f32 %v1859_v40, %v1731_v33  ;;  %v841_v22 = vpop.f32.mrb[43].mxu0 }
 0x14f   :  { %v2139_v58 = vpop.eup %2138  ;;  %2158 = vrcp.f32 %v1243_v36  ;;  %v1246_v45 = vadd.f32 1.0, %v2137_v30  ;;  %v1061_v41 = vsub.f32 0.0, %v3055_v38  ;;  %v842_v48 = vadd.f32 %v841_v22, %v456_v14  ;;  %v1734_v52 = vpop.f32.mrb[44].mxu1  ;;  %v3098_v30 = vld [vmem:[%s3311_s4] ss:$0 sm:$0xff] }
 0x150   :  { %v2141_v37 = vpop.eup %2140  ;;  %1432 = vst [vmem:[%s3312_s5 + $0xd8] sm:$0xff] %v1332_v42  ;;  %v1245_v51 = vadd.f32 1.0, %v2139_v58  ;;  %2160 = vpow2.f32 %v1161_v23  ;;  %v1167_v46 = vmul.f32 1.442695, %v1062_v43  ;;  %v3067_v47 = vadd.f32 %v2788_v50, %v847_v17  ;;  %v1862_v62 = vpop.f32.mrb[44].mxu0 }
 0x151   :  { %v2143_v55 = vpop.eup %2142  ;;  %2162 = vrcp.f32 %v1246_v45  ;;  %v1248_v56 = vadd.f32 1.0, %v2141_v37  ;;  %v1165_v59 = vmul.f32 1.442695, %v1061_v41  ;;  %v3070_v60 = vadd.f32 %v2788_v50, %v842_v48  ;;  %v466_v26 = vpop.f32.mrb[45].mxu1 }
 0x152   :  { %v2145_v1 = vpop.eup %2144  ;;  %v1330_v3 = vmul.f32 %v2143_v55, %v2943_v53  ;;  %2164 = vrcp.f32 %v1245_v51  ;;  %v1064_v4 = vsub.f32 0.0, %v3067_v47  ;;  %v857_v7 = vadd.f32 %v1862_v62, %v1734_v52  ;;  %v851_v12 = vpop.f32.mrb[45].mxu0 }
 0x153   :  { %v2147_v8 = vpop.eup %2146  ;;  %v1336_v10 = vmul.f32 %v2145_v1, %v2956_v9  ;;  %2166 = vrcp.f32 %v1248_v56  ;;  %v1063_v0 = vsub.f32 0.0, %v3070_v60  ;;  %v852_v61 = vadd.f32 %v851_v12, %v466_v26  ;;  %v1737_v29 = vpop.f32.mrb[46].mxu1 }
 0x154   :  { %v2149_v13 = vpop.eup %2148  ;;  %1431 = vst [vmem:[%s3312_s5 + $0xd0] sm:$0xff] %v1330_v3  ;;  %v1247_v6 = vadd.f32 1.0, %v2147_v8  ;;  %2168 = vpow2.f32 %v1167_v46  ;;  %v1171_v53 = vmul.f32 1.442695, %v1064_v4  ;;  %v3080_v15 = vadd.f32 %v2788_v50, %v857_v7  ;;  %v1865_v39 = vpop.f32.mrb[46].mxu0 }
 0x155   :  { %v2151_v18 = vpop.eup %2150  ;;  %1434 = vst [vmem:[%s3312_s5 + $0xe8] sm:$0xff] %v1336_v10  ;;  %v1250_v9 = vadd.f32 1.0, %v2149_v13  ;;  %2170 = vpow2.f32 %v1165_v59  ;;  %v1169_v20 = vmul.f32 1.442695, %v1063_v0  ;;  %v3086_v5 = vadd.f32 %v2788_v50, %v852_v61  ;;  %v476_v21 = vpop.f32.mrb[47].mxu1 }
 0x156   :  { %v2153_v24 = vpop.eup %2152  ;;  %v1334_v27 = vmul.f32 %v2151_v18, %v2959_v2  ;;  %2172 = vrcp.f32 %v1247_v6  ;;  %v1066_v28 = vsub.f32 0.0, %v3080_v15  ;;  %v867_v31 = vadd.f32 %v1865_v39, %v1737_v29  ;;  %v861_v33 = vpop.f32.mrb[47].mxu0 }
 0x157   :  { %v2155_v34 = vpop.eup %2154  ;;  %v1340_v36 = vmul.f32 %v2153_v24, %v2968_v35  ;;  %2174 = vrcp.f32 %v1250_v9  ;;  %v1065_v23 = vsub.f32 0.0, %v3086_v5  ;;  %v862_v40 = vadd.f32 %v861_v33, %v476_v21  ;;  %v1740_v35 = vpop.f32.mrb[48].mxu1 }
 0x158   :  { %v2157_v14 = vpop.eup %2156  ;;  %1433 = vst [vmem:[%s3312_s5 + $0xe0] sm:$0xff] %v1334_v27  ;;  %v1249_v50 = vadd.f32 1.0, %v2155_v34  ;;  %2176 = vpow2.f32 %v1171_v53  ;;  %v1175_v2 = vmul.f32 1.442695, %v1066_v28  ;;  %v3101_v42 = vadd.f32 %v3098_v30, %v867_v31  ;;  %v1868_v45 = vpop.f32.mrb[48].mxu0 }
 0x159   :  { %v2159_v43 = vpop.eup %2158  ;;  %1436 = vst [vmem:[%s3312_s5 + $0xf8] sm:$0xff] %v1340_v36  ;;  %v1252_v17 = vadd.f32 1.0, %v2157_v14  ;;  %2178 = vpow2.f32 %v1169_v20  ;;  %v1173_v22 = vmul.f32 1.442695, %v1065_v23  ;;  %v3107_v58 = vadd.f32 %v3098_v30, %v862_v40  ;;  %v486_v41 = vpop.f32.mrb[49].mxu1 }
 0x15a   :  { %v2161_v48 = vpop.eup %2160  ;;  %v1338_v37 = vmul.f32 %v2159_v43, %v2972_v44  ;;  %2180 = vrcp.f32 %v1249_v50  ;;  %v1068_v51 = vsub.f32 0.0, %v3101_v42  ;;  %v877_v46 = vadd.f32 %v1868_v45, %v1740_v35  ;;  %v871_v52 = vpop.f32.mrb[49].mxu0 }
 0x15b   :  { %v2163_v55 = vpop.eup %2162  ;;  %2182 = vrcp.f32 %v1252_v17  ;;  %v1251_v56 = vadd.f32 1.0, %v2161_v48  ;;  %v1067_v59 = vsub.f32 0.0, %v3107_v58  ;;  %v872_v62 = vadd.f32 %v871_v52, %v486_v41  ;;  %v1743_v4 = vpop.f32.mrb[50].mxu1 }
 0x15c   :  { %v2165_v26 = vpop.eup %2164  ;;  %1435 = vst [vmem:[%s3312_s5 + $0xf0] sm:$0xff] %v1338_v37  ;;  %v1344_v1 = vmul.f32 %v2163_v55, %v2984_v57  ;;  %2184 = vpow2.f32 %v1175_v2  ;;  %v1179_v44 = vmul.f32 1.442695, %v1068_v51  ;;  %v3117_v3 = vadd.f32 %v3098_v30, %v877_v46  ;;  %v1871_v0 = vpop.f32.mrb[50].mxu0 }
 0x15d   :  { %v2167_v7 = vpop.eup %2166  ;;  %v1342_v12 = vmul.f32 %v2165_v26, %v2988_v63  ;;  %2186 = vrcp.f32 %v1251_v56  ;;  %v1177_v8 = vmul.f32 1.442695, %v1067_v59  ;;  %v3121_v10 = vadd.f32 %v3098_v30, %v872_v62  ;;  %v496_v61 = vpop.f32.mrb[51].mxu1 }
 0x15e   :  { %v2169_v13 = vpop.eup %2168  ;;  %1438 = vst [vmem:[%s3312_s5 + $0x108] sm:$0xff] %v1344_v1  ;;  %v1348_v57 = vmul.f32 %v2167_v7, %v3000_v19  ;;  %2188 = vpow2.f32 %v1173_v22  ;;  %v1070_v6 = vsub.f32 0.0, %v3117_v3  ;;  %v887_v53 = vadd.f32 %v1871_v0, %v1743_v4  ;;  %v881_v29 = vpop.f32.mrb[51].mxu0 }
 0x15f   :  { %v2171_v63 = vpop.eup %2170  ;;  %1437 = vst [vmem:[%s3312_s5 + $0x100] sm:$0xff] %v1342_v12  ;;  %v1254_v18 = vadd.f32 1.0, %v2169_v13  ;;  %2190 = vpow2.f32 %v1179_v44  ;;  %v1069_v9 = vsub.f32 0.0, %v3121_v10  ;;  %v882_v20 = vadd.f32 %v881_v29, %v496_v61  ;;  %v1746_v27 = vpop.f32.mrb[52].mxu1 }
 0x160   :  { %v2173_v39 = vpop.eup %2172  ;;  %1440 = vst [vmem:[%s3312_s5 + $0x118] sm:$0xff] %v1348_v57  ;;  %v1253_v19 = vadd.f32 1.0, %v2171_v63  ;;  %2192 = vpow2.f32 %v1177_v8  ;;  %v1183_v21 = vmul.f32 1.442695, %v1070_v6  ;;  %v3136_v24 = vadd.f32 %v3098_v30, %v887_v53  ;;  %v1874_v36 = vpop.f32.mrb[52].mxu0 }
 0x161   :  { %v2175_v28 = vpop.eup %2174  ;;  %v1346_v31 = vmul.f32 %v2173_v39, %v3003_v25  ;;  %2194 = vrcp.f32 %v1254_v18  ;;  %v1181_v33 = vmul.f32 1.442695, %v1069_v9  ;;  %v3140_v34 = vadd.f32 %v3098_v30, %v882_v20  ;;  %v506_v23 = vpop.f32.mrb[53].mxu1 }
 0x162   :  { %v2177_v40 = vpop.eup %2176  ;;  %v1352_v14 = vmul.f32 %v2175_v28, %v3017_v32  ;;  %2196 = vrcp.f32 %v1253_v19  ;;  %v1072_v50 = vsub.f32 0.0, %v3136_v24  ;;  %v897_v2 = vadd.f32 %v1874_v36, %v1746_v27  ;;  %v891_v35 = vpop.f32.mrb[53].mxu0 }
 0x163   :  { %v2179_v43 = vpop.eup %2178  ;;  %1439 = vst [vmem:[%s3312_s5 + $0x110] sm:$0xff] %v1346_v31  ;;  %v1256_v25 = vadd.f32 1.0, %v2177_v40  ;;  %2198 = vpow2.f32 %v1183_v21  ;;  %v1071_v17 = vsub.f32 0.0, %v3140_v34  ;;  %v892_v22 = vadd.f32 %v891_v35, %v506_v23  ;;  %v1749_v37 = vpop.f32.mrb[54].mxu1 }
 0x164   :  { %v2181_v45 = vpop.eup %2180  ;;  %1442 = vst [vmem:[%s3312_s5 + $0x128] sm:$0xff] %v1352_v14  ;;  %v1255_v32 = vadd.f32 1.0, %v2179_v43  ;;  %2200 = vpow2.f32 %v1181_v33  ;;  %v1187_v41 = vmul.f32 1.442695, %v1072_v50  ;;  %v3152_v48 = vadd.f32 %v3098_v30, %v897_v2  ;;  %v1877_v56 = vpop.f32.mrb[54].mxu0 }
 0x165   :  { %v2183_v51 = vpop.eup %2182  ;;  %v1350_v46 = vmul.f32 %v2181_v45, %v3023_v49  ;;  %2202 = vrcp.f32 %v1256_v25  ;;  %v1185_v52 = vmul.f32 1.442695, %v1071_v17  ;;  %v3156_v55 = vadd.f32 %v3098_v30, %v892_v22  ;;  %v516_v59 = vpop.f32.mrb[55].mxu1 }
 0x166   :  { %v2185_v62 = vpop.eup %2184  ;;  %v1356_v26 = vmul.f32 %v2183_v51, %v3033_v54  ;;  %2204 = vrcp.f32 %v1255_v32  ;;  %v1074_v1 = vsub.f32 0.0, %v3152_v48  ;;  %v907_v44 = vadd.f32 %v1877_v56, %v1749_v37  ;;  %v901_v4 = vpop.f32.mrb[55].mxu0 }
 0x167   :  { %v2187_v7 = vpop.eup %2186  ;;  %1441 = vst [vmem:[%s3312_s5 + $0x120] sm:$0xff] %v1350_v46  ;;  %v1258_v49 = vadd.f32 1.0, %v2185_v62  ;;  %2206 = vpow2.f32 %v1187_v41  ;;  %v1073_v12 = vsub.f32 0.0, %v3156_v55  ;;  %v902_v8 = vadd.f32 %v901_v4, %v516_v59  ;;  %v1752_v57 = vpop.f32.mrb[56].mxu1 }
 0x168   :  { %v2189_v0 = vpop.eup %2188  ;;  %1444 = vst [vmem:[%s3312_s5 + $0x138] sm:$0xff] %v1356_v26  ;;  %v1354_v54 = vmul.f32 %v2187_v7, %v3039_v11  ;;  %2208 = vpow2.f32 %v1185_v52  ;;  %v1191_v61 = vmul.f32 1.442695, %v1074_v1  ;;  %v3169_v13 = vadd.f32 %v3098_v30, %v907_v44  ;;  %v1880_v18 = vpop.f32.mrb[56].mxu0 }
 0x169   :  { %v2191_v6 = vpop.eup %2190  ;;  %2210 = vrcp.f32 %v1258_v49  ;;  %v1257_v53 = vadd.f32 1.0, %v2189_v0  ;;  %v1189_v29 = vmul.f32 1.442695, %v1073_v12  ;;  %v3172_v63 = vadd.f32 %v3098_v30, %v902_v8  ;;  %v526_v9 = vpop.f32.mrb[57].mxu1 }
 0x16a   :  { %v2193_v20 = vpop.eup %2192  ;;  %1443 = vst [vmem:[%s3312_s5 + $0x130] sm:$0xff] %v1354_v54  ;;  %v1260_v11 = vadd.f32 1.0, %v2191_v6  ;;  %2212 = vpow2.f32 %v1191_v61  ;;  %v1076_v39 = vsub.f32 0.0, %v3169_v13  ;;  %v917_v19 = vadd.f32 %v1880_v18, %v1752_v57  ;;  %v911_v21 = vpop.f32.mrb[57].mxu0 }
 0x16b   :  { %v2195_v27 = vpop.eup %2194  ;;  %2214 = vrcp.f32 %v1257_v53  ;;  %v1259_v28 = vadd.f32 1.0, %v2193_v20  ;;  %v1075_v31 = vsub.f32 0.0, %v3172_v63  ;;  %v912_v33 = vadd.f32 %v911_v21, %v526_v9  ;;  %v1755_v50 = vpop.f32.mrb[58].mxu1 }
 0x16c   :  { %v2197_v36 = vpop.eup %2196  ;;  %v1360_v23 = vmul.f32 %v2195_v27, %v3049_v16  ;;  %2216 = vrcp.f32 %v1260_v11  ;;  %v1195_v40 = vmul.f32 1.442695, %v1076_v39  ;;  %v3181_v14 = vadd.f32 %v3098_v30, %v917_v19  ;;  %v1883_v17 = vpop.f32.mrb[58].mxu0 }
 0x16d   :  { %v2199_v2 = vpop.eup %2198  ;;  %v1358_v35 = vmul.f32 %v2197_v36, %v3055_v38  ;;  %2218 = vrcp.f32 %v1259_v28  ;;  %v1193_v43 = vmul.f32 1.442695, %v1075_v31  ;;  %v3185_v25 = vadd.f32 %v3098_v30, %v912_v33  ;;  %v536_v22 = vpop.f32.mrb[59].mxu1 }
 0x16e   :  { %v2201_v45 = vpop.eup %2200  ;;  %1446 = vst [vmem:[%s3312_s5 + $0x148] sm:$0xff] %v1360_v23  ;;  %v1262_v16 = vadd.f32 1.0, %v2199_v2  ;;  %2220 = vpow2.f32 %v1189_v29  ;;  %v1078_v32 = vsub.f32 0.0, %v3181_v14  ;;  %v927_v41 = vadd.f32 %v1883_v17, %v1755_v50  ;;  %v921_v37 = vpop.f32.mrb[59].mxu0 }
 0x16f   :  { %v2203_v51 = vpop.eup %2202  ;;  %1445 = vst [vmem:[%s3312_s5 + $0x140] sm:$0xff] %v1358_v35  ;;  %v1261_v38 = vadd.f32 1.0, %v2201_v45  ;;  %2222 = vpow2.f32 %v1195_v40  ;;  %v1077_v46 = vsub.f32 0.0, %v3185_v25  ;;  %v922_v52 = vadd.f32 %v921_v37, %v536_v22  ;;  %v1758_v1 = vpop.f32.mrb[60].mxu1 }
 0x170   :  { %v2205_v56 = vpop.eup %2204  ;;  %v1364_v59 = vmul.f32 %v2203_v51, %v3067_v47  ;;  %2224 = vrcp.f32 %v1262_v16  ;;  %v1199_v62 = vmul.f32 1.442695, %v1078_v32  ;;  %v3197_v26 = vadd.f32 %v3098_v30, %v927_v41  ;;  %v1886_v12 = vpop.f32.mrb[60].mxu0 }
 0x171   :  { %v2207_v44 = vpop.eup %2206  ;;  %v1362_v4 = vmul.f32 %v2205_v56, %v3070_v60  ;;  %2226 = vrcp.f32 %v1261_v38  ;;  %v1197_v7 = vmul.f32 1.442695, %v1077_v46  ;;  %v3201_v49 = vadd.f32 %v3098_v30, %v922_v52  ;;  %v546_v8 = vpop.f32.mrb[61].mxu1 }
 0x172   :  { %v2209_v0 = vpop.eup %2208  ;;  %1448 = vst [vmem:[%s3312_s5 + $0x158] sm:$0xff] %v1364_v59  ;;  %v1264_v47 = vadd.f32 1.0, %v2207_v44  ;;  %2228 = vpow2.f32 %v1193_v43  ;;  %v1080_v54 = vsub.f32 0.0, %v3197_v26  ;;  %v937_v61 = vadd.f32 %v1886_v12, %v1758_v1  ;;  %v931_v57 = vpop.f32.mrb[61].mxu0 }
 0x173   :  { %v2211_v6 = vpop.eup %2210  ;;  %1447 = vst [vmem:[%s3312_s5 + $0x150] sm:$0xff] %v1362_v4  ;;  %v1263_v60 = vadd.f32 1.0, %v2209_v0  ;;  %2230 = vpow2.f32 %v1199_v62  ;;  %v1079_v53 = vsub.f32 0.0, %v3201_v49  ;;  %v932_v29 = vadd.f32 %v931_v57, %v546_v8  ;;  %v1761_v39 = vpop.f32.mrb[62].mxu1 }
 0x174   :  { %v2213_v18 = vpop.eup %2212  ;;  %v1368_v9 = vmul.f32 %v2211_v6, %v3080_v15  ;;  %2232 = vrcp.f32 %v1264_v47  ;;  %v1203_v20 = vmul.f32 1.442695, %v1080_v54  ;;  %v3213_v11 = vadd.f32 %v3098_v30, %v937_v61  ;;  %v1889_v31 = vpop.f32.mrb[62].mxu0 }
 0x175   :  { %v2215_v19 = vpop.eup %2214  ;;  %2234 = vrcp.f32 %v1263_v60  ;;  %v1266_v21 = vadd.f32 1.0, %v2213_v18  ;;  %v1201_v27 = vmul.f32 1.442695, %v1079_v53  ;;  %v3216_v28 = vadd.f32 %v3098_v30, %v932_v29  ;;  %v556_v33 = vpop.f32.mrb[63].mxu1 }
 0x176   :  { %v2217_v36 = vpop.eup %2216  ;;  %1450 = vst [vmem:[%s3312_s5 + $0x168] sm:$0xff] %v1368_v9  ;;  %v1366_v15 = vmul.f32 %v2215_v19, %v3086_v5  ;;  %2236 = vpow2.f32 %v1197_v7  ;;  %v1082_v23 = vsub.f32 0.0, %v3213_v11  ;;  %v947_v40 = vadd.f32 %v1889_v31, %v1761_v39  ;;  %v941_v50 = vpop.f32.mrb[63].mxu0 }
 0x177   :  { %v2219_v2 = vpop.eup %2218  ;;  %v1372_v35 = vmul.f32 %v2217_v36, %v3101_v42  ;;  %2238 = vrcp.f32 %v1266_v21  ;;  %v1081_v43 = vsub.f32 0.0, %v3216_v28  ;;  %v942_v17 = vadd.f32 %v941_v50, %v556_v33 }
 0x178   :  { %v2221_v22 = vpop.eup %2220  ;;  %1449 = vst [vmem:[%s3312_s5 + $0x160] sm:$0xff] %v1366_v15  ;;  %v1370_v45 = vmul.f32 %v2219_v2, %v3107_v58  ;;  %2240 = vpow2.f32 %v1203_v20  ;;  %v1207_v5 = vmul.f32 1.442695, %v1082_v23  ;;  %v3230_v16 = vadd.f32 %v3098_v30, %v947_v40 }
 0x179   :  { %v2223_v32 = vpop.eup %2222  ;;  %1452 = vst [vmem:[%s3312_s5 + $0x178] sm:$0xff] %v1372_v35  ;;  %v1265_v42 = vadd.f32 1.0, %v2221_v22  ;;  %2242 = vpow2.f32 %v1201_v27  ;;  %v1205_v41 = vmul.f32 1.442695, %v1081_v43  ;;  %v3236_v37 = vadd.f32 %v3098_v30, %v942_v17 }
 0x17a   :  { %v2225_v51 = vpop.eup %2224  ;;  %1451 = vst [vmem:[%s3312_s5 + $0x170] sm:$0xff] %v1370_v45  ;;  %v1268_v58 = vadd.f32 1.0, %v2223_v32  ;;  %2244 = vpow2.f32 %v1207_v5  ;;  %v1084_v38 = vsub.f32 0.0, %v3230_v16 }
 0x17b   :  { %v2227_v46 = vpop.eup %2226  ;;  %v1376_v52 = vmul.f32 %v2225_v51, %v3117_v3  ;;  %2246 = vrcp.f32 %v1265_v42  ;;  %v1083_v56 = vsub.f32 0.0, %v3236_v37 }
 0x17c   :  { %v2229_v59 = vpop.eup %2228  ;;  %v1374_v62 = vmul.f32 %v2227_v46, %v3121_v10  ;;  %2248 = vrcp.f32 %v1268_v58  ;;  %v1211_v30 = vmul.f32 1.442695, %v1084_v38 }
 0x17d   :  { %v2231_v1 = vpop.eup %2230  ;;  %1454 = vst [vmem:[%s3312_s5 + $0x188] sm:$0xff] %v1376_v52  ;;  %v1267_v44 = vadd.f32 1.0, %v2229_v59  ;;  %2250 = vpow2.f32 %v1205_v41  ;;  %v1209_v4 = vmul.f32 1.442695, %v1083_v56 }
 0x17e   :  { %v2233_v7 = vpop.eup %2232  ;;  %1453 = vst [vmem:[%s3312_s5 + $0x180] sm:$0xff] %v1374_v62  ;;  %v1270_v3 = vadd.f32 1.0, %v2231_v1  ;;  %2252 = vpow2.f32 %v1211_v30 }
 0x17f   :  { %v2235_v12 = vpop.eup %2234  ;;  %v1380_v10 = vmul.f32 %v2233_v7, %v3136_v24  ;;  %2254 = vrcp.f32 %v1267_v44 }
 0x180   :  { %v2237_v8 = vpop.eup %2236  ;;  %v1378_v0 = vmul.f32 %v2235_v12, %v3140_v34  ;;  %2256 = vrcp.f32 %v1270_v3 }
 0x181   :  { %v2239_v47 = vpop.eup %2238  ;;  %1456 = vst [vmem:[%s3312_s5 + $0x198] sm:$0xff] %v1380_v10  ;;  %v1269_v54 = vadd.f32 1.0, %v2237_v8  ;;  %2258 = vpow2.f32 %v1209_v4 }
 0x182   :  { %v2241_v61 = vpop.eup %2240  ;;  %1455 = vst [vmem:[%s3312_s5 + $0x190] sm:$0xff] %v1378_v0  ;;  %v1384_v57 = vmul.f32 %v2239_v47, %v3152_v48 }
 0x183   :  { %v2243_v24 = vpop.eup %2242  ;;  %2260 = vrcp.f32 %v1269_v54  ;;  %v1272_v6 = vadd.f32 1.0, %v2241_v61 }
 0x184   :  { %v2245_v60 = vpop.eup %2244  ;;  %1458 = vst [vmem:[%s3312_s5 + $0x1a8] sm:$0xff] %v1384_v57  ;;  %v1271_v34 = vadd.f32 1.0, %v2243_v24 }
 0x185   :  { %v2247_v53 = vpop.eup %2246  ;;  %2262 = vrcp.f32 %v1272_v6  ;;  %v1274_v29 = vadd.f32 1.0, %v2245_v60 }
 0x186   :  { %v2249_v18 = vpop.eup %2248  ;;  %v1382_v9 = vmul.f32 %v2247_v53, %v3156_v55  ;;  %2264 = vrcp.f32 %v1271_v34 }
 0x187   :  { %v2251_v20 = vpop.eup %2250  ;;  %v1388_v39 = vmul.f32 %v2249_v18, %v3169_v13  ;;  %2266 = vrcp.f32 %v1274_v29 }
 0x188   :  { %v2253_v48 = vpop.eup %2252  ;;  %1457 = vst [vmem:[%s3312_s5 + $0x1a0] sm:$0xff] %v1382_v9  ;;  %v1273_v19 = vadd.f32 1.0, %v2251_v20 }
 0x189   :  { %v2255_v21 = vpop.eup %2254  ;;  %1460 = vst [vmem:[%s3312_s5 + $0x1b8] sm:$0xff] %v1388_v39  ;;  %v1276_v27 = vadd.f32 1.0, %v2253_v48 }
 0x18a   :  { %v2257_v31 = vpop.eup %2256  ;;  %v1386_v55 = vmul.f32 %v2255_v21, %v3172_v63  ;;  %2268 = vrcp.f32 %v1273_v19 }
 0x18b   :  { %v2259_v33 = vpop.eup %2258  ;;  %v1392_v13 = vmul.f32 %v2257_v31, %v3181_v14  ;;  %2270 = vrcp.f32 %v1276_v27 }
 0x18c   :  { %1459 = vst [vmem:[%s3312_s5 + $0x1b0] sm:$0xff] %v1386_v55  ;;  %v1275_v36 = vadd.f32 1.0, %v2259_v33 }
 0x18d   :  { %v2261_v15 = vpop.eup %2260  ;;  %1462 = vst [vmem:[%s3312_s5 + $0x1c8] sm:$0xff] %v1392_v13 }
 0x18e   :  { %v1390_v23 = vmul.f32 %v2261_v15, %v3185_v25  ;;  %2272 = vrcp.f32 %v1275_v36 }
 0x18f   :  { %v2263_v40 = vpop.eup %2262 }
 0x190   :  { %v2265_v63 = vpop.eup %2264  ;;  %1461 = vst [vmem:[%s3312_s5 + $0x1c0] sm:$0xff] %v1390_v23  ;;  %v1396_v14 = vmul.f32 %v2263_v40, %v3197_v26 }
 0x191   :  { %v2267_v50 = vpop.eup %2266  ;;  %v1394_v2 = vmul.f32 %v2265_v63, %v3201_v49 }
 0x192   :  { %1464 = vst [vmem:[%s3312_s5 + $0x1d8] sm:$0xff] %v1396_v14  ;;  %v1400_v35 = vmul.f32 %v2267_v50, %v3213_v11 }
 0x193   :  { %1463 = vst [vmem:[%s3312_s5 + $0x1d0] sm:$0xff] %v1394_v2 }
 0x194   :  { %v2269_v25 = vpop.eup %2268  ;;  %1466 = vst [vmem:[%s3312_s5 + $0x1e8] sm:$0xff] %v1400_v35 }
 0x195   :  { %v2271_v43 = vpop.eup %2270  ;;  %v1398_v26 = vmul.f32 %v2269_v25, %v3216_v28 }
 0x196   :  { %v1404_v49 = vmul.f32 %v2271_v43, %v3230_v16 }
 0x197   :  { %1465 = vst [vmem:[%s3312_s5 + $0x1e0] sm:$0xff] %v1398_v26 }
 0x198   :  { %v2273_v17 = vpop.eup %2272  ;;  %1468 = vst [vmem:[%s3312_s5 + $0x1f8] sm:$0xff] %v1404_v49 }
 0x199   :  { %v1402_v11 = vmul.f32 %v2273_v17, %v3236_v37 }
 0x19b   :  { %1467 = vst [vmem:[%s3312_s5 + $0x1f0] sm:$0xff] %v1402_v11 }

// kernel: repncsp_forward.5
= control target key start
LH: loop header
LB: loop body
LE: loop exit
PB: predicated region body
PF: predicated region fallthrough
CT: control target
= control target key end

     0   :  { %s7234_s18 = smov 0   ;;  %s7236_s19 = smov 0   ;;  %s8734_s0 = inlined_call_operand.vmem [shape: f32[2,16,16,128], index: 0, kind: input, shape index: {}, may-alias: {0,1,2}]   ;;  %s8735_s1 = inlined_call_operand.vmem [shape: f32[2,16,16,128], index: 1, kind: input, shape index: {}, may-alias: {0,1,2}]   ;;  %s8736_s2 = inlined_call_operand.vmem [shape: f32[2,16,16,128], index: 2, kind: input, shape index: {}, may-alias: {0,1,2}]   ;;  %s8737_s3 = inlined_call_operand.vmem [shape: f32[9,128,128], index: 3, kind: input, shape index: {}]   ;;  %s8738_s4 = inlined_call_operand.vmem [shape: f32[1,128], index: 4, kind: input, shape index: {}]   ;;  %s8739_s5 = inlined_call_operand.vmem [shape: f32[2,16,16,128], index: 5, kind: output, shape index: {}]  }
   0x1   :  { %s7238_s20 = smov 0  }
   0x2 LB: > { %s27_s21 = sadd.s32 1, %s7197_s19  ;;  %p5146_p0 = scmp.ge.s32.totalorder %s7201_s20, 1  ;;  %s7201_s20 = sphi %s7238_s20, %s15_s20   ;;  %s7197_s19 = sphi %s7236_s19, %s8866_s19   ;;  %s7193_s18 = sphi %s7234_s18, %s8865_s18  }
   0x3   : > { %p29_p1 = scmp.ge.s32.totalorder %s27_s21, 2  ;;  %p273_p2 = scmp.lt.s32.totalorder %s7201_s20, 3 }
   0x5   : > { %s8868_s21 = smov (%p29_p1, %s27_s21), 0  ;;  %p274_p3 = pnand %p5146_p0, %p273_p2 }
   0x7   : > { %277 = sbr.rel (%p274_p3) target bundleno = 587 (0x24b), region = 40 }
   0xe   : > { %v1476_v0 = vld [vmem:[%s8737_s3] sm:$0xff]  ;;  %v1477_v1 = vld [vmem:[%s8737_s3 + $0x8] sm:$0xff]  ;;  %p338_p4 = scmp.lt.s32.totalorder %s7193_s18, 1  ;;  %v522_v3 = vlaneseq  ;;  %v1478_v6 = vld [vmem:[%s8737_s3 + $0x10] sm:$0xff]  ;;  %v7203_v8 = vmov 0.0  }
   0xf   : > { %v5203_v2 = vld [vmem:[%s8737_s3 + $0x200] sm:$0xff]  ;;  %v6444_v4 = vpack.c.bf16 %v1477_v1, %v1476_v0  ;;  %v5204_v5 = vld [vmem:[%s8737_s3 + $0x208] sm:$0xff]  ;;  %v1479_v7 = vld [vmem:[%s8737_s3 + $0x18] sm:$0xff]  ;;  %442 = vst [vmem:[#allocation2 + $0x140] sm:$0xff] %v7203_v8 }
  0x10   : > { %v7270_v9 = vpack.c.bf16 %v5204_v5, %v5203_v2  ;;  %v6448_v10 = vpack.c.bf16 %v1479_v7, %v1478_v6  ;;  %v5205_v11 = vld [vmem:[%s8737_s3 + $0x210] sm:$0xff]  ;;  %v5206_v12 = vld [vmem:[%s8737_s3 + $0x218] sm:$0xff]  ;;  %v1480_v13 = vld [vmem:[%s8737_s3 + $0x20] sm:$0xff]  ;;  %s8870_s18 = smov (!%p338_p4, %s7193_s18), 1  ;;  %v7281_v14 = vshrl.u32 %v522_v3, 7  ;;  %1204 = vst [vmem:[#allocation2 + $0x8] sm:$0xff] %v7203_v8 }
  0x11   : > { %6445 = vmatprep.subr.bf16.mxu1 %v6444_v4  ;;  %v7283_v15 = vpack.c.bf16 %v5206_v12, %v5205_v11  ;;  %v1481_v16 = vld [vmem:[%s8737_s3 + $0x28] sm:$0xff]  ;;  %v5207_v17 = vld [vmem:[%s8737_s3 + $0x220] sm:$0xff]  ;;  %s7295_s25 = sshll.u32 %s8870_s18, 8  ;;  %v1482_v23 = vld [vmem:[%s8737_s3 + $0x30] sm:$0xff] }
  0x12   : > { %v5208_v18 = vld [vmem:[%s8737_s3 + $0x228] sm:$0xff]  ;;  %6573 = vmatprep.subr.bf16.mxu0 %v7270_v9  ;;  %6447 = vmatpush3.bf16.msra.mxu1 %v6444_v4  ;;  %v525_v19 = vadd.s32 16, %v7281_v14  ;;  %v6452_v20 = vpack.c.bf16 %v1481_v16, %v1480_v13  ;;  %v526_v21 = vadd.s32 24, %v7281_v14  ;;  %v1483_v24 = vld [vmem:[%s8737_s3 + $0x38] sm:$0xff]  ;;  %v5209_v26 = vld [vmem:[%s8737_s3 + $0x230] sm:$0xff]  ;;  %s360_s10 = scalar_lea.vmem %s8735_s1, %s7295_s25  ;;  %s7323_s13 = scalar_lea.vmem %s8734_s0, %s7295_s25  ;;  %v528_v41 = vadd.s32 40, %v7281_v14 }
  0x13   : > { %8769 = vst [vmem:[#allocation4_spill] sm:$0xff] %v7283_v15  ;;  %6575 = vmatpush3.bf16.msra.mxu0 %v7270_v9  ;;  %6449 = vmatprep.subr.bf16.mxu1 %v6448_v10  ;;  %v7301_v22 = vpack.c.bf16 %v5208_v18, %v5207_v17  ;;  %v5210_v27 = vld [vmem:[%s8737_s3 + $0x238] sm:$0xff]  ;;  %v6456_v29 = vpack.c.bf16 %v1483_v24, %v1482_v23  ;;  %v1484_v30 = vld [vmem:[%s8737_s3 + $0x40] sm:$0xff]  ;;  %v1485_v31 = vld [vmem:[%s8737_s3 + $0x48] sm:$0xff]  ;;  %v529_v42 = vadd.s32 48, %v7281_v14  ;;  %v530_v45 = vadd.s32 56, %v7281_v14  ;;  %s8590_s9 = scalar_lea.vmem %s8739_s5, %s7295_s25 }
  0x14   : > { %6577 = vmatprep.subr.bf16.mxu0 %v7283_v15  ;;  %v581_v25 = vand.u32 15, %v525_v19  ;;  %v588_v28 = vand.u32 15, %v526_v21  ;;  %v7333_v32 = vpack.c.bf16 %v5210_v27, %v5209_v26  ;;  %v5211_v33 = vld [vmem:[%s8737_s3 + $0x240] sm:$0xff]  ;;  %v5212_v34 = vld [vmem:[%s8737_s3 + $0x248] sm:$0xff]  ;;  %v532_v46 = vadd.s32 72, %v7281_v14  ;;  %v7369_v49 = vld [vmem:[%s7323_s13 + $0x10] sm:$0xff] }
  0x15   : > { %8770 = vst [vmem:[#allocation5_spill] sm:$0xff] %v7301_v22  ;;  %v425_v35 = vld [vmem:[%s360_s10] sm:$0xff]  ;;  %v426_v37 = vld [vmem:[%s360_s10 + $0x8] sm:$0xff]  ;;  %v7363_v47 = vpack.c.bf16 %v1485_v31, %v1484_v30  ;;  %v602_v50 = vand.u32 15, %v528_v41  ;;  %v7373_v51 = vld [vmem:[%s7323_s13 + $0x18] sm:$0xff]  ;;  %v609_v52 = vand.u32 15, %v529_v42  ;;  %v7376_v53 = vpack.c.bf16 %v5212_v34, %v5211_v33 }
  0x16   : > { %6451 = vmatpush3.bf16.msra.mxu1 %v6448_v10  ;;  %8771 = vst [vmem:[#allocation6_spill] sm:$0xff] %v7333_v32  ;;  %vm7341_vm0 = vcmp.eq.s32.totalorder %v581_v25, 0  ;;  %v431_v38 = vmul.f32 0.0, %v425_v35  ;;  %v7346_v39 = vld [vmem:[%s7323_s13] sm:$0xff]  ;;  %vm7348_vm1 = vcmp.eq.s32.totalorder %v588_v28, 15  ;;  %v432_v43 = vmul.f32 0.0, %v426_v37 }
  0x17   : > { %6579 = vmatpush3.bf16.msra.mxu0 %v7283_v15  ;;  %6453 = vmatprep.subr.bf16.mxu1 %v6452_v20  ;;  %446 = vst [vmem:[#allocation2 + $0x160] sm:$0xff] %v7346_v39  ;;  %v7357_v44 = vld [vmem:[%s7323_s13 + $0x8] sm:$0xff]  ;;  %1207 = vst [vmem:[#allocation2 + $0x20] sm:$0xff] %v7346_v39  ;;  %v1486_v54 = vld [vmem:[%s8737_s3 + $0x50] sm:$0xff]  ;;  %v616_v58 = vand.u32 15, %v530_v45  ;;  %v630_v59 = vand.u32 15, %v532_v46 }
  0x18   : > { %6581 = vmatprep.subr.bf16.mxu0 %v7301_v22  ;;  %6076 = vmatprep.mubr.f32.mxu0 %v7346_v39  ;;  %444 = vst [vmem:[#allocation2 + $0x150] sm:$0xff] %v431_v38  ;;  %1205 = vst [vmem:[#allocation2 + $0x10] sm:$0xff] %v431_v38  ;;  %v1365_v48 = vsel %vm7341_vm0, 0.0, %v431_v38  ;;  %v1487_v55 = vld [vmem:[%s8737_s3 + $0x58] sm:$0xff]  ;;  %v1166_v56 = vsel %vm7348_vm1, 0.0, %v432_v43  ;;  %v7390_v57 = vld [vmem:[%s7323_s13 + $0x20] sm:$0xff] }
  0x19   : > { %447 = vst [vmem:[#allocation2 + $0x168] sm:$0xff] %v7357_v44  ;;  %1409 = vst [vmem:[#allocation2 + $0x2a8] sm:$0xff] %v7357_v44  ;;  %v5213_v60 = vld [vmem:[%s8737_s3 + $0x250] sm:$0xff]  ;;  %v5214_v61 = vld [vmem:[%s8737_s3 + $0x258] sm:$0xff]  ;;  %vm7399_vm2 = vcmp.eq.s32.totalorder %v602_v50, 15  ;;  %vm7403_vm3 = vcmp.eq.s32.totalorder %v609_v52, 0  ;;  %v7430_v6 = vpack.c.bf16 %v1487_v55, %v1486_v54 }
  0x1a   : > { %6455 = vmatpush3.bf16.msra.mxu1 %v6452_v20  ;;  %8776 = vst [vmem:[#allocation7_spill] sm:$0xff] %v7376_v53  ;;  %1406 = vst [vmem:[#allocation2 + $0x290] sm:$0xff] %v1365_v48  ;;  %v7409_v0 = vld [vmem:[%s7323_s13 + $0x28] sm:$0xff]  ;;  %v534_v1 = vadd.s32 88, %v7281_v14  ;;  %v1168_v2 = vsel %vm7399_vm2, 0.0, %v7357_v44  ;;  %v1369_v3 = vsel %vm7403_vm3, 0.0, %v7369_v49  ;;  %v7445_v12 = vpack.c.bf16 %v5214_v61, %v5213_v60 }
  0x1b   : > { %6583 = vmatpush3.bf16.msra.mxu0 %v7301_v22  ;;  %6457 = vmatprep.subr.bf16.mxu1 %v6456_v29  ;;  %445 = vst [vmem:[#allocation2 + $0x158] sm:$0xff] %v432_v43  ;;  %1407 = vst [vmem:[#allocation2 + $0x298] sm:$0xff] %v432_v43  ;;  %vm7419_vm4 = vcmp.eq.s32.totalorder %v616_v58, 15  ;;  %v7425_v5 = vld [vmem:[%s7323_s13 + $0x30] sm:$0xff]  ;;  %vm7436_vm5 = vcmp.eq.s32.totalorder %v630_v59, 15  ;;  %v7441_v10 = vld [vmem:[%s7323_s13 + $0x38] sm:$0xff] }
  0x1c   : > { %6585 = vmatprep.subr.bf16.mxu0 %v7333_v32  ;;  %448 = vst [vmem:[#allocation2 + $0x170] sm:$0xff] %v7369_v49  ;;  %449 = vst [vmem:[#allocation2 + $0x178] sm:$0xff] %v7373_v51  ;;  %v1170_v7 = vsel %vm7419_vm4, 0.0, %v7373_v51  ;;  %v644_v11 = vand.u32 15, %v534_v1  ;;  %v1488_v13 = vld [vmem:[%s8737_s3 + $0x60] sm:$0xff]  ;;  %v1489_v16 = vld [vmem:[%s8737_s3 + $0x68] sm:$0xff] }
  0x1d   : > { %1209 = vst [vmem:[#allocation2 + $0x30] sm:$0xff] %v7369_v49  ;;  %1411 = vst [vmem:[#allocation2 + $0x2b8] sm:$0xff] %v7373_v51  ;;  %v1172_v17 = vsel %vm7436_vm5, 0.0, %v7409_v0  ;;  %v7458_v18 = vld [vmem:[%s7323_s13 + $0x40] sm:$0xff]  ;;  %v536_v19 = vadd.s32 104, %v7281_v14  ;;  %v538_v20 = vadd.s32 120, %v7281_v14  ;;  %v6468_v35 = vpack.c.bf16 %v1489_v16, %v1488_v13 }
  0x1e   : > { %1206 = vst [vmem:[#allocation2 + $0x18] sm:$0xff] %v1166_v56  ;;  %450 = vst [vmem:[#allocation2 + $0x180] sm:$0xff] %v7390_v57  ;;  %6459 = vmatpush3.bf16.msra.mxu1 %v6456_v29  ;;  %v5215_v21 = vld [vmem:[%s8737_s3 + $0x260] sm:$0xff]  ;;  %v5216_v23 = vld [vmem:[%s8737_s3 + $0x268] sm:$0xff]  ;;  %vm7470_vm6 = vcmp.eq.s32.totalorder %v644_v11, 15  ;;  %v540_v26 = vadd.s32 136, %v7281_v14 }
  0x1f   : > { %1211 = vst [vmem:[#allocation2 + $0x40] sm:$0xff] %v7390_v57  ;;  %451 = vst [vmem:[#allocation2 + $0x188] sm:$0xff] %v7409_v0  ;;  %6587 = vmatpush3.bf16.msra.mxu0 %v7333_v32  ;;  %6461 = vmatprep.subr.bf16.mxu1 %v7363_v47  ;;  %v7475_v25 = vld [vmem:[%s7323_s13 + $0x48] sm:$0xff]  ;;  %v527_v27 = vadd.s32 32, %v7281_v14  ;;  %v1174_v29 = vsel %vm7470_vm6, 0.0, %v7441_v10  ;;  %v7486_v30 = vld [vmem:[%s7323_s13 + $0x50] sm:$0xff]  ;;  %v7503_v41 = vpack.c.bf16 %v5216_v23, %v5215_v21 }
  0x20   : > { %1413 = vst [vmem:[#allocation2 + $0x2c8] sm:$0xff] %v7409_v0  ;;  %1208 = vst [vmem:[#allocation2 + $0x28] sm:$0xff] %v1168_v2  ;;  %6589 = vmatprep.subr.bf16.mxu0 %v7376_v53  ;;  %v1444_v28 = vld [vmem:[#allocation2 + $0xf] sm:$0xff]  ;;  %v658_v31 = vand.u32 15, %v536_v19  ;;  %v7490_v33 = vld [vmem:[%s7323_s13 + $0x58] sm:$0xff]  ;;  %v672_v34 = vand.u32 15, %v538_v20 }
  0x21   : > { %1410 = vst [vmem:[#allocation2 + $0x2b0] sm:$0xff] %v1369_v3  ;;  %452 = vst [vmem:[#allocation2 + $0x190] sm:$0xff] %v7425_v5  ;;  %v7498_v36 = vld [vmem:[%s7323_s13 + $0x60] sm:$0xff]  ;;  %v686_v37 = vand.u32 15, %v540_v26  ;;  %v595_v38 = vand.u32 15, %v527_v27  ;;  %v542_v40 = vadd.s32 152, %v7281_v14  ;;  %5756 = vmatprep.mubr.f32.mxu1 %v1444_v28 }
  0x22   : > { %1213 = vst [vmem:[#allocation2 + $0x50] sm:$0xff] %v7425_v5  ;;  %8785 = vst [vmem:[#allocation8_spill] sm:$0xff] %v7445_v12  ;;  %6463 = vmatpush3.bf16.msra.mxu1 %v7363_v47  ;;  %v1490_v42 = vld [vmem:[%s8737_s3 + $0x70] sm:$0xff]  ;;  %v1491_v43 = vld [vmem:[%s8737_s3 + $0x78] sm:$0xff]  ;;  %vm1056_vm7 = vcmp.eq.s32.totalorder %v658_v31, 15  ;;  %vm1058_vm8 = vcmp.eq.s32.totalorder %v672_v34, 15 }
  0x23   : > { %1210 = vst [vmem:[#allocation2 + $0x38] sm:$0xff] %v1170_v7  ;;  %453 = vst [vmem:[#allocation2 + $0x198] sm:$0xff] %v7441_v10  ;;  %6591 = vmatpush3.bf16.msra.mxu0 %v7376_v53  ;;  %6465 = vmatprep.subr.bf16.mxu1 %v7430_v6  ;;  %v544_v45 = vadd.s32 168, %v7281_v14  ;;  %v5217_v46 = vld [vmem:[%s8737_s3 + $0x270] sm:$0xff]  ;;  %v5218_v47 = vld [vmem:[%s8737_s3 + $0x278] sm:$0xff]  ;;  %v1176_v48 = vsel %vm1056_vm7, 0.0, %v7475_v25  ;;  %v6472_v58 = vpack.c.bf16 %v1491_v43, %v1490_v42 }
  0x24   : > { %1415 = vst [vmem:[#allocation2 + $0x2d8] sm:$0xff] %v7441_v10  ;;  %1212 = vst [vmem:[#allocation2 + $0x48] sm:$0xff] %v1172_v17  ;;  %6593 = vmatprep.subr.bf16.mxu0 %v7445_v12  ;;  %v1178_v50 = vsel %vm1058_vm8, 0.0, %v7490_v33  ;;  %v7523_v52 = vld [vmem:[%s7323_s13 + $0x68] sm:$0xff]  ;;  %vm1060_vm9 = vcmp.eq.s32.totalorder %v686_v37, 15  ;;  %vm7529_vm10 = vcmp.eq.s32.totalorder %v595_v38, 0  ;;  %v7542_v63 = vpack.c.bf16 %v5218_v47, %v5217_v46 }
  0x25   : > { %454 = vst [vmem:[#allocation2 + $0x1a0] sm:$0xff] %v7458_v18  ;;  %1215 = vst [vmem:[#allocation2 + $0x60] sm:$0xff] %v7458_v18  ;;  %v1180_v54 = vsel %vm1060_vm9, 0.0, %v7523_v52  ;;  %v700_v56 = vand.u32 15, %v542_v40  ;;  %v7535_v59 = vld [vmem:[%s7323_s13 + $0x70] sm:$0xff]  ;;  %v1367_v60 = vsel %vm7529_vm10, 0.0, %v7346_v39 }
  0x26   : > { %455 = vst [vmem:[#allocation2 + $0x1a8] sm:$0xff] %v7475_v25  ;;  %1417 = vst [vmem:[#allocation2 + $0x2e8] sm:$0xff] %v7475_v25  ;;  %6467 = vmatpush3.bf16.msra.mxu1 %v7430_v6  ;;  %v714_v61 = vand.u32 15, %v544_v45  ;;  %v531_v62 = vadd.s32 64, %v7281_v14  ;;  %v5155_v1 = vld [vmem:[%s8737_s3 + $0x80] sm:$0xff]  ;;  %v5156_v2 = vld [vmem:[%s8737_s3 + $0x88] sm:$0xff] }
  0x27   : > { %1214 = vst [vmem:[#allocation2 + $0x58] sm:$0xff] %v1174_v29  ;;  %456 = vst [vmem:[#allocation2 + $0x1b0] sm:$0xff] %v7486_v30  ;;  %6595 = vmatpush3.bf16.msra.mxu0 %v7445_v12  ;;  %6469 = vmatprep.subr.bf16.mxu1 %v6468_v35  ;;  %v7552_v3 = vld [vmem:[%s7323_s13 + $0x78] sm:$0xff]  ;;  %vm1062_vm11 = vcmp.eq.s32.totalorder %v700_v56, 15  ;;  %v546_v39 = vadd.s32 184, %v7281_v14  ;;  %v533_v4 = vadd.s32 80, %v7281_v14  ;;  %v6476_v20 = vpack.c.bf16 %v5156_v2, %v5155_v1 }
  0x28   : > { %457 = vst [vmem:[#allocation2 + $0x1b8] sm:$0xff] %v7490_v33  ;;  %1217 = vst [vmem:[#allocation2 + $0x70] sm:$0xff] %v7486_v30  ;;  %6597 = vmatprep.subr.bf16.mxu0 %v7503_v41  ;;  %v5219_v6 = vld [vmem:[%s8737_s3 + $0x280] sm:$0xff]  ;;  %v5220_v7 = vld [vmem:[%s8737_s3 + $0x288] sm:$0xff]  ;;  %v1182_v8 = vsel %vm1062_vm11, 0.0, %v7552_v3  ;;  %v623_v11 = vand.u32 15, %v531_v62 }
  0x29   : > { %1419 = vst [vmem:[#allocation2 + $0x2f8] sm:$0xff] %v7490_v33  ;;  %8788 = vst [vmem:[#allocation9_spill] sm:$0xff] %v7503_v41  ;;  %vm7566_vm12 = vcmp.eq.s32.totalorder %v714_v61, 15  ;;  %v728_v16 = vand.u32 15, %v546_v39  ;;  %v637_v17 = vand.u32 15, %v533_v4  ;;  %v548_v19 = vadd.s32 200, %v7281_v14 }
  0x2a   : > { %458 = vst [vmem:[#allocation2 + $0x1c0] sm:$0xff] %v7498_v36  ;;  %1219 = vst [vmem:[#allocation2 + $0x80] sm:$0xff] %v7498_v36  ;;  %6471 = vmatpush3.bf16.msra.mxu1 %v6468_v35  ;;  %v5221_v21 = vld [vmem:[%s8737_s3 + $0x290] sm:$0xff]  ;;  %vm7575_vm13 = vcmp.eq.s32.totalorder %v623_v11, 0  ;;  %v535_v24 = vadd.s32 96, %v7281_v14  ;;  %v550_v26 = vadd.s32 216, %v7281_v14  ;;  %v7582_v27 = vpack.c.bf16 %v5220_v7, %v5219_v6 }
  0x2b   : > { %1216 = vst [vmem:[#allocation2 + $0x68] sm:$0xff] %v1176_v48  ;;  %1218 = vst [vmem:[#allocation2 + $0x78] sm:$0xff] %v1178_v50  ;;  %6599 = vmatpush3.bf16.msra.mxu0 %v7503_v41  ;;  %6473 = vmatprep.subr.bf16.mxu1 %v6472_v58  ;;  %v5222_v28 = vld [vmem:[%s8737_s3 + $0x298] sm:$0xff]  ;;  %v7588_v29 = vld [vmem:[%s7323_s13 + $0x80] sm:$0xff]  ;;  %v1371_v34 = vsel %vm7575_vm13, 0.0, %v7390_v57  ;;  %vm7596_vm14 = vcmp.eq.s32.totalorder %v637_v17, 0 }
  0x2c   : > { %459 = vst [vmem:[#allocation2 + $0x1c8] sm:$0xff] %v7523_v52  ;;  %1421 = vst [vmem:[#allocation2 + $0x308] sm:$0xff] %v7523_v52  ;;  %6601 = vmatprep.subr.bf16.mxu0 %v7542_v63  ;;  %v7591_v31 = vld [vmem:[%s7323_s13 + $0x88] sm:$0xff]  ;;  %v5157_v37 = vld [vmem:[%s8737_s3 + $0x90] sm:$0xff]  ;;  %vm7610_vm15 = vcmp.eq.s32.totalorder %v728_v16, 15  ;;  %v1373_v42 = vsel %vm7596_vm14, 0.0, %v7425_v5  ;;  %v7625_v55 = vpack.c.bf16 %v5222_v28, %v5221_v21 }
  0x2d   : > { %1220 = vst [vmem:[#allocation2 + $0x88] sm:$0xff] %v1180_v54  ;;  %8791 = vst [vmem:[#allocation10_spill] sm:$0xff] %v7542_v63  ;;  %v1184_v38 = vsel %vm7566_vm12, 0.0, %v7591_v31  ;;  %v742_v43 = vand.u32 15, %v548_v19  ;;  %v1445_v45 = vld [vmem:[#allocation2 + $0x17] sm:$0xff]  ;;  %v651_v48 = vand.u32 15, %v535_v24 }
  0x2e   : > { %460 = vst [vmem:[#allocation2 + $0x1d0] sm:$0xff] %v7535_v59  ;;  %1221 = vst [vmem:[#allocation2 + $0x90] sm:$0xff] %v7535_v59  ;;  %6475 = vmatpush3.bf16.msra.mxu1 %v6472_v58  ;;  %v5158_v46 = vld [vmem:[%s8737_s3 + $0x98] sm:$0xff]  ;;  %v7621_v47 = vld [vmem:[%s7323_s13 + $0x90] sm:$0xff]  ;;  %v756_v50 = vand.u32 15, %v550_v26  ;;  %v537_v54 = vadd.s32 112, %v7281_v14 }
  0x2f   : > { %1408 = vst [vmem:[#allocation2 + $0x2a0] sm:$0xff] %v1367_v60  ;;  %461 = vst [vmem:[#allocation2 + $0x1d8] sm:$0xff] %v7552_v3  ;;  %6603 = vmatpush3.bf16.msra.mxu0 %v7542_v63  ;;  %6477 = vmatprep.subr.bf16.mxu1 %v6476_v20  ;;  %v5223_v56 = vld [vmem:[%s8737_s3 + $0x2a0] sm:$0xff]  ;;  %v5224_v58 = vld [vmem:[%s8737_s3 + $0x2a8] sm:$0xff]  ;;  %v552_v61 = vadd.s32 232, %v7281_v14  ;;  %v539_v62 = vadd.s32 128, %v7281_v14  ;;  %v7661_v11 = vpack.c.bf16 %v5158_v46, %v5157_v37 }
  0x30   : > { %1423 = vst [vmem:[#allocation2 + $0x318] sm:$0xff] %v7552_v3  ;;  %1222 = vst [vmem:[#allocation2 + $0x98] sm:$0xff] %v1182_v8  ;;  %v7636_v60 = vld [vmem:[%s7323_s13 + $0x98] sm:$0xff]  ;;  %6605 = vmatprep.subr.bf16.mxu0 %v7582_v27  ;;  %v5159_v2 = vld [vmem:[%s8737_s3 + $0xa0] sm:$0xff]  ;;  %vm7649_vm0 = vcmp.eq.s32.totalorder %v742_v43, 15  ;;  %vm7653_vm1 = vcmp.eq.s32.totalorder %v651_v48, 0  ;;  %v7701_v37 = vpack.c.bf16 %v5224_v58, %v5223_v56 }
  0x31   : > { %462 = vst [vmem:[#allocation2 + $0x1e0] sm:$0xff] %v7588_v29  ;;  %1223 = vst [vmem:[#allocation2 + $0xa0] sm:$0xff] %v7588_v29  ;;  %v1446_v1 = vld [vmem:[#allocation2 + $0x1f] sm:$0xff]  ;;  %v1186_v39 = vsel %vm7610_vm15, 0.0, %v7636_v60  ;;  %vm7657_vm2 = vcmp.eq.s32.totalorder %v756_v50, 15  ;;  %5757 = vmatmul.mubr.f32.vlgmr.msra.gmra.mrb[0].mxu1 %v1445_v45  ;;  %v1447_v8 = vld [vmem:[#allocation2 + $0x27] sm:$0xff] }
  0x32   : > { %463 = vst [vmem:[#allocation2 + $0x1e8] sm:$0xff] %v7591_v31  ;;  %1425 = vst [vmem:[#allocation2 + $0x328] sm:$0xff] %v7591_v31  ;;  %v5160_v13 = vld [vmem:[%s8737_s3 + $0xa8] sm:$0xff]  ;;  %v7667_v16 = vld [vmem:[%s7323_s13 + $0xa0] sm:$0xff]  ;;  %v1375_v17 = vsel %vm7653_vm1, 0.0, %v7458_v18  ;;  %v665_v19 = vand.u32 15, %v537_v54  ;;  %6077 = vmatmul.mubr.f32.vlgmr.msra.gmra.mrb[0].mxu0 %v7357_v44  ;;  %6479 = vmatpush3.bf16.msra.mxu1 %v6476_v20 }
  0x33   : > { %1412 = vst [vmem:[#allocation2 + $0x2c0] sm:$0xff] %v1371_v34  ;;  %1224 = vst [vmem:[#allocation2 + $0xa8] sm:$0xff] %v1184_v38  ;;  %v770_v21 = vand.u32 15, %v552_v61  ;;  %v7676_v23 = vld [vmem:[%s7323_s13 + $0xa8] sm:$0xff]  ;;  %v7679_v24 = vld [vmem:[%s7323_s13 + $0xb0] sm:$0xff]  ;;  %v679_v28 = vand.u32 15, %v539_v62  ;;  %6607 = vmatpush3.bf16.msra.mxu0 %v7582_v27  ;;  %5759 = vmatprep.mubr.f32.mxu1 %v1446_v1 }
  0x34   : > { %1414 = vst [vmem:[#allocation2 + $0x2d0] sm:$0xff] %v1373_v42  ;;  %464 = vst [vmem:[#allocation2 + $0x1f0] sm:$0xff] %v7621_v47  ;;  %v7682_v26 = vld [vmem:[%s7323_s13 + $0xb8] sm:$0xff]  ;;  %v554_v34 = vadd.s32 248, %v7281_v14  ;;  %v541_v35 = vadd.s32 144, %v7281_v14  ;;  %v1448_v44 = vld [vmem:[#allocation2 + $0x2f] sm:$0xff]  ;;  %6079 = vmatprep.mubr.f32.mxu0 %v7369_v49  ;;  %6609 = vmatprep.subr.bf16.mxu0 %v7625_v55  ;;  %v7709_v42 = vpack.c.bf16 %v5160_v13, %v5159_v2 }
  0x35   : > { %1225 = vst [vmem:[#allocation2 + $0xb0] sm:$0xff] %v7621_v47  ;;  %465 = vst [vmem:[#allocation2 + $0x1f8] sm:$0xff] %v7636_v60  ;;  %v1188_v20 = vsel %vm7649_vm0, 0.0, %v7676_v23  ;;  %v1190_v27 = vsel %vm7657_vm2, 0.0, %v7682_v26  ;;  %vm1257_vm3 = vcmp.eq.s32.totalorder %v665_v19, 0  ;;  %v5225_v38 = vld [vmem:[%s8737_s3 + $0x2b0] sm:$0xff]  ;;  %5760 = vmatmul.mubr.f32.gmra.mrb[2].mxu1 %v1447_v8  ;;  %6481 = vmatprep.subr.bf16.mxu1 %v7661_v11 }
  0x36   : > { %1427 = vst [vmem:[#allocation2 + $0x338] sm:$0xff] %v7636_v60  ;;  %1226 = vst [vmem:[#allocation2 + $0xb8] sm:$0xff] %v1186_v39  ;;  %v5226_v40 = vld [vmem:[%s8737_s3 + $0x2b8] sm:$0xff]  ;;  %v1377_v43 = vsel %vm1257_vm3, 0.0, %v7486_v30  ;;  %vm1259_vm4 = vcmp.eq.s32.totalorder %v679_v28, 0  ;;  %v5161_v49 = vld [vmem:[%s8737_s3 + $0xb0] sm:$0xff]  ;;  %6080 = vmatmul.mubr.f32.gmra.mrb[2].mxu0 %v7373_v51  ;;  %5762 = vmatprep.mubr.f32.mxu1 %v1448_v44 }
  0x37   : > { %466 = vst [vmem:[#allocation2 + $0x200] sm:$0xff] %v7667_v16  ;;  %1227 = vst [vmem:[#allocation2 + $0xc0] sm:$0xff] %v7667_v16  ;;  %v5162_v45 = vld [vmem:[%s8737_s3 + $0xb8] sm:$0xff]  ;;  %vm7719_vm5 = vcmp.eq.s32.totalorder %v770_v21, 15  ;;  %v1379_v48 = vsel %vm1259_vm4, 0.0, %v7498_v36  ;;  %v784_v50 = vand.u32 15, %v554_v34  ;;  %6611 = vmatpush3.bf16.msra.mxu0 %v7625_v55  ;;  %6082 = vmatprep.mubr.f32.mxu0 %v7390_v57  ;;  %v7755_v55 = vpack.c.bf16 %v5226_v40, %v5225_v38 }
  0x38   : > { %1416 = vst [vmem:[#allocation2 + $0x2e0] sm:$0xff] %v1375_v17  ;;  %467 = vst [vmem:[#allocation2 + $0x208] sm:$0xff] %v7676_v23  ;;  %v693_v54 = vand.u32 15, %v541_v35  ;;  %v1449_v56 = vld [vmem:[#allocation2 + $0x37] sm:$0xff]  ;;  %v1450_v58 = vld [vmem:[#allocation2 + $0x3f] sm:$0xff]  ;;  %v556_v62 = vadd.s32 264, %v7281_v14  ;;  %6613 = vmatprep.subr.bf16.mxu0 %v7701_v37  ;;  %6483 = vmatpush3.bf16.msra.mxu1 %v7661_v11  ;;  %v6488_v28 = vpack.c.bf16 %v5162_v45, %v5161_v49 }
  0x39   : > { %1429 = vst [vmem:[#allocation2 + $0x348] sm:$0xff] %v7676_v23  ;;  %468 = vst [vmem:[#allocation2 + $0x210] sm:$0xff] %v7679_v24  ;;  %v7726_v61 = vld [vmem:[%s7323_s13 + $0xc0] sm:$0xff]  ;;  %v543_v1 = vadd.s32 160, %v7281_v14  ;;  %v545_v2 = vadd.s32 176, %v7281_v14  ;;  %v7736_v51 = vld [vmem:[%s7323_s13 + $0xc8] sm:$0xff]  ;;  %5763 = vmatmul.mubr.f32.gmra.mrb[4].mxu1 %v1449_v56  ;;  %6485 = vmatprep.subr.bf16.mxu1 %v7709_v42 }
  0x3a   : > { %1229 = vst [vmem:[#allocation2 + $0xd0] sm:$0xff] %v7679_v24  ;;  %469 = vst [vmem:[#allocation2 + $0x218] sm:$0xff] %v7682_v26  ;;  %v7739_v39 = vld [vmem:[%s7323_s13 + $0xd0] sm:$0xff]  ;;  %v7742_v4 = vld [vmem:[%s7323_s13 + $0xd8] sm:$0xff]  ;;  %vm7744_vm6 = vcmp.eq.s32.totalorder %v784_v50, 15  ;;  %vm7748_vm7 = vcmp.eq.s32.totalorder %v693_v54, 0  ;;  %6083 = vmatmul.mubr.f32.gmra.mrb[4].mxu0 %v7409_v0  ;;  %5765 = vmatprep.mubr.f32.mxu1 %v1450_v58 }
  0x3b   : > { %1431 = vst [vmem:[#allocation2 + $0x358] sm:$0xff] %v7682_v26  ;;  %1228 = vst [vmem:[#allocation2 + $0xc8] sm:$0xff] %v1188_v20  ;;  %v547_v57 = vadd.s32 192, %v7281_v14  ;;  %v1192_v8 = vsel %vm7719_vm5, 0.0, %v7736_v51  ;;  %v1194_v11 = vsel %vm7744_vm6, 0.0, %v7742_v4  ;;  %v1381_v13 = vsel %vm7748_vm7, 0.0, %v7535_v59  ;;  %6615 = vmatpush3.bf16.msra.mxu0 %v7701_v37  ;;  %6085 = vmatprep.mubr.f32.mxu0 %v7425_v5 }
  0x3c   : > { %1230 = vst [vmem:[#allocation2 + $0xd8] sm:$0xff] %v1190_v27  ;;  %1418 = vst [vmem:[#allocation2 + $0x2f0] sm:$0xff] %v1377_v43  ;;  %v1451_v17 = vld [vmem:[#allocation2 + $0x47] sm:$0xff]  ;;  %v798_v34 = vand.u32 15, %v556_v62  ;;  %v707_v35 = vand.u32 15, %v543_v1  ;;  %v721_v44 = vand.u32 15, %v545_v2  ;;  %6617 = vmatprep.subr.bf16.mxu0 %v7755_v55  ;;  %6487 = vmatpush3.bf16.msra.mxu1 %v7709_v42 }
  0x3d   : > { %1420 = vst [vmem:[#allocation2 + $0x300] sm:$0xff] %v1379_v48  ;;  %470 = vst [vmem:[#allocation2 + $0x220] sm:$0xff] %v7726_v61  ;;  %v5227_v19 = vld [vmem:[%s8737_s3 + $0x2c0] sm:$0xff]  ;;  %v5228_v21 = vld [vmem:[%s8737_s3 + $0x2c8] sm:$0xff]  ;;  %v735_v40 = vand.u32 15, %v547_v57  ;;  %v549_v43 = vadd.s32 208, %v7281_v14  ;;  %5766 = vmatmul.mubr.f32.gmra.mrb[6].mxu1 %v1451_v17  ;;  %6489 = vmatprep.subr.bf16.mxu1 %v6488_v28 }
  0x3e   : > { %1231 = vst [vmem:[#allocation2 + $0xe0] sm:$0xff] %v7726_v61  ;;  %471 = vst [vmem:[#allocation2 + $0x228] sm:$0xff] %v7736_v51  ;;  %v5163_v20 = vld [vmem:[%s8737_s3 + $0xc0] sm:$0xff]  ;;  %v5164_v27 = vld [vmem:[%s8737_s3 + $0xc8] sm:$0xff]  ;;  %v551_v49 = vadd.s32 224, %v7281_v14  ;;  %vm7795_vm8 = vcmp.eq.s32.totalorder %v798_v34, 15  ;;  %v6620_v5 = vpack.c.bf16 %v5228_v21, %v5227_v19  ;;  %6086 = vmatmul.mubr.f32.gmra.mrb[6].mxu0 %v7441_v10 }
  0x3f   : > { %1433 = vst [vmem:[#allocation2 + $0x368] sm:$0xff] %v7736_v51  ;;  %472 = vst [vmem:[#allocation2 + $0x230] sm:$0xff] %v7739_v39  ;;  %v7787_v38 = vld [vmem:[%s7323_s13 + $0xe0] sm:$0xff]  ;;  %v1452_v0 = vld [vmem:[#allocation2 + $0x4f] sm:$0xff]  ;;  %vm7799_vm9 = vcmp.eq.s32.totalorder %v707_v35, 0  ;;  %vm7803_vm10 = vcmp.eq.s32.totalorder %v721_v44, 0  ;;  %v6492_v62 = vpack.c.bf16 %v5164_v27, %v5163_v20  ;;  %6619 = vmatpush3.bf16.msra.mxu0 %v7755_v55  ;;  %6088 = vmatprep.mubr.f32.mxu0 %v7458_v18 }
  0x40   : > { %1233 = vst [vmem:[#allocation2 + $0xf0] sm:$0xff] %v7739_v39  ;;  %473 = vst [vmem:[#allocation2 + $0x238] sm:$0xff] %v7742_v4  ;;  %v5229_v37 = vld [vmem:[%s8737_s3 + $0x2d0] sm:$0xff]  ;;  %v7813_v50 = vld [vmem:[%s7323_s13 + $0xe8] sm:$0xff]  ;;  %v1383_v54 = vsel %vm7799_vm9, 0.0, %v7588_v29  ;;  %v1385_v56 = vsel %vm7803_vm10, 0.0, %v7621_v47  ;;  %5768 = vmatprep.mubr.f32.mxu1 %v1452_v0  ;;  %6621 = vmatprep.subr.bf16.mxu0 %v6620_v5 }
  0x41   : > { %1435 = vst [vmem:[#allocation2 + $0x378] sm:$0xff] %v7742_v4  ;;  %1232 = vst [vmem:[#allocation2 + $0xe8] sm:$0xff] %v1192_v8  ;;  %vm7821_vm11 = vcmp.eq.s32.totalorder %v735_v40, 0  ;;  %v5230_v42 = vld [vmem:[%s8737_s3 + $0x2d8] sm:$0xff]  ;;  %v5165_v1 = vld [vmem:[%s8737_s3 + $0xd0] sm:$0xff]  ;;  %v1196_v6 = vsel %vm7795_vm8, 0.0, %v7813_v50  ;;  %6491 = vmatpush3.bf16.msra.mxu1 %v6488_v28 }
  0x42   : > { %1234 = vst [vmem:[#allocation2 + $0xf8] sm:$0xff] %v1194_v11  ;;  %1422 = vst [vmem:[#allocation2 + $0x310] sm:$0xff] %v1381_v13  ;;  %v5166_v2 = vld [vmem:[%s8737_s3 + $0xd8] sm:$0xff]  ;;  %v1387_v7 = vsel %vm7821_vm11, 0.0, %v7667_v16  ;;  %v749_v57 = vand.u32 15, %v549_v43  ;;  %v763_v11 = vand.u32 15, %v551_v49  ;;  %v6624_v34 = vpack.c.bf16 %v5230_v42, %v5229_v37  ;;  %6493 = vmatprep.subr.bf16.mxu1 %v6492_v62  ;;  %6089 = vmatmul.mubr.f32.gmra.mrb[8].mxu0 %v7475_v25 }
  0x43   : > { %474 = vst [vmem:[#allocation2 + $0x240] sm:$0xff] %v7787_v38  ;;  %1235 = vst [vmem:[#allocation2 + $0x100] sm:$0xff] %v7787_v38  ;;  %v1453_v8 = vld [vmem:[#allocation2 + $0x57] sm:$0xff]  ;;  %v553_v13 = vadd.s32 240, %v7281_v14  ;;  %v555_v17 = vadd.s32 256, %v7281_v14  ;;  %v1454_v19 = vld [vmem:[#allocation2 + $0x5f] sm:$0xff]  ;;  %v6496_v10 = vpack.c.bf16 %v5166_v2, %v5165_v1  ;;  %6623 = vmatpush3.bf16.msra.mxu0 %v6620_v5  ;;  %6091 = vmatprep.mubr.f32.mxu0 %v7486_v30 }
  0x44   : > { %475 = vst [vmem:[#allocation2 + $0x248] sm:$0xff] %v7813_v50  ;;  %1437 = vst [vmem:[#allocation2 + $0x388] sm:$0xff] %v7813_v50  ;;  %vm1269_vm12 = vcmp.eq.s32.totalorder %v749_v57, 0  ;;  %v557_v21 = vadd.s32 272, %v7281_v14  ;;  %vm1271_vm13 = vcmp.eq.s32.totalorder %v763_v11, 0  ;;  %5769 = vmatmul.mubr.f32.gmra.mrb[8].mxu1 %v1453_v8  ;;  %v5231_v44 = vld [vmem:[%s8737_s3 + $0x2e0] sm:$0xff]  ;;  %6625 = vmatprep.subr.bf16.mxu0 %v6624_v34 }
  0x45   : > { %1424 = vst [vmem:[#allocation2 + $0x320] sm:$0xff] %v1383_v54  ;;  %1426 = vst [vmem:[#allocation2 + $0x330] sm:$0xff] %v1385_v56  ;;  %v1389_v35 = vsel %vm1269_vm12, 0.0, %v7679_v24  ;;  %v5232_v18 = vld [vmem:[%s8737_s3 + $0x2e8] sm:$0xff]  ;;  %v1391_v55 = vsel %vm1271_vm13, 0.0, %v7726_v61  ;;  %v777_v20 = vand.u32 15, %v553_v13  ;;  %5771 = vmatprep.mubr.f32.mxu1 %v1454_v19  ;;  %6495 = vmatpush3.bf16.msra.mxu1 %v6492_v62 }
  0x46   : > { %1236 = vst [vmem:[#allocation2 + $0x108] sm:$0xff] %v1196_v6  ;;  %1428 = vst [vmem:[#allocation2 + $0x340] sm:$0xff] %v1387_v7  ;;  %v791_v28 = vand.u32 15, %v555_v17  ;;  %v559_v27 = vadd.s32 288, %v7281_v14  ;;  %v1455_v40 = vld [vmem:[#allocation2 + $0x67] sm:$0xff]  ;;  %v805_v0 = vand.u32 15, %v557_v21  ;;  %v6628_v25 = vpack.c.bf16 %v5232_v18, %v5231_v44  ;;  %6497 = vmatprep.subr.bf16.mxu1 %v6496_v10  ;;  %6092 = vmatmul.mubr.f32.gmra.mrb[10].mxu0 %v7490_v33 }
  0x47   : > { %1430 = vst [vmem:[#allocation2 + $0x350] sm:$0xff] %v1389_v35  ;;  %v5167_v43 = vld [vmem:[%s8737_s3 + $0xe0] sm:$0xff]  ;;  %v5168_v49 = vld [vmem:[%s8737_s3 + $0xe8] sm:$0xff]  ;;  %1432 = vst [vmem:[#allocation2 + $0x360] sm:$0xff] %v1391_v55  ;;  %v558_v45 = vadd.s32 280, %v7281_v14  ;;  %vm1273_vm14 = vcmp.eq.s32.totalorder %v777_v20, 0  ;;  %6627 = vmatpush3.bf16.msra.mxu0 %v6624_v34  ;;  %6094 = vmatprep.mubr.f32.mxu0 %v7498_v36 }
  0x48   : > { %v7866_v46 = vld [vmem:[#allocation2 + $0x6f] sm:$0xff]  ;;  %vm1275_vm15 = vcmp.eq.s32.totalorder %v791_v28, 0  ;;  %s5289_s27 = sadd.s32 240, %s7295_s25  ;;  %v1393_v48 = vsel %vm1273_vm14, 0.0, %v7739_v39  ;;  %5772 = vmatmul.mubr.f32.gmra.mrb[10].mxu1 %v1455_v40  ;;  %v5234_v30 = vld [vmem:[%s8737_s3 + $0x2f8] sm:$0xff]  ;;  %v6500_v5 = vpack.c.bf16 %v5168_v49, %v5167_v43  ;;  %vm7877_vm0 = vcmp.eq.s32.totalorder %v805_v0, 0  ;;  %6629 = vmatprep.subr.bf16.mxu0 %v6628_v25 }
  0x49   : > { %v1395_v37 = vsel %vm1275_vm15, 0.0, %v7787_v38  ;;  %v5233_v54 = vld [vmem:[%s8737_s3 + $0x2f0] sm:$0xff]  ;;  %1434 = vst [vmem:[#allocation2 + $0x370] sm:$0xff] %v1393_v48  ;;  %v819_v58 = vand.u32 15, %v559_v27  ;;  %v812_v42 = vand.u32 15, %v558_v45  ;;  %5774 = vmatprep.mubr.f32.mxu1 %v7866_v46  ;;  %v5170_v2 = vld [vmem:[%s8737_s3 + $0xf8] sm:$0xff]  ;;  %s7894_s12 = scalar_lea.vmem %s8736_s2, %s5289_s27  ;;  %6499 = vmatpush3.bf16.msra.mxu1 %v6496_v10 }
  0x4a   : > { %1436 = vst [vmem:[#allocation2 + $0x380] sm:$0xff] %v1395_v37  ;;  %v7883_v62 = vld [vmem:[#allocation2 + $0x77] sm:$0xff]  ;;  %v7897_v33 = vld [vmem:[#allocation2 + $0x7f] sm:$0xff]  ;;  %v6632_v57 = vpack.c.bf16 %v5234_v30, %v5233_v54  ;;  %v5236_v13 = vld [vmem:[%s8737_s3 + $0x308] sm:$0xff]  ;;  %6501 = vmatprep.subr.bf16.mxu1 %v6500_v5  ;;  %6095 = vmatmul.mubr.f32.gmra.mrb[12].mxu0 %v7523_v52 }
  0x4b   : > { %v5169_v1 = vld [vmem:[%s8737_s3 + $0xf0] sm:$0xff]  ;;  %vm7900_vm1 = vcmp.eq.s32.totalorder %v812_v42, 15  ;;  %v424_v11 = vld [vmem:[%s7323_s13 + $0xf8] sm:$0xff]  ;;  %v5235_v36 = vld [vmem:[%s8737_s3 + $0x300] sm:$0xff]  ;;  %vm7915_vm2 = vcmp.eq.s32.totalorder %v819_v58, 0  ;;  %6631 = vmatpush3.bf16.msra.mxu0 %v6628_v25  ;;  %6097 = vmatprep.mubr.f32.mxu0 %v7535_v59 }
  0x4c   : > { %v423_v6 = vld [vmem:[%s7323_s13 + $0xf0] sm:$0xff]  ;;  %5775 = vmatmul.mubr.f32.gmra.mrb[12].mxu1 %v7883_v62  ;;  %v6504_v17 = vpack.c.bf16 %v5170_v2, %v5169_v1  ;;  %477 = vst [vmem:[#allocation2 + $0x258] sm:$0xff] %v424_v11  ;;  %1439 = vst [vmem:[#allocation2 + $0x398] sm:$0xff] %v424_v11  ;;  %v433_v19 = vld [vmem:[%s7894_s12] sm:$0xff]  ;;  %v1198_v34 = vsel %vm7900_vm1, 0.0, %v424_v11  ;;  %6633 = vmatprep.subr.bf16.mxu0 %v6632_v57  ;;  %v6636_v20 = vpack.c.bf16 %v5236_v13, %v5235_v36 }
  0x4d   : > { %476 = vst [vmem:[#allocation2 + $0x250] sm:$0xff] %v423_v6  ;;  %v1397_v8 = vsel %vm7877_vm0, 0.0, %v423_v6  ;;  %1237 = vst [vmem:[#allocation2 + $0x110] sm:$0xff] %v423_v6  ;;  %5777 = vmatprep.mubr.f32.mxu1 %v7897_v33  ;;  %v7923_v10 = vld [vmem:[#allocation2 + $0x87] sm:$0xff]  ;;  %v439_v18 = vmul.f32 0.0, %v433_v19  ;;  %v7932_v55 = vld [vmem:[#allocation2 + $0x8f] sm:$0xff]  ;;  %6503 = vmatpush3.bf16.msra.mxu1 %v6500_v5 }
  0x4e   : > { %1438 = vst [vmem:[#allocation2 + $0x390] sm:$0xff] %v1397_v8  ;;  %v5171_v35 = vld [vmem:[%s8737_s3 + $0x100] sm:$0xff]  ;;  %v5172_v44 = vld [vmem:[%s8737_s3 + $0x108] sm:$0xff]  ;;  %1238 = vst [vmem:[#allocation2 + $0x118] sm:$0xff] %v1198_v34  ;;  %6505 = vmatprep.subr.bf16.mxu1 %v6504_v17  ;;  %6098 = vmatmul.mubr.f32.gmra.mrb[14].mxu0 %v7552_v3  ;;  %v560_v5 = vadd.s32 296, %v7281_v14 }
  0x4f   : > { %v3229_v52 = vld [vmem:[#allocation2 + $0x2a1] sm:$0xff]  ;;  %478 = vst [vmem:[#allocation2 + $0x260] sm:$0xff] %v439_v18  ;;  %v1399_v28 = vsel %vm7915_vm2, 0.0, %v439_v18  ;;  %1239 = vst [vmem:[#allocation2 + $0x120] sm:$0xff] %v439_v18  ;;  %v5237_v27 = vld [vmem:[%s8737_s3 + $0x310] sm:$0xff]  ;;  %v7943_v40 = vpack.c.bf16 %v5172_v44, %v5171_v35  ;;  %6635 = vmatpush3.bf16.msra.mxu0 %v6632_v57 }
  0x50   : > { %5778 = vmatmul.mubr.f32.gmra.mrb[14].mxu1 %v7923_v10  ;;  %v5238_v59 = vld [vmem:[%s8737_s3 + $0x318] sm:$0xff]  ;;  %1440 = vst [vmem:[#allocation2 + $0x3a0] sm:$0xff] %v1399_v28  ;;  %6156 = vmatprep.mubr.f32.mxu0 %v3229_v52  ;;  %v7949_v49 = vld [vmem:[#allocation2 + $0x2a9] sm:$0xff]  ;;  %v5239_v3 = vld [vmem:[%s8737_s3 + $0x320] sm:$0xff]  ;;  %v826_v57 = vand.u32 15, %v560_v5 }
  0x51   : > { %5780 = vmatprep.mubr.f32.mxu1 %v7932_v55  ;;  %v7947_v43 = vld [vmem:[#allocation2 + $0x97] sm:$0xff]  ;;  %v7951_v0 = vld [vmem:[#allocation2 + $0x9f] sm:$0xff]  ;;  %6637 = vmatprep.subr.bf16.mxu0 %v6636_v20  ;;  %v6640_v25 = vpack.c.bf16 %v5238_v59, %v5237_v27  ;;  %v5240_v48 = vld [vmem:[%s8737_s3 + $0x328] sm:$0xff] }
  0x52   : > { %v7953_v45 = vld [vmem:[#allocation2 + $0x2b1] sm:$0xff]  ;;  %6507 = vmatpush3.bf16.msra.mxu1 %v6504_v17  ;;  %6157 = vmatmul.mubr.f32.vlgmr.msra.gmra.mrb[0].mxu0 %v7949_v49  ;;  %v7965_v37 = vld [vmem:[#allocation2 + $0xa7] sm:$0xff]  ;;  %v7968_v54 = vld [vmem:[#allocation2 + $0x2b9] sm:$0xff]  ;;  %v6644_v58 = vpack.c.bf16 %v5240_v48, %v5239_v3  ;;  %vm8010_vm3 = vcmp.eq.s32.totalorder %v826_v57, 15 }
  0x53   : > { %6509 = vmatprep.subr.bf16.mxu1 %v7943_v40  ;;  %6639 = vmatpush3.bf16.msra.mxu0 %v6636_v20  ;;  %v7970_v30 = vld [vmem:[#allocation2 + $0xaf] sm:$0xff]  ;;  %v7973_v56 = vld [vmem:[#allocation2 + $0x2c1] sm:$0xff]  ;;  %v5242_v1 = vld [vmem:[%s8737_s3 + $0x338] sm:$0xff] }
  0x54   : > { %5781 = vmatmul.mubr.f32.gmra.mrb[16].mxu1 %v7947_v43  ;;  %6159 = vmatprep.mubr.f32.mxu0 %v7953_v45  ;;  %v5241_v42 = vld [vmem:[%s8737_s3 + $0x330] sm:$0xff]  ;;  %v7989_v7 = vld [vmem:[#allocation2 + $0xbf] sm:$0xff]  ;;  %v5244_v13 = vld [vmem:[%s8737_s3 + $0x348] sm:$0xff] }
  0x55   : > { %5783 = vmatprep.mubr.f32.mxu1 %v7951_v0  ;;  %6641 = vmatprep.subr.bf16.mxu0 %v6640_v25  ;;  %v7984_v2 = vld [vmem:[#allocation2 + $0xb7] sm:$0xff]  ;;  %v7987_v6 = vld [vmem:[#allocation2 + $0x2c9] sm:$0xff]  ;;  %v6648_v11 = vpack.c.bf16 %v5242_v1, %v5241_v42  ;;  %v5243_v36 = vld [vmem:[%s8737_s3 + $0x340] sm:$0xff] }
  0x56   : > { %6160 = vmatmul.mubr.f32.gmra.mrb[2].mxu0 %v7968_v54  ;;  %v7991_v8 = vld [vmem:[#allocation2 + $0x2d1] sm:$0xff]  ;;  %v8002_v17 = vld [vmem:[#allocation2 + $0xc7] sm:$0xff]  ;;  %v8005_v19 = vld [vmem:[#allocation2 + $0x2d9] sm:$0xff]  ;;  %v6652_v18 = vpack.c.bf16 %v5244_v13, %v5243_v36 }
  0x57   : > { %6162 = vmatprep.mubr.f32.mxu0 %v7973_v56  ;;  %6643 = vmatpush3.bf16.msra.mxu0 %v6640_v25  ;;  %v8007_v21 = vld [vmem:[#allocation2 + $0xcf] sm:$0xff]  ;;  %v8014_v44 = vld [vmem:[#allocation2 + $0x2e1] sm:$0xff]  ;;  %v5246_v28 = vld [vmem:[%s8737_s3 + $0x358] sm:$0xff] }
  0x58   : > { %5784 = vmatmul.mubr.f32.gmra.mrb[18].mxu1 %v7965_v37  ;;  %6645 = vmatprep.subr.bf16.mxu0 %v6644_v58  ;;  %v434_v34 = vld [vmem:[%s7894_s12 + $0x8] sm:$0xff]  ;;  %v5245_v20 = vld [vmem:[%s8737_s3 + $0x350] sm:$0xff]  ;;  %v8036_v3 = vld [vmem:[#allocation2 + $0xdf] sm:$0xff] }
  0x59   : > { %5786 = vmatprep.mubr.f32.mxu1 %v7970_v30  ;;  %v8016_v52 = vmul.f32 0.0, %v434_v34  ;;  %v8027_v27 = vld [vmem:[#allocation2 + $0xd7] sm:$0xff]  ;;  %v8034_v25 = vld [vmem:[#allocation2 + $0x2e9] sm:$0xff]  ;;  %v6656_v5 = vpack.c.bf16 %v5246_v28, %v5245_v20  ;;  %v8056_v36 = vld [vmem:[#allocation2 + $0x301] sm:$0xff] }
  0x5a   : > { %6163 = vmatmul.mubr.f32.gmra.mrb[4].mxu0 %v7987_v6  ;;  %v8038_v48 = vld [vmem:[#allocation2 + $0x2f1] sm:$0xff]  ;;  %v5248_v42 = vld [vmem:[%s8737_s3 + $0x368] sm:$0xff]  ;;  %v8052_v57 = vld [vmem:[#allocation2 + $0x2f9] sm:$0xff] }
  0x5b   : > { %6165 = vmatprep.mubr.f32.mxu0 %v7991_v8  ;;  %6647 = vmatpush3.bf16.msra.mxu0 %v6644_v58  ;;  %8828 = vst [vmem:[#allocation11_spill] sm:$0xff] %v8016_v52  ;;  %v1200_v59 = vsel %vm8010_vm3, 0.0, %v8016_v52  ;;  %1441 = vst [vmem:[#allocation2 + $0x3a8] sm:$0xff] %v8016_v52  ;;  %v5247_v58 = vld [vmem:[%s8737_s3 + $0x360] sm:$0xff]  ;;  %v5249_v34 = vld [vmem:[%s8737_s3 + $0x370] sm:$0xff] }
  0x5c   : > { %5787 = vmatmul.mubr.f32.gmra.mrb[20].mxu1 %v7984_v2  ;;  %6649 = vmatprep.subr.bf16.mxu0 %v6648_v11  ;;  %1240 = vst [vmem:[#allocation2 + $0x128] sm:$0xff] %v1200_v59  ;;  %v8049_v1 = vld [vmem:[#allocation2 + $0xe7] sm:$0xff]  ;;  %v6660_v13 = vpack.c.bf16 %v5248_v42, %v5247_v58  ;;  %v5250_v35 = vld [vmem:[%s8737_s3 + $0x378] sm:$0xff]  ;;  %v5173_v41 = vld [vmem:[%s8737_s3 + $0x110] sm:$0xff] }
  0x5d   : > { %5789 = vmatprep.mubr.f32.mxu1 %v7989_v7  ;;  %v8067_v20 = vld [vmem:[#allocation2 + $0xf7] sm:$0xff]  ;;  %v8072_v28 = vld [vmem:[#allocation2 + $0xff] sm:$0xff]  ;;  %v6664_v58 = vpack.c.bf16 %v5250_v35, %v5249_v34  ;;  %v5252_v52 = vld [vmem:[%s8737_s3 + $0x388] sm:$0xff] }
  0x5e   : > { %6166 = vmatmul.mubr.f32.gmra.mrb[6].mxu0 %v8005_v19  ;;  %v8074_v59 = vld [vmem:[#allocation2 + $0x311] sm:$0xff]  ;;  %v5251_v42 = vld [vmem:[%s8737_s3 + $0x380] sm:$0xff]  ;;  %v7160_v15 = vld [vmem:[#allocation2 + $0x168] sm:$0xff] }
  0x5f   : > { %6168 = vmatprep.mubr.f32.mxu0 %v8014_v44  ;;  %6651 = vmatpush3.bf16.msra.mxu0 %v6648_v11  ;;  %v8054_v11 = vld [vmem:[#allocation2 + $0xef] sm:$0xff]  ;;  %v8085_v63 = vld [vmem:[#allocation2 + $0x107] sm:$0xff]  ;;  %v8092_v35 = vpack.c.bf16 %v5252_v52, %v5251_v42  ;;  %v5174_v12 = vld [vmem:[%s8737_s3 + $0x118] sm:$0xff] }
  0x60   : > { %5790 = vmatmul.mubr.f32.gmra.mrb[22].mxu1 %v8002_v17  ;;  %6653 = vmatprep.subr.bf16.mxu0 %v6652_v18  ;;  %v8090_v34 = vld [vmem:[#allocation2 + $0x321] sm:$0xff]  ;;  %v7157_v53 = vld [vmem:[#allocation2 + $0x150] sm:$0xff]  ;;  %v6512_v42 = vpack.c.bf16 %v5174_v12, %v5173_v41  ;;  %v7158_v32 = vld [vmem:[#allocation2 + $0x158] sm:$0xff] }
  0x61   : > { %5792 = vmatprep.mubr.f32.mxu1 %v8007_v21  ;;  %8829 = vst [vmem:[#allocation12_spill] sm:$0xff] %v8090_v34  ;;  %v8105_v52 = vld [vmem:[#allocation2 + $0x331] sm:$0xff]  ;;  %v5175_v22 = vld [vmem:[%s8737_s3 + $0x120] sm:$0xff] }
  0x62   : > { %6169 = vmatmul.mubr.f32.gmra.mrb[8].mxu0 %v8034_v25  ;;  %8831 = vst [vmem:[#allocation14_spill] sm:$0xff] %v8105_v52  ;;  %v8117_v12 = vld [vmem:[#allocation2 + $0x339] sm:$0xff]  ;;  %v8119_v41 = vld [vmem:[#allocation2 + $0x341] sm:$0xff] }
  0x63   : > { %6171 = vmatprep.mubr.f32.mxu0 %v8038_v48  ;;  %6655 = vmatpush3.bf16.msra.mxu0 %v6652_v18  ;;  %v8070_v18 = vld [vmem:[#allocation2 + $0x309] sm:$0xff]  ;;  %8832 = vst [vmem:[#allocation15_spill] sm:$0xff] %v8117_v12  ;;  %8833 = vst [vmem:[#allocation16_spill] sm:$0xff] %v8119_v41 }
  0x64   : > { %5793 = vmatmul.mubr.f32.gmra.mrb[24].mxu1 %v8027_v27  ;;  %6657 = vmatprep.subr.bf16.mxu0 %v6656_v5 }
  0x65   : > { %5795 = vmatprep.mubr.f32.mxu1 %v8036_v3 }
  0x66   : > { %6172 = vmatmul.mubr.f32.gmra.mrb[10].mxu0 %v8052_v57 }
  0x67   : > { %6174 = vmatprep.mubr.f32.mxu0 %v8056_v36  ;;  %6659 = vmatpush3.bf16.msra.mxu0 %v6656_v5  ;;  %v8088_v5 = vld [vmem:[#allocation2 + $0x319] sm:$0xff] }
  0x68   : > { %5796 = vmatmul.mubr.f32.gmra.mrb[26].mxu1 %v8049_v1  ;;  %6661 = vmatprep.subr.bf16.mxu0 %v6660_v13 }
  0x69   : > { %5798 = vmatprep.mubr.f32.mxu1 %v8054_v11 }
  0x6a   : > { %6175 = vmatmul.mubr.f32.gmra.mrb[12].mxu0 %v8070_v18 }
  0x6b   : > { %6177 = vmatprep.mubr.f32.mxu0 %v8074_v59  ;;  %6663 = vmatpush3.bf16.msra.mxu0 %v6660_v13  ;;  %v8103_v13 = vld [vmem:[#allocation2 + $0x329] sm:$0xff] }
  0x6c   : > { %5799 = vmatmul.mubr.f32.gmra.mrb[28].mxu1 %v8067_v20  ;;  %6665 = vmatprep.subr.bf16.mxu0 %v6664_v58  ;;  %8830 = vst [vmem:[#allocation13_spill] sm:$0xff] %v8103_v13 }
  0x6d   : > { %5801 = vmatprep.mubr.f32.mxu1 %v8072_v28 }
  0x6e   : > { %6178 = vmatmul.mubr.f32.gmra.mrb[14].mxu0 %v8088_v5 }
  0x6f   : > { %6180 = vmatprep.mubr.f32.mxu0 %v8090_v34  ;;  %6667 = vmatpush3.bf16.msra.mxu0 %v6664_v58  ;;  %v7159_v58 = vld [vmem:[#allocation2 + $0x160] sm:$0xff]  ;;  %v5177_v34 = vld [vmem:[%s8737_s3 + $0x130] sm:$0xff] }
  0x70   : > { %5802 = vmatmul.mubr.f32.gmra.mrb[30].mxu1 %v8085_v63  ;;  %6669 = vmatprep.subr.bf16.mxu0 %v8092_v35 }
  0x71   : > { %5836 = vmatprep.mubr.f32.mxu1 %v7157_v53  ;;  %v5176_v53 = vld [vmem:[%s8737_s3 + $0x128] sm:$0xff] }
  0x72   : > { %6181 = vmatmul.mubr.f32.gmra.mrb[16].mxu0 %v8103_v13  ;;  %v5179_v13 = vld [vmem:[%s8737_s3 + $0x140] sm:$0xff] }
  0x73   : > { %6183 = vmatprep.mubr.f32.mxu0 %v8105_v52  ;;  %v8129_v52 = vld [vmem:[#allocation2 + $0x349] sm:$0xff] }
  0x74   : > { %5837 = vmatmul.mubr.f32.vlgmr.msra.gmra.mrb[0].mxu1 %v7158_v32  ;;  %v6516_v32 = vpack.c.bf16 %v5176_v53, %v5175_v22  ;;  %8834 = vst [vmem:[#allocation17_spill] sm:$0xff] %v8129_v52  ;;  %v8131_v22 = vld [vmem:[#allocation2 + $0x351] sm:$0xff] }
  0x75   : > { %6511 = vmatpush3.bf16.msra.mxu1 %v7943_v40  ;;  %5839 = vmatprep.mubr.f32.mxu1 %v7159_v58  ;;  %v5178_v40 = vld [vmem:[%s8737_s3 + $0x138] sm:$0xff]  ;;  %v7161_v58 = vld [vmem:[#allocation2 + $0x170] sm:$0xff]  ;;  %8835 = vst [vmem:[#allocation18_spill] sm:$0xff] %v8131_v22 }
  0x76   : > { %6513 = vmatprep.subr.bf16.mxu1 %v6512_v42  ;;  %6184 = vmatmul.mubr.f32.gmra.mrb[18].mxu0 %v8117_v12  ;;  %v7162_v53 = vld [vmem:[#allocation2 + $0x178] sm:$0xff]  ;;  %v5180_v12 = vld [vmem:[%s8737_s3 + $0x148] sm:$0xff] }
  0x77   : > { %6186 = vmatprep.mubr.f32.mxu0 %v8119_v41  ;;  %v5181_v41 = vld [vmem:[%s8737_s3 + $0x150] sm:$0xff] }
  0x78   : > { %5840 = vmatmul.mubr.f32.gmra.mrb[2].mxu1 %v7160_v15  ;;  %v6520_v15 = vpack.c.bf16 %v5178_v40, %v5177_v34  ;;  %v8143_v34 = vld [vmem:[#allocation2 + $0x361] sm:$0xff]  ;;  %v6524_v40 = vpack.c.bf16 %v5180_v12, %v5179_v13  ;;  %v8155_v13 = vld [vmem:[#allocation2 + $0x371] sm:$0xff] }
  0x79   : > { %5842 = vmatprep.mubr.f32.mxu1 %v7161_v58  ;;  %6515 = vmatpush3.bf16.msra.mxu1 %v6512_v42  ;;  %v7163_v58 = vld [vmem:[#allocation2 + $0x180] sm:$0xff]  ;;  %8837 = vst [vmem:[#allocation20_spill] sm:$0xff] %v8143_v34  ;;  %8839 = vst [vmem:[#allocation22_spill] sm:$0xff] %v8155_v13 }
  0x7a   : > { %6517 = vmatprep.subr.bf16.mxu1 %v6516_v32  ;;  %6187 = vmatmul.mubr.f32.gmra.mrb[20].mxu0 %v8129_v52  ;;  %v8141_v42 = vld [vmem:[#allocation2 + $0x359] sm:$0xff] }
  0x7b   : > { %6189 = vmatprep.mubr.f32.mxu0 %v8131_v22  ;;  %8836 = vst [vmem:[#allocation19_spill] sm:$0xff] %v8141_v42  ;;  %v5182_v52 = vld [vmem:[%s8737_s3 + $0x158] sm:$0xff]  ;;  %v5183_v22 = vld [vmem:[%s8737_s3 + $0x160] sm:$0xff] }
  0x7c   : > { %5843 = vmatmul.mubr.f32.gmra.mrb[4].mxu1 %v7162_v53  ;;  %v7164_v53 = vld [vmem:[#allocation2 + $0x188] sm:$0xff]  ;;  %v6528_v12 = vpack.c.bf16 %v5182_v52, %v5181_v41 }
  0x7d   : > { %5845 = vmatprep.mubr.f32.mxu1 %v7163_v58  ;;  %6519 = vmatpush3.bf16.msra.mxu1 %v6516_v32  ;;  %v7165_v58 = vld [vmem:[#allocation2 + $0x190] sm:$0xff]  ;;  %v8167_v52 = vld [vmem:[#allocation2 + $0x381] sm:$0xff] }
  0x7e   : > { %6521 = vmatprep.subr.bf16.mxu1 %v6520_v15  ;;  %6190 = vmatmul.mubr.f32.gmra.mrb[22].mxu0 %v8141_v42  ;;  %v8153_v32 = vld [vmem:[#allocation2 + $0x369] sm:$0xff]  ;;  %8841 = vst [vmem:[#allocation24_spill] sm:$0xff] %v8167_v52 }
  0x7f   : > { %6192 = vmatprep.mubr.f32.mxu0 %v8143_v34  ;;  %8838 = vst [vmem:[#allocation21_spill] sm:$0xff] %v8153_v32  ;;  %v5184_v42 = vld [vmem:[%s8737_s3 + $0x168] sm:$0xff]  ;;  %v5185_v34 = vld [vmem:[%s8737_s3 + $0x170] sm:$0xff] }
  0x80   : > { %5846 = vmatmul.mubr.f32.gmra.mrb[6].mxu1 %v7164_v53  ;;  %v7166_v53 = vld [vmem:[#allocation2 + $0x198] sm:$0xff]  ;;  %v6532_v41 = vpack.c.bf16 %v5184_v42, %v5183_v22 }
  0x81   : > { %5848 = vmatprep.mubr.f32.mxu1 %v7165_v58  ;;  %6523 = vmatpush3.bf16.msra.mxu1 %v6520_v15  ;;  %v7167_v58 = vld [vmem:[#allocation2 + $0x1a0] sm:$0xff]  ;;  %v3259_v22 = vld [vmem:[#allocation2 + $0x391] sm:$0xff] }
  0x82   : > { %6525 = vmatprep.subr.bf16.mxu1 %v6524_v40  ;;  %6193 = vmatmul.mubr.f32.gmra.mrb[24].mxu0 %v8153_v32  ;;  %v8165_v15 = vld [vmem:[#allocation2 + $0x379] sm:$0xff] }
  0x83   : > { %6195 = vmatprep.mubr.f32.mxu0 %v8155_v13  ;;  %8840 = vst [vmem:[#allocation23_spill] sm:$0xff] %v8165_v15  ;;  %v5186_v32 = vld [vmem:[%s8737_s3 + $0x178] sm:$0xff]  ;;  %v5187_v13 = vld [vmem:[%s8737_s3 + $0x180] sm:$0xff] }
  0x84   : > { %5849 = vmatmul.mubr.f32.gmra.mrb[8].mxu1 %v7166_v53  ;;  %v7168_v53 = vld [vmem:[#allocation2 + $0x1a8] sm:$0xff]  ;;  %v6536_v42 = vpack.c.bf16 %v5186_v32, %v5185_v34 }
  0x85   : > { %5851 = vmatprep.mubr.f32.mxu1 %v7167_v58  ;;  %6527 = vmatpush3.bf16.msra.mxu1 %v6524_v40  ;;  %v7169_v58 = vld [vmem:[#allocation2 + $0x1b0] sm:$0xff]  ;;  %v7172_v32 = vld [vmem:[#allocation2 + $0x1c8] sm:$0xff] }
  0x86   : > { %6529 = vmatprep.subr.bf16.mxu1 %v6528_v12  ;;  %6196 = vmatmul.mubr.f32.gmra.mrb[26].mxu0 %v8165_v15  ;;  %v8177_v40 = vld [vmem:[#allocation2 + $0x389] sm:$0xff] }
  0x87   : > { %6198 = vmatprep.mubr.f32.mxu0 %v8167_v52  ;;  %8842 = vst [vmem:[#allocation25_spill] sm:$0xff] %v8177_v40  ;;  %v5188_v15 = vld [vmem:[%s8737_s3 + $0x188] sm:$0xff]  ;;  %v3260_v52 = vld [vmem:[#allocation2 + $0x399] sm:$0xff] }
  0x88   : > { %5852 = vmatmul.mubr.f32.gmra.mrb[10].mxu1 %v7168_v53  ;;  %v7170_v53 = vld [vmem:[#allocation2 + $0x1b8] sm:$0xff]  ;;  %v8188_v34 = vpack.c.bf16 %v5188_v15, %v5187_v13 }
  0x89   : > { %5854 = vmatprep.mubr.f32.mxu1 %v7169_v58  ;;  %6531 = vmatpush3.bf16.msra.mxu1 %v6528_v12  ;;  %v7171_v58 = vld [vmem:[#allocation2 + $0x1c0] sm:$0xff]  ;;  %v8186_v12 = vld [vmem:[#allocation2 + $0x2f] sm:$0xff] }
  0x8a   : > { %6533 = vmatprep.subr.bf16.mxu1 %v6532_v41  ;;  %6199 = vmatmul.mubr.f32.gmra.mrb[28].mxu0 %v8177_v40  ;;  %v5254_v40 = vld [vmem:[%s8737_s3 + $0x398] sm:$0xff] }
  0x8b   : > { %6201 = vmatprep.mubr.f32.mxu0 %v3259_v22  ;;  %v8199_v13 = vld [vmem:[#allocation2 + $0x3f] sm:$0xff] }
  0x8c   : > { %5855 = vmatmul.mubr.f32.gmra.mrb[12].mxu1 %v7170_v53  ;;  %v5253_v53 = vld [vmem:[%s8737_s3 + $0x390] sm:$0xff]  ;;  %v7174_v22 = vld [vmem:[#allocation2 + $0x1d8] sm:$0xff] }
  0x8d   : > { %5857 = vmatprep.mubr.f32.mxu1 %v7171_v58  ;;  %6535 = vmatpush3.bf16.msra.mxu1 %v6532_v41  ;;  %v7173_v58 = vld [vmem:[#allocation2 + $0x1d0] sm:$0xff]  ;;  %v6672_v15 = vpack.c.bf16 %v5254_v40, %v5253_v53  ;;  %v8212_v40 = vld [vmem:[#allocation2 + $0x47] sm:$0xff] }
  0x8e   : > { %6537 = vmatprep.subr.bf16.mxu1 %v6536_v42  ;;  %6202 = vmatmul.mubr.f32.gmra.mrb[30].mxu0 %v3260_v52  ;;  %v8197_v41 = vld [vmem:[#allocation2 + $0x37] sm:$0xff]  ;;  %v5256_v52 = vld [vmem:[%s8737_s3 + $0x3a8] sm:$0xff] }
  0x8f   : > { %6236 = vmatprep.mubr.f32.mxu0 %v8186_v12 }
  0x90   : > { %5858 = vmatmul.mubr.f32.gmra.mrb[14].mxu1 %v7172_v32  ;;  %v5255_v32 = vld [vmem:[%s8737_s3 + $0x3a0] sm:$0xff] }
  0x91   : > { %5860 = vmatprep.mubr.f32.mxu1 %v7173_v58  ;;  %6539 = vmatpush3.bf16.msra.mxu1 %v6536_v42  ;;  %v8214_v42 = vld [vmem:[#allocation2 + $0x4f] sm:$0xff]  ;;  %v6676_v53 = vpack.c.bf16 %v5256_v52, %v5255_v32  ;;  %v5259_v32 = vld [vmem:[%s8737_s3 + $0x3c0] sm:$0xff] }
  0x92   : > { %6541 = vmatprep.subr.bf16.mxu1 %v8188_v34  ;;  %6237 = vmatmul.mubr.f32.vlgmr.msra.gmra.mrb[0].mxu0 %v8197_v41  ;;  %v5257_v58 = vld [vmem:[%s8737_s3 + $0x3b0] sm:$0xff]  ;;  %v5260_v52 = vld [vmem:[%s8737_s3 + $0x3c8] sm:$0xff] }
  0x93   : > { %6671 = vmatpush3.bf16.msra.mxu0 %v8092_v35  ;;  %6239 = vmatprep.mubr.f32.mxu0 %v8199_v13  ;;  %v8226_v35 = vld [vmem:[#allocation2 + $0x57] sm:$0xff] }
  0x94   : > { %5861 = vmatmul.mubr.f32.gmra.mrb[16].mxu1 %v7174_v22  ;;  %6673 = vmatprep.subr.bf16.mxu0 %v6672_v15  ;;  %v8228_v22 = vld [vmem:[#allocation2 + $0x5f] sm:$0xff] }
  0x95   : > { %5863 = vmatprep.mubr.f32.mxu1 %v7588_v29  ;;  %v5258_v29 = vld [vmem:[%s8737_s3 + $0x3b8] sm:$0xff] }
  0x96   : > { %6240 = vmatmul.mubr.f32.gmra.mrb[2].mxu0 %v8212_v40 }
  0x97   : > { %6242 = vmatprep.mubr.f32.mxu0 %v8214_v42  ;;  %6675 = vmatpush3.bf16.msra.mxu0 %v6672_v15  ;;  %v6684_v15 = vpack.c.bf16 %v5260_v52, %v5259_v32  ;;  %v5272_v52 = vld [vmem:[%s8737_s3 + $0x428] sm:$0xff] }
  0x98   : > { %5864 = vmatmul.mubr.f32.gmra.mrb[18].mxu1 %v7591_v31  ;;  %6677 = vmatprep.subr.bf16.mxu0 %v6676_v53  ;;  %v6680_v31 = vpack.c.bf16 %v5258_v29, %v5257_v58  ;;  %v5262_v58 = vld [vmem:[%s8737_s3 + $0x3d8] sm:$0xff] }
  0x99   : > { %5866 = vmatprep.mubr.f32.mxu1 %v7621_v47  ;;  %v8240_v47 = vld [vmem:[#allocation2 + $0x67] sm:$0xff]  ;;  %v5194_v29 = vld [vmem:[%s8737_s3 + $0x1b8] sm:$0xff] }
  0x9a   : > { %6243 = vmatmul.mubr.f32.gmra.mrb[4].mxu0 %v8226_v35 }
  0x9b   : > { %6245 = vmatprep.mubr.f32.mxu0 %v8228_v22  ;;  %6679 = vmatpush3.bf16.msra.mxu0 %v6676_v53  ;;  %v5264_v53 = vld [vmem:[%s8737_s3 + $0x3e8] sm:$0xff] }
  0x9c   : > { %5867 = vmatmul.mubr.f32.gmra.mrb[20].mxu1 %v7636_v60  ;;  %6681 = vmatprep.subr.bf16.mxu0 %v6680_v31  ;;  %v5261_v60 = vld [vmem:[%s8737_s3 + $0x3d0] sm:$0xff] }
  0x9d   : > { %5869 = vmatprep.mubr.f32.mxu1 %v7667_v16  ;;  %v6688_v16 = vpack.c.bf16 %v5262_v58, %v5261_v60  ;;  %v3973_v60 = vld [vmem:[#allocation2 + $0x190] sm:$0xff] }
  0x9e   : > { %6246 = vmatmul.mubr.f32.gmra.mrb[6].mxu0 %v8240_v47 }
  0x9f   : > { %6248 = vmatprep.mubr.f32.mxu0 %v7866_v46  ;;  %6683 = vmatpush3.bf16.msra.mxu0 %v6680_v31  ;;  %v5266_v46 = vld [vmem:[%s8737_s3 + $0x3f8] sm:$0xff] }
  0xa0   : > { %5870 = vmatmul.mubr.f32.gmra.mrb[22].mxu1 %v7676_v23  ;;  %6685 = vmatprep.subr.bf16.mxu0 %v6684_v15  ;;  %v5263_v23 = vld [vmem:[%s8737_s3 + $0x3e0] sm:$0xff]  ;;  %v5270_v31 = vld [vmem:[%s8737_s3 + $0x418] sm:$0xff] }
  0xa1   : > { %5872 = vmatprep.mubr.f32.mxu1 %v7679_v24  ;;  %v6692_v24 = vpack.c.bf16 %v5264_v53, %v5263_v23  ;;  %v5274_v23 = vld [vmem:[%s8737_s3 + $0x438] sm:$0xff]  ;;  %v8845_v53 = vld [vmem:[#allocation14_spill] sm:$0xff] }
  0xa2   : > { %6249 = vmatmul.mubr.f32.gmra.mrb[8].mxu0 %v7883_v62  ;;  %v5268_v62 = vld [vmem:[%s8737_s3 + $0x408] sm:$0xff] }
  0xa3   : > { %6251 = vmatprep.mubr.f32.mxu0 %v7897_v33  ;;  %6687 = vmatpush3.bf16.msra.mxu0 %v6684_v15  ;;  %v8843_v15 = vld [vmem:[#allocation12_spill] sm:$0xff] }
  0xa4   : > { %5873 = vmatmul.mubr.f32.gmra.mrb[24].mxu1 %v7682_v26  ;;  %6689 = vmatprep.subr.bf16.mxu0 %v6688_v16  ;;  %v5265_v26 = vld [vmem:[%s8737_s3 + $0x3f0] sm:$0xff] }
  0xa5   : > { %5875 = vmatprep.mubr.f32.mxu1 %v7726_v61  ;;  %v6696_v61 = vpack.c.bf16 %v5266_v46, %v5265_v26  ;;  %v3975_v26 = vld [vmem:[#allocation2 + $0x1a0] sm:$0xff] }
  0xa6   : > { %6252 = vmatmul.mubr.f32.gmra.mrb[10].mxu0 %v7923_v10  ;;  %v5190_v10 = vld [vmem:[%s8737_s3 + $0x198] sm:$0xff] }
  0xa7   : > { %6254 = vmatprep.mubr.f32.mxu0 %v7932_v55  ;;  %6691 = vmatpush3.bf16.msra.mxu0 %v6688_v16  ;;  %v2121_v55 = vld [vmem:[#allocation2 + $0x2a1] sm:$0xff] }
  0xa8   : > { %5876 = vmatmul.mubr.f32.gmra.mrb[26].mxu1 %v7736_v51  ;;  %6693 = vmatprep.subr.bf16.mxu0 %v6692_v24  ;;  %v5267_v51 = vld [vmem:[%s8737_s3 + $0x400] sm:$0xff]  ;;  %v8844_v16 = vld [vmem:[#allocation13_spill] sm:$0xff] }
  0xa9   : > { %5878 = vmatprep.mubr.f32.mxu1 %v7739_v39  ;;  %v2119_v39 = vld [vmem:[#allocation2 + $0x291] sm:$0xff]  ;;  %v8282_v33 = vpack.c.bf16 %v5268_v62, %v5267_v51  ;;  %v5275_v51 = vld [vmem:[%s8737_s3 + $0x440] sm:$0xff]  ;;  %v5276_v62 = vld [vmem:[%s8737_s3 + $0x448] sm:$0xff] }
  0xaa   : > { %6255 = vmatmul.mubr.f32.gmra.mrb[12].mxu0 %v7947_v43 }
  0xab   : > { %6257 = vmatprep.mubr.f32.mxu0 %v7951_v0  ;;  %6695 = vmatpush3.bf16.msra.mxu0 %v6692_v24  ;;  %v5192_v0 = vld [vmem:[%s8737_s3 + $0x1a8] sm:$0xff]  ;;  %v3974_v24 = vld [vmem:[#allocation2 + $0x198] sm:$0xff] }
  0xac   : > { %5879 = vmatmul.mubr.f32.gmra.mrb[28].mxu1 %v7742_v4  ;;  %6697 = vmatprep.subr.bf16.mxu0 %v6696_v61  ;;  %v5189_v4 = vld [vmem:[%s8737_s3 + $0x190] sm:$0xff] }
  0xad   : > { %5881 = vmatprep.mubr.f32.mxu1 %v7787_v38  ;;  %v2120_v38 = vld [vmem:[#allocation2 + $0x299] sm:$0xff]  ;;  %v6544_v43 = vpack.c.bf16 %v5190_v10, %v5189_v4  ;;  %v3977_v4 = vld [vmem:[#allocation2 + $0x1b0] sm:$0xff]  ;;  %v6716_v10 = vpack.c.bf16 %v5276_v62, %v5275_v51 }
  0xae   : > { %6258 = vmatmul.mubr.f32.gmra.mrb[14].mxu0 %v7965_v37  ;;  %v8863_v51 = vld [vmem:[#allocation10_spill] sm:$0xff]  ;;  %v8864_v62 = vld [vmem:[#allocation11_spill] sm:$0xff] }
  0xaf   : > { %6260 = vmatprep.mubr.f32.mxu0 %v7970_v30  ;;  %6699 = vmatpush3.bf16.msra.mxu0 %v6696_v61  ;;  %v5193_v30 = vld [vmem:[%s8737_s3 + $0x1b0] sm:$0xff]  ;;  %v8846_v61 = vld [vmem:[#allocation15_spill] sm:$0xff] }
  0xb0   : > { %5882 = vmatmul.mubr.f32.gmra.mrb[30].mxu1 %v7813_v50  ;;  %6701 = vmatprep.subr.bf16.mxu0 %v8282_v33  ;;  %v5191_v50 = vld [vmem:[%s8737_s3 + $0x1a0] sm:$0xff] }
  0xb1   : > { %5916 = vmatprep.mubr.f32.mxu1 %v2119_v39  ;;  %v6548_v37 = vpack.c.bf16 %v5192_v0, %v5191_v50  ;;  %v8847_v39 = vld [vmem:[#allocation16_spill] sm:$0xff]  ;;  %v8849_v50 = vld [vmem:[#allocation18_spill] sm:$0xff]  ;;  %v3978_v0 = vld [vmem:[#allocation2 + $0x1b8] sm:$0xff] }
  0xb2   : > { %6261 = vmatmul.mubr.f32.gmra.mrb[16].mxu0 %v7984_v2  ;;  %v6552_v2 = vpack.c.bf16 %v5194_v29, %v5193_v30  ;;  %v8850_v29 = vld [vmem:[#allocation19_spill] sm:$0xff] }
  0xb3   : > { %6263 = vmatprep.mubr.f32.mxu0 %v7989_v7  ;;  %v5196_v7 = vld [vmem:[%s8737_s3 + $0x1c8] sm:$0xff] }
  0xb4   : > { %5917 = vmatmul.mubr.f32.vlgmr.msra.gmra.mrb[0].mxu1 %v2120_v38  ;;  %v8848_v38 = vld [vmem:[#allocation17_spill] sm:$0xff] }
  0xb5   : > { %6543 = vmatpush3.bf16.msra.mxu1 %v8188_v34  ;;  %5919 = vmatprep.mubr.f32.mxu1 %v2121_v55  ;;  %v3630_v34 = vld [vmem:[#allocation2 + $0x127] sm:$0xff]  ;;  %v5277_v55 = vld [vmem:[%s8737_s3 + $0x450] sm:$0xff] }
  0xb6   : > { %6545 = vmatprep.subr.bf16.mxu1 %v6544_v43  ;;  %6264 = vmatmul.mubr.f32.gmra.mrb[18].mxu0 %v8002_v17  ;;  %v5198_v17 = vld [vmem:[%s8737_s3 + $0x1d8] sm:$0xff] }
  0xb7   : > { %6266 = vmatprep.mubr.f32.mxu0 %v8007_v21  ;;  %v561_v21 = vadd.s32 304, %v7281_v14 }
  0xb8   : > { %5920 = vmatmul.mubr.f32.gmra.mrb[2].mxu1 %v7949_v49  ;;  %v5195_v49 = vld [vmem:[%s8737_s3 + $0x1c0] sm:$0xff] }
  0xb9   : > { %5922 = vmatprep.mubr.f32.mxu1 %v7953_v45  ;;  %6547 = vmatpush3.bf16.msra.mxu1 %v6544_v43  ;;  %v6556_v45 = vpack.c.bf16 %v5196_v7, %v5195_v49  ;;  %v5278_v43 = vld [vmem:[%s8737_s3 + $0x458] sm:$0xff]  ;;  %v5280_v49 = vld [vmem:[%s8737_s3 + $0x468] sm:$0xff]  ;;  %v8851_v7 = vld [vmem:[#allocation20_spill] sm:$0xff] }
  0xba   : > { %6549 = vmatprep.subr.bf16.mxu1 %v6548_v37  ;;  %6267 = vmatmul.mubr.f32.gmra.mrb[20].mxu0 %v8027_v27  ;;  %v5200_v27 = vld [vmem:[%s8737_s3 + $0x1e8] sm:$0xff]  ;;  %v6720_v30 = vpack.c.bf16 %v5278_v43, %v5277_v55  ;;  %v2509_v43 = vld [vmem:[#allocation2 + $0xbf] sm:$0xff] }
  0xbb   : > { %6269 = vmatprep.mubr.f32.mxu0 %v8036_v3  ;;  %v8344_v3 = vld [vmem:[#allocation2 + $0x10f] sm:$0xff] }
  0xbc   : > { %5923 = vmatmul.mubr.f32.gmra.mrb[4].mxu1 %v7968_v54  ;;  %v5197_v54 = vld [vmem:[%s8737_s3 + $0x1d0] sm:$0xff] }
  0xbd   : > { %5925 = vmatprep.mubr.f32.mxu1 %v7973_v56  ;;  %6551 = vmatpush3.bf16.msra.mxu1 %v6548_v37  ;;  %v6560_v56 = vpack.c.bf16 %v5198_v17, %v5197_v54  ;;  %v3979_v37 = vld [vmem:[#allocation2 + $0x1c0] sm:$0xff]  ;;  %v3981_v54 = vld [vmem:[#allocation2 + $0x1d0] sm:$0xff] }
  0xbe   : > { %6553 = vmatprep.subr.bf16.mxu1 %v6552_v2  ;;  %6270 = vmatmul.mubr.f32.gmra.mrb[22].mxu0 %v8049_v1  ;;  %v5202_v1 = vld [vmem:[%s8737_s3 + $0x1f8] sm:$0xff]  ;;  %v4342_v55 = vld [vmem:[#allocation2 + $0x2c9] sm:$0xff] }
  0xbf   : > { %6272 = vmatprep.mubr.f32.mxu0 %v8054_v11 }
  0xc0   : > { %5926 = vmatmul.mubr.f32.gmra.mrb[6].mxu1 %v7987_v6  ;;  %v5199_v6 = vld [vmem:[%s8737_s3 + $0x1e0] sm:$0xff] }
  0xc1   : > { %5928 = vmatprep.mubr.f32.mxu1 %v7991_v8  ;;  %6555 = vmatpush3.bf16.msra.mxu1 %v6552_v2  ;;  %v833_v8 = vand.u32 15, %v561_v21  ;;  %v6564_v14 = vpack.c.bf16 %v5200_v27, %v5199_v6  ;;  %v5279_v2 = vld [vmem:[%s8737_s3 + $0x460] sm:$0xff]  ;;  %v5281_v21 = vld [vmem:[%s8737_s3 + $0x470] sm:$0xff]  ;;  %v5282_v6 = vld [vmem:[%s8737_s3 + $0x478] sm:$0xff] }
  0xc2   : > { %6557 = vmatprep.subr.bf16.mxu1 %v6556_v45  ;;  %6273 = vmatmul.mubr.f32.gmra.mrb[24].mxu0 %v8067_v20  ;;  %v8356_v20 = vld [vmem:[#allocation2 + $0x117] sm:$0xff]  ;;  %v6724_v17 = vpack.c.bf16 %v5280_v49, %v5279_v2  ;;  %v4346_v49 = vld [vmem:[#allocation2 + $0x2e9] sm:$0xff] }
  0xc3   : > { %6275 = vmatprep.mubr.f32.mxu0 %v8072_v28  ;;  %vm1281_vm4 = vcmp.eq.s32.totalorder %v833_v8, 0  ;;  %v8853_v27 = vld [vmem:[#allocation22_spill] sm:$0xff]  ;;  %v3982_v8 = vld [vmem:[#allocation2 + $0x1d8] sm:$0xff] }
  0xc4   : > { %5929 = vmatmul.mubr.f32.gmra.mrb[8].mxu1 %v8005_v19  ;;  %v5201_v19 = vld [vmem:[%s8737_s3 + $0x1f0] sm:$0xff] }
  0xc5   : > { %5931 = vmatprep.mubr.f32.mxu1 %v8014_v44  ;;  %6559 = vmatpush3.bf16.msra.mxu1 %v6556_v45  ;;  %v7175_v44 = vld [vmem:[#allocation2 + $0x140] sm:$0xff]  ;;  %v6568_v28 = vpack.c.bf16 %v5202_v1, %v5201_v19  ;;  %v3980_v45 = vld [vmem:[#allocation2 + $0x1c8] sm:$0xff]  ;;  %v6728_v19 = vpack.c.bf16 %v5282_v6, %v5281_v21  ;;  %v8854_v1 = vld [vmem:[#allocation23_spill] sm:$0xff] }
  0xc6   : > { %6561 = vmatprep.subr.bf16.mxu1 %v6560_v56  ;;  %v1401_v11 = vsel %vm1281_vm4, 0.0, %v7175_v44  ;;  %6276 = vmatmul.mubr.f32.gmra.mrb[26].mxu0 %v8085_v63  ;;  %v3969_v63 = vld [vmem:[#allocation2 + $0x170] sm:$0xff]  ;;  %v8855_v44 = vld [vmem:[#allocation24_spill] sm:$0xff] }
  0xc7   : > { %1442 = vst [vmem:[#allocation2 + $0x3b0] sm:$0xff] %v1401_v11  ;;  %6278 = vmatprep.mubr.f32.mxu0 %v8344_v3  ;;  %v8424_v11 = vld [vmem:[#allocation2 + $0x1e8] sm:$0xff]  ;;  %v2512_v2 = vld [vmem:[#allocation2 + $0xd7] sm:$0xff] }
  0xc8   : > { %5932 = vmatmul.mubr.f32.gmra.mrb[10].mxu1 %v8034_v25  ;;  %v3629_v25 = vld [vmem:[#allocation2 + $0x11f] sm:$0xff]  ;;  %v2516_v6 = vld [vmem:[#allocation2 + $0xf7] sm:$0xff] }
  0xc9   : > { %5934 = vmatprep.mubr.f32.mxu1 %v8038_v48  ;;  %6563 = vmatpush3.bf16.msra.mxu1 %v6560_v56  ;;  %v5269_v48 = vld [vmem:[%s8737_s3 + $0x410] sm:$0xff]  ;;  %v8852_v56 = vld [vmem:[#allocation21_spill] sm:$0xff] }
  0xca   : > { %6565 = vmatprep.subr.bf16.mxu1 %v6564_v14  ;;  %6279 = vmatmul.mubr.f32.gmra.mrb[28].mxu0 %v8356_v20  ;;  %v6704_v32 = vpack.c.bf16 %v5270_v31, %v5269_v48  ;;  %v8431_v48 = vld [vmem:[#allocation2 + $0x1f8] sm:$0xff]  ;;  %v8433_v31 = vld [vmem:[#allocation2 + $0x200] sm:$0xff] }
  0xcb   : > { %6281 = vmatprep.mubr.f32.mxu0 %v3629_v25  ;;  %v2489_v25 = vld [vmem:[#allocation2 + $0x1f] sm:$0xff] }
  0xcc   : > { %5935 = vmatmul.mubr.f32.gmra.mrb[12].mxu1 %v8052_v57  ;;  %v3970_v57 = vld [vmem:[#allocation2 + $0x178] sm:$0xff]  ;;  %v4349_v21 = vld [vmem:[#allocation2 + $0x301] sm:$0xff] }
  0xcd   : > { %5937 = vmatprep.mubr.f32.mxu1 %v8056_v36  ;;  %6567 = vmatpush3.bf16.msra.mxu1 %v6564_v14  ;;  %v3971_v36 = vld [vmem:[#allocation2 + $0x180] sm:$0xff] }
  0xce   : > { %6569 = vmatprep.subr.bf16.mxu1 %v6568_v28  ;;  %6282 = vmatmul.mubr.f32.gmra.mrb[30].mxu0 %v3630_v34  ;;  %v8419_v14 = vld [vmem:[#allocation2 + $0x1e0] sm:$0xff]  ;;  %v8856_v34 = vld [vmem:[#allocation25_spill] sm:$0xff] }
  0xcf   : > { %6316 = vmatprep.mubr.f32.mxu0 %v3969_v63  ;;  %v2490_v63 = vld [vmem:[#allocation2 + $0x27] sm:$0xff] }
  0xd0   : > { %5938 = vmatmul.mubr.f32.gmra.mrb[14].mxu1 %v8070_v18  ;;  %v5271_v18 = vld [vmem:[%s8737_s3 + $0x420] sm:$0xff] }
  0xd1   : > { %5940 = vmatprep.mubr.f32.mxu1 %v8074_v59  ;;  %6571 = vmatpush3.bf16.msra.mxu1 %v6568_v28  ;;  %v3972_v59 = vld [vmem:[#allocation2 + $0x188] sm:$0xff]  ;;  %v6708_v58 = vpack.c.bf16 %v5272_v52, %v5271_v18  ;;  %v8426_v28 = vld [vmem:[#allocation2 + $0x1f0] sm:$0xff]  ;;  %v8448_v18 = vld [vmem:[#allocation2 + $0x218] sm:$0xff] }
  0xd2   : > { %6732 = vmatprep.subr.bf16.mxu1 %v7270_v9  ;;  %6317 = vmatmul.mubr.f32.vlgmr.msra.gmra.mrb[0].mxu0 %v3970_v57  ;;  %v8439_v57 = vld [vmem:[#allocation2 + $0x208] sm:$0xff]  ;;  %v8859_v52 = vld [vmem:[#allocation6_spill] sm:$0xff] }
  0xd3   : > { %6703 = vmatpush3.bf16.msra.mxu0 %v8282_v33  ;;  %6319 = vmatprep.mubr.f32.mxu0 %v3971_v36  ;;  %v3976_v33 = vld [vmem:[#allocation2 + $0x1a8] sm:$0xff]  ;;  %v8441_v36 = vld [vmem:[#allocation2 + $0x210] sm:$0xff] }
  0xd4   : > { %5941 = vmatmul.mubr.f32.gmra.mrb[16].mxu1 %v8088_v5  ;;  %6705 = vmatprep.subr.bf16.mxu0 %v6704_v32  ;;  %v5273_v5 = vld [vmem:[%s8737_s3 + $0x430] sm:$0xff] }
  0xd5   : > { %5943 = vmatprep.mubr.f32.mxu1 %v8843_v15  ;;  %v6712_v46 = vpack.c.bf16 %v5274_v23, %v5273_v5  ;;  %v8471_v15 = vld [vmem:[#allocation2 + $0x240] sm:$0xff]  ;;  %v7176_v5 = vld [vmem:[#allocation2 + $0x250] sm:$0xff]  ;;  %v8862_v23 = vld [vmem:[#allocation9_spill] sm:$0xff] }
  0xd6   : > { %6320 = vmatmul.mubr.f32.gmra.mrb[2].mxu0 %v3972_v59  ;;  %v8860_v59 = vld [vmem:[#allocation7_spill] sm:$0xff] }
  0xd7   : > { %6322 = vmatprep.mubr.f32.mxu0 %v3973_v60  ;;  %6707 = vmatpush3.bf16.msra.mxu0 %v6704_v32  ;;  %v8857_v32 = vld [vmem:[#allocation4_spill] sm:$0xff] }
  0xd8   : > { %5944 = vmatmul.mubr.f32.gmra.mrb[18].mxu1 %v8844_v16  ;;  %6709 = vmatprep.subr.bf16.mxu0 %v6708_v58  ;;  %v2501_v60 = vld [vmem:[#allocation2 + $0x7f] sm:$0xff]  ;;  %v2502_v16 = vld [vmem:[#allocation2 + $0x87] sm:$0xff] }
  0xd9   : > { %5946 = vmatprep.mubr.f32.mxu1 %v8845_v53  ;;  %v7177_v53 = vld [vmem:[#allocation2 + $0x258] sm:$0xff] }
  0xda   : > { %6323 = vmatmul.mubr.f32.gmra.mrb[4].mxu0 %v3974_v24  ;;  %v2504_v24 = vld [vmem:[#allocation2 + $0x97] sm:$0xff] }
  0xdb   : > { %6325 = vmatprep.mubr.f32.mxu0 %v3975_v26  ;;  %6711 = vmatpush3.bf16.msra.mxu0 %v6708_v58  ;;  %v8861_v58 = vld [vmem:[#allocation8_spill] sm:$0xff] }
  0xdc   : > { %5947 = vmatmul.mubr.f32.gmra.mrb[20].mxu1 %v8846_v61  ;;  %6713 = vmatprep.subr.bf16.mxu0 %v6712_v46  ;;  %v7178_v26 = vld [vmem:[#allocation2 + $0x260] sm:$0xff]  ;;  %v4339_v61 = vld [vmem:[#allocation2 + $0x2b1] sm:$0xff] }
  0xdd   : > { %5949 = vmatprep.mubr.f32.mxu1 %v8847_v39  ;;  %v2506_v39 = vld [vmem:[#allocation2 + $0xa7] sm:$0xff] }
  0xde   : > { %6326 = vmatmul.mubr.f32.gmra.mrb[6].mxu0 %v3976_v33  ;;  %v4340_v33 = vld [vmem:[#allocation2 + $0x2b9] sm:$0xff] }
  0xdf   : > { %6328 = vmatprep.mubr.f32.mxu0 %v3977_v4  ;;  %6715 = vmatpush3.bf16.msra.mxu0 %v6712_v46  ;;  %v2505_v46 = vld [vmem:[#allocation2 + $0x9f] sm:$0xff]  ;;  %v2507_v4 = vld [vmem:[#allocation2 + $0xaf] sm:$0xff] }
  0xe0   : > { %5950 = vmatmul.mubr.f32.gmra.mrb[22].mxu1 %v8848_v38  ;;  %6717 = vmatprep.subr.bf16.mxu0 %v6716_v10  ;;  %v2508_v38 = vld [vmem:[#allocation2 + $0xb7] sm:$0xff] }
  0xe1   : > { %5952 = vmatprep.mubr.f32.mxu1 %v8849_v50  ;;  %v4343_v50 = vld [vmem:[#allocation2 + $0x2d1] sm:$0xff] }
  0xe2   : > { %6329 = vmatmul.mubr.f32.gmra.mrb[8].mxu0 %v3978_v0  ;;  %v2510_v0 = vld [vmem:[#allocation2 + $0xc7] sm:$0xff] }
  0xe3   : > { %6331 = vmatprep.mubr.f32.mxu0 %v3979_v37  ;;  %6719 = vmatpush3.bf16.msra.mxu0 %v6716_v10  ;;  %v4341_v10 = vld [vmem:[#allocation2 + $0x2c1] sm:$0xff]  ;;  %v4344_v37 = vld [vmem:[#allocation2 + $0x2d9] sm:$0xff] }
  0xe4   : > { %5953 = vmatmul.mubr.f32.gmra.mrb[24].mxu1 %v8850_v29  ;;  %6721 = vmatprep.subr.bf16.mxu0 %v6720_v30  ;;  %v4345_v29 = vld [vmem:[#allocation2 + $0x2e1] sm:$0xff] }
  0xe5   : > { %5955 = vmatprep.mubr.f32.mxu1 %v8851_v7  ;;  %v2513_v7 = vld [vmem:[#allocation2 + $0xdf] sm:$0xff] }
  0xe6   : > { %6332 = vmatmul.mubr.f32.gmra.mrb[10].mxu0 %v3980_v45  ;;  %v4347_v45 = vld [vmem:[#allocation2 + $0x2f1] sm:$0xff] }
  0xe7   : > { %6334 = vmatprep.mubr.f32.mxu0 %v3981_v54  ;;  %6723 = vmatpush3.bf16.msra.mxu0 %v6720_v30  ;;  %v2511_v30 = vld [vmem:[#allocation2 + $0xcf] sm:$0xff]  ;;  %v2514_v54 = vld [vmem:[#allocation2 + $0xe7] sm:$0xff] }
  0xe8   : > { %5956 = vmatmul.mubr.f32.gmra.mrb[26].mxu1 %v8852_v56  ;;  %6725 = vmatprep.subr.bf16.mxu0 %v6724_v17  ;;  %v2515_v56 = vld [vmem:[#allocation2 + $0xef] sm:$0xff] }
  0xe9   : > { %5958 = vmatprep.mubr.f32.mxu1 %v8853_v27  ;;  %v4350_v27 = vld [vmem:[#allocation2 + $0x309] sm:$0xff] }
  0xea   : > { %6335 = vmatmul.mubr.f32.gmra.mrb[12].mxu0 %v3982_v8  ;;  %v2517_v8 = vld [vmem:[#allocation2 + $0xff] sm:$0xff] }
  0xeb   : > { %6337 = vmatprep.mubr.f32.mxu0 %v8419_v14  ;;  %6727 = vmatpush3.bf16.msra.mxu0 %v6724_v17  ;;  %v4348_v17 = vld [vmem:[#allocation2 + $0x2f9] sm:$0xff] }
  0xec   : > { %5959 = vmatmul.mubr.f32.gmra.mrb[28].mxu1 %v8854_v1  ;;  %6729 = vmatprep.subr.bf16.mxu0 %v6728_v19  ;;  %v2518_v1 = vld [vmem:[#allocation2 + $0x107] sm:$0xff] }
  0xed   : > { %5961 = vmatprep.mubr.f32.mxu1 %v8855_v44  ;;  %v4352_v44 = vld [vmem:[#allocation2 + $0x319] sm:$0xff] }
  0xee   : > { %6338 = vmatmul.mubr.f32.gmra.mrb[14].mxu0 %v8424_v11 }
  0xef   : > { %6340 = vmatprep.mubr.f32.mxu0 %v8426_v28  ;;  %6731 = vmatpush3.bf16.msra.mxu0 %v6728_v19  ;;  %v4351_v19 = vld [vmem:[#allocation2 + $0x311] sm:$0xff] }
  0xf0   : > { %5962 = vmatmul.mubr.f32.gmra.mrb[30].mxu1 %v8856_v34  ;;  %v4354_v34 = vld [vmem:[#allocation2 + $0x329] sm:$0xff] }
  0xf1   : > { %5996 = vmatprep.mubr.f32.mxu1 %v2489_v25  ;;  %v4353_v25 = vld [vmem:[#allocation2 + $0x321] sm:$0xff] }
  0xf2   : > { %6341 = vmatmul.mubr.f32.gmra.mrb[16].mxu0 %v8431_v48 }
  0xf3   : > { %6343 = vmatprep.mubr.f32.mxu0 %v8433_v31 }
  0xf4   : > { %5997 = vmatmul.mubr.f32.vlgmr.msra.gmra.mrb[0].mxu1 %v2490_v63  ;;  %v4355_v63 = vld [vmem:[#allocation2 + $0x331] sm:$0xff] }
  0xf5   : > { %6740 = vmatpush3.bf16.msra.mxu1 %v7270_v9  ;;  %5999 = vmatprep.mubr.f32.mxu1 %v8186_v12  ;;  %v8451_v9 = vld [vmem:[#allocation2 + $0x220] sm:$0xff]  ;;  %v8858_v12 = vld [vmem:[#allocation5_spill] sm:$0xff] }
  0xf6   : > { %6733 = vmatprep.subr.bf16.mxu1 %v8857_v32  ;;  %6344 = vmatmul.mubr.f32.gmra.mrb[18].mxu0 %v8439_v57 }
  0xf7   : > { %6346 = vmatprep.mubr.f32.mxu0 %v8441_v36 }
  0xf8   : > { %6000 = vmatmul.mubr.f32.gmra.mrb[2].mxu1 %v8197_v41  ;;  %v8458_v41 = vld [vmem:[#allocation2 + $0x228] sm:$0xff] }
  0xf9   : > { %6002 = vmatprep.mubr.f32.mxu1 %v8199_v13  ;;  %6741 = vmatpush3.bf16.msra.mxu1 %v8857_v32  ;;  %v8461_v13 = vld [vmem:[#allocation2 + $0x230] sm:$0xff]  ;;  %v4356_v32 = vld [vmem:[#allocation2 + $0x339] sm:$0xff] }
  0xfa   : > { %6734 = vmatprep.subr.bf16.mxu1 %v8858_v12  ;;  %6347 = vmatmul.mubr.f32.gmra.mrb[20].mxu0 %v8448_v18 }
  0xfb   : > { %6349 = vmatprep.mubr.f32.mxu0 %v8451_v9 }
  0xfc   : > { %6003 = vmatmul.mubr.f32.gmra.mrb[4].mxu1 %v8212_v40  ;;  %v8468_v40 = vld [vmem:[#allocation2 + $0x238] sm:$0xff] }
  0xfd   : > { %6005 = vmatprep.mubr.f32.mxu1 %v8214_v42  ;;  %6742 = vmatpush3.bf16.msra.mxu1 %v8858_v12  ;;  %v2499_v42 = vld [vmem:[#allocation2 + $0x6f] sm:$0xff]  ;;  %v4357_v12 = vld [vmem:[#allocation2 + $0x341] sm:$0xff] }
  0xfe   : > { %6735 = vmatprep.subr.bf16.mxu1 %v8859_v52  ;;  %6350 = vmatmul.mubr.f32.gmra.mrb[22].mxu0 %v8458_v41 }
  0xff   : > { %6352 = vmatprep.mubr.f32.mxu0 %v8461_v13 }
 0x100   : > { %6006 = vmatmul.mubr.f32.gmra.mrb[6].mxu1 %v8226_v35  ;;  %v2500_v35 = vld [vmem:[#allocation2 + $0x77] sm:$0xff] }
 0x101   : > { %6008 = vmatprep.mubr.f32.mxu1 %v8228_v22  ;;  %6743 = vmatpush3.bf16.msra.mxu1 %v8859_v52  ;;  %v8477_v22 = vld [vmem:[#allocation2 + $0x248] sm:$0xff] }
 0x102   : > { %6736 = vmatprep.subr.bf16.mxu1 %v8860_v59  ;;  %6353 = vmatmul.mubr.f32.gmra.mrb[24].mxu0 %v8468_v40  ;;  %v4358_v52 = vld [vmem:[#allocation2 + $0x349] sm:$0xff] }
 0x103   : > { %6355 = vmatprep.mubr.f32.mxu0 %v8471_v15 }
 0x104   : > { %6009 = vmatmul.mubr.f32.gmra.mrb[8].mxu1 %v8240_v47  ;;  %v2503_v47 = vld [vmem:[#allocation2 + $0x8f] sm:$0xff] }
 0x105   : > { %6011 = vmatprep.mubr.f32.mxu1 %v2499_v42  ;;  %6744 = vmatpush3.bf16.msra.mxu1 %v8860_v59  ;;  %v4359_v42 = vld [vmem:[#allocation2 + $0x351] sm:$0xff]  ;;  %v4370_v59 = vld [vmem:[#allocation2 + $0x3a9] sm:$0xff] }
 0x106   : > { %6737 = vmatprep.subr.bf16.mxu1 %v8861_v58  ;;  %6356 = vmatmul.mubr.f32.gmra.mrb[26].mxu0 %v8477_v22 }
 0x107   : > { %6358 = vmatprep.mubr.f32.mxu0 %v7176_v5 }
 0x108   : > { %6012 = vmatmul.mubr.f32.gmra.mrb[10].mxu1 %v2500_v35 }
 0x109   : > { %6014 = vmatprep.mubr.f32.mxu1 %v2501_v60  ;;  %6745 = vmatpush3.bf16.msra.mxu1 %v8861_v58 }
 0x10a   : > { %6738 = vmatprep.subr.bf16.mxu1 %v8862_v23  ;;  %6359 = vmatmul.mubr.f32.gmra.mrb[28].mxu0 %v7177_v53 }
 0x10b   : > { %6361 = vmatprep.mubr.f32.mxu0 %v7178_v26 }
 0x10c   : > { %6015 = vmatmul.mubr.f32.gmra.mrb[12].mxu1 %v2502_v16 }
 0x10d   : > { %6017 = vmatprep.mubr.f32.mxu1 %v2503_v47  ;;  %6746 = vmatpush3.bf16.msra.mxu1 %v8862_v23 }
 0x10e   : > { %6739 = vmatprep.subr.bf16.mxu1 %v8863_v51  ;;  %6362 = vmatmul.mubr.f32.gmra.mrb[30].mxu0 %v8864_v62  ;;  %v8519_v62 = vld [vmem:[%s8738_s4] ss:$0 sm:$0xff] }
 0x10f   : > { %6396 = vmatprep.mubr.f32.mxu0 %v4339_v61 }
 0x110   : > { %6018 = vmatmul.mubr.f32.gmra.mrb[14].mxu1 %v2504_v24 }
 0x111   : > { %6020 = vmatprep.mubr.f32.mxu1 %v2505_v46  ;;  %6747 = vmatpush3.bf16.msra.mxu1 %v8863_v51 }
 0x112   : > { %6397 = vmatmul.mubr.f32.vlgmr.msra.gmra.mrb[0].mxu0 %v4340_v33 }
 0x113   : > { %6399 = vmatprep.mubr.f32.mxu0 %v4341_v10 }
 0x114   : > { %6021 = vmatmul.mubr.f32.gmra.mrb[16].mxu1 %v2506_v39 }
 0x115   : > { %6023 = vmatprep.mubr.f32.mxu1 %v2507_v4 }
 0x116   : > { %6400 = vmatmul.mubr.f32.gmra.mrb[2].mxu0 %v4342_v55 }
 0x117   : > { %6402 = vmatprep.mubr.f32.mxu0 %v4343_v50 }
 0x118   : > { %6024 = vmatmul.mubr.f32.gmra.mrb[18].mxu1 %v2508_v38 }
 0x119   : > { %6026 = vmatprep.mubr.f32.mxu1 %v2509_v43 }
 0x11a   : > { %6403 = vmatmul.mubr.f32.gmra.mrb[4].mxu0 %v4344_v37 }
 0x11b   : > { %6405 = vmatprep.mubr.f32.mxu0 %v4345_v29 }
 0x11c   : > { %6027 = vmatmul.mubr.f32.gmra.mrb[20].mxu1 %v2510_v0 }
 0x11d   : > { %6029 = vmatprep.mubr.f32.mxu1 %v2511_v30 }
 0x11e   : > { %6406 = vmatmul.mubr.f32.gmra.mrb[6].mxu0 %v4346_v49 }
 0x11f   : > { %6408 = vmatprep.mubr.f32.mxu0 %v4347_v45 }
 0x120   : > { %6030 = vmatmul.mubr.f32.gmra.mrb[22].mxu1 %v2512_v2 }
 0x121   : > { %6032 = vmatprep.mubr.f32.mxu1 %v2513_v7 }
 0x122   : > { %6409 = vmatmul.mubr.f32.gmra.mrb[8].mxu0 %v4348_v17 }
 0x123   : > { %6411 = vmatprep.mubr.f32.mxu0 %v4349_v21 }
 0x124   : > { %6033 = vmatmul.mubr.f32.gmra.mrb[24].mxu1 %v2514_v54 }
 0x125   : > { %6035 = vmatprep.mubr.f32.mxu1 %v2515_v56 }
 0x126   : > { %6412 = vmatmul.mubr.f32.gmra.mrb[10].mxu0 %v4350_v27 }
 0x127   : > { %6414 = vmatprep.mubr.f32.mxu0 %v4351_v19 }
 0x128   : > { %6036 = vmatmul.mubr.f32.gmra.mrb[26].mxu1 %v2516_v6 }
 0x129   : > { %6038 = vmatprep.mubr.f32.mxu1 %v2517_v8 }
 0x12a   : > { %6415 = vmatmul.mubr.f32.gmra.mrb[12].mxu0 %v4352_v44 }
 0x12b   : > { %6417 = vmatprep.mubr.f32.mxu0 %v4353_v25 }
 0x12c   : > { %6039 = vmatmul.mubr.f32.gmra.mrb[28].mxu1 %v2518_v1 }
 0x12d   : > { %6041 = vmatprep.mubr.f32.mxu1 %v8344_v3  ;;  %v4360_v3 = vld [vmem:[#allocation2 + $0x359] sm:$0xff] }
 0x12e   : > { %6418 = vmatmul.mubr.f32.gmra.mrb[14].mxu0 %v4354_v34 }
 0x12f   : > { %6420 = vmatprep.mubr.f32.mxu0 %v4355_v63 }
 0x130   : > { %6042 = vmatmul.mubr.f32.gmra.mrb[30].mxu1 %v8356_v20  ;;  %v4361_v20 = vld [vmem:[#allocation2 + $0x361] sm:$0xff] }
 0x131   : > { %6100 = vmatprep.mubr.f32.mxu1 %v8419_v14  ;;  %v4362_v14 = vld [vmem:[#allocation2 + $0x369] sm:$0xff] }
 0x132   : > { %6421 = vmatmul.mubr.f32.gmra.mrb[16].mxu0 %v4356_v32 }
 0x133   : > { %6423 = vmatprep.mubr.f32.mxu0 %v4357_v12 }
 0x134   : > { %6101 = vmatmul.mubr.f32.vlgmr.msra.gmra.mrb[16].mxu1 %v8424_v11  ;;  %v4363_v11 = vld [vmem:[#allocation2 + $0x371] sm:$0xff] }
 0x135   : > { %6103 = vmatprep.mubr.f32.mxu1 %v8426_v28  ;;  %v4364_v28 = vld [vmem:[#allocation2 + $0x379] sm:$0xff] }
 0x136   : > { %6424 = vmatmul.mubr.f32.gmra.mrb[18].mxu0 %v4358_v52 }
 0x137   : > { %6426 = vmatprep.mubr.f32.mxu0 %v4359_v42 }
 0x138   : > { %6104 = vmatmul.mubr.f32.gmra.mrb[18].mxu1 %v8431_v48  ;;  %v4365_v48 = vld [vmem:[#allocation2 + $0x381] sm:$0xff] }
 0x139   : > { %6106 = vmatprep.mubr.f32.mxu1 %v8433_v31  ;;  %v4366_v31 = vld [vmem:[#allocation2 + $0x389] sm:$0xff] }
 0x13a   : > { %6427 = vmatmul.mubr.f32.gmra.mrb[20].mxu0 %v4360_v3 }
 0x13b   : > { %6429 = vmatprep.mubr.f32.mxu0 %v4361_v20 }
 0x13c   : > { %6107 = vmatmul.mubr.f32.gmra.mrb[20].mxu1 %v8439_v57  ;;  %v4367_v57 = vld [vmem:[#allocation2 + $0x391] sm:$0xff] }
 0x13d   : > { %6109 = vmatprep.mubr.f32.mxu1 %v8441_v36  ;;  %v4368_v36 = vld [vmem:[#allocation2 + $0x399] sm:$0xff] }
 0x13e   : > { %6430 = vmatmul.mubr.f32.gmra.mrb[22].mxu0 %v4362_v14 }
 0x13f   : > { %6432 = vmatprep.mubr.f32.mxu0 %v4363_v11 }
 0x140   : > { %6110 = vmatmul.mubr.f32.gmra.mrb[22].mxu1 %v8448_v18  ;;  %v2889_v18 = vld [vmem:[#allocation2 + $0x250] sm:$0xff] }
 0x141   : > { %6112 = vmatprep.mubr.f32.mxu1 %v8451_v9  ;;  %v4369_v9 = vld [vmem:[#allocation2 + $0x3a1] sm:$0xff] }
 0x142   : > { %6433 = vmatmul.mubr.f32.gmra.mrb[24].mxu0 %v4364_v28 }
 0x143   : > { %6435 = vmatprep.mubr.f32.mxu0 %v4365_v48 }
 0x144   : > { %6113 = vmatmul.mubr.f32.gmra.mrb[24].mxu1 %v8458_v41  ;;  %v2890_v41 = vld [vmem:[#allocation2 + $0x258] sm:$0xff] }
 0x145   : > { %6115 = vmatprep.mubr.f32.mxu1 %v8461_v13 }
 0x146   : > { %6436 = vmatmul.mubr.f32.gmra.mrb[26].mxu0 %v4366_v31 }
 0x147   : > { %6438 = vmatprep.mubr.f32.mxu0 %v4367_v57 }
 0x148   : > { %6116 = vmatmul.mubr.f32.gmra.mrb[26].mxu1 %v8468_v40 }
 0x149   : > { %6118 = vmatprep.mubr.f32.mxu1 %v8471_v15 }
 0x14a   : > { %6439 = vmatmul.mubr.f32.gmra.mrb[28].mxu0 %v4368_v36 }
 0x14b   : > { %6441 = vmatprep.mubr.f32.mxu0 %v4369_v9 }
 0x14c   : > { %6119 = vmatmul.mubr.f32.gmra.mrb[28].mxu1 %v8477_v22 }
 0x14d   : > { %6121 = vmatprep.mubr.f32.mxu1 %v2889_v18 }
 0x14e   : > { %6442 = vmatmul.mubr.f32.gmra.mrb[30].mxu0 %v4370_v59 }
 0x150   : > { %6122 = vmatmul.mubr.f32.gmra.mrb[30].mxu1 %v2890_v41 }
 0x1c7   : > { %v5998_v13 = vpop.f32.mrb[0].mxu1 }
 0x1c8   : > { %v2604_v35 = vpop.f32.mrb[1].mxu1 }
 0x1cb   : > { %v6001_v60 = vpop.f32.mrb[2].mxu1 }
 0x1cc   : > { %v2614_v40 = vpop.f32.mrb[3].mxu1 }
 0x1cf   : > { %v6004_v58 = vpop.f32.mrb[4].mxu1 }
 0x1d0   : > { %v2624_v16 = vpop.f32.mrb[5].mxu1 }
 0x1d3   : > { %v6007_v15 = vpop.f32.mrb[6].mxu1 }
 0x1d4   : > { %v2634_v5 = vpop.f32.mrb[7].mxu1 }
 0x1d7   : > { %v6010_v47 = vpop.f32.mrb[8].mxu1 }
 0x1d8   : > { %v2644_v23 = vpop.f32.mrb[9].mxu1 }
 0x1db   : > { %v8504_v53 = vpop.f32.mrb[10].mxu1 }
 0x1dc   : > { %v8506_v22 = vpop.f32.mrb[11].mxu1 }
 0x1df   : > { %v8508_v24 = vpop.f32.mrb[12].mxu1 }
 0x1e0   : > { %v8510_v26 = vpop.f32.mrb[13].mxu1 }
 0x1e3   : > { %v8512_v46 = vpop.f32.mrb[14].mxu1 }
 0x1e4   : > { %v8514_v61 = vpop.f32.mrb[15].mxu1 }
 0x1e5   : > { %v6398_v51 = vpop.f32.mrb[0].mxu0 }
 0x1e6   : > { %v6748_v39 = vadd.f32 %v6398_v51, %v5998_v13  ;;  %v4454_v33 = vpop.f32.mrb[1].mxu0 }
 0x1e7   : > { %v6749_v4 = vadd.f32 %v4454_v33, %v2604_v35 }
 0x1e8   : > { %v8522_v10 = vadd.f32 %v6748_v39, %v8519_v62 }
 0x1e9   : > { %v8525_v38 = vadd.f32 %v6749_v4, %v8519_v62  ;;  %v6401_v55 = vpop.f32.mrb[2].mxu0 }
 0x1ea   : > { %v4781_v43 = vsub.f32 0.0, %v8522_v10  ;;  %v6750_v50 = vadd.f32 %v6401_v55, %v6001_v60  ;;  %v4464_v0 = vpop.f32.mrb[3].mxu0 }
 0x1eb   : > { %v4780_v37 = vsub.f32 0.0, %v8525_v38  ;;  %v6751_v30 = vadd.f32 %v4464_v0, %v2614_v40 }
 0x1ec   : > { %v4814_v29 = vmul.f32 1.442695, %v4781_v43  ;;  %v8530_v2 = vadd.f32 %v6750_v50, %v8519_v62 }
 0x1ed   : > { %v4812_v49 = vmul.f32 1.442695, %v4780_v37  ;;  %v8533_v7 = vadd.f32 %v6751_v30, %v8519_v62  ;;  %v6404_v45 = vpop.f32.mrb[4].mxu0 }
 0x1ee   : > { %7029 = vpow2.f32 %v4814_v29  ;;  %v4783_v54 = vsub.f32 0.0, %v8530_v2  ;;  %v6752_v17 = vadd.f32 %v6404_v45, %v6004_v58  ;;  %v4474_v56 = vpop.f32.mrb[5].mxu0 }
 0x1ef   : > { %7031 = vpow2.f32 %v4812_v49  ;;  %v4782_v21 = vsub.f32 0.0, %v8533_v7  ;;  %v6753_v6 = vadd.f32 %v4474_v56, %v2624_v16 }
 0x1f0   : > { %v4818_v27 = vmul.f32 1.442695, %v4783_v54  ;;  %v8538_v8 = vadd.f32 %v6752_v17, %v8519_v62 }
 0x1f1   : > { %v4816_v19 = vmul.f32 1.442695, %v4782_v21  ;;  %v8541_v1 = vadd.f32 %v6753_v6, %v8519_v62  ;;  %v6407_v44 = vpop.f32.mrb[6].mxu0 }
 0x1f2   : > { %7033 = vpow2.f32 %v4818_v27  ;;  %v4785_v25 = vsub.f32 0.0, %v8538_v8  ;;  %v6754_v34 = vadd.f32 %v6407_v44, %v6007_v15  ;;  %v4484_v63 = vpop.f32.mrb[7].mxu0 }
 0x1f3   : > { %7035 = vpow2.f32 %v4816_v19  ;;  %v4784_v32 = vsub.f32 0.0, %v8541_v1  ;;  %v6755_v12 = vadd.f32 %v4484_v63, %v2634_v5 }
 0x1f4   : > { %v4822_v52 = vmul.f32 1.442695, %v4785_v25  ;;  %v8546_v42 = vadd.f32 %v6754_v34, %v8519_v62 }
 0x1f5   : > { %v4820_v3 = vmul.f32 1.442695, %v4784_v32  ;;  %v8549_v20 = vadd.f32 %v6755_v12, %v8519_v62  ;;  %v6410_v14 = vpop.f32.mrb[8].mxu0 }
 0x1f6   : > { %7037 = vpow2.f32 %v4822_v52  ;;  %v4787_v11 = vsub.f32 0.0, %v8546_v42  ;;  %v6756_v28 = vadd.f32 %v6410_v14, %v6010_v47  ;;  %v4494_v48 = vpop.f32.mrb[9].mxu0 }
 0x1f7   : > { %7039 = vpow2.f32 %v4820_v3  ;;  %v4786_v31 = vsub.f32 0.0, %v8549_v20  ;;  %v6757_v57 = vadd.f32 %v4494_v48, %v2644_v23 }
 0x1f8   : > { %v7030_v36 = vpop.eup %7029  ;;  %v4826_v18 = vmul.f32 1.442695, %v4787_v11  ;;  %v8554_v9 = vadd.f32 %v6756_v28, %v8519_v62 }
 0x1f9   : > { %v7032_v41 = vpop.eup %7031  ;;  %v4877_v59 = vadd.f32 1.0, %v7030_v36  ;;  %v4824_v13 = vmul.f32 1.442695, %v4786_v31  ;;  %v8557_v35 = vadd.f32 %v6757_v57, %v8519_v62  ;;  %v6413_v60 = vpop.f32.mrb[10].mxu0 }
 0x1fa   : > { %v4876_v40 = vadd.f32 1.0, %v7032_v41  ;;  %7041 = vpow2.f32 %v4826_v18  ;;  %v4789_v58 = vsub.f32 0.0, %v8554_v9  ;;  %v6758_v16 = vadd.f32 %v6413_v60, %v8504_v53  ;;  %v4504_v15 = vpop.f32.mrb[11].mxu0 }
 0x1fb   : > { %7043 = vrcp.f32 %v4877_v59  ;;  %v4788_v5 = vsub.f32 0.0, %v8557_v35  ;;  %v6759_v47 = vadd.f32 %v4504_v15, %v8506_v22 }
 0x1fc   : > { %v7034_v23 = vpop.eup %7033  ;;  %7045 = vrcp.f32 %v4876_v40  ;;  %v4830_v51 = vmul.f32 1.442695, %v4789_v58  ;;  %v8564_v39 = vadd.f32 %v6758_v16, %v8519_v62 }
 0x1fd   : > { %v7036_v33 = vpop.eup %7035  ;;  %v4879_v4 = vadd.f32 1.0, %v7034_v23  ;;  %7047 = vpow2.f32 %v4824_v13  ;;  %v4828_v55 = vmul.f32 1.442695, %v4788_v5  ;;  %v8567_v43 = vadd.f32 %v6759_v47, %v8519_v62  ;;  %v6416_v53 = vpop.f32.mrb[12].mxu0 }
 0x1fe   : > { %v4878_v50 = vadd.f32 1.0, %v7036_v33  ;;  %7049 = vpow2.f32 %v4830_v51  ;;  %v4791_v0 = vsub.f32 0.0, %v8564_v39  ;;  %v6760_v22 = vadd.f32 %v6416_v53, %v8508_v24  ;;  %v4514_v37 = vpop.f32.mrb[13].mxu0 }
 0x1ff   : > { %7051 = vrcp.f32 %v4879_v4  ;;  %v4790_v30 = vsub.f32 0.0, %v8567_v43  ;;  %v6761_v29 = vadd.f32 %v4514_v37, %v8510_v26 }
 0x200   : > { %v7038_v49 = vpop.eup %7037  ;;  %7053 = vrcp.f32 %v4878_v50  ;;  %v4834_v45 = vmul.f32 1.442695, %v4791_v0  ;;  %v8574_v54 = vadd.f32 %v6760_v22, %v8519_v62 }
 0x201   : > { %v7040_v17 = vpop.eup %7039  ;;  %v4881_v56 = vadd.f32 1.0, %v7038_v49  ;;  %7055 = vpow2.f32 %v4828_v55  ;;  %v4832_v21 = vmul.f32 1.442695, %v4790_v30  ;;  %v8577_v6 = vadd.f32 %v6761_v29, %v8519_v62  ;;  %v6419_v24 = vpop.f32.mrb[14].mxu0 }
 0x202   : > { %v4880_v27 = vadd.f32 1.0, %v7040_v17  ;;  %7057 = vpow2.f32 %v4834_v45  ;;  %v4793_v19 = vsub.f32 0.0, %v8574_v54  ;;  %v6762_v26 = vadd.f32 %v6419_v24, %v8512_v46  ;;  %v4524_v44 = vpop.f32.mrb[15].mxu0 }
 0x203   : > { %7059 = vrcp.f32 %v4881_v56  ;;  %v4792_v25 = vsub.f32 0.0, %v8577_v6  ;;  %v6763_v34 = vadd.f32 %v4524_v44, %v8514_v61 }
 0x204   : > { %v7042_v63 = vpop.eup %7041  ;;  %7061 = vrcp.f32 %v4880_v27  ;;  %v4838_v32 = vmul.f32 1.442695, %v4793_v19  ;;  %v8584_v12 = vadd.f32 %v6762_v26, %v8519_v62 }
 0x205   : > { %v7044_v3 = vpop.eup %7043  ;;  %v4883_v46 = vadd.f32 1.0, %v7042_v63  ;;  %7063 = vpow2.f32 %v4832_v21  ;;  %v4836_v14 = vmul.f32 1.442695, %v4792_v25  ;;  %v8593_v11 = vadd.f32 %v6763_v34, %v8519_v62  ;;  %v6422_v61 = vpop.f32.mrb[16].mxu0 }
 0x206   : > { %v7046_v48 = vpop.eup %7045  ;;  %v4911_v31 = vmul.f32 %v7044_v3, %v8522_v10  ;;  %7065 = vpow2.f32 %v4838_v32  ;;  %v4795_v57 = vsub.f32 0.0, %v8584_v12  ;;  %v4534_v18 = vpop.f32.mrb[17].mxu0 }
 0x207   : > { %v6102_v52 = vpop.f32.mrb[16].mxu1  ;;  %v7048_v41 = vpop.eup %7047  ;;  %v4909_v59 = vmul.f32 %v7046_v48, %v8525_v38  ;;  %7067 = vrcp.f32 %v4883_v46  ;;  %v4794_v13 = vsub.f32 0.0, %v8593_v11 }
 0x208   : > { %v3054_v28 = vpop.f32.mrb[17].mxu1  ;;  %v6764_v36 = vadd.f32 %v6422_v61, %v6102_v52  ;;  %v7050_v40 = vpop.eup %7049  ;;  %4973 = vst [vmem:[%s8590_s9 + $0x8] sm:$0xff] %v4911_v31  ;;  %v4882_v58 = vadd.f32 1.0, %v7048_v41  ;;  %7069 = vpow2.f32 %v4836_v14  ;;  %v4842_v16 = vmul.f32 1.442695, %v4795_v57 }
 0x209   : > { %v6765_v60 = vadd.f32 %v4534_v18, %v3054_v28  ;;  %v7052_v5 = vpop.eup %7051  ;;  %4972 = vst [vmem:[%s8590_s9] sm:$0xff] %v4909_v59  ;;  %v4885_v47 = vadd.f32 1.0, %v7050_v40  ;;  %v4840_v23 = vmul.f32 1.442695, %v4794_v13  ;;  %v6425_v51 = vpop.f32.mrb[18].mxu0 }
 0x20a   : > { %v8601_v10 = vadd.f32 %v6764_v36, %v8519_v62  ;;  %v7054_v4 = vpop.eup %7053  ;;  %v4915_v55 = vmul.f32 %v7052_v5, %v8530_v2  ;;  %7071 = vrcp.f32 %v4882_v58  ;;  %v4544_v0 = vpop.f32.mrb[19].mxu0 }
 0x20b   : > { %v6105_v15 = vpop.f32.mrb[18].mxu1  ;;  %v8605_v38 = vadd.f32 %v6765_v60, %v8519_v62  ;;  %v7056_v22 = vpop.eup %7055  ;;  %v4913_v37 = vmul.f32 %v7054_v4, %v8533_v7  ;;  %7073 = vrcp.f32 %v4885_v47 }
 0x20c   : > { %v3064_v33 = vpop.f32.mrb[19].mxu1  ;;  %v4797_v53 = vsub.f32 0.0, %v8601_v10  ;;  %v6766_v50 = vadd.f32 %v6425_v51, %v6105_v15  ;;  %v7058_v49 = vpop.eup %7057  ;;  %4975 = vst [vmem:[%s8590_s9 + $0x18] sm:$0xff] %v4915_v55  ;;  %v4884_v45 = vadd.f32 1.0, %v7056_v22  ;;  %7075 = vpow2.f32 %v4842_v16 }
 0x20d   : > { %v4796_v30 = vsub.f32 0.0, %v8605_v38  ;;  %v6767_v29 = vadd.f32 %v4544_v0, %v3064_v33  ;;  %v7060_v21 = vpop.eup %7059  ;;  %4974 = vst [vmem:[%s8590_s9 + $0x10] sm:$0xff] %v4913_v37  ;;  %v4887_v24 = vadd.f32 1.0, %v7058_v49  ;;  %7077 = vpow2.f32 %v4840_v23  ;;  %v6428_v19 = vpop.f32.mrb[20].mxu0 }
 0x20e   : > { %v4846_v17 = vmul.f32 1.442695, %v4797_v53  ;;  %v8613_v2 = vadd.f32 %v6766_v50, %v8519_v62  ;;  %v7062_v44 = vpop.eup %7061  ;;  %v4919_v25 = vmul.f32 %v7060_v21, %v8538_v8  ;;  %7079 = vrcp.f32 %v4884_v45  ;;  %v4554_v32 = vpop.f32.mrb[21].mxu0 }
 0x20f   : > { %v6108_v56 = vpop.f32.mrb[20].mxu1  ;;  %v4844_v27 = vmul.f32 1.442695, %v4796_v30  ;;  %v8617_v7 = vadd.f32 %v6767_v29, %v8519_v62  ;;  %v7064_v52 = vpop.eup %7063  ;;  %v4917_v3 = vmul.f32 %v7062_v44, %v8541_v1  ;;  %7081 = vrcp.f32 %v4887_v24 }
 0x210   : > { %v3074_v26 = vpop.f32.mrb[21].mxu1  ;;  %v4799_v34 = vsub.f32 0.0, %v8613_v2  ;;  %v6768_v63 = vadd.f32 %v6428_v19, %v6108_v56  ;;  %v7066_v61 = vpop.eup %7065  ;;  %4977 = vst [vmem:[%s8590_s9 + $0x28] sm:$0xff] %v4919_v25  ;;  %v4886_v28 = vadd.f32 1.0, %v7064_v52  ;;  %7083 = vpow2.f32 %v4846_v17 }
 0x211   : > { %v4798_v46 = vsub.f32 0.0, %v8617_v7  ;;  %v6769_v14 = vadd.f32 %v4554_v32, %v3074_v26  ;;  %v7068_v57 = vpop.eup %7067  ;;  %4976 = vst [vmem:[%s8590_s9 + $0x20] sm:$0xff] %v4917_v3  ;;  %v4889_v36 = vadd.f32 1.0, %v7066_v61  ;;  %7085 = vpow2.f32 %v4844_v27  ;;  %v6431_v41 = vpop.f32.mrb[22].mxu0 }
 0x212   : > { %v4850_v48 = vmul.f32 1.442695, %v4799_v34  ;;  %v8625_v8 = vadd.f32 %v6768_v63, %v8519_v62  ;;  %v7070_v13 = vpop.eup %7069  ;;  %v4923_v60 = vmul.f32 %v7068_v57, %v8546_v42  ;;  %7087 = vrcp.f32 %v4886_v28  ;;  %v4564_v16 = vpop.f32.mrb[23].mxu0 }
 0x213   : > { %v6111_v31 = vpop.f32.mrb[22].mxu1  ;;  %v4848_v18 = vmul.f32 1.442695, %v4798_v46  ;;  %v8629_v1 = vadd.f32 %v6769_v14, %v8519_v62  ;;  %7089 = vrcp.f32 %v4889_v36  ;;  %v4888_v15 = vadd.f32 1.0, %v7070_v13 }
 0x214   : > { %v3084_v59 = vpop.f32.mrb[23].mxu1  ;;  %v4801_v40 = vsub.f32 0.0, %v8625_v8  ;;  %v6770_v58 = vadd.f32 %v6431_v41, %v6111_v31  ;;  %v7072_v23 = vpop.eup %7071  ;;  %4979 = vst [vmem:[%s8590_s9 + $0x38] sm:$0xff] %v4923_v60  ;;  %7091 = vpow2.f32 %v4850_v48 }
 0x215   : > { %v4800_v5 = vsub.f32 0.0, %v8629_v1  ;;  %v6771_v47 = vadd.f32 %v4564_v16, %v3084_v59  ;;  %v7074_v42 = vpop.eup %7073  ;;  %v4921_v55 = vmul.f32 %v7072_v23, %v8549_v20  ;;  %7093 = vrcp.f32 %v4888_v15  ;;  %v6434_v0 = vpop.f32.mrb[24].mxu0 }
 0x216   : > { %v4854_v51 = vmul.f32 1.442695, %v4801_v40  ;;  %v8636_v33 = vadd.f32 %v6770_v58, %v8519_v62  ;;  %v7076_v37 = vpop.eup %7075  ;;  %v4927_v30 = vmul.f32 %v7074_v42, %v8554_v9  ;;  %7095 = vpow2.f32 %v4848_v18  ;;  %v4574_v45 = vpop.f32.mrb[25].mxu0 }
 0x217   : > { %v6114_v4 = vpop.f32.mrb[24].mxu1  ;;  %v4852_v53 = vmul.f32 1.442695, %v4800_v5  ;;  %v8640_v50 = vadd.f32 %v6771_v47, %v8519_v62  ;;  %v7078_v17 = vpop.eup %7077  ;;  %4978 = vst [vmem:[%s8590_s9 + $0x30] sm:$0xff] %v4921_v55  ;;  %v4891_v56 = vadd.f32 1.0, %v7076_v37 }
 0x218   : > { %v3094_v22 = vpop.f32.mrb[25].mxu1  ;;  %v4803_v29 = vsub.f32 0.0, %v8636_v33  ;;  %v6772_v49 = vadd.f32 %v6434_v0, %v6114_v4  ;;  %7097 = vpow2.f32 %v4854_v51  ;;  %v7080_v24 = vpop.eup %7079  ;;  %4981 = vst [vmem:[%s8590_s9 + $0x48] sm:$0xff] %v4927_v30  ;;  %v4890_v27 = vadd.f32 1.0, %v7078_v17 }
 0x219   : > { %v4802_v20 = vsub.f32 0.0, %v8640_v50  ;;  %v6773_v21 = vadd.f32 %v4574_v45, %v3094_v22  ;;  %7099 = vpow2.f32 %v4852_v53  ;;  %v7082_v44 = vpop.eup %7081  ;;  %v4925_v25 = vmul.f32 %v7080_v24, %v8557_v35  ;;  %v6437_v32 = vpop.f32.mrb[26].mxu0 }
 0x21a   : > { %v4858_v19 = vmul.f32 1.442695, %v4803_v29  ;;  %v8648_v26 = vadd.f32 %v6772_v49, %v8519_v62  ;;  %7101 = vrcp.f32 %v4891_v56  ;;  %v7084_v3 = vpop.eup %7083  ;;  %v4931_v46 = vmul.f32 %v7082_v44, %v8564_v39  ;;  %v4584_v28 = vpop.f32.mrb[27].mxu0 }
 0x21b   : > { %v6117_v9 = vpop.f32.mrb[26].mxu1  ;;  %v4856_v34 = vmul.f32 1.442695, %v4802_v20  ;;  %v8652_v63 = vadd.f32 %v6773_v21, %v8519_v62  ;;  %7103 = vrcp.f32 %v4890_v27  ;;  %v7086_v48 = vpop.eup %7085  ;;  %4980 = vst [vmem:[%s8590_s9 + $0x40] sm:$0xff] %v4925_v25  ;;  %v4893_v31 = vadd.f32 1.0, %v7084_v3 }
 0x21c   : > { %v3104_v52 = vpop.f32.mrb[27].mxu1  ;;  %v4805_v14 = vsub.f32 0.0, %v8648_v26  ;;  %v6774_v61 = vadd.f32 %v6437_v32, %v6117_v9  ;;  %7105 = vpow2.f32 %v4858_v19  ;;  %v7088_v36 = vpop.eup %7087  ;;  %4983 = vst [vmem:[%s8590_s9 + $0x58] sm:$0xff] %v4931_v46  ;;  %v4892_v18 = vadd.f32 1.0, %v7086_v48 }
 0x21d   : > { %v4804_v35 = vsub.f32 0.0, %v8652_v63  ;;  %v6775_v57 = vadd.f32 %v4584_v28, %v3104_v52  ;;  %7107 = vpow2.f32 %v4856_v34  ;;  %v7090_v13 = vpop.eup %7089  ;;  %v4929_v60 = vmul.f32 %v7088_v36, %v8567_v43  ;;  %v6440_v16 = vpop.f32.mrb[28].mxu0 }
 0x21e   : > { %v4862_v41 = vmul.f32 1.442695, %v4805_v14  ;;  %v8660_v59 = vadd.f32 %v6774_v61, %v8519_v62  ;;  %7109 = vrcp.f32 %v4893_v31  ;;  %v7092_v5 = vpop.eup %7091  ;;  %v4935_v47 = vmul.f32 %v7090_v13, %v8574_v54  ;;  %v4594_v4 = vpop.f32.mrb[29].mxu0 }
 0x21f   : > { %v6120_v39 = vpop.f32.mrb[28].mxu1  ;;  %v4860_v40 = vmul.f32 1.442695, %v4804_v35  ;;  %v8664_v58 = vadd.f32 %v6775_v57, %v8519_v62  ;;  %7111 = vrcp.f32 %v4892_v18  ;;  %v7094_v42 = vpop.eup %7093  ;;  %4982 = vst [vmem:[%s8590_s9 + $0x50] sm:$0xff] %v4929_v60  ;;  %v4895_v55 = vadd.f32 1.0, %v7092_v5 }
 0x220   : > { %v3114_v15 = vpop.f32.mrb[29].mxu1  ;;  %v4807_v23 = vsub.f32 0.0, %v8660_v59  ;;  %v6776_v51 = vadd.f32 %v6440_v16, %v6120_v39  ;;  %7113 = vpow2.f32 %v4862_v41  ;;  %v7096_v0 = vpop.eup %7095  ;;  %4985 = vst [vmem:[%s8590_s9 + $0x68] sm:$0xff] %v4935_v47  ;;  %v4933_v22 = vmul.f32 %v7094_v42, %v8577_v6 }
 0x221   : > { %v4806_v43 = vsub.f32 0.0, %v8664_v58  ;;  %v6777_v53 = vadd.f32 %v4594_v4, %v3114_v15  ;;  %7115 = vpow2.f32 %v4860_v40  ;;  %v4894_v49 = vadd.f32 1.0, %v7096_v0  ;;  %v6443_v56 = vpop.f32.mrb[30].mxu0 }
 0x222   : > { %v4866_v37 = vmul.f32 1.442695, %v4807_v23  ;;  %v8673_v54 = vadd.f32 %v6776_v51, %v8519_v62  ;;  %v7098_v29 = vpop.eup %7097  ;;  %7117 = vrcp.f32 %v4895_v55  ;;  %4984 = vst [vmem:[%s8590_s9 + $0x60] sm:$0xff] %v4933_v22  ;;  %v4604_v19 = vpop.f32.mrb[31].mxu0 }
 0x223   : > { %v6123_v30 = vpop.f32.mrb[30].mxu1  ;;  %v4864_v45 = vmul.f32 1.442695, %v4806_v43  ;;  %v8676_v17 = vadd.f32 %v6777_v53, %v8519_v62  ;;  %v7100_v21 = vpop.eup %7099  ;;  %v4897_v24 = vadd.f32 1.0, %v7098_v29 }
 0x224   : > { %v3124_v20 = vpop.f32.mrb[31].mxu1  ;;  %7119 = vpow2.f32 %v4866_v37  ;;  %v4809_v6 = vsub.f32 0.0, %v8673_v54  ;;  %v6778_v27 = vadd.f32 %v6443_v56, %v6123_v30  ;;  %v7102_v9 = vpop.eup %7101  ;;  %v4896_v44 = vadd.f32 1.0, %v7100_v21 }
 0x225   : > { %7121 = vrcp.f32 %v4894_v49  ;;  %v4808_v25 = vsub.f32 0.0, %v8676_v17  ;;  %v6779_v34 = vadd.f32 %v4604_v19, %v3124_v20  ;;  %v7104_v32 = vpop.eup %7103  ;;  %v4939_v52 = vmul.f32 %v7102_v9, %v8584_v12 }
 0x226   : > { %7123 = vrcp.f32 %v4897_v24  ;;  %v4870_v3 = vmul.f32 1.442695, %v4809_v6  ;;  %v8683_v46 = vadd.f32 %v6778_v27, %v8519_v62  ;;  %v7106_v14 = vpop.eup %7105  ;;  %v4937_v61 = vmul.f32 %v7104_v32, %v8593_v11 }
 0x227   : > { %7125 = vrcp.f32 %v4896_v44  ;;  %v8687_v28 = vadd.f32 %v6779_v34, %v8519_v62  ;;  %v7108_v48 = vpop.eup %7107  ;;  %4987 = vst [vmem:[%s8590_s9 + $0x78] sm:$0xff] %v4939_v52  ;;  %v4899_v31 = vadd.f32 1.0, %v7106_v14  ;;  %v4868_v35 = vmul.f32 1.442695, %v4808_v25 }
 0x228   : > { %7127 = vpow2.f32 %v4864_v45  ;;  %v4811_v12 = vsub.f32 0.0, %v8683_v46  ;;  %v7110_v57 = vpop.eup %7109  ;;  %4986 = vst [vmem:[%s8590_s9 + $0x70] sm:$0xff] %v4937_v61  ;;  %v4898_v36 = vadd.f32 1.0, %v7108_v48 }
 0x229   : > { %7129 = vpow2.f32 %v4870_v3  ;;  %v4810_v18 = vsub.f32 0.0, %v8687_v28  ;;  %v7112_v11 = vpop.eup %7111  ;;  %v4943_v41 = vmul.f32 %v7110_v57, %v8601_v10 }
 0x22a   : > { %7131 = vrcp.f32 %v4899_v31  ;;  %v4874_v62 = vmul.f32 1.442695, %v4811_v12  ;;  %v7114_v39 = vpop.eup %7113  ;;  %v4941_v13 = vmul.f32 %v7112_v11, %v8605_v38 }
 0x22b   : > { %7133 = vrcp.f32 %v4898_v36  ;;  %v7116_v60 = vpop.eup %7115  ;;  %4989 = vst [vmem:[%s8590_s9 + $0x88] sm:$0xff] %v4943_v41  ;;  %v4901_v40 = vadd.f32 1.0, %v7114_v39  ;;  %v4872_v16 = vmul.f32 1.442695, %v4810_v18 }
 0x22c   : > { %7135 = vpow2.f32 %v4868_v35  ;;  %v7118_v15 = vpop.eup %7117  ;;  %4988 = vst [vmem:[%s8590_s9 + $0x80] sm:$0xff] %v4941_v13  ;;  %v4900_v5 = vadd.f32 1.0, %v7116_v60 }
 0x22d   : > { %7137 = vpow2.f32 %v4874_v62  ;;  %v4947_v10 = vmul.f32 %v7118_v15, %v8613_v2 }
 0x22e   : > { %v7120_v47 = vpop.eup %7119  ;;  %7139 = vrcp.f32 %v4901_v40 }
 0x22f   : > { %v7122_v23 = vpop.eup %7121  ;;  %7141 = vrcp.f32 %v4900_v5  ;;  %v4903_v38 = vadd.f32 1.0, %v7120_v47  ;;  %4991 = vst [vmem:[%s8590_s9 + $0x98] sm:$0xff] %v4947_v10 }
 0x230   : > { %v7124_v51 = vpop.eup %7123  ;;  %v4945_v4 = vmul.f32 %v7122_v23, %v8617_v7  ;;  %7143 = vpow2.f32 %v4872_v16 }
 0x231   : > { %v7126_v42 = vpop.eup %7125  ;;  %v4951_v55 = vmul.f32 %v7124_v51, %v8625_v8  ;;  %7145 = vrcp.f32 %v4903_v38 }
 0x232   : > { %v7128_v43 = vpop.eup %7127  ;;  %4990 = vst [vmem:[%s8590_s9 + $0x90] sm:$0xff] %v4945_v4  ;;  %v4949_v2 = vmul.f32 %v7126_v42, %v8629_v1 }
 0x233   : > { %v7130_v53 = vpop.eup %7129  ;;  %4993 = vst [vmem:[%s8590_s9 + $0xa8] sm:$0xff] %v4951_v55  ;;  %v4902_v0 = vadd.f32 1.0, %v7128_v43 }
 0x234   : > { %v7132_v22 = vpop.eup %7131  ;;  %4992 = vst [vmem:[%s8590_s9 + $0xa0] sm:$0xff] %v4949_v2  ;;  %v4905_v37 = vadd.f32 1.0, %v7130_v53 }
 0x235   : > { %v7134_v30 = vpop.eup %7133  ;;  %v4955_v7 = vmul.f32 %v7132_v22, %v8636_v33  ;;  %7147 = vrcp.f32 %v4902_v0 }
 0x236   : > { %v7136_v29 = vpop.eup %7135  ;;  %v4953_v8 = vmul.f32 %v7134_v30, %v8640_v50  ;;  %7149 = vrcp.f32 %v4905_v37 }
 0x237   : > { %v7138_v49 = vpop.eup %7137  ;;  %4995 = vst [vmem:[%s8590_s9 + $0xb8] sm:$0xff] %v4955_v7  ;;  %v4904_v1 = vadd.f32 1.0, %v7136_v29 }
 0x238   : > { %v7140_v45 = vpop.eup %7139  ;;  %4994 = vst [vmem:[%s8590_s9 + $0xb0] sm:$0xff] %v4953_v8  ;;  %v4907_v56 = vadd.f32 1.0, %v7138_v49 }
 0x239   : > { %v7142_v20 = vpop.eup %7141  ;;  %v4959_v21 = vmul.f32 %v7140_v45, %v8648_v26  ;;  %7151 = vrcp.f32 %v4904_v1 }
 0x23a   : > { %v7144_v33 = vpop.eup %7143  ;;  %v4957_v24 = vmul.f32 %v7142_v20, %v8652_v63  ;;  %7153 = vrcp.f32 %v4907_v56 }
 0x23b   : > { %v7146_v50 = vpop.eup %7145  ;;  %4997 = vst [vmem:[%s8590_s9 + $0xc8] sm:$0xff] %v4959_v21  ;;  %v4906_v6 = vadd.f32 1.0, %v7144_v33 }
 0x23c   : > { %4996 = vst [vmem:[%s8590_s9 + $0xc0] sm:$0xff] %v4957_v24  ;;  %v4963_v27 = vmul.f32 %v7146_v50, %v8660_v59 }
 0x23d   : > { %7155 = vrcp.f32 %v4906_v6 }
 0x23e   : > { %4999 = vst [vmem:[%s8590_s9 + $0xd8] sm:$0xff] %v4963_v27 }
 0x23f   : > { %v7148_v19 = vpop.eup %7147 }
 0x240   : > { %v7150_v26 = vpop.eup %7149  ;;  %v4961_v9 = vmul.f32 %v7148_v19, %v8664_v58 }
 0x241   : > { %v4967_v44 = vmul.f32 %v7150_v26, %v8673_v54 }
 0x242   : > { %4998 = vst [vmem:[%s8590_s9 + $0xd0] sm:$0xff] %v4961_v9 }
 0x243   : > { %v7152_v63 = vpop.eup %7151  ;;  %5001 = vst [vmem:[%s8590_s9 + $0xe8] sm:$0xff] %v4967_v44 }
 0x244   : > { %v7154_v25 = vpop.eup %7153  ;;  %v4965_v34 = vmul.f32 %v7152_v63, %v8676_v17 }
 0x245   : > { %v4971_v32 = vmul.f32 %v7154_v25, %v8683_v46 }
 0x246   : > { %5000 = vst [vmem:[%s8590_s9 + $0xe0] sm:$0xff] %v4965_v34 }
 0x247   : > { %v7156_v52 = vpop.eup %7155  ;;  %5003 = vst [vmem:[%s8590_s9 + $0xf8] sm:$0xff] %v4971_v32 }
 0x248   : > { %v4969_v59 = vmul.f32 %v7156_v52, %v8687_v28 }
 0x24a   : > { %5002 = vst [vmem:[%s8590_s9 + $0xf0] sm:$0xff] %v4969_v59 }
 0x24b PF: > { %s15_s20 = sadd.s32 1, %s7201_s20   ;;  %s8865_s18 = smov %s7197_s19 }
 0x24c   : > { %p12_p5 = scmp.ge.s32.totalorder %s15_s20, 4   ;;  %s8866_s19 = smov %s8868_s21 }
 0x24e   :  { %14 = sbr.rel (!%p12_p5) target bundleno = 2 (0x2), region = 86 }

// kernel: repncsp_forward.6
= control target key start
LH: loop header
LB: loop body
LE: loop exit
PB: predicated region body
PF: predicated region fallthrough
CT: control target
= control target key end

     0   :  { %s7393_s21 = smov 0   ;;  %s7395_s22 = smov 0   ;;  %s8931_s0 = inlined_call_operand.vmem [shape: f32[2,16,16,128], index: 0, kind: input, shape index: {}, may-alias: {0,1,2}]   ;;  %s8932_s1 = inlined_call_operand.vmem [shape: f32[2,16,16,128], index: 1, kind: input, shape index: {}, may-alias: {0,1,2}]   ;;  %s8933_s2 = inlined_call_operand.vmem [shape: f32[2,16,16,128], index: 2, kind: input, shape index: {}, may-alias: {0,1,2}]   ;;  %s8934_s3 = inlined_call_operand.vmem [shape: f32[9,128,128], index: 3, kind: input, shape index: {}]   ;;  %s8935_s4 = inlined_call_operand.vmem [shape: f32[1,128], index: 4, kind: input, shape index: {}]   ;;  %s8936_s5 = inlined_call_operand.vmem [shape: f32[2,16,16,128], index: 5, kind: input, shape index: {}]   ;;  %s8937_s6 = inlined_call_operand.vmem [shape: f32[2,16,16,128], index: 6, kind: output, shape index: {}]  }
   0x1   :  { %s7397_s23 = smov 0  }
   0x2 LB: > { %s28_s24 = sadd.s32 1, %s7351_s22  ;;  %p5297_p0 = scmp.ge.s32.totalorder %s7355_s23, 1  ;;  %s7355_s23 = sphi %s7397_s23, %s16_s23   ;;  %s7351_s22 = sphi %s7395_s22, %s9064_s22   ;;  %s7347_s21 = sphi %s7393_s21, %s9063_s21  }
   0x3   : > { %p30_p1 = scmp.ge.s32.totalorder %s28_s24, 2  ;;  %p316_p2 = scmp.lt.s32.totalorder %s7355_s23, 3 }
   0x5   : > { %s9066_s24 = smov (%p30_p1, %s28_s24), 0  ;;  %p317_p3 = pnand %p5297_p0, %p316_p2 }
   0x7   : > { %320 = sbr.rel (%p317_p3) target bundleno = 591 (0x24f), region = 44 }
   0xe   : > { %v1542_v0 = vld [vmem:[%s8934_s3] sm:$0xff]  ;;  %v1543_v1 = vld [vmem:[%s8934_s3 + $0x8] sm:$0xff]  ;;  %p393_p4 = scmp.lt.s32.totalorder %s7347_s21, 1  ;;  %v588_v3 = vlaneseq  ;;  %v1544_v6 = vld [vmem:[%s8934_s3 + $0x10] sm:$0xff]  ;;  %v7357_v8 = vmov 0.0  }
   0xf   : > { %v5356_v2 = vld [vmem:[%s8934_s3 + $0x200] sm:$0xff]  ;;  %v6598_v4 = vpack.c.bf16 %v1543_v1, %v1542_v0  ;;  %v5357_v5 = vld [vmem:[%s8934_s3 + $0x208] sm:$0xff]  ;;  %v1545_v7 = vld [vmem:[%s8934_s3 + $0x18] sm:$0xff]  ;;  %508 = vst [vmem:[#allocation2 + $0x140] sm:$0xff] %v7357_v8 }
  0x10   : > { %v7429_v9 = vpack.c.bf16 %v5357_v5, %v5356_v2  ;;  %v6602_v10 = vpack.c.bf16 %v1545_v7, %v1544_v6  ;;  %v5358_v11 = vld [vmem:[%s8934_s3 + $0x210] sm:$0xff]  ;;  %v5359_v12 = vld [vmem:[%s8934_s3 + $0x218] sm:$0xff]  ;;  %v1546_v13 = vld [vmem:[%s8934_s3 + $0x20] sm:$0xff]  ;;  %s9068_s21 = smov (!%p393_p4, %s7347_s21), 1  ;;  %v7440_v14 = vshrl.u32 %v588_v3, 7  ;;  %1270 = vst [vmem:[#allocation2 + $0x8] sm:$0xff] %v7357_v8 }
  0x11   : > { %6599 = vmatprep.subr.bf16.mxu1 %v6598_v4  ;;  %v7442_v15 = vpack.c.bf16 %v5359_v12, %v5358_v11  ;;  %v1547_v16 = vld [vmem:[%s8934_s3 + $0x28] sm:$0xff]  ;;  %v5360_v17 = vld [vmem:[%s8934_s3 + $0x220] sm:$0xff]  ;;  %s7454_s29 = sshll.u32 %s9068_s21, 8  ;;  %v1548_v23 = vld [vmem:[%s8934_s3 + $0x30] sm:$0xff] }
  0x12   : > { %v5361_v18 = vld [vmem:[%s8934_s3 + $0x228] sm:$0xff]  ;;  %6727 = vmatprep.subr.bf16.mxu0 %v7429_v9  ;;  %6601 = vmatpush3.bf16.msra.mxu1 %v6598_v4  ;;  %v591_v19 = vadd.s32 16, %v7440_v14  ;;  %v6606_v20 = vpack.c.bf16 %v1547_v16, %v1546_v13  ;;  %v592_v21 = vadd.s32 24, %v7440_v14  ;;  %v1549_v24 = vld [vmem:[%s8934_s3 + $0x38] sm:$0xff]  ;;  %v5362_v26 = vld [vmem:[%s8934_s3 + $0x230] sm:$0xff]  ;;  %s415_s15 = scalar_lea.vmem %s8932_s1, %s7454_s29  ;;  %s7482_s18 = scalar_lea.vmem %s8931_s0, %s7454_s29  ;;  %v594_v41 = vadd.s32 40, %v7440_v14 }
  0x13   : > { %8967 = vst [vmem:[#allocation4_spill] sm:$0xff] %v7442_v15  ;;  %6729 = vmatpush3.bf16.msra.mxu0 %v7429_v9  ;;  %6603 = vmatprep.subr.bf16.mxu1 %v6602_v10  ;;  %v7460_v22 = vpack.c.bf16 %v5361_v18, %v5360_v17  ;;  %v5363_v27 = vld [vmem:[%s8934_s3 + $0x238] sm:$0xff]  ;;  %v6610_v29 = vpack.c.bf16 %v1549_v24, %v1548_v23  ;;  %v1550_v30 = vld [vmem:[%s8934_s3 + $0x40] sm:$0xff]  ;;  %v1551_v31 = vld [vmem:[%s8934_s3 + $0x48] sm:$0xff]  ;;  %v595_v42 = vadd.s32 48, %v7440_v14  ;;  %v596_v45 = vadd.s32 56, %v7440_v14  ;;  %s8742_s8 = scalar_lea.vmem %s8936_s5, %s7454_s29 }
  0x14   : > { %6731 = vmatprep.subr.bf16.mxu0 %v7442_v15  ;;  %v647_v25 = vand.u32 15, %v591_v19  ;;  %v654_v28 = vand.u32 15, %v592_v21  ;;  %v7492_v32 = vpack.c.bf16 %v5363_v27, %v5362_v26  ;;  %v5364_v33 = vld [vmem:[%s8934_s3 + $0x240] sm:$0xff]  ;;  %v5365_v34 = vld [vmem:[%s8934_s3 + $0x248] sm:$0xff]  ;;  %v598_v46 = vadd.s32 72, %v7440_v14  ;;  %v7528_v49 = vld [vmem:[%s7482_s18 + $0x10] sm:$0xff] }
  0x15   : > { %8968 = vst [vmem:[#allocation5_spill] sm:$0xff] %v7460_v22  ;;  %v491_v35 = vld [vmem:[%s415_s15] sm:$0xff]  ;;  %v492_v37 = vld [vmem:[%s415_s15 + $0x8] sm:$0xff]  ;;  %v7522_v47 = vpack.c.bf16 %v1551_v31, %v1550_v30  ;;  %v668_v50 = vand.u32 15, %v594_v41  ;;  %v7532_v51 = vld [vmem:[%s7482_s18 + $0x18] sm:$0xff]  ;;  %v675_v52 = vand.u32 15, %v595_v42  ;;  %v7535_v53 = vpack.c.bf16 %v5365_v34, %v5364_v33 }
  0x16   : > { %6605 = vmatpush3.bf16.msra.mxu1 %v6602_v10  ;;  %8969 = vst [vmem:[#allocation6_spill] sm:$0xff] %v7492_v32  ;;  %vm7500_vm0 = vcmp.eq.s32.totalorder %v647_v25, 0  ;;  %v497_v38 = vmul.f32 0.0, %v491_v35  ;;  %v7505_v39 = vld [vmem:[%s7482_s18] sm:$0xff]  ;;  %vm7507_vm1 = vcmp.eq.s32.totalorder %v654_v28, 15  ;;  %v498_v43 = vmul.f32 0.0, %v492_v37 }
  0x17   : > { %6733 = vmatpush3.bf16.msra.mxu0 %v7442_v15  ;;  %6607 = vmatprep.subr.bf16.mxu1 %v6606_v20  ;;  %512 = vst [vmem:[#allocation2 + $0x160] sm:$0xff] %v7505_v39  ;;  %v7516_v44 = vld [vmem:[%s7482_s18 + $0x8] sm:$0xff]  ;;  %1273 = vst [vmem:[#allocation2 + $0x20] sm:$0xff] %v7505_v39  ;;  %v1552_v54 = vld [vmem:[%s8934_s3 + $0x50] sm:$0xff]  ;;  %v682_v58 = vand.u32 15, %v596_v45  ;;  %v696_v59 = vand.u32 15, %v598_v46 }
  0x18   : > { %6735 = vmatprep.subr.bf16.mxu0 %v7460_v22  ;;  %6230 = vmatprep.mubr.f32.mxu0 %v7505_v39  ;;  %510 = vst [vmem:[#allocation2 + $0x150] sm:$0xff] %v497_v38  ;;  %1271 = vst [vmem:[#allocation2 + $0x10] sm:$0xff] %v497_v38  ;;  %v1431_v48 = vsel %vm7500_vm0, 0.0, %v497_v38  ;;  %v1553_v55 = vld [vmem:[%s8934_s3 + $0x58] sm:$0xff]  ;;  %v1232_v56 = vsel %vm7507_vm1, 0.0, %v498_v43  ;;  %v7549_v57 = vld [vmem:[%s7482_s18 + $0x20] sm:$0xff] }
  0x19   : > { %513 = vst [vmem:[#allocation2 + $0x168] sm:$0xff] %v7516_v44  ;;  %1475 = vst [vmem:[#allocation2 + $0x2a8] sm:$0xff] %v7516_v44  ;;  %v5366_v60 = vld [vmem:[%s8934_s3 + $0x250] sm:$0xff]  ;;  %v5367_v61 = vld [vmem:[%s8934_s3 + $0x258] sm:$0xff]  ;;  %vm7558_vm2 = vcmp.eq.s32.totalorder %v668_v50, 15  ;;  %vm7562_vm3 = vcmp.eq.s32.totalorder %v675_v52, 0  ;;  %v7589_v6 = vpack.c.bf16 %v1553_v55, %v1552_v54 }
  0x1a   : > { %6609 = vmatpush3.bf16.msra.mxu1 %v6606_v20  ;;  %8974 = vst [vmem:[#allocation7_spill] sm:$0xff] %v7535_v53  ;;  %1472 = vst [vmem:[#allocation2 + $0x290] sm:$0xff] %v1431_v48  ;;  %v7568_v0 = vld [vmem:[%s7482_s18 + $0x28] sm:$0xff]  ;;  %v600_v1 = vadd.s32 88, %v7440_v14  ;;  %v1234_v2 = vsel %vm7558_vm2, 0.0, %v7516_v44  ;;  %v1435_v3 = vsel %vm7562_vm3, 0.0, %v7528_v49  ;;  %v7604_v12 = vpack.c.bf16 %v5367_v61, %v5366_v60 }
  0x1b   : > { %6737 = vmatpush3.bf16.msra.mxu0 %v7460_v22  ;;  %6611 = vmatprep.subr.bf16.mxu1 %v6610_v29  ;;  %511 = vst [vmem:[#allocation2 + $0x158] sm:$0xff] %v498_v43  ;;  %1473 = vst [vmem:[#allocation2 + $0x298] sm:$0xff] %v498_v43  ;;  %vm7578_vm4 = vcmp.eq.s32.totalorder %v682_v58, 15  ;;  %v7584_v5 = vld [vmem:[%s7482_s18 + $0x30] sm:$0xff]  ;;  %vm7595_vm5 = vcmp.eq.s32.totalorder %v696_v59, 15  ;;  %v7600_v10 = vld [vmem:[%s7482_s18 + $0x38] sm:$0xff] }
  0x1c   : > { %6739 = vmatprep.subr.bf16.mxu0 %v7492_v32  ;;  %514 = vst [vmem:[#allocation2 + $0x170] sm:$0xff] %v7528_v49  ;;  %515 = vst [vmem:[#allocation2 + $0x178] sm:$0xff] %v7532_v51  ;;  %v1236_v7 = vsel %vm7578_vm4, 0.0, %v7532_v51  ;;  %v710_v11 = vand.u32 15, %v600_v1  ;;  %v1554_v13 = vld [vmem:[%s8934_s3 + $0x60] sm:$0xff]  ;;  %v1555_v16 = vld [vmem:[%s8934_s3 + $0x68] sm:$0xff] }
  0x1d   : > { %1275 = vst [vmem:[#allocation2 + $0x30] sm:$0xff] %v7528_v49  ;;  %1477 = vst [vmem:[#allocation2 + $0x2b8] sm:$0xff] %v7532_v51  ;;  %v1238_v17 = vsel %vm7595_vm5, 0.0, %v7568_v0  ;;  %v7617_v18 = vld [vmem:[%s7482_s18 + $0x40] sm:$0xff]  ;;  %v602_v19 = vadd.s32 104, %v7440_v14  ;;  %v604_v20 = vadd.s32 120, %v7440_v14  ;;  %v6622_v35 = vpack.c.bf16 %v1555_v16, %v1554_v13 }
  0x1e   : > { %1272 = vst [vmem:[#allocation2 + $0x18] sm:$0xff] %v1232_v56  ;;  %516 = vst [vmem:[#allocation2 + $0x180] sm:$0xff] %v7549_v57  ;;  %6613 = vmatpush3.bf16.msra.mxu1 %v6610_v29  ;;  %v5368_v21 = vld [vmem:[%s8934_s3 + $0x260] sm:$0xff]  ;;  %v5369_v23 = vld [vmem:[%s8934_s3 + $0x268] sm:$0xff]  ;;  %vm7629_vm6 = vcmp.eq.s32.totalorder %v710_v11, 15  ;;  %v606_v26 = vadd.s32 136, %v7440_v14 }
  0x1f   : > { %1277 = vst [vmem:[#allocation2 + $0x40] sm:$0xff] %v7549_v57  ;;  %517 = vst [vmem:[#allocation2 + $0x188] sm:$0xff] %v7568_v0  ;;  %6741 = vmatpush3.bf16.msra.mxu0 %v7492_v32  ;;  %6615 = vmatprep.subr.bf16.mxu1 %v7522_v47  ;;  %v7634_v25 = vld [vmem:[%s7482_s18 + $0x48] sm:$0xff]  ;;  %v593_v27 = vadd.s32 32, %v7440_v14  ;;  %v1240_v29 = vsel %vm7629_vm6, 0.0, %v7600_v10  ;;  %v7645_v30 = vld [vmem:[%s7482_s18 + $0x50] sm:$0xff]  ;;  %v7662_v41 = vpack.c.bf16 %v5369_v23, %v5368_v21 }
  0x20   : > { %1479 = vst [vmem:[#allocation2 + $0x2c8] sm:$0xff] %v7568_v0  ;;  %1274 = vst [vmem:[#allocation2 + $0x28] sm:$0xff] %v1234_v2  ;;  %6743 = vmatprep.subr.bf16.mxu0 %v7535_v53  ;;  %v1510_v28 = vld [vmem:[#allocation2 + $0xf] sm:$0xff]  ;;  %v724_v31 = vand.u32 15, %v602_v19  ;;  %v7649_v33 = vld [vmem:[%s7482_s18 + $0x58] sm:$0xff]  ;;  %v738_v34 = vand.u32 15, %v604_v20 }
  0x21   : > { %1476 = vst [vmem:[#allocation2 + $0x2b0] sm:$0xff] %v1435_v3  ;;  %518 = vst [vmem:[#allocation2 + $0x190] sm:$0xff] %v7584_v5  ;;  %v7657_v36 = vld [vmem:[%s7482_s18 + $0x60] sm:$0xff]  ;;  %v752_v37 = vand.u32 15, %v606_v26  ;;  %v661_v38 = vand.u32 15, %v593_v27  ;;  %v608_v40 = vadd.s32 152, %v7440_v14  ;;  %5910 = vmatprep.mubr.f32.mxu1 %v1510_v28 }
  0x22   : > { %1279 = vst [vmem:[#allocation2 + $0x50] sm:$0xff] %v7584_v5  ;;  %8983 = vst [vmem:[#allocation8_spill] sm:$0xff] %v7604_v12  ;;  %6617 = vmatpush3.bf16.msra.mxu1 %v7522_v47  ;;  %v1556_v42 = vld [vmem:[%s8934_s3 + $0x70] sm:$0xff]  ;;  %v1557_v43 = vld [vmem:[%s8934_s3 + $0x78] sm:$0xff]  ;;  %vm1122_vm7 = vcmp.eq.s32.totalorder %v724_v31, 15  ;;  %vm1124_vm8 = vcmp.eq.s32.totalorder %v738_v34, 15 }
  0x23   : > { %1276 = vst [vmem:[#allocation2 + $0x38] sm:$0xff] %v1236_v7  ;;  %519 = vst [vmem:[#allocation2 + $0x198] sm:$0xff] %v7600_v10  ;;  %6745 = vmatpush3.bf16.msra.mxu0 %v7535_v53  ;;  %6619 = vmatprep.subr.bf16.mxu1 %v7589_v6  ;;  %v610_v45 = vadd.s32 168, %v7440_v14  ;;  %v5370_v46 = vld [vmem:[%s8934_s3 + $0x270] sm:$0xff]  ;;  %v5371_v47 = vld [vmem:[%s8934_s3 + $0x278] sm:$0xff]  ;;  %v1242_v48 = vsel %vm1122_vm7, 0.0, %v7634_v25  ;;  %v6626_v58 = vpack.c.bf16 %v1557_v43, %v1556_v42 }
  0x24   : > { %1481 = vst [vmem:[#allocation2 + $0x2d8] sm:$0xff] %v7600_v10  ;;  %1278 = vst [vmem:[#allocation2 + $0x48] sm:$0xff] %v1238_v17  ;;  %6747 = vmatprep.subr.bf16.mxu0 %v7604_v12  ;;  %v1244_v50 = vsel %vm1124_vm8, 0.0, %v7649_v33  ;;  %v7682_v52 = vld [vmem:[%s7482_s18 + $0x68] sm:$0xff]  ;;  %vm1126_vm9 = vcmp.eq.s32.totalorder %v752_v37, 15  ;;  %vm7688_vm10 = vcmp.eq.s32.totalorder %v661_v38, 0  ;;  %v7701_v63 = vpack.c.bf16 %v5371_v47, %v5370_v46 }
  0x25   : > { %520 = vst [vmem:[#allocation2 + $0x1a0] sm:$0xff] %v7617_v18  ;;  %1281 = vst [vmem:[#allocation2 + $0x60] sm:$0xff] %v7617_v18  ;;  %v1246_v54 = vsel %vm1126_vm9, 0.0, %v7682_v52  ;;  %v766_v56 = vand.u32 15, %v608_v40  ;;  %v7694_v59 = vld [vmem:[%s7482_s18 + $0x70] sm:$0xff]  ;;  %v1433_v60 = vsel %vm7688_vm10, 0.0, %v7505_v39 }
  0x26   : > { %521 = vst [vmem:[#allocation2 + $0x1a8] sm:$0xff] %v7634_v25  ;;  %1483 = vst [vmem:[#allocation2 + $0x2e8] sm:$0xff] %v7634_v25  ;;  %6621 = vmatpush3.bf16.msra.mxu1 %v7589_v6  ;;  %v780_v61 = vand.u32 15, %v610_v45  ;;  %v597_v62 = vadd.s32 64, %v7440_v14  ;;  %v5308_v1 = vld [vmem:[%s8934_s3 + $0x80] sm:$0xff]  ;;  %v5309_v2 = vld [vmem:[%s8934_s3 + $0x88] sm:$0xff] }
  0x27   : > { %1280 = vst [vmem:[#allocation2 + $0x58] sm:$0xff] %v1240_v29  ;;  %522 = vst [vmem:[#allocation2 + $0x1b0] sm:$0xff] %v7645_v30  ;;  %6749 = vmatpush3.bf16.msra.mxu0 %v7604_v12  ;;  %6623 = vmatprep.subr.bf16.mxu1 %v6622_v35  ;;  %v7711_v3 = vld [vmem:[%s7482_s18 + $0x78] sm:$0xff]  ;;  %vm1128_vm11 = vcmp.eq.s32.totalorder %v766_v56, 15  ;;  %v612_v39 = vadd.s32 184, %v7440_v14  ;;  %v599_v4 = vadd.s32 80, %v7440_v14  ;;  %v6630_v20 = vpack.c.bf16 %v5309_v2, %v5308_v1 }
  0x28   : > { %523 = vst [vmem:[#allocation2 + $0x1b8] sm:$0xff] %v7649_v33  ;;  %1283 = vst [vmem:[#allocation2 + $0x70] sm:$0xff] %v7645_v30  ;;  %6751 = vmatprep.subr.bf16.mxu0 %v7662_v41  ;;  %v5372_v6 = vld [vmem:[%s8934_s3 + $0x280] sm:$0xff]  ;;  %v5373_v7 = vld [vmem:[%s8934_s3 + $0x288] sm:$0xff]  ;;  %v1248_v8 = vsel %vm1128_vm11, 0.0, %v7711_v3  ;;  %v689_v11 = vand.u32 15, %v597_v62 }
  0x29   : > { %1485 = vst [vmem:[#allocation2 + $0x2f8] sm:$0xff] %v7649_v33  ;;  %8986 = vst [vmem:[#allocation9_spill] sm:$0xff] %v7662_v41  ;;  %vm7725_vm12 = vcmp.eq.s32.totalorder %v780_v61, 15  ;;  %v794_v16 = vand.u32 15, %v612_v39  ;;  %v703_v17 = vand.u32 15, %v599_v4  ;;  %v614_v19 = vadd.s32 200, %v7440_v14 }
  0x2a   : > { %524 = vst [vmem:[#allocation2 + $0x1c0] sm:$0xff] %v7657_v36  ;;  %1285 = vst [vmem:[#allocation2 + $0x80] sm:$0xff] %v7657_v36  ;;  %6625 = vmatpush3.bf16.msra.mxu1 %v6622_v35  ;;  %v5374_v21 = vld [vmem:[%s8934_s3 + $0x290] sm:$0xff]  ;;  %vm7734_vm13 = vcmp.eq.s32.totalorder %v689_v11, 0  ;;  %v601_v24 = vadd.s32 96, %v7440_v14  ;;  %v616_v26 = vadd.s32 216, %v7440_v14  ;;  %v7741_v27 = vpack.c.bf16 %v5373_v7, %v5372_v6 }
  0x2b   : > { %1282 = vst [vmem:[#allocation2 + $0x68] sm:$0xff] %v1242_v48  ;;  %1284 = vst [vmem:[#allocation2 + $0x78] sm:$0xff] %v1244_v50  ;;  %6753 = vmatpush3.bf16.msra.mxu0 %v7662_v41  ;;  %6627 = vmatprep.subr.bf16.mxu1 %v6626_v58  ;;  %v5375_v28 = vld [vmem:[%s8934_s3 + $0x298] sm:$0xff]  ;;  %v7747_v29 = vld [vmem:[%s7482_s18 + $0x80] sm:$0xff]  ;;  %v1437_v34 = vsel %vm7734_vm13, 0.0, %v7549_v57  ;;  %vm7755_vm14 = vcmp.eq.s32.totalorder %v703_v17, 0 }
  0x2c   : > { %525 = vst [vmem:[#allocation2 + $0x1c8] sm:$0xff] %v7682_v52  ;;  %1487 = vst [vmem:[#allocation2 + $0x308] sm:$0xff] %v7682_v52  ;;  %6755 = vmatprep.subr.bf16.mxu0 %v7701_v63  ;;  %v7750_v31 = vld [vmem:[%s7482_s18 + $0x88] sm:$0xff]  ;;  %v5310_v37 = vld [vmem:[%s8934_s3 + $0x90] sm:$0xff]  ;;  %vm7769_vm15 = vcmp.eq.s32.totalorder %v794_v16, 15  ;;  %v1439_v42 = vsel %vm7755_vm14, 0.0, %v7584_v5  ;;  %v7784_v55 = vpack.c.bf16 %v5375_v28, %v5374_v21 }
  0x2d   : > { %1286 = vst [vmem:[#allocation2 + $0x88] sm:$0xff] %v1246_v54  ;;  %8989 = vst [vmem:[#allocation10_spill] sm:$0xff] %v7701_v63  ;;  %v1250_v38 = vsel %vm7725_vm12, 0.0, %v7750_v31  ;;  %v808_v43 = vand.u32 15, %v614_v19  ;;  %v1511_v45 = vld [vmem:[#allocation2 + $0x17] sm:$0xff]  ;;  %v717_v48 = vand.u32 15, %v601_v24 }
  0x2e   : > { %526 = vst [vmem:[#allocation2 + $0x1d0] sm:$0xff] %v7694_v59  ;;  %1287 = vst [vmem:[#allocation2 + $0x90] sm:$0xff] %v7694_v59  ;;  %6629 = vmatpush3.bf16.msra.mxu1 %v6626_v58  ;;  %v5311_v46 = vld [vmem:[%s8934_s3 + $0x98] sm:$0xff]  ;;  %v7780_v47 = vld [vmem:[%s7482_s18 + $0x90] sm:$0xff]  ;;  %v822_v50 = vand.u32 15, %v616_v26  ;;  %v603_v54 = vadd.s32 112, %v7440_v14 }
  0x2f   : > { %1474 = vst [vmem:[#allocation2 + $0x2a0] sm:$0xff] %v1433_v60  ;;  %527 = vst [vmem:[#allocation2 + $0x1d8] sm:$0xff] %v7711_v3  ;;  %6757 = vmatpush3.bf16.msra.mxu0 %v7701_v63  ;;  %6631 = vmatprep.subr.bf16.mxu1 %v6630_v20  ;;  %v5376_v56 = vld [vmem:[%s8934_s3 + $0x2a0] sm:$0xff]  ;;  %v5377_v58 = vld [vmem:[%s8934_s3 + $0x2a8] sm:$0xff]  ;;  %v618_v61 = vadd.s32 232, %v7440_v14  ;;  %v605_v62 = vadd.s32 128, %v7440_v14  ;;  %v7820_v11 = vpack.c.bf16 %v5311_v46, %v5310_v37 }
  0x30   : > { %1489 = vst [vmem:[#allocation2 + $0x318] sm:$0xff] %v7711_v3  ;;  %1288 = vst [vmem:[#allocation2 + $0x98] sm:$0xff] %v1248_v8  ;;  %v7795_v60 = vld [vmem:[%s7482_s18 + $0x98] sm:$0xff]  ;;  %6759 = vmatprep.subr.bf16.mxu0 %v7741_v27  ;;  %v5312_v2 = vld [vmem:[%s8934_s3 + $0xa0] sm:$0xff]  ;;  %vm7808_vm0 = vcmp.eq.s32.totalorder %v808_v43, 15  ;;  %vm7812_vm1 = vcmp.eq.s32.totalorder %v717_v48, 0  ;;  %v7860_v37 = vpack.c.bf16 %v5377_v58, %v5376_v56 }
  0x31   : > { %528 = vst [vmem:[#allocation2 + $0x1e0] sm:$0xff] %v7747_v29  ;;  %1289 = vst [vmem:[#allocation2 + $0xa0] sm:$0xff] %v7747_v29  ;;  %v1512_v1 = vld [vmem:[#allocation2 + $0x1f] sm:$0xff]  ;;  %v1252_v39 = vsel %vm7769_vm15, 0.0, %v7795_v60  ;;  %vm7816_vm2 = vcmp.eq.s32.totalorder %v822_v50, 15  ;;  %5911 = vmatmul.mubr.f32.vlgmr.msra.gmra.mrb[0].mxu1 %v1511_v45  ;;  %v1513_v8 = vld [vmem:[#allocation2 + $0x27] sm:$0xff] }
  0x32   : > { %529 = vst [vmem:[#allocation2 + $0x1e8] sm:$0xff] %v7750_v31  ;;  %1491 = vst [vmem:[#allocation2 + $0x328] sm:$0xff] %v7750_v31  ;;  %v5313_v13 = vld [vmem:[%s8934_s3 + $0xa8] sm:$0xff]  ;;  %v7826_v16 = vld [vmem:[%s7482_s18 + $0xa0] sm:$0xff]  ;;  %v1441_v17 = vsel %vm7812_vm1, 0.0, %v7617_v18  ;;  %v731_v19 = vand.u32 15, %v603_v54  ;;  %6231 = vmatmul.mubr.f32.vlgmr.msra.gmra.mrb[0].mxu0 %v7516_v44  ;;  %6633 = vmatpush3.bf16.msra.mxu1 %v6630_v20 }
  0x33   : > { %1478 = vst [vmem:[#allocation2 + $0x2c0] sm:$0xff] %v1437_v34  ;;  %1290 = vst [vmem:[#allocation2 + $0xa8] sm:$0xff] %v1250_v38  ;;  %v836_v21 = vand.u32 15, %v618_v61  ;;  %v7835_v23 = vld [vmem:[%s7482_s18 + $0xa8] sm:$0xff]  ;;  %v7838_v24 = vld [vmem:[%s7482_s18 + $0xb0] sm:$0xff]  ;;  %v745_v28 = vand.u32 15, %v605_v62  ;;  %6761 = vmatpush3.bf16.msra.mxu0 %v7741_v27  ;;  %5913 = vmatprep.mubr.f32.mxu1 %v1512_v1 }
  0x34   : > { %1480 = vst [vmem:[#allocation2 + $0x2d0] sm:$0xff] %v1439_v42  ;;  %530 = vst [vmem:[#allocation2 + $0x1f0] sm:$0xff] %v7780_v47  ;;  %v7841_v26 = vld [vmem:[%s7482_s18 + $0xb8] sm:$0xff]  ;;  %v620_v34 = vadd.s32 248, %v7440_v14  ;;  %v607_v35 = vadd.s32 144, %v7440_v14  ;;  %v1514_v44 = vld [vmem:[#allocation2 + $0x2f] sm:$0xff]  ;;  %6233 = vmatprep.mubr.f32.mxu0 %v7528_v49  ;;  %6763 = vmatprep.subr.bf16.mxu0 %v7784_v55  ;;  %v7868_v42 = vpack.c.bf16 %v5313_v13, %v5312_v2 }
  0x35   : > { %1291 = vst [vmem:[#allocation2 + $0xb0] sm:$0xff] %v7780_v47  ;;  %531 = vst [vmem:[#allocation2 + $0x1f8] sm:$0xff] %v7795_v60  ;;  %v1254_v20 = vsel %vm7808_vm0, 0.0, %v7835_v23  ;;  %v1256_v27 = vsel %vm7816_vm2, 0.0, %v7841_v26  ;;  %vm1323_vm3 = vcmp.eq.s32.totalorder %v731_v19, 0  ;;  %v5378_v38 = vld [vmem:[%s8934_s3 + $0x2b0] sm:$0xff]  ;;  %5914 = vmatmul.mubr.f32.gmra.mrb[2].mxu1 %v1513_v8  ;;  %6635 = vmatprep.subr.bf16.mxu1 %v7820_v11 }
  0x36   : > { %1493 = vst [vmem:[#allocation2 + $0x338] sm:$0xff] %v7795_v60  ;;  %1292 = vst [vmem:[#allocation2 + $0xb8] sm:$0xff] %v1252_v39  ;;  %v5379_v40 = vld [vmem:[%s8934_s3 + $0x2b8] sm:$0xff]  ;;  %v1443_v43 = vsel %vm1323_vm3, 0.0, %v7645_v30  ;;  %vm1325_vm4 = vcmp.eq.s32.totalorder %v745_v28, 0  ;;  %v5314_v49 = vld [vmem:[%s8934_s3 + $0xb0] sm:$0xff]  ;;  %6234 = vmatmul.mubr.f32.gmra.mrb[2].mxu0 %v7532_v51  ;;  %5916 = vmatprep.mubr.f32.mxu1 %v1514_v44 }
  0x37   : > { %532 = vst [vmem:[#allocation2 + $0x200] sm:$0xff] %v7826_v16  ;;  %1293 = vst [vmem:[#allocation2 + $0xc0] sm:$0xff] %v7826_v16  ;;  %v5315_v45 = vld [vmem:[%s8934_s3 + $0xb8] sm:$0xff]  ;;  %vm7878_vm5 = vcmp.eq.s32.totalorder %v836_v21, 15  ;;  %v1445_v48 = vsel %vm1325_vm4, 0.0, %v7657_v36  ;;  %v850_v50 = vand.u32 15, %v620_v34  ;;  %6765 = vmatpush3.bf16.msra.mxu0 %v7784_v55  ;;  %6236 = vmatprep.mubr.f32.mxu0 %v7549_v57  ;;  %v7914_v55 = vpack.c.bf16 %v5379_v40, %v5378_v38 }
  0x38   : > { %1482 = vst [vmem:[#allocation2 + $0x2e0] sm:$0xff] %v1441_v17  ;;  %533 = vst [vmem:[#allocation2 + $0x208] sm:$0xff] %v7835_v23  ;;  %v759_v54 = vand.u32 15, %v607_v35  ;;  %v1515_v56 = vld [vmem:[#allocation2 + $0x37] sm:$0xff]  ;;  %v1516_v58 = vld [vmem:[#allocation2 + $0x3f] sm:$0xff]  ;;  %v622_v62 = vadd.s32 264, %v7440_v14  ;;  %6767 = vmatprep.subr.bf16.mxu0 %v7860_v37  ;;  %6637 = vmatpush3.bf16.msra.mxu1 %v7820_v11  ;;  %v6642_v28 = vpack.c.bf16 %v5315_v45, %v5314_v49 }
  0x39   : > { %1495 = vst [vmem:[#allocation2 + $0x348] sm:$0xff] %v7835_v23  ;;  %534 = vst [vmem:[#allocation2 + $0x210] sm:$0xff] %v7838_v24  ;;  %v7885_v61 = vld [vmem:[%s7482_s18 + $0xc0] sm:$0xff]  ;;  %v609_v1 = vadd.s32 160, %v7440_v14  ;;  %v611_v2 = vadd.s32 176, %v7440_v14  ;;  %v7895_v51 = vld [vmem:[%s7482_s18 + $0xc8] sm:$0xff]  ;;  %5917 = vmatmul.mubr.f32.gmra.mrb[4].mxu1 %v1515_v56  ;;  %6639 = vmatprep.subr.bf16.mxu1 %v7868_v42 }
  0x3a   : > { %1295 = vst [vmem:[#allocation2 + $0xd0] sm:$0xff] %v7838_v24  ;;  %535 = vst [vmem:[#allocation2 + $0x218] sm:$0xff] %v7841_v26  ;;  %v7898_v39 = vld [vmem:[%s7482_s18 + $0xd0] sm:$0xff]  ;;  %v7901_v4 = vld [vmem:[%s7482_s18 + $0xd8] sm:$0xff]  ;;  %vm7903_vm6 = vcmp.eq.s32.totalorder %v850_v50, 15  ;;  %vm7907_vm7 = vcmp.eq.s32.totalorder %v759_v54, 0  ;;  %6237 = vmatmul.mubr.f32.gmra.mrb[4].mxu0 %v7568_v0  ;;  %5919 = vmatprep.mubr.f32.mxu1 %v1516_v58 }
  0x3b   : > { %1497 = vst [vmem:[#allocation2 + $0x358] sm:$0xff] %v7841_v26  ;;  %1294 = vst [vmem:[#allocation2 + $0xc8] sm:$0xff] %v1254_v20  ;;  %v613_v57 = vadd.s32 192, %v7440_v14  ;;  %v1258_v8 = vsel %vm7878_vm5, 0.0, %v7895_v51  ;;  %v1260_v11 = vsel %vm7903_vm6, 0.0, %v7901_v4  ;;  %v1447_v13 = vsel %vm7907_vm7, 0.0, %v7694_v59  ;;  %6769 = vmatpush3.bf16.msra.mxu0 %v7860_v37  ;;  %6239 = vmatprep.mubr.f32.mxu0 %v7584_v5 }
  0x3c   : > { %1296 = vst [vmem:[#allocation2 + $0xd8] sm:$0xff] %v1256_v27  ;;  %1484 = vst [vmem:[#allocation2 + $0x2f0] sm:$0xff] %v1443_v43  ;;  %v1517_v17 = vld [vmem:[#allocation2 + $0x47] sm:$0xff]  ;;  %v864_v34 = vand.u32 15, %v622_v62  ;;  %v773_v35 = vand.u32 15, %v609_v1  ;;  %v787_v44 = vand.u32 15, %v611_v2  ;;  %6771 = vmatprep.subr.bf16.mxu0 %v7914_v55  ;;  %6641 = vmatpush3.bf16.msra.mxu1 %v7868_v42 }
  0x3d   : > { %1486 = vst [vmem:[#allocation2 + $0x300] sm:$0xff] %v1445_v48  ;;  %536 = vst [vmem:[#allocation2 + $0x220] sm:$0xff] %v7885_v61  ;;  %v5380_v19 = vld [vmem:[%s8934_s3 + $0x2c0] sm:$0xff]  ;;  %v5381_v21 = vld [vmem:[%s8934_s3 + $0x2c8] sm:$0xff]  ;;  %v801_v40 = vand.u32 15, %v613_v57  ;;  %v615_v43 = vadd.s32 208, %v7440_v14  ;;  %5920 = vmatmul.mubr.f32.gmra.mrb[6].mxu1 %v1517_v17  ;;  %6643 = vmatprep.subr.bf16.mxu1 %v6642_v28 }
  0x3e   : > { %1297 = vst [vmem:[#allocation2 + $0xe0] sm:$0xff] %v7885_v61  ;;  %537 = vst [vmem:[#allocation2 + $0x228] sm:$0xff] %v7895_v51  ;;  %v5316_v20 = vld [vmem:[%s8934_s3 + $0xc0] sm:$0xff]  ;;  %v5317_v27 = vld [vmem:[%s8934_s3 + $0xc8] sm:$0xff]  ;;  %v617_v49 = vadd.s32 224, %v7440_v14  ;;  %vm7954_vm8 = vcmp.eq.s32.totalorder %v864_v34, 15  ;;  %v6774_v5 = vpack.c.bf16 %v5381_v21, %v5380_v19  ;;  %6240 = vmatmul.mubr.f32.gmra.mrb[6].mxu0 %v7600_v10 }
  0x3f   : > { %1499 = vst [vmem:[#allocation2 + $0x368] sm:$0xff] %v7895_v51  ;;  %538 = vst [vmem:[#allocation2 + $0x230] sm:$0xff] %v7898_v39  ;;  %v7946_v38 = vld [vmem:[%s7482_s18 + $0xe0] sm:$0xff]  ;;  %v1518_v0 = vld [vmem:[#allocation2 + $0x4f] sm:$0xff]  ;;  %vm7958_vm9 = vcmp.eq.s32.totalorder %v773_v35, 0  ;;  %vm7962_vm10 = vcmp.eq.s32.totalorder %v787_v44, 0  ;;  %v6646_v62 = vpack.c.bf16 %v5317_v27, %v5316_v20  ;;  %6773 = vmatpush3.bf16.msra.mxu0 %v7914_v55  ;;  %6242 = vmatprep.mubr.f32.mxu0 %v7617_v18 }
  0x40   : > { %1299 = vst [vmem:[#allocation2 + $0xf0] sm:$0xff] %v7898_v39  ;;  %539 = vst [vmem:[#allocation2 + $0x238] sm:$0xff] %v7901_v4  ;;  %v5382_v37 = vld [vmem:[%s8934_s3 + $0x2d0] sm:$0xff]  ;;  %v7972_v50 = vld [vmem:[%s7482_s18 + $0xe8] sm:$0xff]  ;;  %v1449_v54 = vsel %vm7958_vm9, 0.0, %v7747_v29  ;;  %v1451_v56 = vsel %vm7962_vm10, 0.0, %v7780_v47  ;;  %5922 = vmatprep.mubr.f32.mxu1 %v1518_v0  ;;  %6775 = vmatprep.subr.bf16.mxu0 %v6774_v5 }
  0x41   : > { %1501 = vst [vmem:[#allocation2 + $0x378] sm:$0xff] %v7901_v4  ;;  %1298 = vst [vmem:[#allocation2 + $0xe8] sm:$0xff] %v1258_v8  ;;  %vm7980_vm11 = vcmp.eq.s32.totalorder %v801_v40, 0  ;;  %v5383_v42 = vld [vmem:[%s8934_s3 + $0x2d8] sm:$0xff]  ;;  %v5318_v1 = vld [vmem:[%s8934_s3 + $0xd0] sm:$0xff]  ;;  %v1262_v6 = vsel %vm7954_vm8, 0.0, %v7972_v50  ;;  %6645 = vmatpush3.bf16.msra.mxu1 %v6642_v28 }
  0x42   : > { %1300 = vst [vmem:[#allocation2 + $0xf8] sm:$0xff] %v1260_v11  ;;  %1488 = vst [vmem:[#allocation2 + $0x310] sm:$0xff] %v1447_v13  ;;  %v5319_v2 = vld [vmem:[%s8934_s3 + $0xd8] sm:$0xff]  ;;  %v1453_v7 = vsel %vm7980_vm11, 0.0, %v7826_v16  ;;  %v815_v57 = vand.u32 15, %v615_v43  ;;  %v829_v11 = vand.u32 15, %v617_v49  ;;  %v6778_v34 = vpack.c.bf16 %v5383_v42, %v5382_v37  ;;  %6647 = vmatprep.subr.bf16.mxu1 %v6646_v62  ;;  %6243 = vmatmul.mubr.f32.gmra.mrb[8].mxu0 %v7634_v25 }
  0x43   : > { %540 = vst [vmem:[#allocation2 + $0x240] sm:$0xff] %v7946_v38  ;;  %1301 = vst [vmem:[#allocation2 + $0x100] sm:$0xff] %v7946_v38  ;;  %v1519_v8 = vld [vmem:[#allocation2 + $0x57] sm:$0xff]  ;;  %v619_v13 = vadd.s32 240, %v7440_v14  ;;  %v621_v17 = vadd.s32 256, %v7440_v14  ;;  %v1520_v19 = vld [vmem:[#allocation2 + $0x5f] sm:$0xff]  ;;  %v6650_v10 = vpack.c.bf16 %v5319_v2, %v5318_v1  ;;  %6777 = vmatpush3.bf16.msra.mxu0 %v6774_v5  ;;  %6245 = vmatprep.mubr.f32.mxu0 %v7645_v30 }
  0x44   : > { %541 = vst [vmem:[#allocation2 + $0x248] sm:$0xff] %v7972_v50  ;;  %1503 = vst [vmem:[#allocation2 + $0x388] sm:$0xff] %v7972_v50  ;;  %vm1335_vm12 = vcmp.eq.s32.totalorder %v815_v57, 0  ;;  %v623_v21 = vadd.s32 272, %v7440_v14  ;;  %vm1337_vm13 = vcmp.eq.s32.totalorder %v829_v11, 0  ;;  %5923 = vmatmul.mubr.f32.gmra.mrb[8].mxu1 %v1519_v8  ;;  %v5384_v44 = vld [vmem:[%s8934_s3 + $0x2e0] sm:$0xff]  ;;  %6779 = vmatprep.subr.bf16.mxu0 %v6778_v34 }
  0x45   : > { %1490 = vst [vmem:[#allocation2 + $0x320] sm:$0xff] %v1449_v54  ;;  %1492 = vst [vmem:[#allocation2 + $0x330] sm:$0xff] %v1451_v56  ;;  %v1455_v35 = vsel %vm1335_vm12, 0.0, %v7838_v24  ;;  %v5385_v18 = vld [vmem:[%s8934_s3 + $0x2e8] sm:$0xff]  ;;  %v1457_v55 = vsel %vm1337_vm13, 0.0, %v7885_v61  ;;  %v843_v20 = vand.u32 15, %v619_v13  ;;  %5925 = vmatprep.mubr.f32.mxu1 %v1520_v19  ;;  %6649 = vmatpush3.bf16.msra.mxu1 %v6646_v62 }
  0x46   : > { %1302 = vst [vmem:[#allocation2 + $0x108] sm:$0xff] %v1262_v6  ;;  %1494 = vst [vmem:[#allocation2 + $0x340] sm:$0xff] %v1453_v7  ;;  %v857_v28 = vand.u32 15, %v621_v17  ;;  %v625_v27 = vadd.s32 288, %v7440_v14  ;;  %v1521_v40 = vld [vmem:[#allocation2 + $0x67] sm:$0xff]  ;;  %v871_v0 = vand.u32 15, %v623_v21  ;;  %v6782_v25 = vpack.c.bf16 %v5385_v18, %v5384_v44  ;;  %6651 = vmatprep.subr.bf16.mxu1 %v6650_v10  ;;  %6246 = vmatmul.mubr.f32.gmra.mrb[10].mxu0 %v7649_v33 }
  0x47   : > { %1496 = vst [vmem:[#allocation2 + $0x350] sm:$0xff] %v1455_v35  ;;  %v5320_v43 = vld [vmem:[%s8934_s3 + $0xe0] sm:$0xff]  ;;  %v5321_v49 = vld [vmem:[%s8934_s3 + $0xe8] sm:$0xff]  ;;  %1498 = vst [vmem:[#allocation2 + $0x360] sm:$0xff] %v1457_v55  ;;  %v624_v45 = vadd.s32 280, %v7440_v14  ;;  %vm1339_vm14 = vcmp.eq.s32.totalorder %v843_v20, 0  ;;  %6781 = vmatpush3.bf16.msra.mxu0 %v6778_v34  ;;  %6248 = vmatprep.mubr.f32.mxu0 %v7657_v36 }
  0x48   : > { %v8025_v46 = vld [vmem:[#allocation2 + $0x6f] sm:$0xff]  ;;  %vm1341_vm15 = vcmp.eq.s32.totalorder %v857_v28, 0  ;;  %s5442_s11 = sadd.s32 240, %s7454_s29  ;;  %v1459_v48 = vsel %vm1339_vm14, 0.0, %v7898_v39  ;;  %5926 = vmatmul.mubr.f32.gmra.mrb[10].mxu1 %v1521_v40  ;;  %v5387_v30 = vld [vmem:[%s8934_s3 + $0x2f8] sm:$0xff]  ;;  %v6654_v5 = vpack.c.bf16 %v5321_v49, %v5320_v43  ;;  %vm8036_vm0 = vcmp.eq.s32.totalorder %v871_v0, 0  ;;  %6783 = vmatprep.subr.bf16.mxu0 %v6782_v25 }
  0x49   : > { %v1461_v37 = vsel %vm1341_vm15, 0.0, %v7946_v38  ;;  %v5386_v54 = vld [vmem:[%s8934_s3 + $0x2f0] sm:$0xff]  ;;  %1500 = vst [vmem:[#allocation2 + $0x370] sm:$0xff] %v1459_v48  ;;  %v885_v58 = vand.u32 15, %v625_v27  ;;  %v878_v42 = vand.u32 15, %v624_v45  ;;  %5928 = vmatprep.mubr.f32.mxu1 %v8025_v46  ;;  %v5323_v2 = vld [vmem:[%s8934_s3 + $0xf8] sm:$0xff]  ;;  %s8053_s27 = scalar_lea.vmem %s8933_s2, %s5442_s11  ;;  %6653 = vmatpush3.bf16.msra.mxu1 %v6650_v10  ;;  %s8762_s11 = scalar_lea.vmem %s8937_s6, %s7454_s29 }
  0x4a   : > { %1502 = vst [vmem:[#allocation2 + $0x380] sm:$0xff] %v1461_v37  ;;  %v8042_v62 = vld [vmem:[#allocation2 + $0x77] sm:$0xff]  ;;  %v8056_v33 = vld [vmem:[#allocation2 + $0x7f] sm:$0xff]  ;;  %v6786_v57 = vpack.c.bf16 %v5387_v30, %v5386_v54  ;;  %v5389_v13 = vld [vmem:[%s8934_s3 + $0x308] sm:$0xff]  ;;  %6655 = vmatprep.subr.bf16.mxu1 %v6654_v5  ;;  %6249 = vmatmul.mubr.f32.gmra.mrb[12].mxu0 %v7682_v52 }
  0x4b   : > { %v5322_v1 = vld [vmem:[%s8934_s3 + $0xf0] sm:$0xff]  ;;  %vm8059_vm1 = vcmp.eq.s32.totalorder %v878_v42, 15  ;;  %v490_v11 = vld [vmem:[%s7482_s18 + $0xf8] sm:$0xff]  ;;  %v5388_v36 = vld [vmem:[%s8934_s3 + $0x300] sm:$0xff]  ;;  %vm8074_vm2 = vcmp.eq.s32.totalorder %v885_v58, 0  ;;  %6785 = vmatpush3.bf16.msra.mxu0 %v6782_v25  ;;  %6251 = vmatprep.mubr.f32.mxu0 %v7694_v59 }
  0x4c   : > { %v489_v6 = vld [vmem:[%s7482_s18 + $0xf0] sm:$0xff]  ;;  %5929 = vmatmul.mubr.f32.gmra.mrb[12].mxu1 %v8042_v62  ;;  %v6658_v17 = vpack.c.bf16 %v5323_v2, %v5322_v1  ;;  %543 = vst [vmem:[#allocation2 + $0x258] sm:$0xff] %v490_v11  ;;  %1505 = vst [vmem:[#allocation2 + $0x398] sm:$0xff] %v490_v11  ;;  %v499_v19 = vld [vmem:[%s8053_s27] sm:$0xff]  ;;  %v1264_v34 = vsel %vm8059_vm1, 0.0, %v490_v11  ;;  %6787 = vmatprep.subr.bf16.mxu0 %v6786_v57  ;;  %v6790_v20 = vpack.c.bf16 %v5389_v13, %v5388_v36 }
  0x4d   : > { %542 = vst [vmem:[#allocation2 + $0x250] sm:$0xff] %v489_v6  ;;  %v1463_v8 = vsel %vm8036_vm0, 0.0, %v489_v6  ;;  %1303 = vst [vmem:[#allocation2 + $0x110] sm:$0xff] %v489_v6  ;;  %5931 = vmatprep.mubr.f32.mxu1 %v8056_v33  ;;  %v8082_v10 = vld [vmem:[#allocation2 + $0x87] sm:$0xff]  ;;  %v505_v18 = vmul.f32 0.0, %v499_v19  ;;  %v8091_v55 = vld [vmem:[#allocation2 + $0x8f] sm:$0xff]  ;;  %6657 = vmatpush3.bf16.msra.mxu1 %v6654_v5 }
  0x4e   : > { %1504 = vst [vmem:[#allocation2 + $0x390] sm:$0xff] %v1463_v8  ;;  %v5324_v35 = vld [vmem:[%s8934_s3 + $0x100] sm:$0xff]  ;;  %v5325_v44 = vld [vmem:[%s8934_s3 + $0x108] sm:$0xff]  ;;  %1304 = vst [vmem:[#allocation2 + $0x118] sm:$0xff] %v1264_v34  ;;  %6659 = vmatprep.subr.bf16.mxu1 %v6658_v17  ;;  %6252 = vmatmul.mubr.f32.gmra.mrb[14].mxu0 %v7711_v3  ;;  %v626_v5 = vadd.s32 296, %v7440_v14 }
  0x4f   : > { %v3295_v52 = vld [vmem:[#allocation2 + $0x2a1] sm:$0xff]  ;;  %544 = vst [vmem:[#allocation2 + $0x260] sm:$0xff] %v505_v18  ;;  %v1465_v28 = vsel %vm8074_vm2, 0.0, %v505_v18  ;;  %1305 = vst [vmem:[#allocation2 + $0x120] sm:$0xff] %v505_v18  ;;  %v5390_v27 = vld [vmem:[%s8934_s3 + $0x310] sm:$0xff]  ;;  %v8102_v40 = vpack.c.bf16 %v5325_v44, %v5324_v35  ;;  %6789 = vmatpush3.bf16.msra.mxu0 %v6786_v57 }
  0x50   : > { %5932 = vmatmul.mubr.f32.gmra.mrb[14].mxu1 %v8082_v10  ;;  %v5391_v59 = vld [vmem:[%s8934_s3 + $0x318] sm:$0xff]  ;;  %1506 = vst [vmem:[#allocation2 + $0x3a0] sm:$0xff] %v1465_v28  ;;  %6310 = vmatprep.mubr.f32.mxu0 %v3295_v52  ;;  %v8108_v49 = vld [vmem:[#allocation2 + $0x2a9] sm:$0xff]  ;;  %v5392_v3 = vld [vmem:[%s8934_s3 + $0x320] sm:$0xff]  ;;  %v892_v57 = vand.u32 15, %v626_v5 }
  0x51   : > { %5934 = vmatprep.mubr.f32.mxu1 %v8091_v55  ;;  %v8106_v43 = vld [vmem:[#allocation2 + $0x97] sm:$0xff]  ;;  %v8110_v0 = vld [vmem:[#allocation2 + $0x9f] sm:$0xff]  ;;  %6791 = vmatprep.subr.bf16.mxu0 %v6790_v20  ;;  %v6794_v25 = vpack.c.bf16 %v5391_v59, %v5390_v27  ;;  %v5393_v48 = vld [vmem:[%s8934_s3 + $0x328] sm:$0xff] }
  0x52   : > { %v8112_v45 = vld [vmem:[#allocation2 + $0x2b1] sm:$0xff]  ;;  %6661 = vmatpush3.bf16.msra.mxu1 %v6658_v17  ;;  %6311 = vmatmul.mubr.f32.vlgmr.msra.gmra.mrb[0].mxu0 %v8108_v49  ;;  %v8124_v37 = vld [vmem:[#allocation2 + $0xa7] sm:$0xff]  ;;  %v8127_v54 = vld [vmem:[#allocation2 + $0x2b9] sm:$0xff]  ;;  %v6798_v58 = vpack.c.bf16 %v5393_v48, %v5392_v3  ;;  %vm8169_vm3 = vcmp.eq.s32.totalorder %v892_v57, 15 }
  0x53   : > { %6663 = vmatprep.subr.bf16.mxu1 %v8102_v40  ;;  %6793 = vmatpush3.bf16.msra.mxu0 %v6790_v20  ;;  %v8129_v30 = vld [vmem:[#allocation2 + $0xaf] sm:$0xff]  ;;  %v8132_v56 = vld [vmem:[#allocation2 + $0x2c1] sm:$0xff]  ;;  %v5395_v1 = vld [vmem:[%s8934_s3 + $0x338] sm:$0xff] }
  0x54   : > { %5935 = vmatmul.mubr.f32.gmra.mrb[16].mxu1 %v8106_v43  ;;  %6313 = vmatprep.mubr.f32.mxu0 %v8112_v45  ;;  %v5394_v42 = vld [vmem:[%s8934_s3 + $0x330] sm:$0xff]  ;;  %v8148_v7 = vld [vmem:[#allocation2 + $0xbf] sm:$0xff]  ;;  %v5397_v13 = vld [vmem:[%s8934_s3 + $0x348] sm:$0xff] }
  0x55   : > { %5937 = vmatprep.mubr.f32.mxu1 %v8110_v0  ;;  %6795 = vmatprep.subr.bf16.mxu0 %v6794_v25  ;;  %v8143_v2 = vld [vmem:[#allocation2 + $0xb7] sm:$0xff]  ;;  %v8146_v6 = vld [vmem:[#allocation2 + $0x2c9] sm:$0xff]  ;;  %v6802_v11 = vpack.c.bf16 %v5395_v1, %v5394_v42  ;;  %v5396_v36 = vld [vmem:[%s8934_s3 + $0x340] sm:$0xff] }
  0x56   : > { %6314 = vmatmul.mubr.f32.gmra.mrb[2].mxu0 %v8127_v54  ;;  %v8150_v8 = vld [vmem:[#allocation2 + $0x2d1] sm:$0xff]  ;;  %v8161_v17 = vld [vmem:[#allocation2 + $0xc7] sm:$0xff]  ;;  %v8164_v19 = vld [vmem:[#allocation2 + $0x2d9] sm:$0xff]  ;;  %v6806_v18 = vpack.c.bf16 %v5397_v13, %v5396_v36 }
  0x57   : > { %6316 = vmatprep.mubr.f32.mxu0 %v8132_v56  ;;  %6797 = vmatpush3.bf16.msra.mxu0 %v6794_v25  ;;  %v8166_v21 = vld [vmem:[#allocation2 + $0xcf] sm:$0xff]  ;;  %v8173_v44 = vld [vmem:[#allocation2 + $0x2e1] sm:$0xff]  ;;  %v5399_v28 = vld [vmem:[%s8934_s3 + $0x358] sm:$0xff] }
  0x58   : > { %5938 = vmatmul.mubr.f32.gmra.mrb[18].mxu1 %v8124_v37  ;;  %6799 = vmatprep.subr.bf16.mxu0 %v6798_v58  ;;  %v500_v34 = vld [vmem:[%s8053_s27 + $0x8] sm:$0xff]  ;;  %v5398_v20 = vld [vmem:[%s8934_s3 + $0x350] sm:$0xff]  ;;  %v8195_v3 = vld [vmem:[#allocation2 + $0xdf] sm:$0xff] }
  0x59   : > { %5940 = vmatprep.mubr.f32.mxu1 %v8129_v30  ;;  %v8175_v52 = vmul.f32 0.0, %v500_v34  ;;  %v8186_v27 = vld [vmem:[#allocation2 + $0xd7] sm:$0xff]  ;;  %v8193_v25 = vld [vmem:[#allocation2 + $0x2e9] sm:$0xff]  ;;  %v6810_v5 = vpack.c.bf16 %v5399_v28, %v5398_v20  ;;  %v8215_v36 = vld [vmem:[#allocation2 + $0x301] sm:$0xff] }
  0x5a   : > { %6317 = vmatmul.mubr.f32.gmra.mrb[4].mxu0 %v8146_v6  ;;  %v8197_v48 = vld [vmem:[#allocation2 + $0x2f1] sm:$0xff]  ;;  %v5401_v42 = vld [vmem:[%s8934_s3 + $0x368] sm:$0xff]  ;;  %v8211_v57 = vld [vmem:[#allocation2 + $0x2f9] sm:$0xff] }
  0x5b   : > { %6319 = vmatprep.mubr.f32.mxu0 %v8150_v8  ;;  %6801 = vmatpush3.bf16.msra.mxu0 %v6798_v58  ;;  %9026 = vst [vmem:[#allocation11_spill] sm:$0xff] %v8175_v52  ;;  %v1266_v59 = vsel %vm8169_vm3, 0.0, %v8175_v52  ;;  %1507 = vst [vmem:[#allocation2 + $0x3a8] sm:$0xff] %v8175_v52  ;;  %v5400_v58 = vld [vmem:[%s8934_s3 + $0x360] sm:$0xff]  ;;  %v5402_v34 = vld [vmem:[%s8934_s3 + $0x370] sm:$0xff] }
  0x5c   : > { %5941 = vmatmul.mubr.f32.gmra.mrb[20].mxu1 %v8143_v2  ;;  %6803 = vmatprep.subr.bf16.mxu0 %v6802_v11  ;;  %1306 = vst [vmem:[#allocation2 + $0x128] sm:$0xff] %v1266_v59  ;;  %v8208_v1 = vld [vmem:[#allocation2 + $0xe7] sm:$0xff]  ;;  %v6814_v13 = vpack.c.bf16 %v5401_v42, %v5400_v58  ;;  %v5403_v35 = vld [vmem:[%s8934_s3 + $0x378] sm:$0xff]  ;;  %v5326_v41 = vld [vmem:[%s8934_s3 + $0x110] sm:$0xff] }
  0x5d   : > { %5943 = vmatprep.mubr.f32.mxu1 %v8148_v7  ;;  %v8226_v20 = vld [vmem:[#allocation2 + $0xf7] sm:$0xff]  ;;  %v8231_v28 = vld [vmem:[#allocation2 + $0xff] sm:$0xff]  ;;  %v6818_v58 = vpack.c.bf16 %v5403_v35, %v5402_v34  ;;  %v5405_v52 = vld [vmem:[%s8934_s3 + $0x388] sm:$0xff] }
  0x5e   : > { %6320 = vmatmul.mubr.f32.gmra.mrb[6].mxu0 %v8164_v19  ;;  %v8233_v59 = vld [vmem:[#allocation2 + $0x311] sm:$0xff]  ;;  %v5404_v42 = vld [vmem:[%s8934_s3 + $0x380] sm:$0xff]  ;;  %v7314_v15 = vld [vmem:[#allocation2 + $0x168] sm:$0xff] }
  0x5f   : > { %6322 = vmatprep.mubr.f32.mxu0 %v8173_v44  ;;  %6805 = vmatpush3.bf16.msra.mxu0 %v6802_v11  ;;  %v8213_v11 = vld [vmem:[#allocation2 + $0xef] sm:$0xff]  ;;  %v8244_v63 = vld [vmem:[#allocation2 + $0x107] sm:$0xff]  ;;  %v8251_v35 = vpack.c.bf16 %v5405_v52, %v5404_v42  ;;  %v5327_v12 = vld [vmem:[%s8934_s3 + $0x118] sm:$0xff] }
  0x60   : > { %5944 = vmatmul.mubr.f32.gmra.mrb[22].mxu1 %v8161_v17  ;;  %6807 = vmatprep.subr.bf16.mxu0 %v6806_v18  ;;  %v8249_v34 = vld [vmem:[#allocation2 + $0x321] sm:$0xff]  ;;  %v7311_v53 = vld [vmem:[#allocation2 + $0x150] sm:$0xff]  ;;  %v6666_v42 = vpack.c.bf16 %v5327_v12, %v5326_v41  ;;  %v7312_v32 = vld [vmem:[#allocation2 + $0x158] sm:$0xff] }
  0x61   : > { %5946 = vmatprep.mubr.f32.mxu1 %v8166_v21  ;;  %9027 = vst [vmem:[#allocation12_spill] sm:$0xff] %v8249_v34  ;;  %v8264_v52 = vld [vmem:[#allocation2 + $0x331] sm:$0xff]  ;;  %v5328_v22 = vld [vmem:[%s8934_s3 + $0x120] sm:$0xff] }
  0x62   : > { %6323 = vmatmul.mubr.f32.gmra.mrb[8].mxu0 %v8193_v25  ;;  %9029 = vst [vmem:[#allocation14_spill] sm:$0xff] %v8264_v52  ;;  %v8276_v12 = vld [vmem:[#allocation2 + $0x339] sm:$0xff]  ;;  %v8278_v41 = vld [vmem:[#allocation2 + $0x341] sm:$0xff] }
  0x63   : > { %6325 = vmatprep.mubr.f32.mxu0 %v8197_v48  ;;  %6809 = vmatpush3.bf16.msra.mxu0 %v6806_v18  ;;  %v8229_v18 = vld [vmem:[#allocation2 + $0x309] sm:$0xff]  ;;  %9030 = vst [vmem:[#allocation15_spill] sm:$0xff] %v8276_v12  ;;  %9031 = vst [vmem:[#allocation16_spill] sm:$0xff] %v8278_v41 }
  0x64   : > { %5947 = vmatmul.mubr.f32.gmra.mrb[24].mxu1 %v8186_v27  ;;  %6811 = vmatprep.subr.bf16.mxu0 %v6810_v5 }
  0x65   : > { %5949 = vmatprep.mubr.f32.mxu1 %v8195_v3 }
  0x66   : > { %6326 = vmatmul.mubr.f32.gmra.mrb[10].mxu0 %v8211_v57 }
  0x67   : > { %6328 = vmatprep.mubr.f32.mxu0 %v8215_v36  ;;  %6813 = vmatpush3.bf16.msra.mxu0 %v6810_v5  ;;  %v8247_v5 = vld [vmem:[#allocation2 + $0x319] sm:$0xff] }
  0x68   : > { %5950 = vmatmul.mubr.f32.gmra.mrb[26].mxu1 %v8208_v1  ;;  %6815 = vmatprep.subr.bf16.mxu0 %v6814_v13 }
  0x69   : > { %5952 = vmatprep.mubr.f32.mxu1 %v8213_v11 }
  0x6a   : > { %6329 = vmatmul.mubr.f32.gmra.mrb[12].mxu0 %v8229_v18 }
  0x6b   : > { %6331 = vmatprep.mubr.f32.mxu0 %v8233_v59  ;;  %6817 = vmatpush3.bf16.msra.mxu0 %v6814_v13  ;;  %v8262_v13 = vld [vmem:[#allocation2 + $0x329] sm:$0xff] }
  0x6c   : > { %5953 = vmatmul.mubr.f32.gmra.mrb[28].mxu1 %v8226_v20  ;;  %6819 = vmatprep.subr.bf16.mxu0 %v6818_v58  ;;  %9028 = vst [vmem:[#allocation13_spill] sm:$0xff] %v8262_v13 }
  0x6d   : > { %5955 = vmatprep.mubr.f32.mxu1 %v8231_v28 }
  0x6e   : > { %6332 = vmatmul.mubr.f32.gmra.mrb[14].mxu0 %v8247_v5 }
  0x6f   : > { %6334 = vmatprep.mubr.f32.mxu0 %v8249_v34  ;;  %6821 = vmatpush3.bf16.msra.mxu0 %v6818_v58  ;;  %v7313_v58 = vld [vmem:[#allocation2 + $0x160] sm:$0xff]  ;;  %v5330_v34 = vld [vmem:[%s8934_s3 + $0x130] sm:$0xff] }
  0x70   : > { %5956 = vmatmul.mubr.f32.gmra.mrb[30].mxu1 %v8244_v63  ;;  %6823 = vmatprep.subr.bf16.mxu0 %v8251_v35 }
  0x71   : > { %5990 = vmatprep.mubr.f32.mxu1 %v7311_v53  ;;  %v5329_v53 = vld [vmem:[%s8934_s3 + $0x128] sm:$0xff] }
  0x72   : > { %6335 = vmatmul.mubr.f32.gmra.mrb[16].mxu0 %v8262_v13  ;;  %v5332_v13 = vld [vmem:[%s8934_s3 + $0x140] sm:$0xff] }
  0x73   : > { %6337 = vmatprep.mubr.f32.mxu0 %v8264_v52  ;;  %v8288_v52 = vld [vmem:[#allocation2 + $0x349] sm:$0xff] }
  0x74   : > { %5991 = vmatmul.mubr.f32.vlgmr.msra.gmra.mrb[0].mxu1 %v7312_v32  ;;  %v6670_v32 = vpack.c.bf16 %v5329_v53, %v5328_v22  ;;  %9032 = vst [vmem:[#allocation17_spill] sm:$0xff] %v8288_v52  ;;  %v8290_v22 = vld [vmem:[#allocation2 + $0x351] sm:$0xff] }
  0x75   : > { %6665 = vmatpush3.bf16.msra.mxu1 %v8102_v40  ;;  %5993 = vmatprep.mubr.f32.mxu1 %v7313_v58  ;;  %v5331_v40 = vld [vmem:[%s8934_s3 + $0x138] sm:$0xff]  ;;  %v7315_v58 = vld [vmem:[#allocation2 + $0x170] sm:$0xff]  ;;  %9033 = vst [vmem:[#allocation18_spill] sm:$0xff] %v8290_v22 }
  0x76   : > { %6667 = vmatprep.subr.bf16.mxu1 %v6666_v42  ;;  %6338 = vmatmul.mubr.f32.gmra.mrb[18].mxu0 %v8276_v12  ;;  %v7316_v53 = vld [vmem:[#allocation2 + $0x178] sm:$0xff]  ;;  %v5333_v12 = vld [vmem:[%s8934_s3 + $0x148] sm:$0xff] }
  0x77   : > { %6340 = vmatprep.mubr.f32.mxu0 %v8278_v41  ;;  %v5334_v41 = vld [vmem:[%s8934_s3 + $0x150] sm:$0xff] }
  0x78   : > { %5994 = vmatmul.mubr.f32.gmra.mrb[2].mxu1 %v7314_v15  ;;  %v6674_v15 = vpack.c.bf16 %v5331_v40, %v5330_v34  ;;  %v8302_v34 = vld [vmem:[#allocation2 + $0x361] sm:$0xff]  ;;  %v6678_v40 = vpack.c.bf16 %v5333_v12, %v5332_v13  ;;  %v8314_v13 = vld [vmem:[#allocation2 + $0x371] sm:$0xff] }
  0x79   : > { %5996 = vmatprep.mubr.f32.mxu1 %v7315_v58  ;;  %6669 = vmatpush3.bf16.msra.mxu1 %v6666_v42  ;;  %v7317_v58 = vld [vmem:[#allocation2 + $0x180] sm:$0xff]  ;;  %9035 = vst [vmem:[#allocation20_spill] sm:$0xff] %v8302_v34  ;;  %9037 = vst [vmem:[#allocation22_spill] sm:$0xff] %v8314_v13 }
  0x7a   : > { %6671 = vmatprep.subr.bf16.mxu1 %v6670_v32  ;;  %6341 = vmatmul.mubr.f32.gmra.mrb[20].mxu0 %v8288_v52  ;;  %v8300_v42 = vld [vmem:[#allocation2 + $0x359] sm:$0xff] }
  0x7b   : > { %6343 = vmatprep.mubr.f32.mxu0 %v8290_v22  ;;  %9034 = vst [vmem:[#allocation19_spill] sm:$0xff] %v8300_v42  ;;  %v5335_v52 = vld [vmem:[%s8934_s3 + $0x158] sm:$0xff]  ;;  %v5336_v22 = vld [vmem:[%s8934_s3 + $0x160] sm:$0xff] }
  0x7c   : > { %5997 = vmatmul.mubr.f32.gmra.mrb[4].mxu1 %v7316_v53  ;;  %v7318_v53 = vld [vmem:[#allocation2 + $0x188] sm:$0xff]  ;;  %v6682_v12 = vpack.c.bf16 %v5335_v52, %v5334_v41 }
  0x7d   : > { %5999 = vmatprep.mubr.f32.mxu1 %v7317_v58  ;;  %6673 = vmatpush3.bf16.msra.mxu1 %v6670_v32  ;;  %v7319_v58 = vld [vmem:[#allocation2 + $0x190] sm:$0xff]  ;;  %v8326_v52 = vld [vmem:[#allocation2 + $0x381] sm:$0xff] }
  0x7e   : > { %6675 = vmatprep.subr.bf16.mxu1 %v6674_v15  ;;  %6344 = vmatmul.mubr.f32.gmra.mrb[22].mxu0 %v8300_v42  ;;  %v8312_v32 = vld [vmem:[#allocation2 + $0x369] sm:$0xff]  ;;  %9039 = vst [vmem:[#allocation24_spill] sm:$0xff] %v8326_v52 }
  0x7f   : > { %6346 = vmatprep.mubr.f32.mxu0 %v8302_v34  ;;  %9036 = vst [vmem:[#allocation21_spill] sm:$0xff] %v8312_v32  ;;  %v5337_v42 = vld [vmem:[%s8934_s3 + $0x168] sm:$0xff]  ;;  %v5338_v34 = vld [vmem:[%s8934_s3 + $0x170] sm:$0xff] }
  0x80   : > { %6000 = vmatmul.mubr.f32.gmra.mrb[6].mxu1 %v7318_v53  ;;  %v7320_v53 = vld [vmem:[#allocation2 + $0x198] sm:$0xff]  ;;  %v6686_v41 = vpack.c.bf16 %v5337_v42, %v5336_v22 }
  0x81   : > { %6002 = vmatprep.mubr.f32.mxu1 %v7319_v58  ;;  %6677 = vmatpush3.bf16.msra.mxu1 %v6674_v15  ;;  %v7321_v58 = vld [vmem:[#allocation2 + $0x1a0] sm:$0xff]  ;;  %v3325_v22 = vld [vmem:[#allocation2 + $0x391] sm:$0xff] }
  0x82   : > { %6679 = vmatprep.subr.bf16.mxu1 %v6678_v40  ;;  %6347 = vmatmul.mubr.f32.gmra.mrb[24].mxu0 %v8312_v32  ;;  %v8324_v15 = vld [vmem:[#allocation2 + $0x379] sm:$0xff] }
  0x83   : > { %6349 = vmatprep.mubr.f32.mxu0 %v8314_v13  ;;  %9038 = vst [vmem:[#allocation23_spill] sm:$0xff] %v8324_v15  ;;  %v5339_v32 = vld [vmem:[%s8934_s3 + $0x178] sm:$0xff]  ;;  %v5340_v13 = vld [vmem:[%s8934_s3 + $0x180] sm:$0xff] }
  0x84   : > { %6003 = vmatmul.mubr.f32.gmra.mrb[8].mxu1 %v7320_v53  ;;  %v7322_v53 = vld [vmem:[#allocation2 + $0x1a8] sm:$0xff]  ;;  %v6690_v42 = vpack.c.bf16 %v5339_v32, %v5338_v34 }
  0x85   : > { %6005 = vmatprep.mubr.f32.mxu1 %v7321_v58  ;;  %6681 = vmatpush3.bf16.msra.mxu1 %v6678_v40  ;;  %v7323_v58 = vld [vmem:[#allocation2 + $0x1b0] sm:$0xff]  ;;  %v7326_v32 = vld [vmem:[#allocation2 + $0x1c8] sm:$0xff] }
  0x86   : > { %6683 = vmatprep.subr.bf16.mxu1 %v6682_v12  ;;  %6350 = vmatmul.mubr.f32.gmra.mrb[26].mxu0 %v8324_v15  ;;  %v8336_v40 = vld [vmem:[#allocation2 + $0x389] sm:$0xff] }
  0x87   : > { %6352 = vmatprep.mubr.f32.mxu0 %v8326_v52  ;;  %9040 = vst [vmem:[#allocation25_spill] sm:$0xff] %v8336_v40  ;;  %v5341_v15 = vld [vmem:[%s8934_s3 + $0x188] sm:$0xff]  ;;  %v3326_v52 = vld [vmem:[#allocation2 + $0x399] sm:$0xff] }
  0x88   : > { %6006 = vmatmul.mubr.f32.gmra.mrb[10].mxu1 %v7322_v53  ;;  %v7324_v53 = vld [vmem:[#allocation2 + $0x1b8] sm:$0xff]  ;;  %v8347_v34 = vpack.c.bf16 %v5341_v15, %v5340_v13 }
  0x89   : > { %6008 = vmatprep.mubr.f32.mxu1 %v7323_v58  ;;  %6685 = vmatpush3.bf16.msra.mxu1 %v6682_v12  ;;  %v7325_v58 = vld [vmem:[#allocation2 + $0x1c0] sm:$0xff]  ;;  %v8345_v12 = vld [vmem:[#allocation2 + $0x2f] sm:$0xff] }
  0x8a   : > { %6687 = vmatprep.subr.bf16.mxu1 %v6686_v41  ;;  %6353 = vmatmul.mubr.f32.gmra.mrb[28].mxu0 %v8336_v40  ;;  %v5407_v40 = vld [vmem:[%s8934_s3 + $0x398] sm:$0xff] }
  0x8b   : > { %6355 = vmatprep.mubr.f32.mxu0 %v3325_v22  ;;  %v8358_v13 = vld [vmem:[#allocation2 + $0x3f] sm:$0xff] }
  0x8c   : > { %6009 = vmatmul.mubr.f32.gmra.mrb[12].mxu1 %v7324_v53  ;;  %v5406_v53 = vld [vmem:[%s8934_s3 + $0x390] sm:$0xff]  ;;  %v7328_v22 = vld [vmem:[#allocation2 + $0x1d8] sm:$0xff] }
  0x8d   : > { %6011 = vmatprep.mubr.f32.mxu1 %v7325_v58  ;;  %6689 = vmatpush3.bf16.msra.mxu1 %v6686_v41  ;;  %v7327_v58 = vld [vmem:[#allocation2 + $0x1d0] sm:$0xff]  ;;  %v6826_v15 = vpack.c.bf16 %v5407_v40, %v5406_v53  ;;  %v8371_v40 = vld [vmem:[#allocation2 + $0x47] sm:$0xff] }
  0x8e   : > { %6691 = vmatprep.subr.bf16.mxu1 %v6690_v42  ;;  %6356 = vmatmul.mubr.f32.gmra.mrb[30].mxu0 %v3326_v52  ;;  %v8356_v41 = vld [vmem:[#allocation2 + $0x37] sm:$0xff]  ;;  %v5409_v52 = vld [vmem:[%s8934_s3 + $0x3a8] sm:$0xff] }
  0x8f   : > { %6390 = vmatprep.mubr.f32.mxu0 %v8345_v12 }
  0x90   : > { %6012 = vmatmul.mubr.f32.gmra.mrb[14].mxu1 %v7326_v32  ;;  %v5408_v32 = vld [vmem:[%s8934_s3 + $0x3a0] sm:$0xff] }
  0x91   : > { %6014 = vmatprep.mubr.f32.mxu1 %v7327_v58  ;;  %6693 = vmatpush3.bf16.msra.mxu1 %v6690_v42  ;;  %v8373_v42 = vld [vmem:[#allocation2 + $0x4f] sm:$0xff]  ;;  %v6830_v53 = vpack.c.bf16 %v5409_v52, %v5408_v32  ;;  %v5412_v32 = vld [vmem:[%s8934_s3 + $0x3c0] sm:$0xff] }
  0x92   : > { %6695 = vmatprep.subr.bf16.mxu1 %v8347_v34  ;;  %6391 = vmatmul.mubr.f32.vlgmr.msra.gmra.mrb[0].mxu0 %v8356_v41  ;;  %v5410_v58 = vld [vmem:[%s8934_s3 + $0x3b0] sm:$0xff]  ;;  %v5413_v52 = vld [vmem:[%s8934_s3 + $0x3c8] sm:$0xff] }
  0x93   : > { %6825 = vmatpush3.bf16.msra.mxu0 %v8251_v35  ;;  %6393 = vmatprep.mubr.f32.mxu0 %v8358_v13  ;;  %v8385_v35 = vld [vmem:[#allocation2 + $0x57] sm:$0xff] }
  0x94   : > { %6015 = vmatmul.mubr.f32.gmra.mrb[16].mxu1 %v7328_v22  ;;  %6827 = vmatprep.subr.bf16.mxu0 %v6826_v15  ;;  %v8387_v22 = vld [vmem:[#allocation2 + $0x5f] sm:$0xff] }
  0x95   : > { %6017 = vmatprep.mubr.f32.mxu1 %v7747_v29  ;;  %v5411_v29 = vld [vmem:[%s8934_s3 + $0x3b8] sm:$0xff] }
  0x96   : > { %6394 = vmatmul.mubr.f32.gmra.mrb[2].mxu0 %v8371_v40 }
  0x97   : > { %6396 = vmatprep.mubr.f32.mxu0 %v8373_v42  ;;  %6829 = vmatpush3.bf16.msra.mxu0 %v6826_v15  ;;  %v6838_v15 = vpack.c.bf16 %v5413_v52, %v5412_v32  ;;  %v5425_v52 = vld [vmem:[%s8934_s3 + $0x428] sm:$0xff] }
  0x98   : > { %6018 = vmatmul.mubr.f32.gmra.mrb[18].mxu1 %v7750_v31  ;;  %6831 = vmatprep.subr.bf16.mxu0 %v6830_v53  ;;  %v6834_v31 = vpack.c.bf16 %v5411_v29, %v5410_v58  ;;  %v5415_v58 = vld [vmem:[%s8934_s3 + $0x3d8] sm:$0xff] }
  0x99   : > { %6020 = vmatprep.mubr.f32.mxu1 %v7780_v47  ;;  %v8399_v47 = vld [vmem:[#allocation2 + $0x67] sm:$0xff]  ;;  %v5347_v29 = vld [vmem:[%s8934_s3 + $0x1b8] sm:$0xff] }
  0x9a   : > { %6397 = vmatmul.mubr.f32.gmra.mrb[4].mxu0 %v8385_v35 }
  0x9b   : > { %6399 = vmatprep.mubr.f32.mxu0 %v8387_v22  ;;  %6833 = vmatpush3.bf16.msra.mxu0 %v6830_v53  ;;  %v5417_v53 = vld [vmem:[%s8934_s3 + $0x3e8] sm:$0xff] }
  0x9c   : > { %6021 = vmatmul.mubr.f32.gmra.mrb[20].mxu1 %v7795_v60  ;;  %6835 = vmatprep.subr.bf16.mxu0 %v6834_v31  ;;  %v5414_v60 = vld [vmem:[%s8934_s3 + $0x3d0] sm:$0xff] }
  0x9d   : > { %6023 = vmatprep.mubr.f32.mxu1 %v7826_v16  ;;  %v6842_v16 = vpack.c.bf16 %v5415_v58, %v5414_v60  ;;  %v4039_v60 = vld [vmem:[#allocation2 + $0x190] sm:$0xff] }
  0x9e   : > { %6400 = vmatmul.mubr.f32.gmra.mrb[6].mxu0 %v8399_v47 }
  0x9f   : > { %6402 = vmatprep.mubr.f32.mxu0 %v8025_v46  ;;  %6837 = vmatpush3.bf16.msra.mxu0 %v6834_v31  ;;  %v5419_v46 = vld [vmem:[%s8934_s3 + $0x3f8] sm:$0xff] }
  0xa0   : > { %6024 = vmatmul.mubr.f32.gmra.mrb[22].mxu1 %v7835_v23  ;;  %6839 = vmatprep.subr.bf16.mxu0 %v6838_v15  ;;  %v5416_v23 = vld [vmem:[%s8934_s3 + $0x3e0] sm:$0xff]  ;;  %v5423_v31 = vld [vmem:[%s8934_s3 + $0x418] sm:$0xff] }
  0xa1   : > { %6026 = vmatprep.mubr.f32.mxu1 %v7838_v24  ;;  %v6846_v24 = vpack.c.bf16 %v5417_v53, %v5416_v23  ;;  %v5427_v23 = vld [vmem:[%s8934_s3 + $0x438] sm:$0xff]  ;;  %v9043_v53 = vld [vmem:[#allocation14_spill] sm:$0xff] }
  0xa2   : > { %6403 = vmatmul.mubr.f32.gmra.mrb[8].mxu0 %v8042_v62  ;;  %v5421_v62 = vld [vmem:[%s8934_s3 + $0x408] sm:$0xff] }
  0xa3   : > { %6405 = vmatprep.mubr.f32.mxu0 %v8056_v33  ;;  %6841 = vmatpush3.bf16.msra.mxu0 %v6838_v15  ;;  %v9041_v15 = vld [vmem:[#allocation12_spill] sm:$0xff] }
  0xa4   : > { %6027 = vmatmul.mubr.f32.gmra.mrb[24].mxu1 %v7841_v26  ;;  %6843 = vmatprep.subr.bf16.mxu0 %v6842_v16  ;;  %v5418_v26 = vld [vmem:[%s8934_s3 + $0x3f0] sm:$0xff] }
  0xa5   : > { %6029 = vmatprep.mubr.f32.mxu1 %v7885_v61  ;;  %v6850_v61 = vpack.c.bf16 %v5419_v46, %v5418_v26  ;;  %v4041_v26 = vld [vmem:[#allocation2 + $0x1a0] sm:$0xff] }
  0xa6   : > { %6406 = vmatmul.mubr.f32.gmra.mrb[10].mxu0 %v8082_v10  ;;  %v5343_v10 = vld [vmem:[%s8934_s3 + $0x198] sm:$0xff] }
  0xa7   : > { %6408 = vmatprep.mubr.f32.mxu0 %v8091_v55  ;;  %6845 = vmatpush3.bf16.msra.mxu0 %v6842_v16  ;;  %v2187_v55 = vld [vmem:[#allocation2 + $0x2a1] sm:$0xff] }
  0xa8   : > { %6030 = vmatmul.mubr.f32.gmra.mrb[26].mxu1 %v7895_v51  ;;  %6847 = vmatprep.subr.bf16.mxu0 %v6846_v24  ;;  %v5420_v51 = vld [vmem:[%s8934_s3 + $0x400] sm:$0xff]  ;;  %v9042_v16 = vld [vmem:[#allocation13_spill] sm:$0xff] }
  0xa9   : > { %6032 = vmatprep.mubr.f32.mxu1 %v7898_v39  ;;  %v2185_v39 = vld [vmem:[#allocation2 + $0x291] sm:$0xff]  ;;  %v8441_v33 = vpack.c.bf16 %v5421_v62, %v5420_v51  ;;  %v5428_v51 = vld [vmem:[%s8934_s3 + $0x440] sm:$0xff]  ;;  %v5429_v62 = vld [vmem:[%s8934_s3 + $0x448] sm:$0xff] }
  0xaa   : > { %6409 = vmatmul.mubr.f32.gmra.mrb[12].mxu0 %v8106_v43 }
  0xab   : > { %6411 = vmatprep.mubr.f32.mxu0 %v8110_v0  ;;  %6849 = vmatpush3.bf16.msra.mxu0 %v6846_v24  ;;  %v5345_v0 = vld [vmem:[%s8934_s3 + $0x1a8] sm:$0xff]  ;;  %v4040_v24 = vld [vmem:[#allocation2 + $0x198] sm:$0xff] }
  0xac   : > { %6033 = vmatmul.mubr.f32.gmra.mrb[28].mxu1 %v7901_v4  ;;  %6851 = vmatprep.subr.bf16.mxu0 %v6850_v61  ;;  %v5342_v4 = vld [vmem:[%s8934_s3 + $0x190] sm:$0xff] }
  0xad   : > { %6035 = vmatprep.mubr.f32.mxu1 %v7946_v38  ;;  %v2186_v38 = vld [vmem:[#allocation2 + $0x299] sm:$0xff]  ;;  %v6698_v43 = vpack.c.bf16 %v5343_v10, %v5342_v4  ;;  %v4043_v4 = vld [vmem:[#allocation2 + $0x1b0] sm:$0xff]  ;;  %v6870_v10 = vpack.c.bf16 %v5429_v62, %v5428_v51 }
  0xae   : > { %6412 = vmatmul.mubr.f32.gmra.mrb[14].mxu0 %v8124_v37  ;;  %v9061_v51 = vld [vmem:[#allocation10_spill] sm:$0xff]  ;;  %v9062_v62 = vld [vmem:[#allocation11_spill] sm:$0xff] }
  0xaf   : > { %6414 = vmatprep.mubr.f32.mxu0 %v8129_v30  ;;  %6853 = vmatpush3.bf16.msra.mxu0 %v6850_v61  ;;  %v5346_v30 = vld [vmem:[%s8934_s3 + $0x1b0] sm:$0xff]  ;;  %v9044_v61 = vld [vmem:[#allocation15_spill] sm:$0xff] }
  0xb0   : > { %6036 = vmatmul.mubr.f32.gmra.mrb[30].mxu1 %v7972_v50  ;;  %6855 = vmatprep.subr.bf16.mxu0 %v8441_v33  ;;  %v5344_v50 = vld [vmem:[%s8934_s3 + $0x1a0] sm:$0xff] }
  0xb1   : > { %6070 = vmatprep.mubr.f32.mxu1 %v2185_v39  ;;  %v6702_v37 = vpack.c.bf16 %v5345_v0, %v5344_v50  ;;  %v9045_v39 = vld [vmem:[#allocation16_spill] sm:$0xff]  ;;  %v9047_v50 = vld [vmem:[#allocation18_spill] sm:$0xff]  ;;  %v4044_v0 = vld [vmem:[#allocation2 + $0x1b8] sm:$0xff] }
  0xb2   : > { %6415 = vmatmul.mubr.f32.gmra.mrb[16].mxu0 %v8143_v2  ;;  %v6706_v2 = vpack.c.bf16 %v5347_v29, %v5346_v30  ;;  %v9048_v29 = vld [vmem:[#allocation19_spill] sm:$0xff] }
  0xb3   : > { %6417 = vmatprep.mubr.f32.mxu0 %v8148_v7  ;;  %v5349_v7 = vld [vmem:[%s8934_s3 + $0x1c8] sm:$0xff] }
  0xb4   : > { %6071 = vmatmul.mubr.f32.vlgmr.msra.gmra.mrb[0].mxu1 %v2186_v38  ;;  %v9046_v38 = vld [vmem:[#allocation17_spill] sm:$0xff] }
  0xb5   : > { %6697 = vmatpush3.bf16.msra.mxu1 %v8347_v34  ;;  %6073 = vmatprep.mubr.f32.mxu1 %v2187_v55  ;;  %v3696_v34 = vld [vmem:[#allocation2 + $0x127] sm:$0xff]  ;;  %v5430_v55 = vld [vmem:[%s8934_s3 + $0x450] sm:$0xff] }
  0xb6   : > { %6699 = vmatprep.subr.bf16.mxu1 %v6698_v43  ;;  %6418 = vmatmul.mubr.f32.gmra.mrb[18].mxu0 %v8161_v17  ;;  %v5351_v17 = vld [vmem:[%s8934_s3 + $0x1d8] sm:$0xff] }
  0xb7   : > { %6420 = vmatprep.mubr.f32.mxu0 %v8166_v21  ;;  %v627_v21 = vadd.s32 304, %v7440_v14 }
  0xb8   : > { %6074 = vmatmul.mubr.f32.gmra.mrb[2].mxu1 %v8108_v49  ;;  %v5348_v49 = vld [vmem:[%s8934_s3 + $0x1c0] sm:$0xff] }
  0xb9   : > { %6076 = vmatprep.mubr.f32.mxu1 %v8112_v45  ;;  %6701 = vmatpush3.bf16.msra.mxu1 %v6698_v43  ;;  %v6710_v45 = vpack.c.bf16 %v5349_v7, %v5348_v49  ;;  %v5431_v43 = vld [vmem:[%s8934_s3 + $0x458] sm:$0xff]  ;;  %v5433_v49 = vld [vmem:[%s8934_s3 + $0x468] sm:$0xff]  ;;  %v9049_v7 = vld [vmem:[#allocation20_spill] sm:$0xff] }
  0xba   : > { %6703 = vmatprep.subr.bf16.mxu1 %v6702_v37  ;;  %6421 = vmatmul.mubr.f32.gmra.mrb[20].mxu0 %v8186_v27  ;;  %v5353_v27 = vld [vmem:[%s8934_s3 + $0x1e8] sm:$0xff]  ;;  %v6874_v30 = vpack.c.bf16 %v5431_v43, %v5430_v55  ;;  %v2575_v43 = vld [vmem:[#allocation2 + $0xbf] sm:$0xff] }
  0xbb   : > { %6423 = vmatprep.mubr.f32.mxu0 %v8195_v3  ;;  %v8503_v3 = vld [vmem:[#allocation2 + $0x10f] sm:$0xff] }
  0xbc   : > { %6077 = vmatmul.mubr.f32.gmra.mrb[4].mxu1 %v8127_v54  ;;  %v5350_v54 = vld [vmem:[%s8934_s3 + $0x1d0] sm:$0xff] }
  0xbd   : > { %6079 = vmatprep.mubr.f32.mxu1 %v8132_v56  ;;  %6705 = vmatpush3.bf16.msra.mxu1 %v6702_v37  ;;  %v6714_v56 = vpack.c.bf16 %v5351_v17, %v5350_v54  ;;  %v4045_v37 = vld [vmem:[#allocation2 + $0x1c0] sm:$0xff]  ;;  %v4047_v54 = vld [vmem:[#allocation2 + $0x1d0] sm:$0xff] }
  0xbe   : > { %6707 = vmatprep.subr.bf16.mxu1 %v6706_v2  ;;  %6424 = vmatmul.mubr.f32.gmra.mrb[22].mxu0 %v8208_v1  ;;  %v5355_v1 = vld [vmem:[%s8934_s3 + $0x1f8] sm:$0xff]  ;;  %v4408_v55 = vld [vmem:[#allocation2 + $0x2c9] sm:$0xff] }
  0xbf   : > { %6426 = vmatprep.mubr.f32.mxu0 %v8213_v11 }
  0xc0   : > { %6080 = vmatmul.mubr.f32.gmra.mrb[6].mxu1 %v8146_v6  ;;  %v5352_v6 = vld [vmem:[%s8934_s3 + $0x1e0] sm:$0xff] }
  0xc1   : > { %6082 = vmatprep.mubr.f32.mxu1 %v8150_v8  ;;  %6709 = vmatpush3.bf16.msra.mxu1 %v6706_v2  ;;  %v899_v8 = vand.u32 15, %v627_v21  ;;  %v6718_v14 = vpack.c.bf16 %v5353_v27, %v5352_v6  ;;  %v5432_v2 = vld [vmem:[%s8934_s3 + $0x460] sm:$0xff]  ;;  %v5434_v21 = vld [vmem:[%s8934_s3 + $0x470] sm:$0xff]  ;;  %v5435_v6 = vld [vmem:[%s8934_s3 + $0x478] sm:$0xff] }
  0xc2   : > { %6711 = vmatprep.subr.bf16.mxu1 %v6710_v45  ;;  %6427 = vmatmul.mubr.f32.gmra.mrb[24].mxu0 %v8226_v20  ;;  %v8515_v20 = vld [vmem:[#allocation2 + $0x117] sm:$0xff]  ;;  %v6878_v17 = vpack.c.bf16 %v5433_v49, %v5432_v2  ;;  %v4412_v49 = vld [vmem:[#allocation2 + $0x2e9] sm:$0xff] }
  0xc3   : > { %6429 = vmatprep.mubr.f32.mxu0 %v8231_v28  ;;  %vm1347_vm4 = vcmp.eq.s32.totalorder %v899_v8, 0  ;;  %v9051_v27 = vld [vmem:[#allocation22_spill] sm:$0xff]  ;;  %v4048_v8 = vld [vmem:[#allocation2 + $0x1d8] sm:$0xff] }
  0xc4   : > { %6083 = vmatmul.mubr.f32.gmra.mrb[8].mxu1 %v8164_v19  ;;  %v5354_v19 = vld [vmem:[%s8934_s3 + $0x1f0] sm:$0xff] }
  0xc5   : > { %6085 = vmatprep.mubr.f32.mxu1 %v8173_v44  ;;  %6713 = vmatpush3.bf16.msra.mxu1 %v6710_v45  ;;  %v7329_v44 = vld [vmem:[#allocation2 + $0x140] sm:$0xff]  ;;  %v6722_v28 = vpack.c.bf16 %v5355_v1, %v5354_v19  ;;  %v4046_v45 = vld [vmem:[#allocation2 + $0x1c8] sm:$0xff]  ;;  %v6882_v19 = vpack.c.bf16 %v5435_v6, %v5434_v21  ;;  %v9052_v1 = vld [vmem:[#allocation23_spill] sm:$0xff] }
  0xc6   : > { %6715 = vmatprep.subr.bf16.mxu1 %v6714_v56  ;;  %v1467_v11 = vsel %vm1347_vm4, 0.0, %v7329_v44  ;;  %6430 = vmatmul.mubr.f32.gmra.mrb[26].mxu0 %v8244_v63  ;;  %v4035_v63 = vld [vmem:[#allocation2 + $0x170] sm:$0xff]  ;;  %v9053_v44 = vld [vmem:[#allocation24_spill] sm:$0xff] }
  0xc7   : > { %1508 = vst [vmem:[#allocation2 + $0x3b0] sm:$0xff] %v1467_v11  ;;  %6432 = vmatprep.mubr.f32.mxu0 %v8503_v3  ;;  %v8583_v11 = vld [vmem:[#allocation2 + $0x1e8] sm:$0xff]  ;;  %v2578_v2 = vld [vmem:[#allocation2 + $0xd7] sm:$0xff] }
  0xc8   : > { %6086 = vmatmul.mubr.f32.gmra.mrb[10].mxu1 %v8193_v25  ;;  %v3695_v25 = vld [vmem:[#allocation2 + $0x11f] sm:$0xff]  ;;  %v2582_v6 = vld [vmem:[#allocation2 + $0xf7] sm:$0xff] }
  0xc9   : > { %6088 = vmatprep.mubr.f32.mxu1 %v8197_v48  ;;  %6717 = vmatpush3.bf16.msra.mxu1 %v6714_v56  ;;  %v5422_v48 = vld [vmem:[%s8934_s3 + $0x410] sm:$0xff]  ;;  %v9050_v56 = vld [vmem:[#allocation21_spill] sm:$0xff] }
  0xca   : > { %6719 = vmatprep.subr.bf16.mxu1 %v6718_v14  ;;  %6433 = vmatmul.mubr.f32.gmra.mrb[28].mxu0 %v8515_v20  ;;  %v6858_v32 = vpack.c.bf16 %v5423_v31, %v5422_v48  ;;  %v8590_v48 = vld [vmem:[#allocation2 + $0x1f8] sm:$0xff]  ;;  %v8592_v31 = vld [vmem:[#allocation2 + $0x200] sm:$0xff] }
  0xcb   : > { %6435 = vmatprep.mubr.f32.mxu0 %v3695_v25  ;;  %v2555_v25 = vld [vmem:[#allocation2 + $0x1f] sm:$0xff] }
  0xcc   : > { %6089 = vmatmul.mubr.f32.gmra.mrb[12].mxu1 %v8211_v57  ;;  %v4036_v57 = vld [vmem:[#allocation2 + $0x178] sm:$0xff]  ;;  %v4415_v21 = vld [vmem:[#allocation2 + $0x301] sm:$0xff] }
  0xcd   : > { %6091 = vmatprep.mubr.f32.mxu1 %v8215_v36  ;;  %6721 = vmatpush3.bf16.msra.mxu1 %v6718_v14  ;;  %v4037_v36 = vld [vmem:[#allocation2 + $0x180] sm:$0xff] }
  0xce   : > { %6723 = vmatprep.subr.bf16.mxu1 %v6722_v28  ;;  %6436 = vmatmul.mubr.f32.gmra.mrb[30].mxu0 %v3696_v34  ;;  %v8578_v14 = vld [vmem:[#allocation2 + $0x1e0] sm:$0xff]  ;;  %v9054_v34 = vld [vmem:[#allocation25_spill] sm:$0xff] }
  0xcf   : > { %6470 = vmatprep.mubr.f32.mxu0 %v4035_v63  ;;  %v2556_v63 = vld [vmem:[#allocation2 + $0x27] sm:$0xff] }
  0xd0   : > { %6092 = vmatmul.mubr.f32.gmra.mrb[14].mxu1 %v8229_v18  ;;  %v5424_v18 = vld [vmem:[%s8934_s3 + $0x420] sm:$0xff] }
  0xd1   : > { %6094 = vmatprep.mubr.f32.mxu1 %v8233_v59  ;;  %6725 = vmatpush3.bf16.msra.mxu1 %v6722_v28  ;;  %v4038_v59 = vld [vmem:[#allocation2 + $0x188] sm:$0xff]  ;;  %v6862_v58 = vpack.c.bf16 %v5425_v52, %v5424_v18  ;;  %v8585_v28 = vld [vmem:[#allocation2 + $0x1f0] sm:$0xff]  ;;  %v8607_v18 = vld [vmem:[#allocation2 + $0x218] sm:$0xff] }
  0xd2   : > { %6886 = vmatprep.subr.bf16.mxu1 %v7429_v9  ;;  %6471 = vmatmul.mubr.f32.vlgmr.msra.gmra.mrb[0].mxu0 %v4036_v57  ;;  %v8598_v57 = vld [vmem:[#allocation2 + $0x208] sm:$0xff]  ;;  %v9057_v52 = vld [vmem:[#allocation6_spill] sm:$0xff] }
  0xd3   : > { %6857 = vmatpush3.bf16.msra.mxu0 %v8441_v33  ;;  %6473 = vmatprep.mubr.f32.mxu0 %v4037_v36  ;;  %v4042_v33 = vld [vmem:[#allocation2 + $0x1a8] sm:$0xff]  ;;  %v8600_v36 = vld [vmem:[#allocation2 + $0x210] sm:$0xff] }
  0xd4   : > { %6095 = vmatmul.mubr.f32.gmra.mrb[16].mxu1 %v8247_v5  ;;  %6859 = vmatprep.subr.bf16.mxu0 %v6858_v32  ;;  %v5426_v5 = vld [vmem:[%s8934_s3 + $0x430] sm:$0xff] }
  0xd5   : > { %6097 = vmatprep.mubr.f32.mxu1 %v9041_v15  ;;  %v6866_v46 = vpack.c.bf16 %v5427_v23, %v5426_v5  ;;  %v8630_v15 = vld [vmem:[#allocation2 + $0x240] sm:$0xff]  ;;  %v7330_v5 = vld [vmem:[#allocation2 + $0x250] sm:$0xff]  ;;  %v9060_v23 = vld [vmem:[#allocation9_spill] sm:$0xff] }
  0xd6   : > { %6474 = vmatmul.mubr.f32.gmra.mrb[2].mxu0 %v4038_v59  ;;  %v9058_v59 = vld [vmem:[#allocation7_spill] sm:$0xff] }
  0xd7   : > { %6476 = vmatprep.mubr.f32.mxu0 %v4039_v60  ;;  %6861 = vmatpush3.bf16.msra.mxu0 %v6858_v32  ;;  %v9055_v32 = vld [vmem:[#allocation4_spill] sm:$0xff] }
  0xd8   : > { %6098 = vmatmul.mubr.f32.gmra.mrb[18].mxu1 %v9042_v16  ;;  %6863 = vmatprep.subr.bf16.mxu0 %v6862_v58  ;;  %v2567_v60 = vld [vmem:[#allocation2 + $0x7f] sm:$0xff]  ;;  %v2568_v16 = vld [vmem:[#allocation2 + $0x87] sm:$0xff] }
  0xd9   : > { %6100 = vmatprep.mubr.f32.mxu1 %v9043_v53  ;;  %v7331_v53 = vld [vmem:[#allocation2 + $0x258] sm:$0xff] }
  0xda   : > { %6477 = vmatmul.mubr.f32.gmra.mrb[4].mxu0 %v4040_v24  ;;  %v2570_v24 = vld [vmem:[#allocation2 + $0x97] sm:$0xff] }
  0xdb   : > { %6479 = vmatprep.mubr.f32.mxu0 %v4041_v26  ;;  %6865 = vmatpush3.bf16.msra.mxu0 %v6862_v58  ;;  %v9059_v58 = vld [vmem:[#allocation8_spill] sm:$0xff] }
  0xdc   : > { %6101 = vmatmul.mubr.f32.gmra.mrb[20].mxu1 %v9044_v61  ;;  %6867 = vmatprep.subr.bf16.mxu0 %v6866_v46  ;;  %v7332_v26 = vld [vmem:[#allocation2 + $0x260] sm:$0xff]  ;;  %v4405_v61 = vld [vmem:[#allocation2 + $0x2b1] sm:$0xff] }
  0xdd   : > { %6103 = vmatprep.mubr.f32.mxu1 %v9045_v39  ;;  %v2572_v39 = vld [vmem:[#allocation2 + $0xa7] sm:$0xff] }
  0xde   : > { %6480 = vmatmul.mubr.f32.gmra.mrb[6].mxu0 %v4042_v33  ;;  %v4406_v33 = vld [vmem:[#allocation2 + $0x2b9] sm:$0xff] }
  0xdf   : > { %6482 = vmatprep.mubr.f32.mxu0 %v4043_v4  ;;  %6869 = vmatpush3.bf16.msra.mxu0 %v6866_v46  ;;  %v2571_v46 = vld [vmem:[#allocation2 + $0x9f] sm:$0xff]  ;;  %v2573_v4 = vld [vmem:[#allocation2 + $0xaf] sm:$0xff] }
  0xe0   : > { %6104 = vmatmul.mubr.f32.gmra.mrb[22].mxu1 %v9046_v38  ;;  %6871 = vmatprep.subr.bf16.mxu0 %v6870_v10  ;;  %v2574_v38 = vld [vmem:[#allocation2 + $0xb7] sm:$0xff] }
  0xe1   : > { %6106 = vmatprep.mubr.f32.mxu1 %v9047_v50  ;;  %v4409_v50 = vld [vmem:[#allocation2 + $0x2d1] sm:$0xff] }
  0xe2   : > { %6483 = vmatmul.mubr.f32.gmra.mrb[8].mxu0 %v4044_v0  ;;  %v2576_v0 = vld [vmem:[#allocation2 + $0xc7] sm:$0xff] }
  0xe3   : > { %6485 = vmatprep.mubr.f32.mxu0 %v4045_v37  ;;  %6873 = vmatpush3.bf16.msra.mxu0 %v6870_v10  ;;  %v4407_v10 = vld [vmem:[#allocation2 + $0x2c1] sm:$0xff]  ;;  %v4410_v37 = vld [vmem:[#allocation2 + $0x2d9] sm:$0xff] }
  0xe4   : > { %6107 = vmatmul.mubr.f32.gmra.mrb[24].mxu1 %v9048_v29  ;;  %6875 = vmatprep.subr.bf16.mxu0 %v6874_v30  ;;  %v4411_v29 = vld [vmem:[#allocation2 + $0x2e1] sm:$0xff] }
  0xe5   : > { %6109 = vmatprep.mubr.f32.mxu1 %v9049_v7  ;;  %v2579_v7 = vld [vmem:[#allocation2 + $0xdf] sm:$0xff] }
  0xe6   : > { %6486 = vmatmul.mubr.f32.gmra.mrb[10].mxu0 %v4046_v45  ;;  %v4413_v45 = vld [vmem:[#allocation2 + $0x2f1] sm:$0xff] }
  0xe7   : > { %6488 = vmatprep.mubr.f32.mxu0 %v4047_v54  ;;  %6877 = vmatpush3.bf16.msra.mxu0 %v6874_v30  ;;  %v2577_v30 = vld [vmem:[#allocation2 + $0xcf] sm:$0xff]  ;;  %v2580_v54 = vld [vmem:[#allocation2 + $0xe7] sm:$0xff] }
  0xe8   : > { %6110 = vmatmul.mubr.f32.gmra.mrb[26].mxu1 %v9050_v56  ;;  %6879 = vmatprep.subr.bf16.mxu0 %v6878_v17  ;;  %v2581_v56 = vld [vmem:[#allocation2 + $0xef] sm:$0xff] }
  0xe9   : > { %6112 = vmatprep.mubr.f32.mxu1 %v9051_v27  ;;  %v4416_v27 = vld [vmem:[#allocation2 + $0x309] sm:$0xff] }
  0xea   : > { %6489 = vmatmul.mubr.f32.gmra.mrb[12].mxu0 %v4048_v8  ;;  %v2583_v8 = vld [vmem:[#allocation2 + $0xff] sm:$0xff] }
  0xeb   : > { %6491 = vmatprep.mubr.f32.mxu0 %v8578_v14  ;;  %6881 = vmatpush3.bf16.msra.mxu0 %v6878_v17  ;;  %v4414_v17 = vld [vmem:[#allocation2 + $0x2f9] sm:$0xff] }
  0xec   : > { %6113 = vmatmul.mubr.f32.gmra.mrb[28].mxu1 %v9052_v1  ;;  %6883 = vmatprep.subr.bf16.mxu0 %v6882_v19  ;;  %v2584_v1 = vld [vmem:[#allocation2 + $0x107] sm:$0xff] }
  0xed   : > { %6115 = vmatprep.mubr.f32.mxu1 %v9053_v44  ;;  %v4418_v44 = vld [vmem:[#allocation2 + $0x319] sm:$0xff] }
  0xee   : > { %6492 = vmatmul.mubr.f32.gmra.mrb[14].mxu0 %v8583_v11 }
  0xef   : > { %6494 = vmatprep.mubr.f32.mxu0 %v8585_v28  ;;  %6885 = vmatpush3.bf16.msra.mxu0 %v6882_v19  ;;  %v4417_v19 = vld [vmem:[#allocation2 + $0x311] sm:$0xff] }
  0xf0   : > { %6116 = vmatmul.mubr.f32.gmra.mrb[30].mxu1 %v9054_v34  ;;  %v4420_v34 = vld [vmem:[#allocation2 + $0x329] sm:$0xff] }
  0xf1   : > { %6150 = vmatprep.mubr.f32.mxu1 %v2555_v25  ;;  %v4419_v25 = vld [vmem:[#allocation2 + $0x321] sm:$0xff] }
  0xf2   : > { %6495 = vmatmul.mubr.f32.gmra.mrb[16].mxu0 %v8590_v48 }
  0xf3   : > { %6497 = vmatprep.mubr.f32.mxu0 %v8592_v31 }
  0xf4   : > { %6151 = vmatmul.mubr.f32.vlgmr.msra.gmra.mrb[0].mxu1 %v2556_v63  ;;  %v4421_v63 = vld [vmem:[#allocation2 + $0x331] sm:$0xff] }
  0xf5   : > { %6894 = vmatpush3.bf16.msra.mxu1 %v7429_v9  ;;  %6153 = vmatprep.mubr.f32.mxu1 %v8345_v12  ;;  %v8610_v9 = vld [vmem:[#allocation2 + $0x220] sm:$0xff]  ;;  %v9056_v12 = vld [vmem:[#allocation5_spill] sm:$0xff] }
  0xf6   : > { %6887 = vmatprep.subr.bf16.mxu1 %v9055_v32  ;;  %6498 = vmatmul.mubr.f32.gmra.mrb[18].mxu0 %v8598_v57 }
  0xf7   : > { %6500 = vmatprep.mubr.f32.mxu0 %v8600_v36 }
  0xf8   : > { %6154 = vmatmul.mubr.f32.gmra.mrb[2].mxu1 %v8356_v41  ;;  %v8617_v41 = vld [vmem:[#allocation2 + $0x228] sm:$0xff] }
  0xf9   : > { %6156 = vmatprep.mubr.f32.mxu1 %v8358_v13  ;;  %6895 = vmatpush3.bf16.msra.mxu1 %v9055_v32  ;;  %v8620_v13 = vld [vmem:[#allocation2 + $0x230] sm:$0xff]  ;;  %v4422_v32 = vld [vmem:[#allocation2 + $0x339] sm:$0xff] }
  0xfa   : > { %6888 = vmatprep.subr.bf16.mxu1 %v9056_v12  ;;  %6501 = vmatmul.mubr.f32.gmra.mrb[20].mxu0 %v8607_v18 }
  0xfb   : > { %6503 = vmatprep.mubr.f32.mxu0 %v8610_v9 }
  0xfc   : > { %6157 = vmatmul.mubr.f32.gmra.mrb[4].mxu1 %v8371_v40  ;;  %v8627_v40 = vld [vmem:[#allocation2 + $0x238] sm:$0xff] }
  0xfd   : > { %6159 = vmatprep.mubr.f32.mxu1 %v8373_v42  ;;  %6896 = vmatpush3.bf16.msra.mxu1 %v9056_v12  ;;  %v2565_v42 = vld [vmem:[#allocation2 + $0x6f] sm:$0xff]  ;;  %v4423_v12 = vld [vmem:[#allocation2 + $0x341] sm:$0xff] }
  0xfe   : > { %6889 = vmatprep.subr.bf16.mxu1 %v9057_v52  ;;  %6504 = vmatmul.mubr.f32.gmra.mrb[22].mxu0 %v8617_v41 }
  0xff   : > { %6506 = vmatprep.mubr.f32.mxu0 %v8620_v13 }
 0x100   : > { %6160 = vmatmul.mubr.f32.gmra.mrb[6].mxu1 %v8385_v35  ;;  %v2566_v35 = vld [vmem:[#allocation2 + $0x77] sm:$0xff] }
 0x101   : > { %6162 = vmatprep.mubr.f32.mxu1 %v8387_v22  ;;  %6897 = vmatpush3.bf16.msra.mxu1 %v9057_v52  ;;  %v8636_v22 = vld [vmem:[#allocation2 + $0x248] sm:$0xff] }
 0x102   : > { %6890 = vmatprep.subr.bf16.mxu1 %v9058_v59  ;;  %6507 = vmatmul.mubr.f32.gmra.mrb[24].mxu0 %v8627_v40  ;;  %v4424_v52 = vld [vmem:[#allocation2 + $0x349] sm:$0xff] }
 0x103   : > { %6509 = vmatprep.mubr.f32.mxu0 %v8630_v15 }
 0x104   : > { %6163 = vmatmul.mubr.f32.gmra.mrb[8].mxu1 %v8399_v47  ;;  %v2569_v47 = vld [vmem:[#allocation2 + $0x8f] sm:$0xff] }
 0x105   : > { %6165 = vmatprep.mubr.f32.mxu1 %v2565_v42  ;;  %6898 = vmatpush3.bf16.msra.mxu1 %v9058_v59  ;;  %v4425_v42 = vld [vmem:[#allocation2 + $0x351] sm:$0xff]  ;;  %v4436_v59 = vld [vmem:[#allocation2 + $0x3a9] sm:$0xff] }
 0x106   : > { %6891 = vmatprep.subr.bf16.mxu1 %v9059_v58  ;;  %6510 = vmatmul.mubr.f32.gmra.mrb[26].mxu0 %v8636_v22 }
 0x107   : > { %6512 = vmatprep.mubr.f32.mxu0 %v7330_v5 }
 0x108   : > { %6166 = vmatmul.mubr.f32.gmra.mrb[10].mxu1 %v2566_v35 }
 0x109   : > { %6168 = vmatprep.mubr.f32.mxu1 %v2567_v60  ;;  %6899 = vmatpush3.bf16.msra.mxu1 %v9059_v58 }
 0x10a   : > { %6892 = vmatprep.subr.bf16.mxu1 %v9060_v23  ;;  %6513 = vmatmul.mubr.f32.gmra.mrb[28].mxu0 %v7331_v53 }
 0x10b   : > { %6515 = vmatprep.mubr.f32.mxu0 %v7332_v26 }
 0x10c   : > { %6169 = vmatmul.mubr.f32.gmra.mrb[12].mxu1 %v2568_v16 }
 0x10d   : > { %6171 = vmatprep.mubr.f32.mxu1 %v2569_v47  ;;  %6900 = vmatpush3.bf16.msra.mxu1 %v9060_v23 }
 0x10e   : > { %6893 = vmatprep.subr.bf16.mxu1 %v9061_v51  ;;  %6516 = vmatmul.mubr.f32.gmra.mrb[30].mxu0 %v9062_v62  ;;  %v8678_v62 = vld [vmem:[%s8935_s4] ss:$0 sm:$0xff] }
 0x10f   : > { %6550 = vmatprep.mubr.f32.mxu0 %v4405_v61 }
 0x110   : > { %6172 = vmatmul.mubr.f32.gmra.mrb[14].mxu1 %v2570_v24 }
 0x111   : > { %6174 = vmatprep.mubr.f32.mxu1 %v2571_v46  ;;  %6901 = vmatpush3.bf16.msra.mxu1 %v9061_v51 }
 0x112   : > { %6551 = vmatmul.mubr.f32.vlgmr.msra.gmra.mrb[0].mxu0 %v4406_v33 }
 0x113   : > { %6553 = vmatprep.mubr.f32.mxu0 %v4407_v10 }
 0x114   : > { %6175 = vmatmul.mubr.f32.gmra.mrb[16].mxu1 %v2572_v39 }
 0x115   : > { %6177 = vmatprep.mubr.f32.mxu1 %v2573_v4 }
 0x116   : > { %6554 = vmatmul.mubr.f32.gmra.mrb[2].mxu0 %v4408_v55 }
 0x117   : > { %6556 = vmatprep.mubr.f32.mxu0 %v4409_v50 }
 0x118   : > { %6178 = vmatmul.mubr.f32.gmra.mrb[18].mxu1 %v2574_v38 }
 0x119   : > { %6180 = vmatprep.mubr.f32.mxu1 %v2575_v43 }
 0x11a   : > { %6557 = vmatmul.mubr.f32.gmra.mrb[4].mxu0 %v4410_v37 }
 0x11b   : > { %6559 = vmatprep.mubr.f32.mxu0 %v4411_v29 }
 0x11c   : > { %6181 = vmatmul.mubr.f32.gmra.mrb[20].mxu1 %v2576_v0 }
 0x11d   : > { %6183 = vmatprep.mubr.f32.mxu1 %v2577_v30 }
 0x11e   : > { %6560 = vmatmul.mubr.f32.gmra.mrb[6].mxu0 %v4412_v49 }
 0x11f   : > { %6562 = vmatprep.mubr.f32.mxu0 %v4413_v45 }
 0x120   : > { %6184 = vmatmul.mubr.f32.gmra.mrb[22].mxu1 %v2578_v2 }
 0x121   : > { %6186 = vmatprep.mubr.f32.mxu1 %v2579_v7 }
 0x122   : > { %6563 = vmatmul.mubr.f32.gmra.mrb[8].mxu0 %v4414_v17 }
 0x123   : > { %6565 = vmatprep.mubr.f32.mxu0 %v4415_v21 }
 0x124   : > { %6187 = vmatmul.mubr.f32.gmra.mrb[24].mxu1 %v2580_v54 }
 0x125   : > { %6189 = vmatprep.mubr.f32.mxu1 %v2581_v56 }
 0x126   : > { %6566 = vmatmul.mubr.f32.gmra.mrb[10].mxu0 %v4416_v27 }
 0x127   : > { %6568 = vmatprep.mubr.f32.mxu0 %v4417_v19 }
 0x128   : > { %6190 = vmatmul.mubr.f32.gmra.mrb[26].mxu1 %v2582_v6 }
 0x129   : > { %6192 = vmatprep.mubr.f32.mxu1 %v2583_v8 }
 0x12a   : > { %6569 = vmatmul.mubr.f32.gmra.mrb[12].mxu0 %v4418_v44 }
 0x12b   : > { %6571 = vmatprep.mubr.f32.mxu0 %v4419_v25 }
 0x12c   : > { %6193 = vmatmul.mubr.f32.gmra.mrb[28].mxu1 %v2584_v1 }
 0x12d   : > { %6195 = vmatprep.mubr.f32.mxu1 %v8503_v3  ;;  %v4426_v3 = vld [vmem:[#allocation2 + $0x359] sm:$0xff] }
 0x12e   : > { %6572 = vmatmul.mubr.f32.gmra.mrb[14].mxu0 %v4420_v34 }
 0x12f   : > { %6574 = vmatprep.mubr.f32.mxu0 %v4421_v63 }
 0x130   : > { %6196 = vmatmul.mubr.f32.gmra.mrb[30].mxu1 %v8515_v20  ;;  %v4427_v20 = vld [vmem:[#allocation2 + $0x361] sm:$0xff] }
 0x131   : > { %6254 = vmatprep.mubr.f32.mxu1 %v8578_v14  ;;  %v4428_v14 = vld [vmem:[#allocation2 + $0x369] sm:$0xff] }
 0x132   : > { %6575 = vmatmul.mubr.f32.gmra.mrb[16].mxu0 %v4422_v32 }
 0x133   : > { %6577 = vmatprep.mubr.f32.mxu0 %v4423_v12 }
 0x134   : > { %6255 = vmatmul.mubr.f32.vlgmr.msra.gmra.mrb[16].mxu1 %v8583_v11  ;;  %v4429_v11 = vld [vmem:[#allocation2 + $0x371] sm:$0xff] }
 0x135   : > { %6257 = vmatprep.mubr.f32.mxu1 %v8585_v28  ;;  %v4430_v28 = vld [vmem:[#allocation2 + $0x379] sm:$0xff] }
 0x136   : > { %6578 = vmatmul.mubr.f32.gmra.mrb[18].mxu0 %v4424_v52 }
 0x137   : > { %6580 = vmatprep.mubr.f32.mxu0 %v4425_v42 }
 0x138   : > { %6258 = vmatmul.mubr.f32.gmra.mrb[18].mxu1 %v8590_v48  ;;  %v4431_v48 = vld [vmem:[#allocation2 + $0x381] sm:$0xff] }
 0x139   : > { %6260 = vmatprep.mubr.f32.mxu1 %v8592_v31  ;;  %v4432_v31 = vld [vmem:[#allocation2 + $0x389] sm:$0xff] }
 0x13a   : > { %6581 = vmatmul.mubr.f32.gmra.mrb[20].mxu0 %v4426_v3 }
 0x13b   : > { %6583 = vmatprep.mubr.f32.mxu0 %v4427_v20 }
 0x13c   : > { %6261 = vmatmul.mubr.f32.gmra.mrb[20].mxu1 %v8598_v57  ;;  %v4433_v57 = vld [vmem:[#allocation2 + $0x391] sm:$0xff] }
 0x13d   : > { %6263 = vmatprep.mubr.f32.mxu1 %v8600_v36  ;;  %v4434_v36 = vld [vmem:[#allocation2 + $0x399] sm:$0xff] }
 0x13e   : > { %6584 = vmatmul.mubr.f32.gmra.mrb[22].mxu0 %v4428_v14 }
 0x13f   : > { %6586 = vmatprep.mubr.f32.mxu0 %v4429_v11 }
 0x140   : > { %6264 = vmatmul.mubr.f32.gmra.mrb[22].mxu1 %v8607_v18  ;;  %v2955_v18 = vld [vmem:[#allocation2 + $0x250] sm:$0xff] }
 0x141   : > { %6266 = vmatprep.mubr.f32.mxu1 %v8610_v9  ;;  %v4435_v9 = vld [vmem:[#allocation2 + $0x3a1] sm:$0xff] }
 0x142   : > { %6587 = vmatmul.mubr.f32.gmra.mrb[24].mxu0 %v4430_v28 }
 0x143   : > { %6589 = vmatprep.mubr.f32.mxu0 %v4431_v48 }
 0x144   : > { %6267 = vmatmul.mubr.f32.gmra.mrb[24].mxu1 %v8617_v41  ;;  %v2956_v41 = vld [vmem:[#allocation2 + $0x258] sm:$0xff] }
 0x145   : > { %6269 = vmatprep.mubr.f32.mxu1 %v8620_v13 }
 0x146   : > { %6590 = vmatmul.mubr.f32.gmra.mrb[26].mxu0 %v4432_v31 }
 0x147   : > { %6592 = vmatprep.mubr.f32.mxu0 %v4433_v57 }
 0x148   : > { %6270 = vmatmul.mubr.f32.gmra.mrb[26].mxu1 %v8627_v40 }
 0x149   : > { %6272 = vmatprep.mubr.f32.mxu1 %v8630_v15 }
 0x14a   : > { %6593 = vmatmul.mubr.f32.gmra.mrb[28].mxu0 %v4434_v36 }
 0x14b   : > { %6595 = vmatprep.mubr.f32.mxu0 %v4435_v9 }
 0x14c   : > { %6273 = vmatmul.mubr.f32.gmra.mrb[28].mxu1 %v8636_v22 }
 0x14d   : > { %6275 = vmatprep.mubr.f32.mxu1 %v2955_v18 }
 0x14e   : > { %6596 = vmatmul.mubr.f32.gmra.mrb[30].mxu0 %v4436_v59 }
 0x150   : > { %6276 = vmatmul.mubr.f32.gmra.mrb[30].mxu1 %v2956_v41 }
 0x1c7   : > { %v6152_v13 = vpop.f32.mrb[0].mxu1 }
 0x1c8   : > { %v2670_v35 = vpop.f32.mrb[1].mxu1 }
 0x1cb   : > { %v6155_v60 = vpop.f32.mrb[2].mxu1 }
 0x1cc   : > { %v2680_v40 = vpop.f32.mrb[3].mxu1 }
 0x1cf   : > { %v6158_v58 = vpop.f32.mrb[4].mxu1 }
 0x1d0   : > { %v2690_v16 = vpop.f32.mrb[5].mxu1 }
 0x1d3   : > { %v6161_v15 = vpop.f32.mrb[6].mxu1 }
 0x1d4   : > { %v2700_v5 = vpop.f32.mrb[7].mxu1 }
 0x1d7   : > { %v6164_v47 = vpop.f32.mrb[8].mxu1 }
 0x1d8   : > { %v2710_v23 = vpop.f32.mrb[9].mxu1 }
 0x1db   : > { %v8663_v53 = vpop.f32.mrb[10].mxu1 }
 0x1dc   : > { %v8665_v22 = vpop.f32.mrb[11].mxu1 }
 0x1df   : > { %v8667_v24 = vpop.f32.mrb[12].mxu1 }
 0x1e0   : > { %v8669_v26 = vpop.f32.mrb[13].mxu1 }
 0x1e3   : > { %v8671_v46 = vpop.f32.mrb[14].mxu1 }
 0x1e4   : > { %v8673_v61 = vpop.f32.mrb[15].mxu1 }
 0x1e5   : > { %v6552_v51 = vpop.f32.mrb[0].mxu0 }
 0x1e6   : > { %v6902_v39 = vadd.f32 %v6552_v51, %v6152_v13  ;;  %v4520_v33 = vpop.f32.mrb[1].mxu0 }
 0x1e7   : > { %v6903_v4 = vadd.f32 %v4520_v33, %v2670_v35 }
 0x1e8   : > { %v8681_v10 = vadd.f32 %v6902_v39, %v8678_v62 }
 0x1e9   : > { %v8684_v38 = vadd.f32 %v6903_v4, %v8678_v62  ;;  %v6555_v55 = vpop.f32.mrb[2].mxu0 }
 0x1ea   : > { %v4847_v43 = vsub.f32 0.0, %v8681_v10  ;;  %v6904_v50 = vadd.f32 %v6555_v55, %v6155_v60  ;;  %v4530_v0 = vpop.f32.mrb[3].mxu0 }
 0x1eb   : > { %v4846_v37 = vsub.f32 0.0, %v8684_v38  ;;  %v6905_v30 = vadd.f32 %v4530_v0, %v2680_v40 }
 0x1ec   : > { %v4880_v29 = vmul.f32 1.442695, %v4847_v43  ;;  %v8689_v2 = vadd.f32 %v6904_v50, %v8678_v62 }
 0x1ed   : > { %v4878_v49 = vmul.f32 1.442695, %v4846_v37  ;;  %v8692_v7 = vadd.f32 %v6905_v30, %v8678_v62  ;;  %v6558_v45 = vpop.f32.mrb[4].mxu0 }
 0x1ee   : > { %7183 = vpow2.f32 %v4880_v29  ;;  %v4849_v54 = vsub.f32 0.0, %v8689_v2  ;;  %v6906_v17 = vadd.f32 %v6558_v45, %v6158_v58  ;;  %v4540_v56 = vpop.f32.mrb[5].mxu0 }
 0x1ef   : > { %7185 = vpow2.f32 %v4878_v49  ;;  %v4848_v21 = vsub.f32 0.0, %v8692_v7  ;;  %v6907_v6 = vadd.f32 %v4540_v56, %v2690_v16 }
 0x1f0   : > { %v4884_v27 = vmul.f32 1.442695, %v4849_v54  ;;  %v8697_v8 = vadd.f32 %v6906_v17, %v8678_v62 }
 0x1f1   : > { %v4882_v19 = vmul.f32 1.442695, %v4848_v21  ;;  %v8700_v1 = vadd.f32 %v6907_v6, %v8678_v62  ;;  %v6561_v44 = vpop.f32.mrb[6].mxu0 }
 0x1f2   : > { %7187 = vpow2.f32 %v4884_v27  ;;  %v4851_v25 = vsub.f32 0.0, %v8697_v8  ;;  %v6908_v34 = vadd.f32 %v6561_v44, %v6161_v15  ;;  %v4550_v63 = vpop.f32.mrb[7].mxu0 }
 0x1f3   : > { %7189 = vpow2.f32 %v4882_v19  ;;  %v4850_v32 = vsub.f32 0.0, %v8700_v1  ;;  %v6909_v12 = vadd.f32 %v4550_v63, %v2700_v5 }
 0x1f4   : > { %v4888_v52 = vmul.f32 1.442695, %v4851_v25  ;;  %v8705_v42 = vadd.f32 %v6908_v34, %v8678_v62 }
 0x1f5   : > { %v4886_v3 = vmul.f32 1.442695, %v4850_v32  ;;  %v8708_v20 = vadd.f32 %v6909_v12, %v8678_v62  ;;  %v6564_v14 = vpop.f32.mrb[8].mxu0 }
 0x1f6   : > { %7191 = vpow2.f32 %v4888_v52  ;;  %v4853_v11 = vsub.f32 0.0, %v8705_v42  ;;  %v6910_v28 = vadd.f32 %v6564_v14, %v6164_v47  ;;  %v4560_v48 = vpop.f32.mrb[9].mxu0  ;;  %v5039_v14 = vld [vmem:[%s8742_s8 + $0x8] sm:$0xff] }
 0x1f7   : > { %7193 = vpow2.f32 %v4886_v3  ;;  %v4852_v31 = vsub.f32 0.0, %v8708_v20  ;;  %v6911_v57 = vadd.f32 %v4560_v48, %v2710_v23 }
 0x1f8   : > { %v7184_v36 = vpop.eup %7183  ;;  %v4892_v18 = vmul.f32 1.442695, %v4853_v11  ;;  %v8713_v9 = vadd.f32 %v6910_v28, %v8678_v62 }
 0x1f9   : > { %v7186_v41 = vpop.eup %7185  ;;  %v4943_v59 = vadd.f32 1.0, %v7184_v36  ;;  %v4890_v13 = vmul.f32 1.442695, %v4852_v31  ;;  %v8716_v35 = vadd.f32 %v6911_v57, %v8678_v62  ;;  %v6567_v60 = vpop.f32.mrb[10].mxu0  ;;  %v5038_v36 = vld [vmem:[%s8742_s8] sm:$0xff] }
 0x1fa   : > { %v4942_v40 = vadd.f32 1.0, %v7186_v41  ;;  %7195 = vpow2.f32 %v4892_v18  ;;  %v4855_v58 = vsub.f32 0.0, %v8713_v9  ;;  %v6912_v16 = vadd.f32 %v6567_v60, %v8663_v53  ;;  %v4570_v15 = vpop.f32.mrb[11].mxu0 }
 0x1fb   : > { %7197 = vrcp.f32 %v4943_v59  ;;  %v4854_v5 = vsub.f32 0.0, %v8716_v35  ;;  %v6913_v47 = vadd.f32 %v4570_v15, %v8665_v22 }
 0x1fc   : > { %v7188_v23 = vpop.eup %7187  ;;  %7199 = vrcp.f32 %v4942_v40  ;;  %v4896_v51 = vmul.f32 1.442695, %v4855_v58  ;;  %v8723_v39 = vadd.f32 %v6912_v16, %v8678_v62 }
 0x1fd   : > { %v7190_v33 = vpop.eup %7189  ;;  %v4945_v4 = vadd.f32 1.0, %v7188_v23  ;;  %7201 = vpow2.f32 %v4890_v13  ;;  %v4894_v55 = vmul.f32 1.442695, %v4854_v5  ;;  %v8726_v43 = vadd.f32 %v6913_v47, %v8678_v62  ;;  %v6570_v53 = vpop.f32.mrb[12].mxu0 }
 0x1fe   : > { %v4944_v50 = vadd.f32 1.0, %v7190_v33  ;;  %7203 = vpow2.f32 %v4896_v51  ;;  %v4857_v0 = vsub.f32 0.0, %v8723_v39  ;;  %v6914_v22 = vadd.f32 %v6570_v53, %v8667_v24  ;;  %v4580_v37 = vpop.f32.mrb[13].mxu0  ;;  %v5041_v33 = vld [vmem:[%s8742_s8 + $0x18] sm:$0xff] }
 0x1ff   : > { %7205 = vrcp.f32 %v4945_v4  ;;  %v4856_v30 = vsub.f32 0.0, %v8726_v43  ;;  %v6915_v29 = vadd.f32 %v4580_v37, %v8669_v26  ;;  %v5040_v37 = vld [vmem:[%s8742_s8 + $0x10] sm:$0xff] }
 0x200   : > { %v7192_v49 = vpop.eup %7191  ;;  %7207 = vrcp.f32 %v4944_v50  ;;  %v4900_v45 = vmul.f32 1.442695, %v4857_v0  ;;  %v8733_v54 = vadd.f32 %v6914_v22, %v8678_v62 }
 0x201   : > { %v7194_v17 = vpop.eup %7193  ;;  %v4947_v56 = vadd.f32 1.0, %v7192_v49  ;;  %7209 = vpow2.f32 %v4894_v55  ;;  %v4898_v21 = vmul.f32 1.442695, %v4856_v30  ;;  %v8736_v6 = vadd.f32 %v6915_v29, %v8678_v62  ;;  %v6573_v24 = vpop.f32.mrb[14].mxu0 }
 0x202   : > { %v4946_v26 = vadd.f32 1.0, %v7194_v17  ;;  %7211 = vpow2.f32 %v4900_v45  ;;  %v4859_v27 = vsub.f32 0.0, %v8733_v54  ;;  %v6916_v19 = vadd.f32 %v6573_v24, %v8671_v46  ;;  %v4590_v44 = vpop.f32.mrb[15].mxu0 }
 0x203   : > { %7213 = vrcp.f32 %v4947_v56  ;;  %v4858_v25 = vsub.f32 0.0, %v8736_v6  ;;  %v6917_v34 = vadd.f32 %v4590_v44, %v8673_v61 }
 0x204   : > { %v7196_v63 = vpop.eup %7195  ;;  %7215 = vrcp.f32 %v4946_v26  ;;  %v4904_v32 = vmul.f32 1.442695, %v4859_v27  ;;  %v8749_v12 = vadd.f32 %v6916_v19, %v8678_v62 }
 0x205   : > { %v7198_v3 = vpop.eup %7197  ;;  %v4949_v11 = vadd.f32 1.0, %v7196_v63  ;;  %7217 = vpow2.f32 %v4898_v21  ;;  %v4902_v46 = vmul.f32 1.442695, %v4858_v25  ;;  %v8753_v28 = vadd.f32 %v6917_v34, %v8678_v62  ;;  %v6576_v48 = vpop.f32.mrb[16].mxu0  ;;  %v5043_v34 = vld [vmem:[%s8742_s8 + $0x28] sm:$0xff] }
 0x206   : > { %v7200_v61 = vpop.eup %7199  ;;  %v4977_v57 = vmul.f32 %v7198_v3, %v8681_v10  ;;  %7219 = vpow2.f32 %v4904_v32  ;;  %v4861_v18 = vsub.f32 0.0, %v8749_v12  ;;  %v4600_v59 = vpop.f32.mrb[17].mxu0 }
 0x207   : > { %v6256_v52 = vpop.f32.mrb[16].mxu1  ;;  %v7202_v13 = vpop.eup %7201  ;;  %v4975_v60 = vmul.f32 %v7200_v61, %v8684_v38  ;;  %7221 = vrcp.f32 %v4949_v11  ;;  %v4860_v40 = vsub.f32 0.0, %v8753_v28  ;;  %v5042_v11 = vld [vmem:[%s8742_s8 + $0x20] sm:$0xff] }
 0x208   : > { %v3120_v31 = vpop.f32.mrb[17].mxu1  ;;  %v6918_v41 = vadd.f32 %v6576_v48, %v6256_v52  ;;  %v7204_v10 = vpop.eup %7203  ;;  %v5071_v16 = vadd.f32 %v5039_v14, %v4977_v57  ;;  %v4948_v15 = vadd.f32 1.0, %v7202_v13  ;;  %7223 = vpow2.f32 %v4902_v46 }
 0x209   : > { %v6919_v58 = vadd.f32 %v4600_v59, %v3120_v31  ;;  %v4908_v5 = vmul.f32 1.442695, %v4861_v18  ;;  %v7206_v23 = vpop.eup %7205  ;;  %v5070_v51 = vadd.f32 %v5038_v36, %v4975_v60  ;;  %v4951_v4 = vadd.f32 1.0, %v7204_v10  ;;  %v6579_v53 = vpop.f32.mrb[18].mxu0  ;;  %v5045_v10 = vld [vmem:[%s8742_s8 + $0x38] sm:$0xff] }
 0x20a   : > { %v4906_v55 = vmul.f32 1.442695, %v4860_v40  ;;  %v8768_v38 = vadd.f32 %v6918_v41, %v8678_v62  ;;  %v7208_v0 = vpop.eup %7207  ;;  %5103 = vst [vmem:[%s8762_s11 + $0x8] sm:$0xff] %v5071_v16  ;;  %v4981_v22 = vmul.f32 %v7206_v23, %v8689_v2  ;;  %7225 = vrcp.f32 %v4948_v15  ;;  %v4610_v49 = vpop.f32.mrb[19].mxu0 }
 0x20b   : > { %v6259_v47 = vpop.f32.mrb[18].mxu1  ;;  %v8774_v30 = vadd.f32 %v6919_v58, %v8678_v62  ;;  %v7210_v45 = vpop.eup %7209  ;;  %5102 = vst [vmem:[%s8762_s11] sm:$0xff] %v5070_v51  ;;  %v4979_v17 = vmul.f32 %v7208_v0, %v8692_v7  ;;  %7227 = vrcp.f32 %v4951_v4 }
 0x20c   : > { %v3130_v50 = vpop.f32.mrb[19].mxu1  ;;  %v6920_v29 = vadd.f32 %v6579_v53, %v6259_v47  ;;  %v4863_v56 = vsub.f32 0.0, %v8768_v38  ;;  %v7212_v24 = vpop.eup %7211  ;;  %v5073_v26 = vadd.f32 %v5041_v33, %v4981_v22  ;;  %v4950_v2 = vadd.f32 1.0, %v7210_v45 }
 0x20d   : > { %v6921_v21 = vadd.f32 %v4610_v49, %v3130_v50  ;;  %7229 = vpow2.f32 %v4908_v5  ;;  %v4862_v27 = vsub.f32 0.0, %v8774_v30  ;;  %v7214_v44 = vpop.eup %7213  ;;  %v5072_v25 = vadd.f32 %v5040_v37, %v4979_v17  ;;  %v6582_v32 = vpop.f32.mrb[20].mxu0  ;;  %v5044_v37 = vld [vmem:[%s8742_s8 + $0x30] sm:$0xff] }
 0x20e   : > { %v4953_v63 = vadd.f32 1.0, %v7212_v24  ;;  %7231 = vpow2.f32 %v4906_v55  ;;  %v4912_v7 = vmul.f32 1.442695, %v4863_v56  ;;  %v7216_v3 = vpop.eup %7215  ;;  %5105 = vst [vmem:[%s8762_s11 + $0x18] sm:$0xff] %v5073_v26  ;;  %v4985_v14 = vmul.f32 %v7214_v44, %v8697_v8  ;;  %v4620_v31 = vpop.f32.mrb[21].mxu0  ;;  %v5047_v56 = vld [vmem:[%s8742_s8 + $0x48] sm:$0xff] }
 0x20f   : > { %v6262_v19 = vpop.f32.mrb[20].mxu1  ;;  %7233 = vrcp.f32 %v4950_v2  ;;  %v4910_v46 = vmul.f32 1.442695, %v4862_v27  ;;  %v8785_v48 = vadd.f32 %v6920_v29, %v8678_v62  ;;  %v7218_v61 = vpop.eup %7217  ;;  %5104 = vst [vmem:[%s8762_s11 + $0x10] sm:$0xff] %v5072_v25  ;;  %v4983_v57 = vmul.f32 %v7216_v3, %v8700_v1 }
 0x210   : > { %v3140_v52 = vpop.f32.mrb[21].mxu1  ;;  %7235 = vrcp.f32 %v4953_v63  ;;  %v8790_v36 = vadd.f32 %v6921_v21, %v8678_v62  ;;  %v6922_v18 = vadd.f32 %v6582_v32, %v6262_v19  ;;  %v7220_v41 = vpop.eup %7219  ;;  %v5075_v8 = vadd.f32 %v5043_v34, %v4985_v14 }
 0x211   : > { %v4952_v59 = vadd.f32 1.0, %v7218_v61  ;;  %7237 = vpow2.f32 %v4912_v7  ;;  %v4865_v13 = vsub.f32 0.0, %v8785_v48  ;;  %v7222_v40 = vpop.eup %7221  ;;  %v5074_v58 = vadd.f32 %v5042_v11, %v4983_v57  ;;  %v6585_v15 = vpop.f32.mrb[22].mxu0 }
 0x212   : > { %v4955_v16 = vadd.f32 1.0, %v7220_v41  ;;  %7239 = vpow2.f32 %v4910_v46  ;;  %v4864_v1 = vsub.f32 0.0, %v8790_v36  ;;  %v7224_v47 = vpop.eup %7223  ;;  %5107 = vst [vmem:[%s8762_s11 + $0x28] sm:$0xff] %v5075_v8  ;;  %v4989_v23 = vmul.f32 %v7222_v40, %v8705_v42  ;;  %v4630_v4 = vpop.f32.mrb[23].mxu0 }
 0x213   : > { %v6265_v60 = vpop.f32.mrb[22].mxu1  ;;  %7241 = vrcp.f32 %v4952_v59  ;;  %v4916_v51 = vmul.f32 1.442695, %v4865_v13  ;;  %v8798_v33 = vadd.f32 %v6922_v18, %v8678_v62  ;;  %5106 = vst [vmem:[%s8762_s11 + $0x20] sm:$0xff] %v5074_v58  ;;  %v4954_v55 = vadd.f32 1.0, %v7224_v47  ;;  %v5049_v18 = vld [vmem:[%s8742_s8 + $0x58] sm:$0xff] }
 0x214   : > { %v3150_v5 = vpop.f32.mrb[23].mxu1  ;;  %7243 = vrcp.f32 %v4955_v16  ;;  %v4914_v53 = vmul.f32 1.442695, %v4864_v1  ;;  %v6923_v50 = vadd.f32 %v4620_v31, %v3140_v52  ;;  %v7226_v0 = vpop.eup %7225  ;;  %v5077_v22 = vadd.f32 %v5045_v10, %v4989_v23 }
 0x215   : > { %7245 = vpow2.f32 %v4916_v51  ;;  %v4867_v29 = vsub.f32 0.0, %v8798_v33  ;;  %v6924_v42 = vadd.f32 %v6585_v15, %v6265_v60  ;;  %v7228_v45 = vpop.eup %7227  ;;  %v4987_v17 = vmul.f32 %v7226_v0, %v8708_v20  ;;  %v6588_v26 = vpop.f32.mrb[24].mxu0  ;;  %v5048_v51 = vld [vmem:[%s8742_s8 + $0x50] sm:$0xff]  ;;  %v5051_v0 = vld [vmem:[%s8742_s8 + $0x68] sm:$0xff] }
 0x216   : > { %7247 = vrcp.f32 %v4954_v55  ;;  %v8806_v21 = vadd.f32 %v6923_v50, %v8678_v62  ;;  %v6925_v24 = vadd.f32 %v4630_v4, %v3150_v5  ;;  %5109 = vst [vmem:[%s8762_s11 + $0x38] sm:$0xff] %v5077_v22  ;;  %v4993_v19 = vmul.f32 %v7228_v45, %v8713_v9  ;;  %v4640_v20 = vpop.f32.mrb[25].mxu0  ;;  %v5046_v9 = vld [vmem:[%s8742_s8 + $0x40] sm:$0xff] }
 0x217   : > { %v6268_v49 = vpop.f32.mrb[24].mxu1  ;;  %v7230_v27 = vpop.eup %7229  ;;  %7249 = vpow2.f32 %v4914_v53  ;;  %v4920_v44 = vmul.f32 1.442695, %v4867_v29  ;;  %v8811_v25 = vadd.f32 %v6924_v42, %v8678_v62  ;;  %v5076_v63 = vadd.f32 %v5044_v37, %v4987_v17 }
 0x218   : > { %v3160_v2 = vpop.f32.mrb[25].mxu1  ;;  %v7232_v34 = vpop.eup %7231  ;;  %v4957_v7 = vadd.f32 1.0, %v7230_v27  ;;  %v4866_v32 = vsub.f32 0.0, %v8806_v21  ;;  %v8815_v52 = vadd.f32 %v6925_v24, %v8678_v62  ;;  %v5079_v14 = vadd.f32 %v5047_v56, %v4993_v19 }
 0x219   : > { %v7234_v3 = vpop.eup %7233  ;;  %v4956_v11 = vadd.f32 1.0, %v7232_v34  ;;  %7251 = vpow2.f32 %v4920_v44  ;;  %v4869_v46 = vsub.f32 0.0, %v8811_v25  ;;  %5108 = vst [vmem:[%s8762_s11 + $0x30] sm:$0xff] %v5076_v63  ;;  %v6591_v59 = vpop.f32.mrb[26].mxu0  ;;  %v6926_v10 = vadd.f32 %v6588_v26, %v6268_v49 }
 0x21a   : > { %v7236_v61 = vpop.eup %7235  ;;  %v4991_v57 = vmul.f32 %v7234_v3, %v8716_v35  ;;  %7253 = vrcp.f32 %v4957_v7  ;;  %v4918_v41 = vmul.f32 1.442695, %v4866_v32  ;;  %v4868_v8 = vsub.f32 0.0, %v8815_v52  ;;  %5111 = vst [vmem:[%s8762_s11 + $0x48] sm:$0xff] %v5079_v14  ;;  %v4650_v16 = vpop.f32.mrb[27].mxu0 }
 0x21b   : > { %v6271_v31 = vpop.f32.mrb[26].mxu1  ;;  %v7238_v60 = vpop.eup %7237  ;;  %v4997_v40 = vmul.f32 %v7236_v61, %v8723_v39  ;;  %7255 = vrcp.f32 %v4956_v11  ;;  %v4924_v58 = vmul.f32 1.442695, %v4869_v46  ;;  %v8827_v55 = vadd.f32 %v6926_v10, %v8678_v62 }
 0x21c   : > { %v3170_v13 = vpop.f32.mrb[27].mxu1  ;;  %v7240_v1 = vpop.eup %7239  ;;  %v5078_v35 = vadd.f32 %v5046_v9, %v4991_v57  ;;  %v4959_v15 = vadd.f32 1.0, %v7238_v60  ;;  %7257 = vpow2.f32 %v4918_v41  ;;  %v4922_v5 = vmul.f32 1.442695, %v4868_v8  ;;  %v5053_v41 = vld [vmem:[%s8742_s8 + $0x78] sm:$0xff] }
 0x21d   : > { %v7242_v47 = vpop.eup %7241  ;;  %v5081_v23 = vadd.f32 %v5049_v18, %v4997_v40  ;;  %v4958_v4 = vadd.f32 1.0, %v7240_v1  ;;  %7259 = vpow2.f32 %v4924_v58  ;;  %v6927_v22 = vadd.f32 %v4640_v20, %v3160_v2  ;;  %v6594_v29 = vpop.f32.mrb[28].mxu0  ;;  %v5052_v58 = vld [vmem:[%s8742_s8 + $0x70] sm:$0xff] }
 0x21e   : > { %v7244_v53 = vpop.eup %7243  ;;  %5110 = vst [vmem:[%s8762_s11 + $0x40] sm:$0xff] %v5078_v35  ;;  %v4995_v50 = vmul.f32 %v7242_v47, %v8726_v43  ;;  %7261 = vrcp.f32 %v4959_v15  ;;  %v6928_v37 = vadd.f32 %v6591_v59, %v6271_v31  ;;  %v4871_v17 = vsub.f32 0.0, %v8827_v55  ;;  %v4660_v24 = vpop.f32.mrb[29].mxu0  ;;  %v5050_v43 = vld [vmem:[%s8742_s8 + $0x60] sm:$0xff] }
 0x21f   : > { %v6274_v39 = vpop.f32.mrb[28].mxu1  ;;  %v7246_v49 = vpop.eup %7245  ;;  %5113 = vst [vmem:[%s8762_s11 + $0x58] sm:$0xff] %v5081_v23  ;;  %v5001_v45 = vmul.f32 %v7244_v53, %v8733_v54  ;;  %7263 = vrcp.f32 %v4958_v4  ;;  %v6929_v56 = vadd.f32 %v4650_v16, %v3170_v13  ;;  %v8837_v2 = vadd.f32 %v6927_v22, %v8678_v62 }
 0x220   : > { %v3180_v42 = vpop.f32.mrb[29].mxu1  ;;  %v7248_v26 = vpop.eup %7247  ;;  %v5080_v27 = vadd.f32 %v5048_v51, %v4995_v50  ;;  %v4961_v19 = vadd.f32 1.0, %v7246_v49  ;;  %7265 = vpow2.f32 %v4922_v5  ;;  %v4928_v54 = vmul.f32 1.442695, %v4871_v17  ;;  %v5055_v50 = vld [vmem:[%s8742_s8 + $0x88] sm:$0xff] }
 0x221   : > { %v7250_v44 = vpop.eup %7249  ;;  %v5083_v20 = vadd.f32 %v5051_v0, %v5001_v45  ;;  %v4999_v34 = vmul.f32 %v7248_v26, %v8736_v6  ;;  %v8841_v63 = vadd.f32 %v6928_v37, %v8678_v62  ;;  %v4870_v3 = vsub.f32 0.0, %v8837_v2  ;;  %v6597_v9 = vpop.f32.mrb[30].mxu0 }
 0x222   : > { %5112 = vst [vmem:[%s8762_s11 + $0x50] sm:$0xff] %v5080_v27  ;;  %7267 = vrcp.f32 %v4961_v19  ;;  %v4960_v32 = vadd.f32 1.0, %v7250_v44  ;;  %v8846_v14 = vadd.f32 %v6929_v56, %v8678_v62  ;;  %v6930_v61 = vadd.f32 %v6594_v29, %v6274_v39  ;;  %v4670_v57 = vpop.f32.mrb[31].mxu0  ;;  %v5054_v29 = vld [vmem:[%s8742_s8 + $0x80] sm:$0xff]  ;;  %v5057_v44 = vld [vmem:[%s8742_s8 + $0x98] sm:$0xff] }
 0x223   : > { %v6277_v7 = vpop.f32.mrb[30].mxu1  ;;  %v7252_v46 = vpop.eup %7251  ;;  %5115 = vst [vmem:[%s8762_s11 + $0x68] sm:$0xff] %v5083_v20  ;;  %v5082_v6 = vadd.f32 %v5050_v43, %v4999_v34  ;;  %7269 = vpow2.f32 %v4928_v54  ;;  %v4873_v31 = vsub.f32 0.0, %v8841_v63  ;;  %v4926_v59 = vmul.f32 1.442695, %v4870_v3  ;;  %v5056_v3 = vld [vmem:[%s8742_s8 + $0x90] sm:$0xff] }
 0x224   : > { %v3190_v11 = vpop.f32.mrb[31].mxu1  ;;  %v7254_v18 = vpop.eup %7253  ;;  %7271 = vrcp.f32 %v4960_v32  ;;  %v4963_v8 = vadd.f32 1.0, %v7252_v46  ;;  %v4872_v13 = vsub.f32 0.0, %v8846_v14  ;;  %v8856_v16 = vadd.f32 %v6930_v61, %v8678_v62 }
 0x225   : > { %v7256_v60 = vpop.eup %7255  ;;  %5114 = vst [vmem:[%s8762_s11 + $0x60] sm:$0xff] %v5082_v6  ;;  %v5005_v40 = vmul.f32 %v7254_v18, %v8749_v12  ;;  %v4932_v10 = vmul.f32 1.442695, %v4873_v31  ;;  %v6931_v1 = vadd.f32 %v4660_v24, %v3180_v42  ;;  %v6932_v47 = vadd.f32 %v6597_v9, %v6277_v7  ;;  %v5059_v31 = vld [vmem:[%s8742_s8 + $0xa8] sm:$0xff] }
 0x226   : > { %v7258_v35 = vpop.eup %7257  ;;  %v5003_v15 = vmul.f32 %v7256_v60, %v8753_v28  ;;  %7273 = vrcp.f32 %v4963_v8  ;;  %v4930_v5 = vmul.f32 1.442695, %v4872_v13  ;;  %v4875_v12 = vsub.f32 0.0, %v8856_v16 }
 0x227   : > { %v7260_v23 = vpop.eup %7259  ;;  %v5085_v51 = vadd.f32 %v5053_v41, %v5005_v40  ;;  %v4962_v4 = vadd.f32 1.0, %v7258_v35  ;;  %7275 = vpow2.f32 %v4926_v59  ;;  %v8862_v22 = vadd.f32 %v6931_v1, %v8678_v62 }
 0x228   : > { %v7262_v39 = vpop.eup %7261  ;;  %v5084_v53 = vadd.f32 %v5052_v58, %v5003_v15  ;;  %v4965_v0 = vadd.f32 1.0, %v7260_v23  ;;  %7277 = vpow2.f32 %v4932_v10  ;;  %v4936_v42 = vmul.f32 1.442695, %v4875_v12  ;;  %v5061_v10 = vld [vmem:[%s8742_s8 + $0xb8] sm:$0xff] }
 0x229   : > { %v7264_v28 = vpop.eup %7263  ;;  %5117 = vst [vmem:[%s8762_s11 + $0x78] sm:$0xff] %v5085_v51  ;;  %v5009_v37 = vmul.f32 %v7262_v39, %v8768_v38  ;;  %7279 = vrcp.f32 %v4962_v4  ;;  %v8868_v49 = vadd.f32 %v6932_v47, %v8678_v62  ;;  %v4874_v56 = vsub.f32 0.0, %v8862_v22  ;;  %v5060_v51 = vld [vmem:[%s8742_s8 + $0xb0] sm:$0xff] }
 0x22a   : > { %v7266_v45 = vpop.eup %7265  ;;  %5116 = vst [vmem:[%s8762_s11 + $0x70] sm:$0xff] %v5084_v53  ;;  %v5007_v17 = vmul.f32 %v7264_v28, %v8774_v30  ;;  %7281 = vrcp.f32 %v4965_v0  ;;  %v6933_v24 = vadd.f32 %v4670_v57, %v3190_v11  ;;  %v5063_v0 = vld [vmem:[%s8742_s8 + $0xc8] sm:$0xff] }
 0x22b   : > { %v5087_v26 = vadd.f32 %v5055_v50, %v5009_v37  ;;  %v4964_v27 = vadd.f32 1.0, %v7266_v45  ;;  %7283 = vpow2.f32 %v4930_v5  ;;  %v4877_v38 = vsub.f32 0.0, %v8868_v49 }
 0x22c   : > { %v7268_v43 = vpop.eup %7267  ;;  %v5086_v19 = vadd.f32 %v5054_v29, %v5007_v17  ;;  %7285 = vpow2.f32 %v4936_v42  ;;  %v4934_v20 = vmul.f32 1.442695, %v4874_v56  ;;  %v8876_v34 = vadd.f32 %v6933_v24, %v8678_v62  ;;  %v5062_v17 = vld [vmem:[%s8742_s8 + $0xc0] sm:$0xff] }
 0x22d   : > { %v7270_v30 = vpop.eup %7269  ;;  %5119 = vst [vmem:[%s8762_s11 + $0x88] sm:$0xff] %v5087_v26  ;;  %v5013_v54 = vmul.f32 %v7268_v43, %v8785_v48  ;;  %7287 = vrcp.f32 %v4964_v27  ;;  %v4940_v7 = vmul.f32 1.442695, %v4877_v38  ;;  %v5065_v26 = vld [vmem:[%s8742_s8 + $0xd8] sm:$0xff] }
 0x22e   : > { %v7272_v32 = vpop.eup %7271  ;;  %5118 = vst [vmem:[%s8762_s11 + $0x80] sm:$0xff] %v5086_v19  ;;  %v4967_v9 = vadd.f32 1.0, %v7270_v30  ;;  %7289 = vpow2.f32 %v4934_v20  ;;  %v4876_v11 = vsub.f32 0.0, %v8876_v34  ;;  %v5064_v19 = vld [vmem:[%s8742_s8 + $0xd0] sm:$0xff]  ;;  %v5067_v30 = vld [vmem:[%s8742_s8 + $0xe8] sm:$0xff] }
 0x22f   : > { %v5089_v46 = vadd.f32 %v5057_v44, %v5013_v54  ;;  %v5011_v62 = vmul.f32 %v7272_v32, %v8790_v36  ;;  %7291 = vpow2.f32 %v4940_v7  ;;  %v5058_v36 = vld [vmem:[%s8742_s8 + $0xa0] sm:$0xff] }
 0x230   : > { %v7274_v6 = vpop.eup %7273  ;;  %7293 = vrcp.f32 %v4967_v9  ;;  %v4938_v48 = vmul.f32 1.442695, %v4876_v11  ;;  %v5066_v7 = vld [vmem:[%s8742_s8 + $0xe0] sm:$0xff]  ;;  %v5069_v11 = vld [vmem:[%s8742_s8 + $0xf8] sm:$0xff] }
 0x231   : > { %v7276_v61 = vpop.eup %7275  ;;  %5121 = vst [vmem:[%s8762_s11 + $0x98] sm:$0xff] %v5089_v46  ;;  %v5088_v57 = vadd.f32 %v5056_v3, %v5011_v62  ;;  %v5017_v18 = vmul.f32 %v7274_v6, %v8798_v33 }
 0x232   : > { %v7278_v41 = vpop.eup %7277  ;;  %v4966_v8 = vadd.f32 1.0, %v7276_v61  ;;  %7295 = vpow2.f32 %v4938_v48 }
 0x233   : > { %v7280_v59 = vpop.eup %7279  ;;  %5120 = vst [vmem:[%s8762_s11 + $0x90] sm:$0xff] %v5088_v57  ;;  %v5091_v13 = vadd.f32 %v5059_v31, %v5017_v18  ;;  %v4969_v60 = vadd.f32 1.0, %v7278_v41  ;;  %v5068_v31 = vld [vmem:[%s8742_s8 + $0xf0] sm:$0xff] }
 0x234   : > { %v7282_v40 = vpop.eup %7281  ;;  %v5015_v58 = vmul.f32 %v7280_v59, %v8806_v21  ;;  %7297 = vrcp.f32 %v4966_v8 }
 0x235   : > { %v7284_v1 = vpop.eup %7283  ;;  %5123 = vst [vmem:[%s8762_s11 + $0xa8] sm:$0xff] %v5091_v13  ;;  %v5021_v33 = vmul.f32 %v7282_v40, %v8811_v25  ;;  %7299 = vrcp.f32 %v4969_v60 }
 0x236   : > { %v7286_v35 = vpop.eup %7285  ;;  %v5090_v15 = vadd.f32 %v5058_v36, %v5015_v58  ;;  %v4968_v5 = vadd.f32 1.0, %v7284_v1 }
 0x237   : > { %v7288_v47 = vpop.eup %7287  ;;  %v5093_v23 = vadd.f32 %v5061_v10, %v5021_v33  ;;  %v4971_v4 = vadd.f32 1.0, %v7286_v35 }
 0x238   : > { %v7290_v12 = vpop.eup %7289  ;;  %5122 = vst [vmem:[%s8762_s11 + $0xa0] sm:$0xff] %v5090_v15  ;;  %v5019_v21 = vmul.f32 %v7288_v47, %v8815_v52  ;;  %7301 = vrcp.f32 %v4968_v5 }
 0x239   : > { %v7292_v39 = vpop.eup %7291  ;;  %5125 = vst [vmem:[%s8762_s11 + $0xb8] sm:$0xff] %v5093_v23  ;;  %7303 = vrcp.f32 %v4971_v4  ;;  %v4970_v25 = vadd.f32 1.0, %v7290_v12 }
 0x23a   : > { %v7294_v53 = vpop.eup %7293  ;;  %v5092_v50 = vadd.f32 %v5060_v51, %v5019_v21  ;;  %v4973_v28 = vadd.f32 1.0, %v7292_v39 }
 0x23b   : > { %v5025_v37 = vmul.f32 %v7294_v53, %v8827_v55  ;;  %7305 = vrcp.f32 %v4970_v25 }
 0x23c   : > { %v7296_v29 = vpop.eup %7295  ;;  %5124 = vst [vmem:[%s8762_s11 + $0xb0] sm:$0xff] %v5092_v50  ;;  %7307 = vrcp.f32 %v4973_v28 }
 0x23d   : > { %v5095_v52 = vadd.f32 %v5063_v0, %v5025_v37  ;;  %v4972_v42 = vadd.f32 1.0, %v7296_v29 }
 0x23e   : > { %v7298_v45 = vpop.eup %7297 }
 0x23f   : > { %v7300_v56 = vpop.eup %7299  ;;  %5127 = vst [vmem:[%s8762_s11 + $0xc8] sm:$0xff] %v5095_v52  ;;  %v5023_v24 = vmul.f32 %v7298_v45, %v8837_v2  ;;  %7309 = vrcp.f32 %v4972_v42 }
 0x240   : > { %v5029_v55 = vmul.f32 %v7300_v56, %v8841_v63 }
 0x241   : > { %v5094_v27 = vadd.f32 %v5062_v17, %v5023_v24 }
 0x242   : > { %v7302_v38 = vpop.eup %7301  ;;  %v5097_v43 = vadd.f32 %v5065_v26, %v5029_v55 }
 0x243   : > { %v7304_v44 = vpop.eup %7303  ;;  %5126 = vst [vmem:[%s8762_s11 + $0xc0] sm:$0xff] %v5094_v27  ;;  %v5027_v20 = vmul.f32 %v7302_v38, %v8846_v14 }
 0x244   : > { %5129 = vst [vmem:[%s8762_s11 + $0xd8] sm:$0xff] %v5097_v43  ;;  %v5033_v2 = vmul.f32 %v7304_v44, %v8856_v16 }
 0x245   : > { %v7306_v54 = vpop.eup %7305  ;;  %v5096_v63 = vadd.f32 %v5064_v19, %v5027_v20 }
 0x246   : > { %v7308_v32 = vpop.eup %7307  ;;  %v5099_v3 = vadd.f32 %v5067_v30, %v5033_v2  ;;  %v5031_v9 = vmul.f32 %v7306_v54, %v8862_v22 }
 0x247   : > { %5128 = vst [vmem:[%s8762_s11 + $0xd0] sm:$0xff] %v5096_v63  ;;  %v5037_v46 = vmul.f32 %v7308_v32, %v8868_v49 }
 0x248   : > { %5131 = vst [vmem:[%s8762_s11 + $0xe8] sm:$0xff] %v5099_v3  ;;  %v5098_v14 = vadd.f32 %v5066_v7, %v5031_v9 }
 0x249   : > { %v7310_v62 = vpop.eup %7309  ;;  %v5101_v6 = vadd.f32 %v5069_v11, %v5037_v46 }
 0x24a   : > { %5130 = vst [vmem:[%s8762_s11 + $0xe0] sm:$0xff] %v5098_v14  ;;  %v5035_v16 = vmul.f32 %v7310_v62, %v8876_v34 }
 0x24b   : > { %5133 = vst [vmem:[%s8762_s11 + $0xf8] sm:$0xff] %v5101_v6 }
 0x24c   : > { %v5100_v48 = vadd.f32 %v5068_v31, %v5035_v16 }
 0x24e   : > { %5132 = vst [vmem:[%s8762_s11 + $0xf0] sm:$0xff] %v5100_v48 }
 0x24f PF: > { %s16_s23 = sadd.s32 1, %s7355_s23   ;;  %s9063_s21 = smov %s7351_s22 }
 0x250   : > { %p13_p5 = scmp.ge.s32.totalorder %s16_s23, 4   ;;  %s9064_s22 = smov %s9066_s24 }
 0x252   :  { %15 = sbr.rel (!%p13_p5) target bundleno = 2 (0x2), region = 93 }

</bundles_post_ra>
